<compile_context>
chip_gen: v7x
topology: tpu7x:2x2x1
jax: 0.10.0
libtpu: 0.0.40
codegen_flags: <defaults>
</compile_context>

<pallas_src>
import functools

import jax
import jax.numpy as jnp
from jax.experimental import pallas as pl
from jax.experimental.pallas import tpu as pltpu


# ----------------------------------------------------------------------------
# tiling helper: largest tile <= preferred that divides the dim and is aligned;
# falls back to the full dimension (always a legal block) for unaligned dims so
# no operand ever needs a padding copy.
# ----------------------------------------------------------------------------
def _pick_tile(dim, preferred, align):
    if dim % align != 0:
        return dim
    t = min(preferred, dim)
    t -= t % align
    while dim % t != 0:
        t -= align
    return t


# ----------------------------------------------------------------------------
# Pallas kernel 1: tiled MXU matmul (bf16 inputs, f32 accumulation in o_ref)
# ----------------------------------------------------------------------------
def _matmul_kernel(a_ref, b_ref, o_ref):
    @pl.when(pl.program_id(2) == 0)
    def _():
        o_ref[...] = jnp.zeros_like(o_ref)

    o_ref[...] += jnp.dot(a_ref[...], b_ref[...],
                          preferred_element_type=jnp.float32)


def pallas_matmul(a, b):
    """a: [M, K] bf16, b: [K, N] bf16 -> [M, N] f32 (no operand padding)."""
    M, K = a.shape
    K2, N = b.shape
    assert K == K2
    tm = _pick_tile(M, 256, 8)
    tk = _pick_tile(K, 512, 128)
    tn = _pick_tile(N, 256, 128)
    grid = (M // tm, N // tn, K // tk)
    return pl.pallas_call(
        _matmul_kernel,
        out_shape=jax.ShapeDtypeStruct((M, N), jnp.float32),
        grid_spec=pltpu.PrefetchScalarGridSpec(
            num_scalar_prefetch=0,
            grid=grid,
            in_specs=[pl.BlockSpec((tm, tk), lambda i, j, k: (i, k)),
                      pl.BlockSpec((tk, tn), lambda i, j, k: (k, j))],
            out_specs=pl.BlockSpec((tm, tn), lambda i, j, k: (i, j))),
        compiler_params=pltpu.CompilerParams(
            dimension_semantics=("parallel", "parallel", "arbitrary")),
    )(a, b)


# ----------------------------------------------------------------------------
# Pallas kernel 2: fully fused BatchNorm (batch stats) + residual add + ReLU
# (single block: whole activation fits VMEM at these sizes -> one HBM read)
# ----------------------------------------------------------------------------
def _bn_fused_kernel(*refs, relu, fold, rows, eps, has_res):
    if has_res:
        y_ref, r_ref, g_ref, b_ref, o_ref = refs
    else:
        y_ref, g_ref, b_ref, o_ref = refs
        r_ref = None
    y = y_ref[...]
    C = g_ref.shape[1]
    cs = jnp.sum(y, axis=0, keepdims=True)          # [1, fold*C]
    css = jnp.sum(y * y, axis=0, keepdims=True)
    s, ss = cs[:, :C], css[:, :C]
    for i in range(1, fold):                        # reduce the lane-folds
        s = s + cs[:, i * C:(i + 1) * C]
        ss = ss + css[:, i * C:(i + 1) * C]
    inv_n = 1.0 / rows
    mean = s * inv_n
    var = ss * inv_n - mean * mean                  # biased var (PyTorch fwd)
    scale = g_ref[...] * jax.lax.rsqrt(var + eps)
    shift = b_ref[...] - mean * scale
    if fold > 1:
        scale = jnp.concatenate([scale] * fold, axis=1)
        shift = jnp.concatenate([shift] * fold, axis=1)
    out = y * scale + shift
    if r_ref is not None:
        out = out + r_ref[...]
    if relu:
        out = jnp.maximum(out, 0.0)
    o_ref[...] = out


# Fallback (large row counts only): affine apply kernel, stats done in XLA.
def _affine_kernel(*refs, relu, has_res):
    if has_res:
        y_ref, r_ref, s_ref, t_ref, o_ref = refs
    else:
        y_ref, s_ref, t_ref, o_ref = refs
        r_ref = None
    out = y_ref[...] * s_ref[...] + t_ref[...]
    if r_ref is not None:
        out = out + r_ref[...]
    if relu:
        out = jnp.maximum(out, 0.0)
    o_ref[...] = out


def _pallas_affine(y, scale, shift, res, relu):
    R, C = y.shape
    tr = _pick_tile(R, 1024, 8)
    s2 = scale.reshape(1, C).astype(jnp.float32)
    t2 = shift.reshape(1, C).astype(jnp.float32)
    ins = [y] + ([res] if res is not None else []) + [s2, t2]
    specs = ([pl.BlockSpec((tr, C), lambda i: (i, 0))]
             * (2 if res is not None else 1)
             + [pl.BlockSpec((1, C), lambda i: (0, 0))] * 2)
    return pl.pallas_call(
        functools.partial(_affine_kernel, relu=relu, has_res=res is not None),
        out_shape=jax.ShapeDtypeStruct((R, C), jnp.float32),
        grid_spec=pltpu.PrefetchScalarGridSpec(
            num_scalar_prefetch=0, grid=(R // tr,),
            in_specs=specs,
            out_specs=pl.BlockSpec((tr, C), lambda i: (i, 0))),
        compiler_params=pltpu.CompilerParams(
            dimension_semantics=("parallel",)),
    )(*ins)


_MAX_FUSED_ROWS = 2048


def batchnorm_act(y4, gamma, beta, residual=None, relu=True, eps=1e-5):
    """Training-mode BatchNorm2d fused with (optional) residual add + ReLU."""
    n, h, w, c = y4.shape
    rows = n * h * w
    y = y4.reshape(rows, c)
    res = residual.reshape(rows, c) if residual is not None else None

    # lane-dense folding for narrow channel counts (C=64): view `fold`
    # consecutive rows as one 128-wide row so stores are unmasked.
    fold = 1
    if c < 128 and 128 % c == 0 and rows % (128 // c) == 0:
        fold = 128 // c
    yf = y.reshape(rows // fold, c * fold)
    rf = res.reshape(rows // fold, c * fold) if res is not None else None
    g2 = gamma.reshape(1, c).astype(jnp.float32)
    b2 = beta.reshape(1, c).astype(jnp.float32)
    rp, cp = yf.shape

    if rp <= _MAX_FUSED_ROWS:
        kernel = functools.partial(_bn_fused_kernel, relu=relu, fold=fold,
                                   rows=rows, eps=eps, has_res=rf is not None)
        ins = [yf] + ([rf] if rf is not None else []) + [g2, b2]
        specs = ([pl.BlockSpec((rp, cp), lambda i: (0, 0))]
                 * (2 if rf is not None else 1)
                 + [pl.BlockSpec((1, c), lambda i: (0, 0))] * 2)
        out = pl.pallas_call(
            kernel,
            out_shape=jax.ShapeDtypeStruct((rp, cp), jnp.float32),
            grid_spec=pltpu.PrefetchScalarGridSpec(
                num_scalar_prefetch=0, grid=(1,),
                in_specs=specs,
                out_specs=pl.BlockSpec((rp, cp), lambda i: (0, 0))),
        )(*ins)
    else:  # large activations: stats in XLA, tiled affine apply in Pallas
        mean = jnp.mean(y, axis=0)
        var = jnp.mean(jnp.square(y), axis=0) - mean * mean
        scale = gamma / jnp.sqrt(var + eps)
        shift = beta - mean * scale
        out = _pallas_affine(yf, jnp.tile(scale, fold), jnp.tile(shift, fold),
                             rf, relu)
    return out.reshape(n, h, w, c)


# ----------------------------------------------------------------------------
# Convolutions: im2col (built directly in bf16 matmul layout, fused by XLA
# under jit) feeding the Pallas matmul.
# TODO(synk): for large spatial sizes, fold the k*k taps into the matmul grid
# (reduction axis over taps with shifted-window index_maps) to avoid the im2col
# materialisation; at these tiny spatial sizes the extra grid steps would cost
# more than the single fused im2col write.
# ----------------------------------------------------------------------------
def _im2col(x, k, stride, padding):
    N, H, W, C = x.shape
    xp = jnp.pad(x, ((0, 0), (padding, padding), (padding, padding), (0, 0)))
    xp = xp.astype(jnp.bfloat16)
    Ho = (H + 2 * padding - k) // stride + 1
    Wo = (W + 2 * padding - k) // stride + 1
    cols = []
    for dy in range(k):
        for dx in range(k):
            cols.append(xp[:, dy:dy + stride * Ho:stride,
                           dx:dx + stride * Wo:stride, :])
    a = jnp.stack(cols, axis=3).reshape(N * Ho * Wo, k * k * C)
    return a, Ho, Wo


def conv2d(x, w_packed, k, stride, padding, cout):
    """x: [N,H,W,Cin] f32; w_packed: [k*k*Cin, Cout] bf16 -> [N,Ho,Wo,Cout] f32."""
    N = x.shape[0]
    if k == 1:
        xs = x[:, ::stride, ::stride, :] if stride > 1 else x
        Ho, Wo = xs.shape[1], xs.shape[2]
        a = xs.reshape(N * Ho * Wo, xs.shape[3]).astype(jnp.bfloat16)
    else:
        a, Ho, Wo = _im2col(x, k, stride, padding)
    y = pallas_matmul(a, w_packed)
    return y.reshape(N, Ho, Wo, cout)


def maxpool2d(x, k=3, stride=2, padding=1):
    """Running max over k*k shifted strided views (fused by XLA under jit;
    no k^2 patch tensor is materialised)."""
    N, H, W, C = x.shape
    xp = jnp.pad(x, ((0, 0), (padding, padding), (padding, padding), (0, 0)),
                 constant_values=-jnp.inf)
    Ho = (H + 2 * padding - k) // stride + 1
    Wo = (W + 2 * padding - k) // stride + 1
    out = None
    for dy in range(k):
        for dx in range(k):
            sl = xp[:, dy:dy + stride * Ho:stride, dx:dx + stride * Wo:stride, :]
            out = sl if out is None else jnp.maximum(out, sl)
    return out


# ----------------------------------------------------------------------------
# Configuration helpers (mirror the PyTorch module's layer-building logic)
# ----------------------------------------------------------------------------
def build_residual_blocks(expansion, building_blocks, stride):
    group_blocks = [[x[0], x[1], 1, 1] for x in building_blocks * expansion]
    group_blocks[0][2] = stride
    gs = len(building_blocks)
    return [group_blocks[i:i + gs] for i in range(0, len(group_blocks), gs)]


def create_in_feature_maps_list(in_features, expansion, building_blocks):
    fm = [x[0] for x in building_blocks] * expansion
    fm.pop()
    fm.insert(0, in_features)
    gs = len(building_blocks)
    return [fm[i:i + gs] for i in range(0, len(fm), gs)]


def init_params(key, conv_configurations, num_classes):
    keys = iter(jax.random.split(key, 512))

    def conv_packed(k, cin, cout):
        fan_in = k * k * cin
        w = jax.random.normal(next(keys), (k, k, cin, cout), jnp.float32)
        w = w * (2.0 / fan_in) ** 0.5
        # pack once into the [K, Cout] bf16 layout the matmul kernel consumes.
        return w.reshape(k * k * cin, cout).astype(jnp.bfloat16)

    def bn(c):
        return jnp.ones((c,), jnp.float32), jnp.zeros((c,), jnp.float32)

    params = {}
    g, b = bn(64)
    params['conv1'] = dict(w=conv_packed(7, 3, 64), k=7, stride=2, pad=3,
                           cout=64, gamma=g, beta=b)

    stages = []
    for (in_features, expansion, building_blocks, stride) in conv_configurations:
        block_specs_list = build_residual_blocks(expansion, building_blocks, stride)
        feat_maps = create_in_feature_maps_list(in_features, expansion, building_blocks)
        stage = []
        for block_specs, in_feats in zip(block_specs_list, feat_maps):
            convs = []
            for (out_ch, kk, s, p), cin in zip(block_specs, in_feats):
                g, b = bn(out_ch)
                convs.append(dict(w=conv_packed(kk, cin, out_ch), k=kk,
                                  stride=s, pad=p, cout=out_ch,
                                  gamma=g, beta=b))
            block_in = in_feats[0]
            block_out = block_specs[-1][0]
            first_stride = block_specs[0][2]
            down = None
            if first_stride != 1 or block_in != block_out:
                g, b = bn(block_out)
                down = dict(w=conv_packed(1, block_in, block_out), k=1,
                            stride=first_stride, pad=0, cout=block_out,
                            gamma=g, beta=b)
            stage.append(dict(convs=convs, down=down))
        stages.append(stage)
    params['stages'] = stages

    fc_in = 512 * (4 if len(conv_configurations[3][2]) > 2 else 1)
    w = jax.random.normal(next(keys), (fc_in, num_classes), jnp.float32)
    w = w * (1.0 / fc_in) ** 0.5
    bias = jnp.zeros((num_classes,), jnp.float32)
    # fold the bias into a single packed matmul operand (ones column on A).
    params['fc'] = dict(wb=jnp.concatenate([w, bias[None, :]], axis=0)
                        .astype(jnp.bfloat16))
    return params


# ----------------------------------------------------------------------------
# Forward pass
# ----------------------------------------------------------------------------
def residual_block_forward(x, block):
    convs = block['convs']
    n = len(convs)
    out = x
    for i, cp in enumerate(convs):
        out = conv2d(out, cp['w'], cp['k'], cp['stride'], cp['pad'], cp['cout'])
        if i < n - 1:
            out = batchnorm_act(out, cp['gamma'], cp['beta'], relu=True)
    if block['down'] is not None:
        dp = block['down']
        sc = conv2d(x, dp['w'], dp['k'], dp['stride'], dp['pad'], dp['cout'])
        sc = batchnorm_act(sc, dp['gamma'], dp['beta'], relu=False)
    else:
        sc = x
    cp = convs[-1]
    return batchnorm_act(out, cp['gamma'], cp['beta'], residual=sc, relu=True)


def resnet_forward(x_nchw, params):
    # layout: accept NCHW (PyTorch convention), compute in NHWC.
    x = jnp.transpose(x_nchw, (0, 2, 3, 1)).astype(jnp.float32)

    p1 = params['conv1']
    x = conv2d(x, p1['w'], p1['k'], p1['stride'], p1['pad'], p1['cout'])
    x = batchnorm_act(x, p1['gamma'], p1['beta'], relu=True)
    x = maxpool2d(x, k=3, stride=2, padding=1)

    for stage in params['stages']:
        for block in stage:
            x = residual_block_forward(x, block)

    # adaptive average pool to (1, 1) + flatten (tiny reduction; fused glue)
    x = jnp.mean(x, axis=(1, 2))  # [N, C]

    # classifier: bias folded into the Pallas matmul via an appended ones column
    a = jnp.concatenate([x, jnp.ones((x.shape[0], 1), jnp.float32)], axis=1)
    logits = pallas_matmul(a.astype(jnp.bfloat16), params['fc']['wb'])
    return logits


# ----------------------------------------------------------------------------
# Main
# ----------------------------------------------------------------------------
if __name__ == "__main__":
    # ResNet-18-style configuration: 4 stages x 2 basic blocks (2 convs each)
    conv_configurations = [
        (64, 2, [[64, 3], [64, 3]], 1),
        (64, 2, [[128, 3], [128, 3]], 2),
        (128, 2, [[256, 3], [256, 3]], 2),
        (256, 2, [[512, 3], [512, 3]], 2),
    ]
    num_classes = 10

    root = jax.random.PRNGKey(0)
    k_in, k_par = jax.random.split(root)

    # small input consistent with conv1(3 -> 64): batch=2, channels=3, spatial=32
    x = jax.random.normal(k_in, (2, 3, 32, 32), jnp.float32)

    params = init_params(k_par, conv_configurations, num_classes)

    # jit the whole forward; params are closure-captured so kernel sizes /
    # strides stay static Python ints and packed weights become constants.
    forward = jax.jit(lambda inp: resnet_forward(inp, params))

    logits = jax.block_until_ready(forward(x))

    assert logits.shape == (2, num_classes), logits.shape
    assert bool(jnp.all(jnp.isfinite(logits)))
    print("KERNEL_OK")
</pallas_src>

<mosaic_0001>
module attributes {stable_mosaic.version = 11 : i64} {
  func.func @_matmul_kernel(%arg0: i32, %arg1: i32, %arg2: i32, %arg3: memref<256x147xbf16, #tpu.memory_space<vmem>>, %arg4: memref<147x64xbf16, #tpu.memory_space<vmem>>, %arg5: memref<256x64xf32, #tpu.memory_space<vmem>>) attributes {dimension_semantics = [#tpu.dimension_semantics<parallel>, #tpu.dimension_semantics<parallel>, #tpu.dimension_semantics<arbitrary>], iteration_bounds = array<i64: 2, 1, 1>, scalar_prefetch = 0 : i64, scratch_operands = 0 : i64, tpu.core_type = #tpu.core_type<tc>, window_params = [{transform_indices = @transform_0, window_bounds = array<i64: 256, 147>}, {transform_indices = @transform_1, window_bounds = array<i64: 147, 64>}, {transform_indices = @transform_2, window_bounds = array<i64: 256, 64>}]} {
    %c0_i32 = arith.constant 0 : i32
    %0 = arith.cmpi eq, %arg2, %c0_i32 : i32
    %1 = arith.extui %0 : i1 to i32
    %c0_i32_0 = arith.constant 0 : i32
    %2 = arith.cmpi ne, %1, %c0_i32_0 : i32
    scf.if %2 {
      %cst_8 = arith.constant 0.000000e+00 : f32
      %9 = vector.broadcast %cst_8 : f32 to vector<256x64xf32>
      %c0_9 = arith.constant 0 : index
      %c0_10 = arith.constant 0 : index
      %10 = vector.load %arg5[%c0_9, %c0_10] : memref<256x64xf32, #tpu.memory_space<vmem>>, vector<256x64xf32>
      tpu.vector_store %arg5[%c0_9, %c0_10], %9 {strides = array<i32>} : memref<256x64xf32, #tpu.memory_space<vmem>>, vector<256x64xf32>,
    } else {
    }
    %c0 = arith.constant 0 : index
    %c0_1 = arith.constant 0 : index
    %3 = vector.load %arg5[%c0, %c0_1] : memref<256x64xf32, #tpu.memory_space<vmem>>, vector<256x64xf32>
    %c0_2 = arith.constant 0 : index
    %c0_3 = arith.constant 0 : index
    %4 = vector.load %arg3[%c0_2, %c0_3] : memref<256x147xbf16, #tpu.memory_space<vmem>>, vector<256x147xbf16>
    %c0_4 = arith.constant 0 : index
    %c0_5 = arith.constant 0 : index
    %5 = vector.load %arg4[%c0_4, %c0_5] : memref<147x64xbf16, #tpu.memory_space<vmem>>, vector<147x64xbf16>
    %cst = arith.constant dense<0.000000e+00> : vector<256x64xf32>
    %6 = tpu.matmul %4, %5, %cst {dimension_numbers = #tpu.dot_dimension_numbers<[1], [0], [0], [1], [0, 0, 1, 1], [], []>} : vector<256x147xbf16>, vector<147x64xbf16>, vector<256x64xf32> -> vector<256x64xf32>
    %7 = arith.addf %3, %6 : vector<256x64xf32>
    %c0_6 = arith.constant 0 : index
    %c0_7 = arith.constant 0 : index
    %8 = vector.load %arg5[%c0_6, %c0_7] : memref<256x64xf32, #tpu.memory_space<vmem>>, vector<256x64xf32>
    tpu.vector_store %arg5[%c0_6, %c0_7], %7 {strides = array<i32>} : memref<256x64xf32, #tpu.memory_space<vmem>>, vector<256x64xf32>,
    return
  }
  func.func @transform_0(%arg0: i32, %arg1: i32, %arg2: i32) -> (i32, i32) {
    %c0_i32 = arith.constant 0 : i32
    return %arg0, %arg2 : i32, i32
  }
  func.func @transform_1(%arg0: i32, %arg1: i32, %arg2: i32) -> (i32, i32) {
    %c0_i32 = arith.constant 0 : i32
    return %arg2, %arg1 : i32, i32
  }
  func.func @transform_2(%arg0: i32, %arg1: i32, %arg2: i32) -> (i32, i32) {
    %c0_i32 = arith.constant 0 : i32
    return %arg0, %arg1 : i32, i32
  }
}

module attributes {stable_mosaic.version = 11 : i64} {
  func.func @_bn_fused_kernel(%arg0: i32, %arg1: memref<256x128xf32, #tpu.memory_space<vmem>>, %arg2: memref<1x64xf32, #tpu.memory_space<vmem>>, %arg3: memref<1x64xf32, #tpu.memory_space<vmem>>, %arg4: memref<256x128xf32, #tpu.memory_space<vmem>>) attributes {dimension_semantics = [#tpu.dimension_semantics<arbitrary>], iteration_bounds = array<i64: 1>, scalar_prefetch = 0 : i64, scratch_operands = 0 : i64, tpu.core_type = #tpu.core_type<tc>, window_params = [{pipeline_mode = #tpu.pipeline_mode<synchronous>, transform_indices = @transform_0, window_bounds = array<i64: 256, 128>}, {pipeline_mode = #tpu.pipeline_mode<synchronous>, transform_indices = @transform_1, window_bounds = array<i64: 1, 64>}, {pipeline_mode = #tpu.pipeline_mode<synchronous>, transform_indices = @transform_2, window_bounds = array<i64: 1, 64>}, {pipeline_mode = #tpu.pipeline_mode<synchronous>, transform_indices = @transform_3, window_bounds = array<i64: 256, 128>}]} {
    %c0 = arith.constant 0 : index
    %c0_0 = arith.constant 0 : index
    %0 = vector.load %arg1[%c0, %c0_0] : memref<256x128xf32, #tpu.memory_space<vmem>>, vector<256x128xf32>
    %cst = arith.constant dense<0.000000e+00> : vector<128xf32>
    %1 = vector.multi_reduction <add>, %0, %cst [0] : vector<256x128xf32> to vector<128xf32>
    %2 = vector.shape_cast %1 : vector<128xf32> to vector<1x128xf32>
    %3 = arith.mulf %0, %0 : vector<256x128xf32>
    %cst_1 = arith.constant dense<0.000000e+00> : vector<128xf32>
    %4 = vector.multi_reduction <add>, %3, %cst_1 [0] : vector<256x128xf32> to vector<128xf32>
    %5 = vector.shape_cast %4 : vector<128xf32> to vector<1x128xf32>
    %6 = vector.extract_strided_slice %2 {offsets = [0, 0], sizes = [1, 64], strides = [1, 1]} : vector<1x128xf32> to vector<1x64xf32>
    %7 = vector.extract_strided_slice %5 {offsets = [0, 0], sizes = [1, 64], strides = [1, 1]} : vector<1x128xf32> to vector<1x64xf32>
    %8 = vector.extract_strided_slice %2 {offsets = [0, 64], sizes = [1, 64], strides = [1, 1]} : vector<1x128xf32> to vector<1x64xf32>
    %9 = arith.addf %6, %8 : vector<1x64xf32>
    %10 = vector.extract_strided_slice %5 {offsets = [0, 64], sizes = [1, 64], strides = [1, 1]} : vector<1x128xf32> to vector<1x64xf32>
    %11 = arith.addf %7, %10 : vector<1x64xf32>
    %cst_2 = arith.constant 0.001953125 : f32
    %12 = vector.broadcast %cst_2 : f32 to vector<1x64xf32>
    %13 = arith.mulf %9, %12 : vector<1x64xf32>
    %cst_3 = arith.constant 0.001953125 : f32
    %14 = vector.broadcast %cst_3 : f32 to vector<1x64xf32>
    %15 = arith.mulf %11, %14 : vector<1x64xf32>
    %16 = arith.mulf %13, %13 : vector<1x64xf32>
    %17 = arith.subf %15, %16 : vector<1x64xf32>
    %c0_4 = arith.constant 0 : index
    %c0_5 = arith.constant 0 : index
    %18 = vector.load %arg2[%c0_4, %c0_5] : memref<1x64xf32, #tpu.memory_space<vmem>>, vector<1x64xf32>
    %cst_6 = arith.constant 9.99999974E-6 : f32
    %19 = vector.broadcast %cst_6 : f32 to vector<1x64xf32>
    %20 = arith.addf %17, %19 : vector<1x64xf32>
    %21 = math.rsqrt %20 : vector<1x64xf32>
    %22 = arith.mulf %18, %21 : vector<1x64xf32>
    %c0_7 = arith.constant 0 : index
    %c0_8 = arith.constant 0 : index
    %23 = vector.load %arg3[%c0_7, %c0_8] : memref<1x64xf32, #tpu.memory_space<vmem>>, vector<1x64xf32>
    %24 = arith.mulf %13, %22 : vector<1x64xf32>
    %25 = arith.subf %23, %24 : vector<1x64xf32>
    %26 = tpu.concatenate %22, %22 in 1 : vector<1x64xf32>, vector<1x64xf32> -> vector<1x128xf32>
    %27 = tpu.concatenate %25, %25 in 1 : vector<1x64xf32>, vector<1x64xf32> -> vector<1x128xf32>
    %28 = vector.broadcast %26 : vector<1x128xf32> to vector<256x128xf32>
    %29 = arith.mulf %0, %28 : vector<256x128xf32>
    %30 = vector.broadcast %27 : vector<1x128xf32> to vector<256x128xf32>
    %31 = arith.addf %29, %30 : vector<256x128xf32>
    %cst_9 = arith.constant 0.000000e+00 : f32
    %32 = vector.broadcast %cst_9 : f32 to vector<256x128xf32>
    %33 = arith.maximumf %31, %32 : vector<256x128xf32>
    %c0_10 = arith.constant 0 : index
    %c0_11 = arith.constant 0 : index
    %34 = vector.load %arg4[%c0_10, %c0_11] : memref<256x128xf32, #tpu.memory_space<vmem>>, vector<256x128xf32>
    tpu.vector_store %arg4[%c0_10, %c0_11], %33 {strides = array<i32>} : memref<256x128xf32, #tpu.memory_space<vmem>>, vector<256x128xf32>,
    return
  }
  func.func @transform_0(%arg0: i32) -> (i32, i32) {
    %c0_i32 = arith.constant 0 : i32
    %c0_i32_0 = arith.constant 0 : i32
    %c0_i32_1 = arith.constant 0 : i32
    return %c0_i32, %c0_i32_0 : i32, i32
  }
  func.func @transform_1(%arg0: i32) -> (i32, i32) {
    %c0_i32 = arith.constant 0 : i32
    %c0_i32_0 = arith.constant 0 : i32
    %c0_i32_1 = arith.constant 0 : i32
    return %c0_i32, %c0_i32_0 : i32, i32
  }
  func.func @transform_2(%arg0: i32) -> (i32, i32) {
    %c0_i32 = arith.constant 0 : i32
    %c0_i32_0 = arith.constant 0 : i32
    %c0_i32_1 = arith.constant 0 : i32
    return %c0_i32, %c0_i32_0 : i32, i32
  }
  func.func @transform_3(%arg0: i32) -> (i32, i32) {
    %c0_i32 = arith.constant 0 : i32
    %c0_i32_0 = arith.constant 0 : i32
    %c0_i32_1 = arith.constant 0 : i32
    return %c0_i32, %c0_i32_0 : i32, i32
  }
}

module attributes {stable_mosaic.version = 11 : i64} {
  func.func @_matmul_kernel(%arg0: i32, %arg1: i32, %arg2: i32, %arg3: memref<128x576xbf16, #tpu.memory_space<vmem>>, %arg4: memref<576x64xbf16, #tpu.memory_space<vmem>>, %arg5: memref<128x64xf32, #tpu.memory_space<vmem>>) attributes {dimension_semantics = [#tpu.dimension_semantics<parallel>, #tpu.dimension_semantics<parallel>, #tpu.dimension_semantics<arbitrary>], iteration_bounds = array<i64: 1, 1, 1>, scalar_prefetch = 0 : i64, scratch_operands = 0 : i64, tpu.core_type = #tpu.core_type<tc>, window_params = [{transform_indices = @transform_0, window_bounds = array<i64: 128, 576>}, {transform_indices = @transform_1, window_bounds = array<i64: 576, 64>}, {transform_indices = @transform_2, window_bounds = array<i64: 128, 64>}]} {
    %c0_i32 = arith.constant 0 : i32
    %0 = arith.cmpi eq, %arg2, %c0_i32 : i32
    %1 = arith.extui %0 : i1 to i32
    %c0_i32_0 = arith.constant 0 : i32
    %2 = arith.cmpi ne, %1, %c0_i32_0 : i32
    scf.if %2 {
      %cst_8 = arith.constant 0.000000e+00 : f32
      %9 = vector.broadcast %cst_8 : f32 to vector<128x64xf32>
      %c0_9 = arith.constant 0 : index
      %c0_10 = arith.constant 0 : index
      %10 = vector.load %arg5[%c0_9, %c0_10] : memref<128x64xf32, #tpu.memory_space<vmem>>, vector<128x64xf32>
      tpu.vector_store %arg5[%c0_9, %c0_10], %9 {strides = array<i32>} : memref<128x64xf32, #tpu.memory_space<vmem>>, vector<128x64xf32>,
    } else {
    }
    %c0 = arith.constant 0 : index
    %c0_1 = arith.constant 0 : index
    %3 = vector.load %arg5[%c0, %c0_1] : memref<128x64xf32, #tpu.memory_space<vmem>>, vector<128x64xf32>
    %c0_2 = arith.constant 0 : index
    %c0_3 = arith.constant 0 : index
    %4 = vector.load %arg3[%c0_2, %c0_3] : memref<128x576xbf16, #tpu.memory_space<vmem>>, vector<128x576xbf16>
    %c0_4 = arith.constant 0 : index
    %c0_5 = arith.constant 0 : index
    %5 = vector.load %arg4[%c0_4, %c0_5] : memref<576x64xbf16, #tpu.memory_space<vmem>>, vector<576x64xbf16>
    %cst = arith.constant dense<0.000000e+00> : vector<128x64xf32>
    %6 = tpu.matmul %4, %5, %cst {dimension_numbers = #tpu.dot_dimension_numbers<[1], [0], [0], [1], [0, 0, 1, 1], [], []>} : vector<128x576xbf16>, vector<576x64xbf16>, vector<128x64xf32> -> vector<128x64xf32>
    %7 = arith.addf %3, %6 : vector<128x64xf32>
    %c0_6 = arith.constant 0 : index
    %c0_7 = arith.constant 0 : index
    %8 = vector.load %arg5[%c0_6, %c0_7] : memref<128x64xf32, #tpu.memory_space<vmem>>, vector<128x64xf32>
    tpu.vector_store %arg5[%c0_6, %c0_7], %7 {strides = array<i32>} : memref<128x64xf32, #tpu.memory_space<vmem>>, vector<128x64xf32>,
    return
  }
  func.func @transform_0(%arg0: i32, %arg1: i32, %arg2: i32) -> (i32, i32) {
    %c0_i32 = arith.constant 0 : i32
    return %arg0, %arg2 : i32, i32
  }
  func.func @transform_1(%arg0: i32, %arg1: i32, %arg2: i32) -> (i32, i32) {
    %c0_i32 = arith.constant 0 : i32
    return %arg2, %arg1 : i32, i32
  }
  func.func @transform_2(%arg0: i32, %arg1: i32, %arg2: i32) -> (i32, i32) {
    %c0_i32 = arith.constant 0 : i32
    return %arg0, %arg1 : i32, i32
  }
}

module attributes {stable_mosaic.version = 11 : i64} {
  func.func @_bn_fused_kernel(%arg0: i32, %arg1: memref<64x128xf32, #tpu.memory_space<vmem>>, %arg2: memref<1x64xf32, #tpu.memory_space<vmem>>, %arg3: memref<1x64xf32, #tpu.memory_space<vmem>>, %arg4: memref<64x128xf32, #tpu.memory_space<vmem>>) attributes {dimension_semantics = [#tpu.dimension_semantics<arbitrary>], iteration_bounds = array<i64: 1>, scalar_prefetch = 0 : i64, scratch_operands = 0 : i64, tpu.core_type = #tpu.core_type<tc>, window_params = [{pipeline_mode = #tpu.pipeline_mode<synchronous>, transform_indices = @transform_0, window_bounds = array<i64: 64, 128>}, {pipeline_mode = #tpu.pipeline_mode<synchronous>, transform_indices = @transform_1, window_bounds = array<i64: 1, 64>}, {pipeline_mode = #tpu.pipeline_mode<synchronous>, transform_indices = @transform_2, window_bounds = array<i64: 1, 64>}, {pipeline_mode = #tpu.pipeline_mode<synchronous>, transform_indices = @transform_3, window_bounds = array<i64: 64, 128>}]} {
    %c0 = arith.constant 0 : index
    %c0_0 = arith.constant 0 : index
    %0 = vector.load %arg1[%c0, %c0_0] : memref<64x128xf32, #tpu.memory_space<vmem>>, vector<64x128xf32>
    %cst = arith.constant dense<0.000000e+00> : vector<128xf32>
    %1 = vector.multi_reduction <add>, %0, %cst [0] : vector<64x128xf32> to vector<128xf32>
    %2 = vector.shape_cast %1 : vector<128xf32> to vector<1x128xf32>
    %3 = arith.mulf %0, %0 : vector<64x128xf32>
    %cst_1 = arith.constant dense<0.000000e+00> : vector<128xf32>
    %4 = vector.multi_reduction <add>, %3, %cst_1 [0] : vector<64x128xf32> to vector<128xf32>
    %5 = vector.shape_cast %4 : vector<128xf32> to vector<1x128xf32>
    %6 = vector.extract_strided_slice %2 {offsets = [0, 0], sizes = [1, 64], strides = [1, 1]} : vector<1x128xf32> to vector<1x64xf32>
    %7 = vector.extract_strided_slice %5 {offsets = [0, 0], sizes = [1, 64], strides = [1, 1]} : vector<1x128xf32> to vector<1x64xf32>
    %8 = vector.extract_strided_slice %2 {offsets = [0, 64], sizes = [1, 64], strides = [1, 1]} : vector<1x128xf32> to vector<1x64xf32>
    %9 = arith.addf %6, %8 : vector<1x64xf32>
    %10 = vector.extract_strided_slice %5 {offsets = [0, 64], sizes = [1, 64], strides = [1, 1]} : vector<1x128xf32> to vector<1x64xf32>
    %11 = arith.addf %7, %10 : vector<1x64xf32>
    %cst_2 = arith.constant 7.812500e-03 : f32
    %12 = vector.broadcast %cst_2 : f32 to vector<1x64xf32>
    %13 = arith.mulf %9, %12 : vector<1x64xf32>
    %cst_3 = arith.constant 7.812500e-03 : f32
    %14 = vector.broadcast %cst_3 : f32 to vector<1x64xf32>
    %15 = arith.mulf %11, %14 : vector<1x64xf32>
    %16 = arith.mulf %13, %13 : vector<1x64xf32>
    %17 = arith.subf %15, %16 : vector<1x64xf32>
    %c0_4 = arith.constant 0 : index
    %c0_5 = arith.constant 0 : index
    %18 = vector.load %arg2[%c0_4, %c0_5] : memref<1x64xf32, #tpu.memory_space<vmem>>, vector<1x64xf32>
    %cst_6 = arith.constant 9.99999974E-6 : f32
    %19 = vector.broadcast %cst_6 : f32 to vector<1x64xf32>
    %20 = arith.addf %17, %19 : vector<1x64xf32>
    %21 = math.rsqrt %20 : vector<1x64xf32>
    %22 = arith.mulf %18, %21 : vector<1x64xf32>
    %c0_7 = arith.constant 0 : index
    %c0_8 = arith.constant 0 : index
    %23 = vector.load %arg3[%c0_7, %c0_8] : memref<1x64xf32, #tpu.memory_space<vmem>>, vector<1x64xf32>
    %24 = arith.mulf %13, %22 : vector<1x64xf32>
    %25 = arith.subf %23, %24 : vector<1x64xf32>
    %26 = tpu.concatenate %22, %22 in 1 : vector<1x64xf32>, vector<1x64xf32> -> vector<1x128xf32>
    %27 = tpu.concatenate %25, %25 in 1 : vector<1x64xf32>, vector<1x64xf32> -> vector<1x128xf32>
    %28 = vector.broadcast %26 : vector<1x128xf32> to vector<64x128xf32>
    %29 = arith.mulf %0, %28 : vector<64x128xf32>
    %30 = vector.broadcast %27 : vector<1x128xf32> to vector<64x128xf32>
    %31 = arith.addf %29, %30 : vector<64x128xf32>
    %cst_9 = arith.constant 0.000000e+00 : f32
    %32 = vector.broadcast %cst_9 : f32 to vector<64x128xf32>
    %33 = arith.maximumf %31, %32 : vector<64x128xf32>
    %c0_10 = arith.constant 0 : index
    %c0_11 = arith.constant 0 : index
    %34 = vector.load %arg4[%c0_10, %c0_11] : memref<64x128xf32, #tpu.memory_space<vmem>>, vector<64x128xf32>
    tpu.vector_store %arg4[%c0_10, %c0_11], %33 {strides = array<i32>} : memref<64x128xf32, #tpu.memory_space<vmem>>, vector<64x128xf32>,
    return
  }
  func.func @transform_0(%arg0: i32) -> (i32, i32) {
    %c0_i32 = arith.constant 0 : i32
    %c0_i32_0 = arith.constant 0 : i32
    %c0_i32_1 = arith.constant 0 : i32
    return %c0_i32, %c0_i32_0 : i32, i32
  }
  func.func @transform_1(%arg0: i32) -> (i32, i32) {
    %c0_i32 = arith.constant 0 : i32
    %c0_i32_0 = arith.constant 0 : i32
    %c0_i32_1 = arith.constant 0 : i32
    return %c0_i32, %c0_i32_0 : i32, i32
  }
  func.func @transform_2(%arg0: i32) -> (i32, i32) {
    %c0_i32 = arith.constant 0 : i32
    %c0_i32_0 = arith.constant 0 : i32
    %c0_i32_1 = arith.constant 0 : i32
    return %c0_i32, %c0_i32_0 : i32, i32
  }
  func.func @transform_3(%arg0: i32) -> (i32, i32) {
    %c0_i32 = arith.constant 0 : i32
    %c0_i32_0 = arith.constant 0 : i32
    %c0_i32_1 = arith.constant 0 : i32
    return %c0_i32, %c0_i32_0 : i32, i32
  }
}

module attributes {stable_mosaic.version = 11 : i64} {
  func.func @_bn_fused_kernel(%arg0: i32, %arg1: memref<64x128xf32, #tpu.memory_space<vmem>>, %arg2: memref<64x128xf32, #tpu.memory_space<vmem>>, %arg3: memref<1x64xf32, #tpu.memory_space<vmem>>, %arg4: memref<1x64xf32, #tpu.memory_space<vmem>>, %arg5: memref<64x128xf32, #tpu.memory_space<vmem>>) attributes {dimension_semantics = [#tpu.dimension_semantics<arbitrary>], iteration_bounds = array<i64: 1>, scalar_prefetch = 0 : i64, scratch_operands = 0 : i64, tpu.core_type = #tpu.core_type<tc>, window_params = [{pipeline_mode = #tpu.pipeline_mode<synchronous>, transform_indices = @transform_0, window_bounds = array<i64: 64, 128>}, {pipeline_mode = #tpu.pipeline_mode<synchronous>, transform_indices = @transform_1, window_bounds = array<i64: 64, 128>}, {pipeline_mode = #tpu.pipeline_mode<synchronous>, transform_indices = @transform_2, window_bounds = array<i64: 1, 64>}, {pipeline_mode = #tpu.pipeline_mode<synchronous>, transform_indices = @transform_3, window_bounds = array<i64: 1, 64>}, {pipeline_mode = #tpu.pipeline_mode<synchronous>, transform_indices = @transform_4, window_bounds = array<i64: 64, 128>}]} {
    %c0 = arith.constant 0 : index
    %c0_0 = arith.constant 0 : index
    %0 = vector.load %arg1[%c0, %c0_0] : memref<64x128xf32, #tpu.memory_space<vmem>>, vector<64x128xf32>
    %cst = arith.constant dense<0.000000e+00> : vector<128xf32>
    %1 = vector.multi_reduction <add>, %0, %cst [0] : vector<64x128xf32> to vector<128xf32>
    %2 = vector.shape_cast %1 : vector<128xf32> to vector<1x128xf32>
    %3 = arith.mulf %0, %0 : vector<64x128xf32>
    %cst_1 = arith.constant dense<0.000000e+00> : vector<128xf32>
    %4 = vector.multi_reduction <add>, %3, %cst_1 [0] : vector<64x128xf32> to vector<128xf32>
    %5 = vector.shape_cast %4 : vector<128xf32> to vector<1x128xf32>
    %6 = vector.extract_strided_slice %2 {offsets = [0, 0], sizes = [1, 64], strides = [1, 1]} : vector<1x128xf32> to vector<1x64xf32>
    %7 = vector.extract_strided_slice %5 {offsets = [0, 0], sizes = [1, 64], strides = [1, 1]} : vector<1x128xf32> to vector<1x64xf32>
    %8 = vector.extract_strided_slice %2 {offsets = [0, 64], sizes = [1, 64], strides = [1, 1]} : vector<1x128xf32> to vector<1x64xf32>
    %9 = arith.addf %6, %8 : vector<1x64xf32>
    %10 = vector.extract_strided_slice %5 {offsets = [0, 64], sizes = [1, 64], strides = [1, 1]} : vector<1x128xf32> to vector<1x64xf32>
    %11 = arith.addf %7, %10 : vector<1x64xf32>
    %cst_2 = arith.constant 7.812500e-03 : f32
    %12 = vector.broadcast %cst_2 : f32 to vector<1x64xf32>
    %13 = arith.mulf %9, %12 : vector<1x64xf32>
    %cst_3 = arith.constant 7.812500e-03 : f32
    %14 = vector.broadcast %cst_3 : f32 to vector<1x64xf32>
    %15 = arith.mulf %11, %14 : vector<1x64xf32>
    %16 = arith.mulf %13, %13 : vector<1x64xf32>
    %17 = arith.subf %15, %16 : vector<1x64xf32>
    %c0_4 = arith.constant 0 : index
    %c0_5 = arith.constant 0 : index
    %18 = vector.load %arg3[%c0_4, %c0_5] : memref<1x64xf32, #tpu.memory_space<vmem>>, vector<1x64xf32>
    %cst_6 = arith.constant 9.99999974E-6 : f32
    %19 = vector.broadcast %cst_6 : f32 to vector<1x64xf32>
    %20 = arith.addf %17, %19 : vector<1x64xf32>
    %21 = math.rsqrt %20 : vector<1x64xf32>
    %22 = arith.mulf %18, %21 : vector<1x64xf32>
    %c0_7 = arith.constant 0 : index
    %c0_8 = arith.constant 0 : index
    %23 = vector.load %arg4[%c0_7, %c0_8] : memref<1x64xf32, #tpu.memory_space<vmem>>, vector<1x64xf32>
    %24 = arith.mulf %13, %22 : vector<1x64xf32>
    %25 = arith.subf %23, %24 : vector<1x64xf32>
    %26 = tpu.concatenate %22, %22 in 1 : vector<1x64xf32>, vector<1x64xf32> -> vector<1x128xf32>
    %27 = tpu.concatenate %25, %25 in 1 : vector<1x64xf32>, vector<1x64xf32> -> vector<1x128xf32>
    %28 = vector.broadcast %26 : vector<1x128xf32> to vector<64x128xf32>
    %29 = arith.mulf %0, %28 : vector<64x128xf32>
    %30 = vector.broadcast %27 : vector<1x128xf32> to vector<64x128xf32>
    %31 = arith.addf %29, %30 : vector<64x128xf32>
    %c0_9 = arith.constant 0 : index
    %c0_10 = arith.constant 0 : index
    %32 = vector.load %arg2[%c0_9, %c0_10] : memref<64x128xf32, #tpu.memory_space<vmem>>, vector<64x128xf32>
    %33 = arith.addf %31, %32 : vector<64x128xf32>
    %cst_11 = arith.constant 0.000000e+00 : f32
    %34 = vector.broadcast %cst_11 : f32 to vector<64x128xf32>
    %35 = arith.maximumf %33, %34 : vector<64x128xf32>
    %c0_12 = arith.constant 0 : index
    %c0_13 = arith.constant 0 : index
    %36 = vector.load %arg5[%c0_12, %c0_13] : memref<64x128xf32, #tpu.memory_space<vmem>>, vector<64x128xf32>
    tpu.vector_store %arg5[%c0_12, %c0_13], %35 {strides = array<i32>} : memref<64x128xf32, #tpu.memory_space<vmem>>, vector<64x128xf32>,
    return
  }
  func.func @transform_0(%arg0: i32) -> (i32, i32) {
    %c0_i32 = arith.constant 0 : i32
    %c0_i32_0 = arith.constant 0 : i32
    %c0_i32_1 = arith.constant 0 : i32
    return %c0_i32, %c0_i32_0 : i32, i32
  }
  func.func @transform_1(%arg0: i32) -> (i32, i32) {
    %c0_i32 = arith.constant 0 : i32
    %c0_i32_0 = arith.constant 0 : i32
    %c0_i32_1 = arith.constant 0 : i32
    return %c0_i32, %c0_i32_0 : i32, i32
  }
  func.func @transform_2(%arg0: i32) -> (i32, i32) {
    %c0_i32 = arith.constant 0 : i32
    %c0_i32_0 = arith.constant 0 : i32
    %c0_i32_1 = arith.constant 0 : i32
    return %c0_i32, %c0_i32_0 : i32, i32
  }
  func.func @transform_3(%arg0: i32) -> (i32, i32) {
    %c0_i32 = arith.constant 0 : i32
    %c0_i32_0 = arith.constant 0 : i32
    %c0_i32_1 = arith.constant 0 : i32
    return %c0_i32, %c0_i32_0 : i32, i32
  }
  func.func @transform_4(%arg0: i32) -> (i32, i32) {
    %c0_i32 = arith.constant 0 : i32
    %c0_i32_0 = arith.constant 0 : i32
    %c0_i32_1 = arith.constant 0 : i32
    return %c0_i32, %c0_i32_0 : i32, i32
  }
}

module attributes {stable_mosaic.version = 11 : i64} {
  func.func @_matmul_kernel(%arg0: i32, %arg1: i32, %arg2: i32, %arg3: memref<32x576xbf16, #tpu.memory_space<vmem>>, %arg4: memref<576x128xbf16, #tpu.memory_space<vmem>>, %arg5: memref<32x128xf32, #tpu.memory_space<vmem>>) attributes {dimension_semantics = [#tpu.dimension_semantics<parallel>, #tpu.dimension_semantics<parallel>, #tpu.dimension_semantics<arbitrary>], iteration_bounds = array<i64: 1, 1, 1>, scalar_prefetch = 0 : i64, scratch_operands = 0 : i64, tpu.core_type = #tpu.core_type<tc>, window_params = [{transform_indices = @transform_0, window_bounds = array<i64: 32, 576>}, {transform_indices = @transform_1, window_bounds = array<i64: 576, 128>}, {transform_indices = @transform_2, window_bounds = array<i64: 32, 128>}]} {
    %c0_i32 = arith.constant 0 : i32
    %0 = arith.cmpi eq, %arg2, %c0_i32 : i32
    %1 = arith.extui %0 : i1 to i32
    %c0_i32_0 = arith.constant 0 : i32
    %2 = arith.cmpi ne, %1, %c0_i32_0 : i32
    scf.if %2 {
      %cst_8 = arith.constant 0.000000e+00 : f32
      %9 = vector.broadcast %cst_8 : f32 to vector<32x128xf32>
      %c0_9 = arith.constant 0 : index
      %c0_10 = arith.constant 0 : index
      %10 = vector.load %arg5[%c0_9, %c0_10] : memref<32x128xf32, #tpu.memory_space<vmem>>, vector<32x128xf32>
      tpu.vector_store %arg5[%c0_9, %c0_10], %9 {strides = array<i32>} : memref<32x128xf32, #tpu.memory_space<vmem>>, vector<32x128xf32>,
    } else {
    }
    %c0 = arith.constant 0 : index
    %c0_1 = arith.constant 0 : index
    %3 = vector.load %arg5[%c0, %c0_1] : memref<32x128xf32, #tpu.memory_space<vmem>>, vector<32x128xf32>
    %c0_2 = arith.constant 0 : index
    %c0_3 = arith.constant 0 : index
    %4 = vector.load %arg3[%c0_2, %c0_3] : memref<32x576xbf16, #tpu.memory_space<vmem>>, vector<32x576xbf16>
    %c0_4 = arith.constant 0 : index
    %c0_5 = arith.constant 0 : index
    %5 = vector.load %arg4[%c0_4, %c0_5] : memref<576x128xbf16, #tpu.memory_space<vmem>>, vector<576x128xbf16>
    %cst = arith.constant dense<0.000000e+00> : vector<32x128xf32>
    %6 = tpu.matmul %4, %5, %cst {dimension_numbers = #tpu.dot_dimension_numbers<[1], [0], [0], [1], [0, 0, 1, 1], [], []>} : vector<32x576xbf16>, vector<576x128xbf16>, vector<32x128xf32> -> vector<32x128xf32>
    %7 = arith.addf %3, %6 : vector<32x128xf32>
    %c0_6 = arith.constant 0 : index
    %c0_7 = arith.constant 0 : index
    %8 = vector.load %arg5[%c0_6, %c0_7] : memref<32x128xf32, #tpu.memory_space<vmem>>, vector<32x128xf32>
    tpu.vector_store %arg5[%c0_6, %c0_7], %7 {strides = array<i32>} : memref<32x128xf32, #tpu.memory_space<vmem>>, vector<32x128xf32>,
    return
  }
  func.func @transform_0(%arg0: i32, %arg1: i32, %arg2: i32) -> (i32, i32) {
    %c0_i32 = arith.constant 0 : i32
    return %arg0, %arg2 : i32, i32
  }
  func.func @transform_1(%arg0: i32, %arg1: i32, %arg2: i32) -> (i32, i32) {
    %c0_i32 = arith.constant 0 : i32
    return %arg2, %arg1 : i32, i32
  }
  func.func @transform_2(%arg0: i32, %arg1: i32, %arg2: i32) -> (i32, i32) {
    %c0_i32 = arith.constant 0 : i32
    return %arg0, %arg1 : i32, i32
  }
}

module attributes {stable_mosaic.version = 11 : i64} {
  func.func @_bn_fused_kernel(%arg0: i32, %arg1: memref<32x128xf32, #tpu.memory_space<vmem>>, %arg2: memref<1x128xf32, #tpu.memory_space<vmem>>, %arg3: memref<1x128xf32, #tpu.memory_space<vmem>>, %arg4: memref<32x128xf32, #tpu.memory_space<vmem>>) attributes {dimension_semantics = [#tpu.dimension_semantics<arbitrary>], iteration_bounds = array<i64: 1>, scalar_prefetch = 0 : i64, scratch_operands = 0 : i64, tpu.core_type = #tpu.core_type<tc>, window_params = [{pipeline_mode = #tpu.pipeline_mode<synchronous>, transform_indices = @transform_0, window_bounds = array<i64: 32, 128>}, {pipeline_mode = #tpu.pipeline_mode<synchronous>, transform_indices = @transform_1, window_bounds = array<i64: 1, 128>}, {pipeline_mode = #tpu.pipeline_mode<synchronous>, transform_indices = @transform_2, window_bounds = array<i64: 1, 128>}, {pipeline_mode = #tpu.pipeline_mode<synchronous>, transform_indices = @transform_3, window_bounds = array<i64: 32, 128>}]} {
    %c0 = arith.constant 0 : index
    %c0_0 = arith.constant 0 : index
    %0 = vector.load %arg1[%c0, %c0_0] : memref<32x128xf32, #tpu.memory_space<vmem>>, vector<32x128xf32>
    %cst = arith.constant dense<0.000000e+00> : vector<128xf32>
    %1 = vector.multi_reduction <add>, %0, %cst [0] : vector<32x128xf32> to vector<128xf32>
    %2 = vector.shape_cast %1 : vector<128xf32> to vector<1x128xf32>
    %3 = arith.mulf %0, %0 : vector<32x128xf32>
    %cst_1 = arith.constant dense<0.000000e+00> : vector<128xf32>
    %4 = vector.multi_reduction <add>, %3, %cst_1 [0] : vector<32x128xf32> to vector<128xf32>
    %5 = vector.shape_cast %4 : vector<128xf32> to vector<1x128xf32>
    %cst_2 = arith.constant 3.125000e-02 : f32
    %6 = vector.broadcast %cst_2 : f32 to vector<1x128xf32>
    %7 = arith.mulf %2, %6 : vector<1x128xf32>
    %cst_3 = arith.constant 3.125000e-02 : f32
    %8 = vector.broadcast %cst_3 : f32 to vector<1x128xf32>
    %9 = arith.mulf %5, %8 : vector<1x128xf32>
    %10 = arith.mulf %7, %7 : vector<1x128xf32>
    %11 = arith.subf %9, %10 : vector<1x128xf32>
    %c0_4 = arith.constant 0 : index
    %c0_5 = arith.constant 0 : index
    %12 = vector.load %arg2[%c0_4, %c0_5] : memref<1x128xf32, #tpu.memory_space<vmem>>, vector<1x128xf32>
    %cst_6 = arith.constant 9.99999974E-6 : f32
    %13 = vector.broadcast %cst_6 : f32 to vector<1x128xf32>
    %14 = arith.addf %11, %13 : vector<1x128xf32>
    %15 = math.rsqrt %14 : vector<1x128xf32>
    %16 = arith.mulf %12, %15 : vector<1x128xf32>
    %c0_7 = arith.constant 0 : index
    %c0_8 = arith.constant 0 : index
    %17 = vector.load %arg3[%c0_7, %c0_8] : memref<1x128xf32, #tpu.memory_space<vmem>>, vector<1x128xf32>
    %18 = arith.mulf %7, %16 : vector<1x128xf32>
    %19 = arith.subf %17, %18 : vector<1x128xf32>
    %20 = vector.broadcast %16 : vector<1x128xf32> to vector<32x128xf32>
    %21 = arith.mulf %0, %20 : vector<32x128xf32>
    %22 = vector.broadcast %19 : vector<1x128xf32> to vector<32x128xf32>
    %23 = arith.addf %21, %22 : vector<32x128xf32>
    %cst_9 = arith.constant 0.000000e+00 : f32
    %24 = vector.broadcast %cst_9 : f32 to vector<32x128xf32>
    %25 = arith.maximumf %23, %24 : vector<32x128xf32>
    %c0_10 = arith.constant 0 : index
    %c0_11 = arith.constant 0 : index
    %26 = vector.load %arg4[%c0_10, %c0_11] : memref<32x128xf32, #tpu.memory_space<vmem>>, vector<32x128xf32>
    tpu.vector_store %arg4[%c0_10, %c0_11], %25 {strides = array<i32>} : memref<32x128xf32, #tpu.memory_space<vmem>>, vector<32x128xf32>,
    return
  }
  func.func @transform_0(%arg0: i32) -> (i32, i32) {
    %c0_i32 = arith.constant 0 : i32
    %c0_i32_0 = arith.constant 0 : i32
    %c0_i32_1 = arith.constant 0 : i32
    return %c0_i32, %c0_i32_0 : i32, i32
  }
  func.func @transform_1(%arg0: i32) -> (i32, i32) {
    %c0_i32 = arith.constant 0 : i32
    %c0_i32_0 = arith.constant 0 : i32
    %c0_i32_1 = arith.constant 0 : i32
    return %c0_i32, %c0_i32_0 : i32, i32
  }
  func.func @transform_2(%arg0: i32) -> (i32, i32) {
    %c0_i32 = arith.constant 0 : i32
    %c0_i32_0 = arith.constant 0 : i32
    %c0_i32_1 = arith.constant 0 : i32
    return %c0_i32, %c0_i32_0 : i32, i32
  }
  func.func @transform_3(%arg0: i32) -> (i32, i32) {
    %c0_i32 = arith.constant 0 : i32
    %c0_i32_0 = arith.constant 0 : i32
    %c0_i32_1 = arith.constant 0 : i32
    return %c0_i32, %c0_i32_0 : i32, i32
  }
}

module attributes {stable_mosaic.version = 11 : i64} {
  func.func @_matmul_kernel(%arg0: i32, %arg1: i32, %arg2: i32, %arg3: memref<32x384xbf16, #tpu.memory_space<vmem>>, %arg4: memref<384x128xbf16, #tpu.memory_space<vmem>>, %arg5: memref<32x128xf32, #tpu.memory_space<vmem>>) attributes {dimension_semantics = [#tpu.dimension_semantics<parallel>, #tpu.dimension_semantics<parallel>, #tpu.dimension_semantics<arbitrary>], iteration_bounds = array<i64: 1, 1, 3>, scalar_prefetch = 0 : i64, scratch_operands = 0 : i64, tpu.core_type = #tpu.core_type<tc>, window_params = [{transform_indices = @transform_0, window_bounds = array<i64: 32, 384>}, {transform_indices = @transform_1, window_bounds = array<i64: 384, 128>}, {transform_indices = @transform_2, window_bounds = array<i64: 32, 128>}]} {
    %c0_i32 = arith.constant 0 : i32
    %0 = arith.cmpi eq, %arg2, %c0_i32 : i32
    %1 = arith.extui %0 : i1 to i32
    %c0_i32_0 = arith.constant 0 : i32
    %2 = arith.cmpi ne, %1, %c0_i32_0 : i32
    scf.if %2 {
      %cst_8 = arith.constant 0.000000e+00 : f32
      %9 = vector.broadcast %cst_8 : f32 to vector<32x128xf32>
      %c0_9 = arith.constant 0 : index
      %c0_10 = arith.constant 0 : index
      %10 = vector.load %arg5[%c0_9, %c0_10] : memref<32x128xf32, #tpu.memory_space<vmem>>, vector<32x128xf32>
      tpu.vector_store %arg5[%c0_9, %c0_10], %9 {strides = array<i32>} : memref<32x128xf32, #tpu.memory_space<vmem>>, vector<32x128xf32>,
    } else {
    }
    %c0 = arith.constant 0 : index
    %c0_1 = arith.constant 0 : index
    %3 = vector.load %arg5[%c0, %c0_1] : memref<32x128xf32, #tpu.memory_space<vmem>>, vector<32x128xf32>
    %c0_2 = arith.constant 0 : index
    %c0_3 = arith.constant 0 : index
    %4 = vector.load %arg3[%c0_2, %c0_3] : memref<32x384xbf16, #tpu.memory_space<vmem>>, vector<32x384xbf16>
    %c0_4 = arith.constant 0 : index
    %c0_5 = arith.constant 0 : index
    %5 = vector.load %arg4[%c0_4, %c0_5] : memref<384x128xbf16, #tpu.memory_space<vmem>>, vector<384x128xbf16>
    %cst = arith.constant dense<0.000000e+00> : vector<32x128xf32>
    %6 = tpu.matmul %4, %5, %cst {dimension_numbers = #tpu.dot_dimension_numbers<[1], [0], [0], [1], [0, 0, 1, 1], [], []>} : vector<32x384xbf16>, vector<384x128xbf16>, vector<32x128xf32> -> vector<32x128xf32>
    %7 = arith.addf %3, %6 : vector<32x128xf32>
    %c0_6 = arith.constant 0 : index
    %c0_7 = arith.constant 0 : index
    %8 = vector.load %arg5[%c0_6, %c0_7] : memref<32x128xf32, #tpu.memory_space<vmem>>, vector<32x128xf32>
    tpu.vector_store %arg5[%c0_6, %c0_7], %7 {strides = array<i32>} : memref<32x128xf32, #tpu.memory_space<vmem>>, vector<32x128xf32>,
    return
  }
  func.func @transform_0(%arg0: i32, %arg1: i32, %arg2: i32) -> (i32, i32) {
    %c0_i32 = arith.constant 0 : i32
    return %arg0, %arg2 : i32, i32
  }
  func.func @transform_1(%arg0: i32, %arg1: i32, %arg2: i32) -> (i32, i32) {
    %c0_i32 = arith.constant 0 : i32
    return %arg2, %arg1 : i32, i32
  }
  func.func @transform_2(%arg0: i32, %arg1: i32, %arg2: i32) -> (i32, i32) {
    %c0_i32 = arith.constant 0 : i32
    return %arg0, %arg1 : i32, i32
  }
}

module attributes {stable_mosaic.version = 11 : i64} {
  func.func @_matmul_kernel(%arg0: i32, %arg1: i32, %arg2: i32, %arg3: memref<32x64xbf16, #tpu.memory_space<vmem>>, %arg4: memref<64x128xbf16, #tpu.memory_space<vmem>>, %arg5: memref<32x128xf32, #tpu.memory_space<vmem>>) attributes {dimension_semantics = [#tpu.dimension_semantics<parallel>, #tpu.dimension_semantics<parallel>, #tpu.dimension_semantics<arbitrary>], iteration_bounds = array<i64: 1, 1, 1>, scalar_prefetch = 0 : i64, scratch_operands = 0 : i64, tpu.core_type = #tpu.core_type<tc>, window_params = [{transform_indices = @transform_0, window_bounds = array<i64: 32, 64>}, {transform_indices = @transform_1, window_bounds = array<i64: 64, 128>}, {transform_indices = @transform_2, window_bounds = array<i64: 32, 128>}]} {
    %c0_i32 = arith.constant 0 : i32
    %0 = arith.cmpi eq, %arg2, %c0_i32 : i32
    %1 = arith.extui %0 : i1 to i32
    %c0_i32_0 = arith.constant 0 : i32
    %2 = arith.cmpi ne, %1, %c0_i32_0 : i32
    scf.if %2 {
      %cst_8 = arith.constant 0.000000e+00 : f32
      %9 = vector.broadcast %cst_8 : f32 to vector<32x128xf32>
      %c0_9 = arith.constant 0 : index
      %c0_10 = arith.constant 0 : index
      %10 = vector.load %arg5[%c0_9, %c0_10] : memref<32x128xf32, #tpu.memory_space<vmem>>, vector<32x128xf32>
      tpu.vector_store %arg5[%c0_9, %c0_10], %9 {strides = array<i32>} : memref<32x128xf32, #tpu.memory_space<vmem>>, vector<32x128xf32>,
    } else {
    }
    %c0 = arith.constant 0 : index
    %c0_1 = arith.constant 0 : index
    %3 = vector.load %arg5[%c0, %c0_1] : memref<32x128xf32, #tpu.memory_space<vmem>>, vector<32x128xf32>
    %c0_2 = arith.constant 0 : index
    %c0_3 = arith.constant 0 : index
    %4 = vector.load %arg3[%c0_2, %c0_3] : memref<32x64xbf16, #tpu.memory_space<vmem>>, vector<32x64xbf16>
    %c0_4 = arith.constant 0 : index
    %c0_5 = arith.constant 0 : index
    %5 = vector.load %arg4[%c0_4, %c0_5] : memref<64x128xbf16, #tpu.memory_space<vmem>>, vector<64x128xbf16>
    %cst = arith.constant dense<0.000000e+00> : vector<32x128xf32>
    %6 = tpu.matmul %4, %5, %cst {dimension_numbers = #tpu.dot_dimension_numbers<[1], [0], [0], [1], [0, 0, 1, 1], [], []>} : vector<32x64xbf16>, vector<64x128xbf16>, vector<32x128xf32> -> vector<32x128xf32>
    %7 = arith.addf %3, %6 : vector<32x128xf32>
    %c0_6 = arith.constant 0 : index
    %c0_7 = arith.constant 0 : index
    %8 = vector.load %arg5[%c0_6, %c0_7] : memref<32x128xf32, #tpu.memory_space<vmem>>, vector<32x128xf32>
    tpu.vector_store %arg5[%c0_6, %c0_7], %7 {strides = array<i32>} : memref<32x128xf32, #tpu.memory_space<vmem>>, vector<32x128xf32>,
    return
  }
  func.func @transform_0(%arg0: i32, %arg1: i32, %arg2: i32) -> (i32, i32) {
    %c0_i32 = arith.constant 0 : i32
    return %arg0, %arg2 : i32, i32
  }
  func.func @transform_1(%arg0: i32, %arg1: i32, %arg2: i32) -> (i32, i32) {
    %c0_i32 = arith.constant 0 : i32
    return %arg2, %arg1 : i32, i32
  }
  func.func @transform_2(%arg0: i32, %arg1: i32, %arg2: i32) -> (i32, i32) {
    %c0_i32 = arith.constant 0 : i32
    return %arg0, %arg1 : i32, i32
  }
}

module attributes {stable_mosaic.version = 11 : i64} {
  func.func @_bn_fused_kernel(%arg0: i32, %arg1: memref<32x128xf32, #tpu.memory_space<vmem>>, %arg2: memref<1x128xf32, #tpu.memory_space<vmem>>, %arg3: memref<1x128xf32, #tpu.memory_space<vmem>>, %arg4: memref<32x128xf32, #tpu.memory_space<vmem>>) attributes {dimension_semantics = [#tpu.dimension_semantics<arbitrary>], iteration_bounds = array<i64: 1>, scalar_prefetch = 0 : i64, scratch_operands = 0 : i64, tpu.core_type = #tpu.core_type<tc>, window_params = [{pipeline_mode = #tpu.pipeline_mode<synchronous>, transform_indices = @transform_0, window_bounds = array<i64: 32, 128>}, {pipeline_mode = #tpu.pipeline_mode<synchronous>, transform_indices = @transform_1, window_bounds = array<i64: 1, 128>}, {pipeline_mode = #tpu.pipeline_mode<synchronous>, transform_indices = @transform_2, window_bounds = array<i64: 1, 128>}, {pipeline_mode = #tpu.pipeline_mode<synchronous>, transform_indices = @transform_3, window_bounds = array<i64: 32, 128>}]} {
    %c0 = arith.constant 0 : index
    %c0_0 = arith.constant 0 : index
    %0 = vector.load %arg1[%c0, %c0_0] : memref<32x128xf32, #tpu.memory_space<vmem>>, vector<32x128xf32>
    %cst = arith.constant dense<0.000000e+00> : vector<128xf32>
    %1 = vector.multi_reduction <add>, %0, %cst [0] : vector<32x128xf32> to vector<128xf32>
    %2 = vector.shape_cast %1 : vector<128xf32> to vector<1x128xf32>
    %3 = arith.mulf %0, %0 : vector<32x128xf32>
    %cst_1 = arith.constant dense<0.000000e+00> : vector<128xf32>
    %4 = vector.multi_reduction <add>, %3, %cst_1 [0] : vector<32x128xf32> to vector<128xf32>
    %5 = vector.shape_cast %4 : vector<128xf32> to vector<1x128xf32>
    %cst_2 = arith.constant 3.125000e-02 : f32
    %6 = vector.broadcast %cst_2 : f32 to vector<1x128xf32>
    %7 = arith.mulf %2, %6 : vector<1x128xf32>
    %cst_3 = arith.constant 3.125000e-02 : f32
    %8 = vector.broadcast %cst_3 : f32 to vector<1x128xf32>
    %9 = arith.mulf %5, %8 : vector<1x128xf32>
    %10 = arith.mulf %7, %7 : vector<1x128xf32>
    %11 = arith.subf %9, %10 : vector<1x128xf32>
    %c0_4 = arith.constant 0 : index
    %c0_5 = arith.constant 0 : index
    %12 = vector.load %arg2[%c0_4, %c0_5] : memref<1x128xf32, #tpu.memory_space<vmem>>, vector<1x128xf32>
    %cst_6 = arith.constant 9.99999974E-6 : f32
    %13 = vector.broadcast %cst_6 : f32 to vector<1x128xf32>
    %14 = arith.addf %11, %13 : vector<1x128xf32>
    %15 = math.rsqrt %14 : vector<1x128xf32>
    %16 = arith.mulf %12, %15 : vector<1x128xf32>
    %c0_7 = arith.constant 0 : index
    %c0_8 = arith.constant 0 : index
    %17 = vector.load %arg3[%c0_7, %c0_8] : memref<1x128xf32, #tpu.memory_space<vmem>>, vector<1x128xf32>
    %18 = arith.mulf %7, %16 : vector<1x128xf32>
    %19 = arith.subf %17, %18 : vector<1x128xf32>
    %20 = vector.broadcast %16 : vector<1x128xf32> to vector<32x128xf32>
    %21 = arith.mulf %0, %20 : vector<32x128xf32>
    %22 = vector.broadcast %19 : vector<1x128xf32> to vector<32x128xf32>
    %23 = arith.addf %21, %22 : vector<32x128xf32>
    %c0_9 = arith.constant 0 : index
    %c0_10 = arith.constant 0 : index
    %24 = vector.load %arg4[%c0_9, %c0_10] : memref<32x128xf32, #tpu.memory_space<vmem>>, vector<32x128xf32>
    tpu.vector_store %arg4[%c0_9, %c0_10], %23 {strides = array<i32>} : memref<32x128xf32, #tpu.memory_space<vmem>>, vector<32x128xf32>,
    return
  }
  func.func @transform_0(%arg0: i32) -> (i32, i32) {
    %c0_i32 = arith.constant 0 : i32
    %c0_i32_0 = arith.constant 0 : i32
    %c0_i32_1 = arith.constant 0 : i32
    return %c0_i32, %c0_i32_0 : i32, i32
  }
  func.func @transform_1(%arg0: i32) -> (i32, i32) {
    %c0_i32 = arith.constant 0 : i32
    %c0_i32_0 = arith.constant 0 : i32
    %c0_i32_1 = arith.constant 0 : i32
    return %c0_i32, %c0_i32_0 : i32, i32
  }
  func.func @transform_2(%arg0: i32) -> (i32, i32) {
    %c0_i32 = arith.constant 0 : i32
    %c0_i32_0 = arith.constant 0 : i32
    %c0_i32_1 = arith.constant 0 : i32
    return %c0_i32, %c0_i32_0 : i32, i32
  }
  func.func @transform_3(%arg0: i32) -> (i32, i32) {
    %c0_i32 = arith.constant 0 : i32
    %c0_i32_0 = arith.constant 0 : i32
    %c0_i32_1 = arith.constant 0 : i32
    return %c0_i32, %c0_i32_0 : i32, i32
  }
}

module attributes {stable_mosaic.version = 11 : i64} {
  func.func @_bn_fused_kernel(%arg0: i32, %arg1: memref<32x128xf32, #tpu.memory_space<vmem>>, %arg2: memref<32x128xf32, #tpu.memory_space<vmem>>, %arg3: memref<1x128xf32, #tpu.memory_space<vmem>>, %arg4: memref<1x128xf32, #tpu.memory_space<vmem>>, %arg5: memref<32x128xf32, #tpu.memory_space<vmem>>) attributes {dimension_semantics = [#tpu.dimension_semantics<arbitrary>], iteration_bounds = array<i64: 1>, scalar_prefetch = 0 : i64, scratch_operands = 0 : i64, tpu.core_type = #tpu.core_type<tc>, window_params = [{pipeline_mode = #tpu.pipeline_mode<synchronous>, transform_indices = @transform_0, window_bounds = array<i64: 32, 128>}, {pipeline_mode = #tpu.pipeline_mode<synchronous>, transform_indices = @transform_1, window_bounds = array<i64: 32, 128>}, {pipeline_mode = #tpu.pipeline_mode<synchronous>, transform_indices = @transform_2, window_bounds = array<i64: 1, 128>}, {pipeline_mode = #tpu.pipeline_mode<synchronous>, transform_indices = @transform_3, window_bounds = array<i64: 1, 128>}, {pipeline_mode = #tpu.pipeline_mode<synchronous>, transform_indices = @transform_4, window_bounds = array<i64: 32, 128>}]} {
    %c0 = arith.constant 0 : index
    %c0_0 = arith.constant 0 : index
    %0 = vector.load %arg1[%c0, %c0_0] : memref<32x128xf32, #tpu.memory_space<vmem>>, vector<32x128xf32>
    %cst = arith.constant dense<0.000000e+00> : vector<128xf32>
    %1 = vector.multi_reduction <add>, %0, %cst [0] : vector<32x128xf32> to vector<128xf32>
    %2 = vector.shape_cast %1 : vector<128xf32> to vector<1x128xf32>
    %3 = arith.mulf %0, %0 : vector<32x128xf32>
    %cst_1 = arith.constant dense<0.000000e+00> : vector<128xf32>
    %4 = vector.multi_reduction <add>, %3, %cst_1 [0] : vector<32x128xf32> to vector<128xf32>
    %5 = vector.shape_cast %4 : vector<128xf32> to vector<1x128xf32>
    %cst_2 = arith.constant 3.125000e-02 : f32
    %6 = vector.broadcast %cst_2 : f32 to vector<1x128xf32>
    %7 = arith.mulf %2, %6 : vector<1x128xf32>
    %cst_3 = arith.constant 3.125000e-02 : f32
    %8 = vector.broadcast %cst_3 : f32 to vector<1x128xf32>
    %9 = arith.mulf %5, %8 : vector<1x128xf32>
    %10 = arith.mulf %7, %7 : vector<1x128xf32>
    %11 = arith.subf %9, %10 : vector<1x128xf32>
    %c0_4 = arith.constant 0 : index
    %c0_5 = arith.constant 0 : index
    %12 = vector.load %arg3[%c0_4, %c0_5] : memref<1x128xf32, #tpu.memory_space<vmem>>, vector<1x128xf32>
    %cst_6 = arith.constant 9.99999974E-6 : f32
    %13 = vector.broadcast %cst_6 : f32 to vector<1x128xf32>
    %14 = arith.addf %11, %13 : vector<1x128xf32>
    %15 = math.rsqrt %14 : vector<1x128xf32>
    %16 = arith.mulf %12, %15 : vector<1x128xf32>
    %c0_7 = arith.constant 0 : index
    %c0_8 = arith.constant 0 : index
    %17 = vector.load %arg4[%c0_7, %c0_8] : memref<1x128xf32, #tpu.memory_space<vmem>>, vector<1x128xf32>
    %18 = arith.mulf %7, %16 : vector<1x128xf32>
    %19 = arith.subf %17, %18 : vector<1x128xf32>
    %20 = vector.broadcast %16 : vector<1x128xf32> to vector<32x128xf32>
    %21 = arith.mulf %0, %20 : vector<32x128xf32>
    %22 = vector.broadcast %19 : vector<1x128xf32> to vector<32x128xf32>
    %23 = arith.addf %21, %22 : vector<32x128xf32>
    %c0_9 = arith.constant 0 : index
    %c0_10 = arith.constant 0 : index
    %24 = vector.load %arg2[%c0_9, %c0_10] : memref<32x128xf32, #tpu.memory_space<vmem>>, vector<32x128xf32>
    %25 = arith.addf %23, %24 : vector<32x128xf32>
    %cst_11 = arith.constant 0.000000e+00 : f32
    %26 = vector.broadcast %cst_11 : f32 to vector<32x128xf32>
    %27 = arith.maximumf %25, %26 : vector<32x128xf32>
    %c0_12 = arith.constant 0 : index
    %c0_13 = arith.constant 0 : index
    %28 = vector.load %arg5[%c0_12, %c0_13] : memref<32x128xf32, #tpu.memory_space<vmem>>, vector<32x128xf32>
    tpu.vector_store %arg5[%c0_12, %c0_13], %27 {strides = array<i32>} : memref<32x128xf32, #tpu.memory_space<vmem>>, vector<32x128xf32>,
    return
  }
  func.func @transform_0(%arg0: i32) -> (i32, i32) {
    %c0_i32 = arith.constant 0 : i32
    %c0_i32_0 = arith.constant 0 : i32
    %c0_i32_1 = arith.constant 0 : i32
    return %c0_i32, %c0_i32_0 : i32, i32
  }
  func.func @transform_1(%arg0: i32) -> (i32, i32) {
    %c0_i32 = arith.constant 0 : i32
    %c0_i32_0 = arith.constant 0 : i32
    %c0_i32_1 = arith.constant 0 : i32
    return %c0_i32, %c0_i32_0 : i32, i32
  }
  func.func @transform_2(%arg0: i32) -> (i32, i32) {
    %c0_i32 = arith.constant 0 : i32
    %c0_i32_0 = arith.constant 0 : i32
    %c0_i32_1 = arith.constant 0 : i32
    return %c0_i32, %c0_i32_0 : i32, i32
  }
  func.func @transform_3(%arg0: i32) -> (i32, i32) {
    %c0_i32 = arith.constant 0 : i32
    %c0_i32_0 = arith.constant 0 : i32
    %c0_i32_1 = arith.constant 0 : i32
    return %c0_i32, %c0_i32_0 : i32, i32
  }
  func.func @transform_4(%arg0: i32) -> (i32, i32) {
    %c0_i32 = arith.constant 0 : i32
    %c0_i32_0 = arith.constant 0 : i32
    %c0_i32_1 = arith.constant 0 : i32
    return %c0_i32, %c0_i32_0 : i32, i32
  }
}

module attributes {stable_mosaic.version = 11 : i64} {
  func.func @_matmul_kernel(%arg0: i32, %arg1: i32, %arg2: i32, %arg3: memref<8x384xbf16, #tpu.memory_space<vmem>>, %arg4: memref<384x256xbf16, #tpu.memory_space<vmem>>, %arg5: memref<8x256xf32, #tpu.memory_space<vmem>>) attributes {dimension_semantics = [#tpu.dimension_semantics<parallel>, #tpu.dimension_semantics<parallel>, #tpu.dimension_semantics<arbitrary>], iteration_bounds = array<i64: 1, 1, 3>, scalar_prefetch = 0 : i64, scratch_operands = 0 : i64, tpu.core_type = #tpu.core_type<tc>, window_params = [{transform_indices = @transform_0, window_bounds = array<i64: 8, 384>}, {transform_indices = @transform_1, window_bounds = array<i64: 384, 256>}, {transform_indices = @transform_2, window_bounds = array<i64: 8, 256>}]} {
    %c0_i32 = arith.constant 0 : i32
    %0 = arith.cmpi eq, %arg2, %c0_i32 : i32
    %1 = arith.extui %0 : i1 to i32
    %c0_i32_0 = arith.constant 0 : i32
    %2 = arith.cmpi ne, %1, %c0_i32_0 : i32
    scf.if %2 {
      %cst_8 = arith.constant 0.000000e+00 : f32
      %9 = vector.broadcast %cst_8 : f32 to vector<8x256xf32>
      %c0_9 = arith.constant 0 : index
      %c0_10 = arith.constant 0 : index
      %10 = vector.load %arg5[%c0_9, %c0_10] : memref<8x256xf32, #tpu.memory_space<vmem>>, vector<8x256xf32>
      tpu.vector_store %arg5[%c0_9, %c0_10], %9 {strides = array<i32>} : memref<8x256xf32, #tpu.memory_space<vmem>>, vector<8x256xf32>,
    } else {
    }
    %c0 = arith.constant 0 : index
    %c0_1 = arith.constant 0 : index
    %3 = vector.load %arg5[%c0, %c0_1] : memref<8x256xf32, #tpu.memory_space<vmem>>, vector<8x256xf32>
    %c0_2 = arith.constant 0 : index
    %c0_3 = arith.constant 0 : index
    %4 = vector.load %arg3[%c0_2, %c0_3] : memref<8x384xbf16, #tpu.memory_space<vmem>>, vector<8x384xbf16>
    %c0_4 = arith.constant 0 : index
    %c0_5 = arith.constant 0 : index
    %5 = vector.load %arg4[%c0_4, %c0_5] : memref<384x256xbf16, #tpu.memory_space<vmem>>, vector<384x256xbf16>
    %cst = arith.constant dense<0.000000e+00> : vector<8x256xf32>
    %6 = tpu.matmul %4, %5, %cst {dimension_numbers = #tpu.dot_dimension_numbers<[1], [0], [0], [1], [0, 0, 1, 1], [], []>} : vector<8x384xbf16>, vector<384x256xbf16>, vector<8x256xf32> -> vector<8x256xf32>
    %7 = arith.addf %3, %6 : vector<8x256xf32>
    %c0_6 = arith.constant 0 : index
    %c0_7 = arith.constant 0 : index
    %8 = vector.load %arg5[%c0_6, %c0_7] : memref<8x256xf32, #tpu.memory_space<vmem>>, vector<8x256xf32>
    tpu.vector_store %arg5[%c0_6, %c0_7], %7 {strides = array<i32>} : memref<8x256xf32, #tpu.memory_space<vmem>>, vector<8x256xf32>,
    return
  }
  func.func @transform_0(%arg0: i32, %arg1: i32, %arg2: i32) -> (i32, i32) {
    %c0_i32 = arith.constant 0 : i32
    return %arg0, %arg2 : i32, i32
  }
  func.func @transform_1(%arg0: i32, %arg1: i32, %arg2: i32) -> (i32, i32) {
    %c0_i32 = arith.constant 0 : i32
    return %arg2, %arg1 : i32, i32
  }
  func.func @transform_2(%arg0: i32, %arg1: i32, %arg2: i32) -> (i32, i32) {
    %c0_i32 = arith.constant 0 : i32
    return %arg0, %arg1 : i32, i32
  }
}

module attributes {stable_mosaic.version = 11 : i64} {
  func.func @_bn_fused_kernel(%arg0: i32, %arg1: memref<8x256xf32, #tpu.memory_space<vmem>>, %arg2: memref<1x256xf32, #tpu.memory_space<vmem>>, %arg3: memref<1x256xf32, #tpu.memory_space<vmem>>, %arg4: memref<8x256xf32, #tpu.memory_space<vmem>>) attributes {dimension_semantics = [#tpu.dimension_semantics<arbitrary>], iteration_bounds = array<i64: 1>, scalar_prefetch = 0 : i64, scratch_operands = 0 : i64, tpu.core_type = #tpu.core_type<tc>, window_params = [{pipeline_mode = #tpu.pipeline_mode<synchronous>, transform_indices = @transform_0, window_bounds = array<i64: 8, 256>}, {pipeline_mode = #tpu.pipeline_mode<synchronous>, transform_indices = @transform_1, window_bounds = array<i64: 1, 256>}, {pipeline_mode = #tpu.pipeline_mode<synchronous>, transform_indices = @transform_2, window_bounds = array<i64: 1, 256>}, {pipeline_mode = #tpu.pipeline_mode<synchronous>, transform_indices = @transform_3, window_bounds = array<i64: 8, 256>}]} {
    %c0 = arith.constant 0 : index
    %c0_0 = arith.constant 0 : index
    %0 = vector.load %arg1[%c0, %c0_0] : memref<8x256xf32, #tpu.memory_space<vmem>>, vector<8x256xf32>
    %cst = arith.constant dense<0.000000e+00> : vector<256xf32>
    %1 = vector.multi_reduction <add>, %0, %cst [0] : vector<8x256xf32> to vector<256xf32>
    %2 = vector.shape_cast %1 : vector<256xf32> to vector<1x256xf32>
    %3 = arith.mulf %0, %0 : vector<8x256xf32>
    %cst_1 = arith.constant dense<0.000000e+00> : vector<256xf32>
    %4 = vector.multi_reduction <add>, %3, %cst_1 [0] : vector<8x256xf32> to vector<256xf32>
    %5 = vector.shape_cast %4 : vector<256xf32> to vector<1x256xf32>
    %cst_2 = arith.constant 1.250000e-01 : f32
    %6 = vector.broadcast %cst_2 : f32 to vector<1x256xf32>
    %7 = arith.mulf %2, %6 : vector<1x256xf32>
    %cst_3 = arith.constant 1.250000e-01 : f32
    %8 = vector.broadcast %cst_3 : f32 to vector<1x256xf32>
    %9 = arith.mulf %5, %8 : vector<1x256xf32>
    %10 = arith.mulf %7, %7 : vector<1x256xf32>
    %11 = arith.subf %9, %10 : vector<1x256xf32>
    %c0_4 = arith.constant 0 : index
    %c0_5 = arith.constant 0 : index
    %12 = vector.load %arg2[%c0_4, %c0_5] : memref<1x256xf32, #tpu.memory_space<vmem>>, vector<1x256xf32>
    %cst_6 = arith.constant 9.99999974E-6 : f32
    %13 = vector.broadcast %cst_6 : f32 to vector<1x256xf32>
    %14 = arith.addf %11, %13 : vector<1x256xf32>
    %15 = math.rsqrt %14 : vector<1x256xf32>
    %16 = arith.mulf %12, %15 : vector<1x256xf32>
    %c0_7 = arith.constant 0 : index
    %c0_8 = arith.constant 0 : index
    %17 = vector.load %arg3[%c0_7, %c0_8] : memref<1x256xf32, #tpu.memory_space<vmem>>, vector<1x256xf32>
    %18 = arith.mulf %7, %16 : vector<1x256xf32>
    %19 = arith.subf %17, %18 : vector<1x256xf32>
    %20 = vector.broadcast %16 : vector<1x256xf32> to vector<8x256xf32>
    %21 = arith.mulf %0, %20 : vector<8x256xf32>
    %22 = vector.broadcast %19 : vector<1x256xf32> to vector<8x256xf32>
    %23 = arith.addf %21, %22 : vector<8x256xf32>
    %cst_9 = arith.constant 0.000000e+00 : f32
    %24 = vector.broadcast %cst_9 : f32 to vector<8x256xf32>
    %25 = arith.maximumf %23, %24 : vector<8x256xf32>
    %c0_10 = arith.constant 0 : index
    %c0_11 = arith.constant 0 : index
    %26 = vector.load %arg4[%c0_10, %c0_11] : memref<8x256xf32, #tpu.memory_space<vmem>>, vector<8x256xf32>
    tpu.vector_store %arg4[%c0_10, %c0_11], %25 {strides = array<i32>} : memref<8x256xf32, #tpu.memory_space<vmem>>, vector<8x256xf32>,
    return
  }
  func.func @transform_0(%arg0: i32) -> (i32, i32) {
    %c0_i32 = arith.constant 0 : i32
    %c0_i32_0 = arith.constant 0 : i32
    %c0_i32_1 = arith.constant 0 : i32
    return %c0_i32, %c0_i32_0 : i32, i32
  }
  func.func @transform_1(%arg0: i32) -> (i32, i32) {
    %c0_i32 = arith.constant 0 : i32
    %c0_i32_0 = arith.constant 0 : i32
    %c0_i32_1 = arith.constant 0 : i32
    return %c0_i32, %c0_i32_0 : i32, i32
  }
  func.func @transform_2(%arg0: i32) -> (i32, i32) {
    %c0_i32 = arith.constant 0 : i32
    %c0_i32_0 = arith.constant 0 : i32
    %c0_i32_1 = arith.constant 0 : i32
    return %c0_i32, %c0_i32_0 : i32, i32
  }
  func.func @transform_3(%arg0: i32) -> (i32, i32) {
    %c0_i32 = arith.constant 0 : i32
    %c0_i32_0 = arith.constant 0 : i32
    %c0_i32_1 = arith.constant 0 : i32
    return %c0_i32, %c0_i32_0 : i32, i32
  }
}

module attributes {stable_mosaic.version = 11 : i64} {
  func.func @_matmul_kernel(%arg0: i32, %arg1: i32, %arg2: i32, %arg3: memref<8x384xbf16, #tpu.memory_space<vmem>>, %arg4: memref<384x256xbf16, #tpu.memory_space<vmem>>, %arg5: memref<8x256xf32, #tpu.memory_space<vmem>>) attributes {dimension_semantics = [#tpu.dimension_semantics<parallel>, #tpu.dimension_semantics<parallel>, #tpu.dimension_semantics<arbitrary>], iteration_bounds = array<i64: 1, 1, 6>, scalar_prefetch = 0 : i64, scratch_operands = 0 : i64, tpu.core_type = #tpu.core_type<tc>, window_params = [{transform_indices = @transform_0, window_bounds = array<i64: 8, 384>}, {transform_indices = @transform_1, window_bounds = array<i64: 384, 256>}, {transform_indices = @transform_2, window_bounds = array<i64: 8, 256>}]} {
    %c0_i32 = arith.constant 0 : i32
    %0 = arith.cmpi eq, %arg2, %c0_i32 : i32
    %1 = arith.extui %0 : i1 to i32
    %c0_i32_0 = arith.constant 0 : i32
    %2 = arith.cmpi ne, %1, %c0_i32_0 : i32
    scf.if %2 {
      %cst_8 = arith.constant 0.000000e+00 : f32
      %9 = vector.broadcast %cst_8 : f32 to vector<8x256xf32>
      %c0_9 = arith.constant 0 : index
      %c0_10 = arith.constant 0 : index
      %10 = vector.load %arg5[%c0_9, %c0_10] : memref<8x256xf32, #tpu.memory_space<vmem>>, vector<8x256xf32>
      tpu.vector_store %arg5[%c0_9, %c0_10], %9 {strides = array<i32>} : memref<8x256xf32, #tpu.memory_space<vmem>>, vector<8x256xf32>,
    } else {
    }
    %c0 = arith.constant 0 : index
    %c0_1 = arith.constant 0 : index
    %3 = vector.load %arg5[%c0, %c0_1] : memref<8x256xf32, #tpu.memory_space<vmem>>, vector<8x256xf32>
    %c0_2 = arith.constant 0 : index
    %c0_3 = arith.constant 0 : index
    %4 = vector.load %arg3[%c0_2, %c0_3] : memref<8x384xbf16, #tpu.memory_space<vmem>>, vector<8x384xbf16>
    %c0_4 = arith.constant 0 : index
    %c0_5 = arith.constant 0 : index
    %5 = vector.load %arg4[%c0_4, %c0_5] : memref<384x256xbf16, #tpu.memory_space<vmem>>, vector<384x256xbf16>
    %cst = arith.constant dense<0.000000e+00> : vector<8x256xf32>
    %6 = tpu.matmul %4, %5, %cst {dimension_numbers = #tpu.dot_dimension_numbers<[1], [0], [0], [1], [0, 0, 1, 1], [], []>} : vector<8x384xbf16>, vector<384x256xbf16>, vector<8x256xf32> -> vector<8x256xf32>
    %7 = arith.addf %3, %6 : vector<8x256xf32>
    %c0_6 = arith.constant 0 : index
    %c0_7 = arith.constant 0 : index
    %8 = vector.load %arg5[%c0_6, %c0_7] : memref<8x256xf32, #tpu.memory_space<vmem>>, vector<8x256xf32>
    tpu.vector_store %arg5[%c0_6, %c0_7], %7 {strides = array<i32>} : memref<8x256xf32, #tpu.memory_space<vmem>>, vector<8x256xf32>,
    return
  }
  func.func @transform_0(%arg0: i32, %arg1: i32, %arg2: i32) -> (i32, i32) {
    %c0_i32 = arith.constant 0 : i32
    return %arg0, %arg2 : i32, i32
  }
  func.func @transform_1(%arg0: i32, %arg1: i32, %arg2: i32) -> (i32, i32) {
    %c0_i32 = arith.constant 0 : i32
    return %arg2, %arg1 : i32, i32
  }
  func.func @transform_2(%arg0: i32, %arg1: i32, %arg2: i32) -> (i32, i32) {
    %c0_i32 = arith.constant 0 : i32
    return %arg0, %arg1 : i32, i32
  }
}

module attributes {stable_mosaic.version = 11 : i64} {
  func.func @_matmul_kernel(%arg0: i32, %arg1: i32, %arg2: i32, %arg3: memref<8x128xbf16, #tpu.memory_space<vmem>>, %arg4: memref<128x256xbf16, #tpu.memory_space<vmem>>, %arg5: memref<8x256xf32, #tpu.memory_space<vmem>>) attributes {dimension_semantics = [#tpu.dimension_semantics<parallel>, #tpu.dimension_semantics<parallel>, #tpu.dimension_semantics<arbitrary>], iteration_bounds = array<i64: 1, 1, 1>, scalar_prefetch = 0 : i64, scratch_operands = 0 : i64, tpu.core_type = #tpu.core_type<tc>, window_params = [{transform_indices = @transform_0, window_bounds = array<i64: 8, 128>}, {transform_indices = @transform_1, window_bounds = array<i64: 128, 256>}, {transform_indices = @transform_2, window_bounds = array<i64: 8, 256>}]} {
    %c0_i32 = arith.constant 0 : i32
    %0 = arith.cmpi eq, %arg2, %c0_i32 : i32
    %1 = arith.extui %0 : i1 to i32
    %c0_i32_0 = arith.constant 0 : i32
    %2 = arith.cmpi ne, %1, %c0_i32_0 : i32
    scf.if %2 {
      %cst_8 = arith.constant 0.000000e+00 : f32
      %9 = vector.broadcast %cst_8 : f32 to vector<8x256xf32>
      %c0_9 = arith.constant 0 : index
      %c0_10 = arith.constant 0 : index
      %10 = vector.load %arg5[%c0_9, %c0_10] : memref<8x256xf32, #tpu.memory_space<vmem>>, vector<8x256xf32>
      tpu.vector_store %arg5[%c0_9, %c0_10], %9 {strides = array<i32>} : memref<8x256xf32, #tpu.memory_space<vmem>>, vector<8x256xf32>,
    } else {
    }
    %c0 = arith.constant 0 : index
    %c0_1 = arith.constant 0 : index
    %3 = vector.load %arg5[%c0, %c0_1] : memref<8x256xf32, #tpu.memory_space<vmem>>, vector<8x256xf32>
    %c0_2 = arith.constant 0 : index
    %c0_3 = arith.constant 0 : index
    %4 = vector.load %arg3[%c0_2, %c0_3] : memref<8x128xbf16, #tpu.memory_space<vmem>>, vector<8x128xbf16>
    %c0_4 = arith.constant 0 : index
    %c0_5 = arith.constant 0 : index
    %5 = vector.load %arg4[%c0_4, %c0_5] : memref<128x256xbf16, #tpu.memory_space<vmem>>, vector<128x256xbf16>
    %cst = arith.constant dense<0.000000e+00> : vector<8x256xf32>
    %6 = tpu.matmul %4, %5, %cst {dimension_numbers = #tpu.dot_dimension_numbers<[1], [0], [0], [1], [0, 0, 1, 1], [], []>} : vector<8x128xbf16>, vector<128x256xbf16>, vector<8x256xf32> -> vector<8x256xf32>
    %7 = arith.addf %3, %6 : vector<8x256xf32>
    %c0_6 = arith.constant 0 : index
    %c0_7 = arith.constant 0 : index
    %8 = vector.load %arg5[%c0_6, %c0_7] : memref<8x256xf32, #tpu.memory_space<vmem>>, vector<8x256xf32>
    tpu.vector_store %arg5[%c0_6, %c0_7], %7 {strides = array<i32>} : memref<8x256xf32, #tpu.memory_space<vmem>>, vector<8x256xf32>,
    return
  }
  func.func @transform_0(%arg0: i32, %arg1: i32, %arg2: i32) -> (i32, i32) {
    %c0_i32 = arith.constant 0 : i32
    return %arg0, %arg2 : i32, i32
  }
  func.func @transform_1(%arg0: i32, %arg1: i32, %arg2: i32) -> (i32, i32) {
    %c0_i32 = arith.constant 0 : i32
    return %arg2, %arg1 : i32, i32
  }
  func.func @transform_2(%arg0: i32, %arg1: i32, %arg2: i32) -> (i32, i32) {
    %c0_i32 = arith.constant 0 : i32
    return %arg0, %arg1 : i32, i32
  }
}

module attributes {stable_mosaic.version = 11 : i64} {
  func.func @_bn_fused_kernel(%arg0: i32, %arg1: memref<8x256xf32, #tpu.memory_space<vmem>>, %arg2: memref<1x256xf32, #tpu.memory_space<vmem>>, %arg3: memref<1x256xf32, #tpu.memory_space<vmem>>, %arg4: memref<8x256xf32, #tpu.memory_space<vmem>>) attributes {dimension_semantics = [#tpu.dimension_semantics<arbitrary>], iteration_bounds = array<i64: 1>, scalar_prefetch = 0 : i64, scratch_operands = 0 : i64, tpu.core_type = #tpu.core_type<tc>, window_params = [{pipeline_mode = #tpu.pipeline_mode<synchronous>, transform_indices = @transform_0, window_bounds = array<i64: 8, 256>}, {pipeline_mode = #tpu.pipeline_mode<synchronous>, transform_indices = @transform_1, window_bounds = array<i64: 1, 256>}, {pipeline_mode = #tpu.pipeline_mode<synchronous>, transform_indices = @transform_2, window_bounds = array<i64: 1, 256>}, {pipeline_mode = #tpu.pipeline_mode<synchronous>, transform_indices = @transform_3, window_bounds = array<i64: 8, 256>}]} {
    %c0 = arith.constant 0 : index
    %c0_0 = arith.constant 0 : index
    %0 = vector.load %arg1[%c0, %c0_0] : memref<8x256xf32, #tpu.memory_space<vmem>>, vector<8x256xf32>
    %cst = arith.constant dense<0.000000e+00> : vector<256xf32>
    %1 = vector.multi_reduction <add>, %0, %cst [0] : vector<8x256xf32> to vector<256xf32>
    %2 = vector.shape_cast %1 : vector<256xf32> to vector<1x256xf32>
    %3 = arith.mulf %0, %0 : vector<8x256xf32>
    %cst_1 = arith.constant dense<0.000000e+00> : vector<256xf32>
    %4 = vector.multi_reduction <add>, %3, %cst_1 [0] : vector<8x256xf32> to vector<256xf32>
    %5 = vector.shape_cast %4 : vector<256xf32> to vector<1x256xf32>
    %cst_2 = arith.constant 1.250000e-01 : f32
    %6 = vector.broadcast %cst_2 : f32 to vector<1x256xf32>
    %7 = arith.mulf %2, %6 : vector<1x256xf32>
    %cst_3 = arith.constant 1.250000e-01 : f32
    %8 = vector.broadcast %cst_3 : f32 to vector<1x256xf32>
    %9 = arith.mulf %5, %8 : vector<1x256xf32>
    %10 = arith.mulf %7, %7 : vector<1x256xf32>
    %11 = arith.subf %9, %10 : vector<1x256xf32>
    %c0_4 = arith.constant 0 : index
    %c0_5 = arith.constant 0 : index
    %12 = vector.load %arg2[%c0_4, %c0_5] : memref<1x256xf32, #tpu.memory_space<vmem>>, vector<1x256xf32>
    %cst_6 = arith.constant 9.99999974E-6 : f32
    %13 = vector.broadcast %cst_6 : f32 to vector<1x256xf32>
    %14 = arith.addf %11, %13 : vector<1x256xf32>
    %15 = math.rsqrt %14 : vector<1x256xf32>
    %16 = arith.mulf %12, %15 : vector<1x256xf32>
    %c0_7 = arith.constant 0 : index
    %c0_8 = arith.constant 0 : index
    %17 = vector.load %arg3[%c0_7, %c0_8] : memref<1x256xf32, #tpu.memory_space<vmem>>, vector<1x256xf32>
    %18 = arith.mulf %7, %16 : vector<1x256xf32>
    %19 = arith.subf %17, %18 : vector<1x256xf32>
    %20 = vector.broadcast %16 : vector<1x256xf32> to vector<8x256xf32>
    %21 = arith.mulf %0, %20 : vector<8x256xf32>
    %22 = vector.broadcast %19 : vector<1x256xf32> to vector<8x256xf32>
    %23 = arith.addf %21, %22 : vector<8x256xf32>
    %c0_9 = arith.constant 0 : index
    %c0_10 = arith.constant 0 : index
    %24 = vector.load %arg4[%c0_9, %c0_10] : memref<8x256xf32, #tpu.memory_space<vmem>>, vector<8x256xf32>
    tpu.vector_store %arg4[%c0_9, %c0_10], %23 {strides = array<i32>} : memref<8x256xf32, #tpu.memory_space<vmem>>, vector<8x256xf32>,
    return
  }
  func.func @transform_0(%arg0: i32) -> (i32, i32) {
    %c0_i32 = arith.constant 0 : i32
    %c0_i32_0 = arith.constant 0 : i32
    %c0_i32_1 = arith.constant 0 : i32
    return %c0_i32, %c0_i32_0 : i32, i32
  }
  func.func @transform_1(%arg0: i32) -> (i32, i32) {
    %c0_i32 = arith.constant 0 : i32
    %c0_i32_0 = arith.constant 0 : i32
    %c0_i32_1 = arith.constant 0 : i32
    return %c0_i32, %c0_i32_0 : i32, i32
  }
  func.func @transform_2(%arg0: i32) -> (i32, i32) {
    %c0_i32 = arith.constant 0 : i32
    %c0_i32_0 = arith.constant 0 : i32
    %c0_i32_1 = arith.constant 0 : i32
    return %c0_i32, %c0_i32_0 : i32, i32
  }
  func.func @transform_3(%arg0: i32) -> (i32, i32) {
    %c0_i32 = arith.constant 0 : i32
    %c0_i32_0 = arith.constant 0 : i32
    %c0_i32_1 = arith.constant 0 : i32
    return %c0_i32, %c0_i32_0 : i32, i32
  }
}

module attributes {stable_mosaic.version = 11 : i64} {
  func.func @_bn_fused_kernel(%arg0: i32, %arg1: memref<8x256xf32, #tpu.memory_space<vmem>>, %arg2: memref<8x256xf32, #tpu.memory_space<vmem>>, %arg3: memref<1x256xf32, #tpu.memory_space<vmem>>, %arg4: memref<1x256xf32, #tpu.memory_space<vmem>>, %arg5: memref<8x256xf32, #tpu.memory_space<vmem>>) attributes {dimension_semantics = [#tpu.dimension_semantics<arbitrary>], iteration_bounds = array<i64: 1>, scalar_prefetch = 0 : i64, scratch_operands = 0 : i64, tpu.core_type = #tpu.core_type<tc>, window_params = [{pipeline_mode = #tpu.pipeline_mode<synchronous>, transform_indices = @transform_0, window_bounds = array<i64: 8, 256>}, {pipeline_mode = #tpu.pipeline_mode<synchronous>, transform_indices = @transform_1, window_bounds = array<i64: 8, 256>}, {pipeline_mode = #tpu.pipeline_mode<synchronous>, transform_indices = @transform_2, window_bounds = array<i64: 1, 256>}, {pipeline_mode = #tpu.pipeline_mode<synchronous>, transform_indices = @transform_3, window_bounds = array<i64: 1, 256>}, {pipeline_mode = #tpu.pipeline_mode<synchronous>, transform_indices = @transform_4, window_bounds = array<i64: 8, 256>}]} {
    %c0 = arith.constant 0 : index
    %c0_0 = arith.constant 0 : index
    %0 = vector.load %arg1[%c0, %c0_0] : memref<8x256xf32, #tpu.memory_space<vmem>>, vector<8x256xf32>
    %cst = arith.constant dense<0.000000e+00> : vector<256xf32>
    %1 = vector.multi_reduction <add>, %0, %cst [0] : vector<8x256xf32> to vector<256xf32>
    %2 = vector.shape_cast %1 : vector<256xf32> to vector<1x256xf32>
    %3 = arith.mulf %0, %0 : vector<8x256xf32>
    %cst_1 = arith.constant dense<0.000000e+00> : vector<256xf32>
    %4 = vector.multi_reduction <add>, %3, %cst_1 [0] : vector<8x256xf32> to vector<256xf32>
    %5 = vector.shape_cast %4 : vector<256xf32> to vector<1x256xf32>
    %cst_2 = arith.constant 1.250000e-01 : f32
    %6 = vector.broadcast %cst_2 : f32 to vector<1x256xf32>
    %7 = arith.mulf %2, %6 : vector<1x256xf32>
    %cst_3 = arith.constant 1.250000e-01 : f32
    %8 = vector.broadcast %cst_3 : f32 to vector<1x256xf32>
    %9 = arith.mulf %5, %8 : vector<1x256xf32>
    %10 = arith.mulf %7, %7 : vector<1x256xf32>
    %11 = arith.subf %9, %10 : vector<1x256xf32>
    %c0_4 = arith.constant 0 : index
    %c0_5 = arith.constant 0 : index
    %12 = vector.load %arg3[%c0_4, %c0_5] : memref<1x256xf32, #tpu.memory_space<vmem>>, vector<1x256xf32>
    %cst_6 = arith.constant 9.99999974E-6 : f32
    %13 = vector.broadcast %cst_6 : f32 to vector<1x256xf32>
    %14 = arith.addf %11, %13 : vector<1x256xf32>
    %15 = math.rsqrt %14 : vector<1x256xf32>
    %16 = arith.mulf %12, %15 : vector<1x256xf32>
    %c0_7 = arith.constant 0 : index
    %c0_8 = arith.constant 0 : index
    %17 = vector.load %arg4[%c0_7, %c0_8] : memref<1x256xf32, #tpu.memory_space<vmem>>, vector<1x256xf32>
    %18 = arith.mulf %7, %16 : vector<1x256xf32>
    %19 = arith.subf %17, %18 : vector<1x256xf32>
    %20 = vector.broadcast %16 : vector<1x256xf32> to vector<8x256xf32>
    %21 = arith.mulf %0, %20 : vector<8x256xf32>
    %22 = vector.broadcast %19 : vector<1x256xf32> to vector<8x256xf32>
    %23 = arith.addf %21, %22 : vector<8x256xf32>
    %c0_9 = arith.constant 0 : index
    %c0_10 = arith.constant 0 : index
    %24 = vector.load %arg2[%c0_9, %c0_10] : memref<8x256xf32, #tpu.memory_space<vmem>>, vector<8x256xf32>
    %25 = arith.addf %23, %24 : vector<8x256xf32>
    %cst_11 = arith.constant 0.000000e+00 : f32
    %26 = vector.broadcast %cst_11 : f32 to vector<8x256xf32>
    %27 = arith.maximumf %25, %26 : vector<8x256xf32>
    %c0_12 = arith.constant 0 : index
    %c0_13 = arith.constant 0 : index
    %28 = vector.load %arg5[%c0_12, %c0_13] : memref<8x256xf32, #tpu.memory_space<vmem>>, vector<8x256xf32>
    tpu.vector_store %arg5[%c0_12, %c0_13], %27 {strides = array<i32>} : memref<8x256xf32, #tpu.memory_space<vmem>>, vector<8x256xf32>,
    return
  }
  func.func @transform_0(%arg0: i32) -> (i32, i32) {
    %c0_i32 = arith.constant 0 : i32
    %c0_i32_0 = arith.constant 0 : i32
    %c0_i32_1 = arith.constant 0 : i32
    return %c0_i32, %c0_i32_0 : i32, i32
  }
  func.func @transform_1(%arg0: i32) -> (i32, i32) {
    %c0_i32 = arith.constant 0 : i32
    %c0_i32_0 = arith.constant 0 : i32
    %c0_i32_1 = arith.constant 0 : i32
    return %c0_i32, %c0_i32_0 : i32, i32
  }
  func.func @transform_2(%arg0: i32) -> (i32, i32) {
    %c0_i32 = arith.constant 0 : i32
    %c0_i32_0 = arith.constant 0 : i32
    %c0_i32_1 = arith.constant 0 : i32
    return %c0_i32, %c0_i32_0 : i32, i32
  }
  func.func @transform_3(%arg0: i32) -> (i32, i32) {
    %c0_i32 = arith.constant 0 : i32
    %c0_i32_0 = arith.constant 0 : i32
    %c0_i32_1 = arith.constant 0 : i32
    return %c0_i32, %c0_i32_0 : i32, i32
  }
  func.func @transform_4(%arg0: i32) -> (i32, i32) {
    %c0_i32 = arith.constant 0 : i32
    %c0_i32_0 = arith.constant 0 : i32
    %c0_i32_1 = arith.constant 0 : i32
    return %c0_i32, %c0_i32_0 : i32, i32
  }
}

module attributes {stable_mosaic.version = 11 : i64} {
  func.func @_bn_fused_kernel(%arg0: i32, %arg1: memref<2x512xf32, #tpu.memory_space<vmem>>, %arg2: memref<1x512xf32, #tpu.memory_space<vmem>>, %arg3: memref<1x512xf32, #tpu.memory_space<vmem>>, %arg4: memref<2x512xf32, #tpu.memory_space<vmem>>) attributes {dimension_semantics = [#tpu.dimension_semantics<arbitrary>], iteration_bounds = array<i64: 1>, scalar_prefetch = 0 : i64, scratch_operands = 0 : i64, tpu.core_type = #tpu.core_type<tc>, window_params = [{pipeline_mode = #tpu.pipeline_mode<synchronous>, transform_indices = @transform_0, window_bounds = array<i64: 2, 512>}, {pipeline_mode = #tpu.pipeline_mode<synchronous>, transform_indices = @transform_1, window_bounds = array<i64: 1, 512>}, {pipeline_mode = #tpu.pipeline_mode<synchronous>, transform_indices = @transform_2, window_bounds = array<i64: 1, 512>}, {pipeline_mode = #tpu.pipeline_mode<synchronous>, transform_indices = @transform_3, window_bounds = array<i64: 2, 512>}]} {
    %c0 = arith.constant 0 : index
    %c0_0 = arith.constant 0 : index
    %0 = vector.load %arg1[%c0, %c0_0] : memref<2x512xf32, #tpu.memory_space<vmem>>, vector<2x512xf32>
    %cst = arith.constant dense<0.000000e+00> : vector<512xf32>
    %1 = vector.multi_reduction <add>, %0, %cst [0] : vector<2x512xf32> to vector<512xf32>
    %2 = vector.shape_cast %1 : vector<512xf32> to vector<1x512xf32>
    %3 = arith.mulf %0, %0 : vector<2x512xf32>
    %cst_1 = arith.constant dense<0.000000e+00> : vector<512xf32>
    %4 = vector.multi_reduction <add>, %3, %cst_1 [0] : vector<2x512xf32> to vector<512xf32>
    %5 = vector.shape_cast %4 : vector<512xf32> to vector<1x512xf32>
    %cst_2 = arith.constant 5.000000e-01 : f32
    %6 = vector.broadcast %cst_2 : f32 to vector<1x512xf32>
    %7 = arith.mulf %2, %6 : vector<1x512xf32>
    %cst_3 = arith.constant 5.000000e-01 : f32
    %8 = vector.broadcast %cst_3 : f32 to vector<1x512xf32>
    %9 = arith.mulf %5, %8 : vector<1x512xf32>
    %10 = arith.mulf %7, %7 : vector<1x512xf32>
    %11 = arith.subf %9, %10 : vector<1x512xf32>
    %c0_4 = arith.constant 0 : index
    %c0_5 = arith.constant 0 : index
    %12 = vector.load %arg2[%c0_4, %c0_5] : memref<1x512xf32, #tpu.memory_space<vmem>>, vector<1x512xf32>
    %cst_6 = arith.constant 9.99999974E-6 : f32
    %13 = vector.broadcast %cst_6 : f32 to vector<1x512xf32>
    %14 = arith.addf %11, %13 : vector<1x512xf32>
    %15 = math.rsqrt %14 : vector<1x512xf32>
    %16 = arith.mulf %12, %15 : vector<1x512xf32>
    %c0_7 = arith.constant 0 : index
    %c0_8 = arith.constant 0 : index
    %17 = vector.load %arg3[%c0_7, %c0_8] : memref<1x512xf32, #tpu.memory_space<vmem>>, vector<1x512xf32>
    %18 = arith.mulf %7, %16 : vector<1x512xf32>
    %19 = arith.subf %17, %18 : vector<1x512xf32>
    %20 = vector.broadcast %16 : vector<1x512xf32> to vector<2x512xf32>
    %21 = arith.mulf %0, %20 : vector<2x512xf32>
    %22 = vector.broadcast %19 : vector<1x512xf32> to vector<2x512xf32>
    %23 = arith.addf %21, %22 : vector<2x512xf32>
    %cst_9 = arith.constant 0.000000e+00 : f32
    %24 = vector.broadcast %cst_9 : f32 to vector<2x512xf32>
    %25 = arith.maximumf %23, %24 : vector<2x512xf32>
    %c0_10 = arith.constant 0 : index
    %c0_11 = arith.constant 0 : index
    %26 = vector.load %arg4[%c0_10, %c0_11] : memref<2x512xf32, #tpu.memory_space<vmem>>, vector<2x512xf32>
    tpu.vector_store %arg4[%c0_10, %c0_11], %25 {strides = array<i32>} : memref<2x512xf32, #tpu.memory_space<vmem>>, vector<2x512xf32>,
    return
  }
  func.func @transform_0(%arg0: i32) -> (i32, i32) {
    %c0_i32 = arith.constant 0 : i32
    %c0_i32_0 = arith.constant 0 : i32
    %c0_i32_1 = arith.constant 0 : i32
    return %c0_i32, %c0_i32_0 : i32, i32
  }
  func.func @transform_1(%arg0: i32) -> (i32, i32) {
    %c0_i32 = arith.constant 0 : i32
    %c0_i32_0 = arith.constant 0 : i32
    %c0_i32_1 = arith.constant 0 : i32
    return %c0_i32, %c0_i32_0 : i32, i32
  }
  func.func @transform_2(%arg0: i32) -> (i32, i32) {
    %c0_i32 = arith.constant 0 : i32
    %c0_i32_0 = arith.constant 0 : i32
    %c0_i32_1 = arith.constant 0 : i32
    return %c0_i32, %c0_i32_0 : i32, i32
  }
  func.func @transform_3(%arg0: i32) -> (i32, i32) {
    %c0_i32 = arith.constant 0 : i32
    %c0_i32_0 = arith.constant 0 : i32
    %c0_i32_1 = arith.constant 0 : i32
    return %c0_i32, %c0_i32_0 : i32, i32
  }
}

module attributes {stable_mosaic.version = 11 : i64} {
  func.func @_matmul_kernel(%arg0: i32, %arg1: i32, %arg2: i32, %arg3: memref<2x384xbf16, #tpu.memory_space<vmem>>, %arg4: memref<384x256xbf16, #tpu.memory_space<vmem>>, %arg5: memref<2x256xf32, #tpu.memory_space<vmem>>) attributes {dimension_semantics = [#tpu.dimension_semantics<parallel>, #tpu.dimension_semantics<parallel>, #tpu.dimension_semantics<arbitrary>], iteration_bounds = array<i64: 1, 2, 6>, scalar_prefetch = 0 : i64, scratch_operands = 0 : i64, tpu.core_type = #tpu.core_type<tc>, window_params = [{transform_indices = @transform_0, window_bounds = array<i64: 2, 384>}, {transform_indices = @transform_1, window_bounds = array<i64: 384, 256>}, {transform_indices = @transform_2, window_bounds = array<i64: 2, 256>}]} {
    %c0_i32 = arith.constant 0 : i32
    %0 = arith.cmpi eq, %arg2, %c0_i32 : i32
    %1 = arith.extui %0 : i1 to i32
    %c0_i32_0 = arith.constant 0 : i32
    %2 = arith.cmpi ne, %1, %c0_i32_0 : i32
    scf.if %2 {
      %cst_8 = arith.constant 0.000000e+00 : f32
      %9 = vector.broadcast %cst_8 : f32 to vector<2x256xf32>
      %c0_9 = arith.constant 0 : index
      %c0_10 = arith.constant 0 : index
      %10 = vector.load %arg5[%c0_9, %c0_10] : memref<2x256xf32, #tpu.memory_space<vmem>>, vector<2x256xf32>
      tpu.vector_store %arg5[%c0_9, %c0_10], %9 {strides = array<i32>} : memref<2x256xf32, #tpu.memory_space<vmem>>, vector<2x256xf32>,
    } else {
    }
    %c0 = arith.constant 0 : index
    %c0_1 = arith.constant 0 : index
    %3 = vector.load %arg5[%c0, %c0_1] : memref<2x256xf32, #tpu.memory_space<vmem>>, vector<2x256xf32>
    %c0_2 = arith.constant 0 : index
    %c0_3 = arith.constant 0 : index
    %4 = vector.load %arg3[%c0_2, %c0_3] : memref<2x384xbf16, #tpu.memory_space<vmem>>, vector<2x384xbf16>
    %c0_4 = arith.constant 0 : index
    %c0_5 = arith.constant 0 : index
    %5 = vector.load %arg4[%c0_4, %c0_5] : memref<384x256xbf16, #tpu.memory_space<vmem>>, vector<384x256xbf16>
    %cst = arith.constant dense<0.000000e+00> : vector<2x256xf32>
    %6 = tpu.matmul %4, %5, %cst {dimension_numbers = #tpu.dot_dimension_numbers<[1], [0], [0], [1], [0, 0, 1, 1], [], []>} : vector<2x384xbf16>, vector<384x256xbf16>, vector<2x256xf32> -> vector<2x256xf32>
    %7 = arith.addf %3, %6 : vector<2x256xf32>
    %c0_6 = arith.constant 0 : index
    %c0_7 = arith.constant 0 : index
    %8 = vector.load %arg5[%c0_6, %c0_7] : memref<2x256xf32, #tpu.memory_space<vmem>>, vector<2x256xf32>
    tpu.vector_store %arg5[%c0_6, %c0_7], %7 {strides = array<i32>} : memref<2x256xf32, #tpu.memory_space<vmem>>, vector<2x256xf32>,
    return
  }
  func.func @transform_0(%arg0: i32, %arg1: i32, %arg2: i32) -> (i32, i32) {
    %c0_i32 = arith.constant 0 : i32
    return %arg0, %arg2 : i32, i32
  }
  func.func @transform_1(%arg0: i32, %arg1: i32, %arg2: i32) -> (i32, i32) {
    %c0_i32 = arith.constant 0 : i32
    return %arg2, %arg1 : i32, i32
  }
  func.func @transform_2(%arg0: i32, %arg1: i32, %arg2: i32) -> (i32, i32) {
    %c0_i32 = arith.constant 0 : i32
    return %arg0, %arg1 : i32, i32
  }
}

module attributes {stable_mosaic.version = 11 : i64} {
  func.func @_matmul_kernel(%arg0: i32, %arg1: i32, %arg2: i32, %arg3: memref<2x512xbf16, #tpu.memory_space<vmem>>, %arg4: memref<512x256xbf16, #tpu.memory_space<vmem>>, %arg5: memref<2x256xf32, #tpu.memory_space<vmem>>) attributes {dimension_semantics = [#tpu.dimension_semantics<parallel>, #tpu.dimension_semantics<parallel>, #tpu.dimension_semantics<arbitrary>], iteration_bounds = array<i64: 1, 2, 9>, scalar_prefetch = 0 : i64, scratch_operands = 0 : i64, tpu.core_type = #tpu.core_type<tc>, window_params = [{transform_indices = @transform_0, window_bounds = array<i64: 2, 512>}, {transform_indices = @transform_1, window_bounds = array<i64: 512, 256>}, {transform_indices = @transform_2, window_bounds = array<i64: 2, 256>}]} {
    %c0_i32 = arith.constant 0 : i32
    %0 = arith.cmpi eq, %arg2, %c0_i32 : i32
    %1 = arith.extui %0 : i1 to i32
    %c0_i32_0 = arith.constant 0 : i32
    %2 = arith.cmpi ne, %1, %c0_i32_0 : i32
    scf.if %2 {
      %cst_8 = arith.constant 0.000000e+00 : f32
      %9 = vector.broadcast %cst_8 : f32 to vector<2x256xf32>
      %c0_9 = arith.constant 0 : index
      %c0_10 = arith.constant 0 : index
      %10 = vector.load %arg5[%c0_9, %c0_10] : memref<2x256xf32, #tpu.memory_space<vmem>>, vector<2x256xf32>
      tpu.vector_store %arg5[%c0_9, %c0_10], %9 {strides = array<i32>} : memref<2x256xf32, #tpu.memory_space<vmem>>, vector<2x256xf32>,
    } else {
    }
    %c0 = arith.constant 0 : index
    %c0_1 = arith.constant 0 : index
    %3 = vector.load %arg5[%c0, %c0_1] : memref<2x256xf32, #tpu.memory_space<vmem>>, vector<2x256xf32>
    %c0_2 = arith.constant 0 : index
    %c0_3 = arith.constant 0 : index
    %4 = vector.load %arg3[%c0_2, %c0_3] : memref<2x512xbf16, #tpu.memory_space<vmem>>, vector<2x512xbf16>
    %c0_4 = arith.constant 0 : index
    %c0_5 = arith.constant 0 : index
    %5 = vector.load %arg4[%c0_4, %c0_5] : memref<512x256xbf16, #tpu.memory_space<vmem>>, vector<512x256xbf16>
    %cst = arith.constant dense<0.000000e+00> : vector<2x256xf32>
    %6 = tpu.matmul %4, %5, %cst {dimension_numbers = #tpu.dot_dimension_numbers<[1], [0], [0], [1], [0, 0, 1, 1], [], []>} : vector<2x512xbf16>, vector<512x256xbf16>, vector<2x256xf32> -> vector<2x256xf32>
    %7 = arith.addf %3, %6 : vector<2x256xf32>
    %c0_6 = arith.constant 0 : index
    %c0_7 = arith.constant 0 : index
    %8 = vector.load %arg5[%c0_6, %c0_7] : memref<2x256xf32, #tpu.memory_space<vmem>>, vector<2x256xf32>
    tpu.vector_store %arg5[%c0_6, %c0_7], %7 {strides = array<i32>} : memref<2x256xf32, #tpu.memory_space<vmem>>, vector<2x256xf32>,
    return
  }
  func.func @transform_0(%arg0: i32, %arg1: i32, %arg2: i32) -> (i32, i32) {
    %c0_i32 = arith.constant 0 : i32
    return %arg0, %arg2 : i32, i32
  }
  func.func @transform_1(%arg0: i32, %arg1: i32, %arg2: i32) -> (i32, i32) {
    %c0_i32 = arith.constant 0 : i32
    return %arg2, %arg1 : i32, i32
  }
  func.func @transform_2(%arg0: i32, %arg1: i32, %arg2: i32) -> (i32, i32) {
    %c0_i32 = arith.constant 0 : i32
    return %arg0, %arg1 : i32, i32
  }
}

module attributes {stable_mosaic.version = 11 : i64} {
  func.func @_matmul_kernel(%arg0: i32, %arg1: i32, %arg2: i32, %arg3: memref<2x256xbf16, #tpu.memory_space<vmem>>, %arg4: memref<256x256xbf16, #tpu.memory_space<vmem>>, %arg5: memref<2x256xf32, #tpu.memory_space<vmem>>) attributes {dimension_semantics = [#tpu.dimension_semantics<parallel>, #tpu.dimension_semantics<parallel>, #tpu.dimension_semantics<arbitrary>], iteration_bounds = array<i64: 1, 2, 1>, scalar_prefetch = 0 : i64, scratch_operands = 0 : i64, tpu.core_type = #tpu.core_type<tc>, window_params = [{transform_indices = @transform_0, window_bounds = array<i64: 2, 256>}, {transform_indices = @transform_1, window_bounds = array<i64: 256, 256>}, {transform_indices = @transform_2, window_bounds = array<i64: 2, 256>}]} {
    %c0_i32 = arith.constant 0 : i32
    %0 = arith.cmpi eq, %arg2, %c0_i32 : i32
    %1 = arith.extui %0 : i1 to i32
    %c0_i32_0 = arith.constant 0 : i32
    %2 = arith.cmpi ne, %1, %c0_i32_0 : i32
    scf.if %2 {
      %cst_8 = arith.constant 0.000000e+00 : f32
      %9 = vector.broadcast %cst_8 : f32 to vector<2x256xf32>
      %c0_9 = arith.constant 0 : index
      %c0_10 = arith.constant 0 : index
      %10 = vector.load %arg5[%c0_9, %c0_10] : memref<2x256xf32, #tpu.memory_space<vmem>>, vector<2x256xf32>
      tpu.vector_store %arg5[%c0_9, %c0_10], %9 {strides = array<i32>} : memref<2x256xf32, #tpu.memory_space<vmem>>, vector<2x256xf32>,
    } else {
    }
    %c0 = arith.constant 0 : index
    %c0_1 = arith.constant 0 : index
    %3 = vector.load %arg5[%c0, %c0_1] : memref<2x256xf32, #tpu.memory_space<vmem>>, vector<2x256xf32>
    %c0_2 = arith.constant 0 : index
    %c0_3 = arith.constant 0 : index
    %4 = vector.load %arg3[%c0_2, %c0_3] : memref<2x256xbf16, #tpu.memory_space<vmem>>, vector<2x256xbf16>
    %c0_4 = arith.constant 0 : index
    %c0_5 = arith.constant 0 : index
    %5 = vector.load %arg4[%c0_4, %c0_5] : memref<256x256xbf16, #tpu.memory_space<vmem>>, vector<256x256xbf16>
    %cst = arith.constant dense<0.000000e+00> : vector<2x256xf32>
    %6 = tpu.matmul %4, %5, %cst {dimension_numbers = #tpu.dot_dimension_numbers<[1], [0], [0], [1], [0, 0, 1, 1], [], []>} : vector<2x256xbf16>, vector<256x256xbf16>, vector<2x256xf32> -> vector<2x256xf32>
    %7 = arith.addf %3, %6 : vector<2x256xf32>
    %c0_6 = arith.constant 0 : index
    %c0_7 = arith.constant 0 : index
    %8 = vector.load %arg5[%c0_6, %c0_7] : memref<2x256xf32, #tpu.memory_space<vmem>>, vector<2x256xf32>
    tpu.vector_store %arg5[%c0_6, %c0_7], %7 {strides = array<i32>} : memref<2x256xf32, #tpu.memory_space<vmem>>, vector<2x256xf32>,
    return
  }
  func.func @transform_0(%arg0: i32, %arg1: i32, %arg2: i32) -> (i32, i32) {
    %c0_i32 = arith.constant 0 : i32
    return %arg0, %arg2 : i32, i32
  }
  func.func @transform_1(%arg0: i32, %arg1: i32, %arg2: i32) -> (i32, i32) {
    %c0_i32 = arith.constant 0 : i32
    return %arg2, %arg1 : i32, i32
  }
  func.func @transform_2(%arg0: i32, %arg1: i32, %arg2: i32) -> (i32, i32) {
    %c0_i32 = arith.constant 0 : i32
    return %arg0, %arg1 : i32, i32
  }
}

module attributes {stable_mosaic.version = 11 : i64} {
  func.func @_bn_fused_kernel(%arg0: i32, %arg1: memref<2x512xf32, #tpu.memory_space<vmem>>, %arg2: memref<1x512xf32, #tpu.memory_space<vmem>>, %arg3: memref<1x512xf32, #tpu.memory_space<vmem>>, %arg4: memref<2x512xf32, #tpu.memory_space<vmem>>) attributes {dimension_semantics = [#tpu.dimension_semantics<arbitrary>], iteration_bounds = array<i64: 1>, scalar_prefetch = 0 : i64, scratch_operands = 0 : i64, tpu.core_type = #tpu.core_type<tc>, window_params = [{pipeline_mode = #tpu.pipeline_mode<synchronous>, transform_indices = @transform_0, window_bounds = array<i64: 2, 512>}, {pipeline_mode = #tpu.pipeline_mode<synchronous>, transform_indices = @transform_1, window_bounds = array<i64: 1, 512>}, {pipeline_mode = #tpu.pipeline_mode<synchronous>, transform_indices = @transform_2, window_bounds = array<i64: 1, 512>}, {pipeline_mode = #tpu.pipeline_mode<synchronous>, transform_indices = @transform_3, window_bounds = array<i64: 2, 512>}]} {
    %c0 = arith.constant 0 : index
    %c0_0 = arith.constant 0 : index
    %0 = vector.load %arg1[%c0, %c0_0] : memref<2x512xf32, #tpu.memory_space<vmem>>, vector<2x512xf32>
    %cst = arith.constant dense<0.000000e+00> : vector<512xf32>
    %1 = vector.multi_reduction <add>, %0, %cst [0] : vector<2x512xf32> to vector<512xf32>
    %2 = vector.shape_cast %1 : vector<512xf32> to vector<1x512xf32>
    %3 = arith.mulf %0, %0 : vector<2x512xf32>
    %cst_1 = arith.constant dense<0.000000e+00> : vector<512xf32>
    %4 = vector.multi_reduction <add>, %3, %cst_1 [0] : vector<2x512xf32> to vector<512xf32>
    %5 = vector.shape_cast %4 : vector<512xf32> to vector<1x512xf32>
    %cst_2 = arith.constant 5.000000e-01 : f32
    %6 = vector.broadcast %cst_2 : f32 to vector<1x512xf32>
    %7 = arith.mulf %2, %6 : vector<1x512xf32>
    %cst_3 = arith.constant 5.000000e-01 : f32
    %8 = vector.broadcast %cst_3 : f32 to vector<1x512xf32>
    %9 = arith.mulf %5, %8 : vector<1x512xf32>
    %10 = arith.mulf %7, %7 : vector<1x512xf32>
    %11 = arith.subf %9, %10 : vector<1x512xf32>
    %c0_4 = arith.constant 0 : index
    %c0_5 = arith.constant 0 : index
    %12 = vector.load %arg2[%c0_4, %c0_5] : memref<1x512xf32, #tpu.memory_space<vmem>>, vector<1x512xf32>
    %cst_6 = arith.constant 9.99999974E-6 : f32
    %13 = vector.broadcast %cst_6 : f32 to vector<1x512xf32>
    %14 = arith.addf %11, %13 : vector<1x512xf32>
    %15 = math.rsqrt %14 : vector<1x512xf32>
    %16 = arith.mulf %12, %15 : vector<1x512xf32>
    %c0_7 = arith.constant 0 : index
    %c0_8 = arith.constant 0 : index
    %17 = vector.load %arg3[%c0_7, %c0_8] : memref<1x512xf32, #tpu.memory_space<vmem>>, vector<1x512xf32>
    %18 = arith.mulf %7, %16 : vector<1x512xf32>
    %19 = arith.subf %17, %18 : vector<1x512xf32>
    %20 = vector.broadcast %16 : vector<1x512xf32> to vector<2x512xf32>
    %21 = arith.mulf %0, %20 : vector<2x512xf32>
    %22 = vector.broadcast %19 : vector<1x512xf32> to vector<2x512xf32>
    %23 = arith.addf %21, %22 : vector<2x512xf32>
    %c0_9 = arith.constant 0 : index
    %c0_10 = arith.constant 0 : index
    %24 = vector.load %arg4[%c0_9, %c0_10] : memref<2x512xf32, #tpu.memory_space<vmem>>, vector<2x512xf32>
    tpu.vector_store %arg4[%c0_9, %c0_10], %23 {strides = array<i32>} : memref<2x512xf32, #tpu.memory_space<vmem>>, vector<2x512xf32>,
    return
  }
  func.func @transform_0(%arg0: i32) -> (i32, i32) {
    %c0_i32 = arith.constant 0 : i32
    %c0_i32_0 = arith.constant 0 : i32
    %c0_i32_1 = arith.constant 0 : i32
    return %c0_i32, %c0_i32_0 : i32, i32
  }
  func.func @transform_1(%arg0: i32) -> (i32, i32) {
    %c0_i32 = arith.constant 0 : i32
    %c0_i32_0 = arith.constant 0 : i32
    %c0_i32_1 = arith.constant 0 : i32
    return %c0_i32, %c0_i32_0 : i32, i32
  }
  func.func @transform_2(%arg0: i32) -> (i32, i32) {
    %c0_i32 = arith.constant 0 : i32
    %c0_i32_0 = arith.constant 0 : i32
    %c0_i32_1 = arith.constant 0 : i32
    return %c0_i32, %c0_i32_0 : i32, i32
  }
  func.func @transform_3(%arg0: i32) -> (i32, i32) {
    %c0_i32 = arith.constant 0 : i32
    %c0_i32_0 = arith.constant 0 : i32
    %c0_i32_1 = arith.constant 0 : i32
    return %c0_i32, %c0_i32_0 : i32, i32
  }
}

module attributes {stable_mosaic.version = 11 : i64} {
  func.func @_bn_fused_kernel(%arg0: i32, %arg1: memref<2x512xf32, #tpu.memory_space<vmem>>, %arg2: memref<2x512xf32, #tpu.memory_space<vmem>>, %arg3: memref<1x512xf32, #tpu.memory_space<vmem>>, %arg4: memref<1x512xf32, #tpu.memory_space<vmem>>, %arg5: memref<2x512xf32, #tpu.memory_space<vmem>>) attributes {dimension_semantics = [#tpu.dimension_semantics<arbitrary>], iteration_bounds = array<i64: 1>, scalar_prefetch = 0 : i64, scratch_operands = 0 : i64, tpu.core_type = #tpu.core_type<tc>, window_params = [{pipeline_mode = #tpu.pipeline_mode<synchronous>, transform_indices = @transform_0, window_bounds = array<i64: 2, 512>}, {pipeline_mode = #tpu.pipeline_mode<synchronous>, transform_indices = @transform_1, window_bounds = array<i64: 2, 512>}, {pipeline_mode = #tpu.pipeline_mode<synchronous>, transform_indices = @transform_2, window_bounds = array<i64: 1, 512>}, {pipeline_mode = #tpu.pipeline_mode<synchronous>, transform_indices = @transform_3, window_bounds = array<i64: 1, 512>}, {pipeline_mode = #tpu.pipeline_mode<synchronous>, transform_indices = @transform_4, window_bounds = array<i64: 2, 512>}]} {
    %c0 = arith.constant 0 : index
    %c0_0 = arith.constant 0 : index
    %0 = vector.load %arg1[%c0, %c0_0] : memref<2x512xf32, #tpu.memory_space<vmem>>, vector<2x512xf32>
    %cst = arith.constant dense<0.000000e+00> : vector<512xf32>
    %1 = vector.multi_reduction <add>, %0, %cst [0] : vector<2x512xf32> to vector<512xf32>
    %2 = vector.shape_cast %1 : vector<512xf32> to vector<1x512xf32>
    %3 = arith.mulf %0, %0 : vector<2x512xf32>
    %cst_1 = arith.constant dense<0.000000e+00> : vector<512xf32>
    %4 = vector.multi_reduction <add>, %3, %cst_1 [0] : vector<2x512xf32> to vector<512xf32>
    %5 = vector.shape_cast %4 : vector<512xf32> to vector<1x512xf32>
    %cst_2 = arith.constant 5.000000e-01 : f32
    %6 = vector.broadcast %cst_2 : f32 to vector<1x512xf32>
    %7 = arith.mulf %2, %6 : vector<1x512xf32>
    %cst_3 = arith.constant 5.000000e-01 : f32
    %8 = vector.broadcast %cst_3 : f32 to vector<1x512xf32>
    %9 = arith.mulf %5, %8 : vector<1x512xf32>
    %10 = arith.mulf %7, %7 : vector<1x512xf32>
    %11 = arith.subf %9, %10 : vector<1x512xf32>
    %c0_4 = arith.constant 0 : index
    %c0_5 = arith.constant 0 : index
    %12 = vector.load %arg3[%c0_4, %c0_5] : memref<1x512xf32, #tpu.memory_space<vmem>>, vector<1x512xf32>
    %cst_6 = arith.constant 9.99999974E-6 : f32
    %13 = vector.broadcast %cst_6 : f32 to vector<1x512xf32>
    %14 = arith.addf %11, %13 : vector<1x512xf32>
    %15 = math.rsqrt %14 : vector<1x512xf32>
    %16 = arith.mulf %12, %15 : vector<1x512xf32>
    %c0_7 = arith.constant 0 : index
    %c0_8 = arith.constant 0 : index
    %17 = vector.load %arg4[%c0_7, %c0_8] : memref<1x512xf32, #tpu.memory_space<vmem>>, vector<1x512xf32>
    %18 = arith.mulf %7, %16 : vector<1x512xf32>
    %19 = arith.subf %17, %18 : vector<1x512xf32>
    %20 = vector.broadcast %16 : vector<1x512xf32> to vector<2x512xf32>
    %21 = arith.mulf %0, %20 : vector<2x512xf32>
    %22 = vector.broadcast %19 : vector<1x512xf32> to vector<2x512xf32>
    %23 = arith.addf %21, %22 : vector<2x512xf32>
    %c0_9 = arith.constant 0 : index
    %c0_10 = arith.constant 0 : index
    %24 = vector.load %arg2[%c0_9, %c0_10] : memref<2x512xf32, #tpu.memory_space<vmem>>, vector<2x512xf32>
    %25 = arith.addf %23, %24 : vector<2x512xf32>
    %cst_11 = arith.constant 0.000000e+00 : f32
    %26 = vector.broadcast %cst_11 : f32 to vector<2x512xf32>
    %27 = arith.maximumf %25, %26 : vector<2x512xf32>
    %c0_12 = arith.constant 0 : index
    %c0_13 = arith.constant 0 : index
    %28 = vector.load %arg5[%c0_12, %c0_13] : memref<2x512xf32, #tpu.memory_space<vmem>>, vector<2x512xf32>
    tpu.vector_store %arg5[%c0_12, %c0_13], %27 {strides = array<i32>} : memref<2x512xf32, #tpu.memory_space<vmem>>, vector<2x512xf32>,
    return
  }
  func.func @transform_0(%arg0: i32) -> (i32, i32) {
    %c0_i32 = arith.constant 0 : i32
    %c0_i32_0 = arith.constant 0 : i32
    %c0_i32_1 = arith.constant 0 : i32
    return %c0_i32, %c0_i32_0 : i32, i32
  }
  func.func @transform_1(%arg0: i32) -> (i32, i32) {
    %c0_i32 = arith.constant 0 : i32
    %c0_i32_0 = arith.constant 0 : i32
    %c0_i32_1 = arith.constant 0 : i32
    return %c0_i32, %c0_i32_0 : i32, i32
  }
  func.func @transform_2(%arg0: i32) -> (i32, i32) {
    %c0_i32 = arith.constant 0 : i32
    %c0_i32_0 = arith.constant 0 : i32
    %c0_i32_1 = arith.constant 0 : i32
    return %c0_i32, %c0_i32_0 : i32, i32
  }
  func.func @transform_3(%arg0: i32) -> (i32, i32) {
    %c0_i32 = arith.constant 0 : i32
    %c0_i32_0 = arith.constant 0 : i32
    %c0_i32_1 = arith.constant 0 : i32
    return %c0_i32, %c0_i32_0 : i32, i32
  }
  func.func @transform_4(%arg0: i32) -> (i32, i32) {
    %c0_i32 = arith.constant 0 : i32
    %c0_i32_0 = arith.constant 0 : i32
    %c0_i32_1 = arith.constant 0 : i32
    return %c0_i32, %c0_i32_0 : i32, i32
  }
}

module attributes {stable_mosaic.version = 11 : i64} {
  func.func @_matmul_kernel(%arg0: i32, %arg1: i32, %arg2: i32, %arg3: memref<2x513xbf16, #tpu.memory_space<vmem>>, %arg4: memref<513x10xbf16, #tpu.memory_space<vmem>>, %arg5: memref<2x10xf32, #tpu.memory_space<vmem>>) attributes {dimension_semantics = [#tpu.dimension_semantics<parallel>, #tpu.dimension_semantics<parallel>, #tpu.dimension_semantics<arbitrary>], iteration_bounds = array<i64: 1, 1, 1>, scalar_prefetch = 0 : i64, scratch_operands = 0 : i64, tpu.core_type = #tpu.core_type<tc>, window_params = [{transform_indices = @transform_0, window_bounds = array<i64: 2, 513>}, {transform_indices = @transform_1, window_bounds = array<i64: 513, 10>}, {transform_indices = @transform_2, window_bounds = array<i64: 2, 10>}]} {
    %c0_i32 = arith.constant 0 : i32
    %0 = arith.cmpi eq, %arg2, %c0_i32 : i32
    %1 = arith.extui %0 : i1 to i32
    %c0_i32_0 = arith.constant 0 : i32
    %2 = arith.cmpi ne, %1, %c0_i32_0 : i32
    scf.if %2 {
      %cst_8 = arith.constant 0.000000e+00 : f32
      %9 = vector.broadcast %cst_8 : f32 to vector<2x10xf32>
      %c0_9 = arith.constant 0 : index
      %c0_10 = arith.constant 0 : index
      %10 = vector.load %arg5[%c0_9, %c0_10] : memref<2x10xf32, #tpu.memory_space<vmem>>, vector<2x10xf32>
      tpu.vector_store %arg5[%c0_9, %c0_10], %9 {strides = array<i32>} : memref<2x10xf32, #tpu.memory_space<vmem>>, vector<2x10xf32>,
    } else {
    }
    %c0 = arith.constant 0 : index
    %c0_1 = arith.constant 0 : index
    %3 = vector.load %arg5[%c0, %c0_1] : memref<2x10xf32, #tpu.memory_space<vmem>>, vector<2x10xf32>
    %c0_2 = arith.constant 0 : index
    %c0_3 = arith.constant 0 : index
    %4 = vector.load %arg3[%c0_2, %c0_3] : memref<2x513xbf16, #tpu.memory_space<vmem>>, vector<2x513xbf16>
    %c0_4 = arith.constant 0 : index
    %c0_5 = arith.constant 0 : index
    %5 = vector.load %arg4[%c0_4, %c0_5] : memref<513x10xbf16, #tpu.memory_space<vmem>>, vector<513x10xbf16>
    %cst = arith.constant dense<0.000000e+00> : vector<2x10xf32>
    %6 = tpu.matmul %4, %5, %cst {dimension_numbers = #tpu.dot_dimension_numbers<[1], [0], [0], [1], [0, 0, 1, 1], [], []>} : vector<2x513xbf16>, vector<513x10xbf16>, vector<2x10xf32> -> vector<2x10xf32>
    %7 = arith.addf %3, %6 : vector<2x10xf32>
    %c0_6 = arith.constant 0 : index
    %c0_7 = arith.constant 0 : index
    %8 = vector.load %arg5[%c0_6, %c0_7] : memref<2x10xf32, #tpu.memory_space<vmem>>, vector<2x10xf32>
    tpu.vector_store %arg5[%c0_6, %c0_7], %7 {strides = array<i32>} : memref<2x10xf32, #tpu.memory_space<vmem>>, vector<2x10xf32>,
    return
  }
  func.func @transform_0(%arg0: i32, %arg1: i32, %arg2: i32) -> (i32, i32) {
    %c0_i32 = arith.constant 0 : i32
    return %arg0, %arg2 : i32, i32
  }
  func.func @transform_1(%arg0: i32, %arg1: i32, %arg2: i32) -> (i32, i32) {
    %c0_i32 = arith.constant 0 : i32
    return %arg2, %arg1 : i32, i32
  }
  func.func @transform_2(%arg0: i32, %arg1: i32, %arg2: i32) -> (i32, i32) {
    %c0_i32 = arith.constant 0 : i32
    return %arg0, %arg1 : i32, i32
  }
}

</mosaic_0001>

<bundles_post_ra>
// kernel: _lambda_.42
= control target key start
LH: loop header
LB: loop body
LE: loop exit
PB: predicated region body
PF: predicated region fallthrough
CT: control target
= control target key end

     0   :  { %vm181_vm0 = vcmask 523264   ;;  %s784_s0 = inlined_call_operand.vmem [shape: f32[256,128], index: 0, kind: input, shape index: {}]   ;;  %s785_s1 = inlined_call_operand.vmem [shape: f32[1,64], index: 1, kind: input, shape index: {}]   ;;  %s786_s2 = inlined_call_operand.vmem [shape: f32[1,64], index: 2, kind: input, shape index: {}]   ;;  %s787_s3 = inlined_call_operand.vmem [shape: f32[256,128], index: 3, kind: output, shape index: {}]  }
   0x1   :  { %v359_v0 = vld [vmem:[%s784_s0] sm:$0xff]  ;;  %v364_v1 = vld [vmem:[%s784_s0 + $0x8] sm:$0xff]  ;;  %v369_v2 = vld [vmem:[%s784_s0 + $0x10] sm:$0xff] }
   0x2   :  { %v46_v3 = vadd.f32 %v364_v1, %v359_v0  ;;  %v83_v4 = vmul.f32 %v359_v0, %v359_v0  ;;  %v84_v5 = vmul.f32 %v364_v1, %v364_v1  ;;  %v380_v6 = vld [vmem:[%s784_s0 + $0x18] sm:$0xff]  ;;  %v85_v7 = vmul.f32 %v369_v2, %v369_v2  ;;  %v388_v9 = vld [vmem:[%s784_s0 + $0x20] sm:$0xff]  ;;  %v396_v13 = vld [vmem:[%s784_s0 + $0x28] sm:$0xff] }
   0x3   :  { %v86_v10 = vmul.f32 %v380_v6, %v380_v6  ;;  %v87_v14 = vmul.f32 %v388_v9, %v388_v9  ;;  %v404_v17 = vld [vmem:[%s784_s0 + $0x30] sm:$0xff]  ;;  %v88_v18 = vmul.f32 %v396_v13, %v396_v13  ;;  %v412_v21 = vld [vmem:[%s784_s0 + $0x38] sm:$0xff]  ;;  %v420_v25 = vld [vmem:[%s784_s0 + $0x40] sm:$0xff] }
   0x4   :  { %v47_v8 = vadd.f32 %v46_v3, %v369_v2  ;;  %v115_v11 = vadd.f32 %v84_v5, %v83_v4  ;;  %v89_v22 = vmul.f32 %v404_v17, %v404_v17  ;;  %v90_v26 = vmul.f32 %v412_v21, %v412_v21  ;;  %v428_v29 = vld [vmem:[%s784_s0 + $0x48] sm:$0xff]  ;;  %v436_v33 = vld [vmem:[%s784_s0 + $0x50] sm:$0xff]  ;;  %v444_v37 = vld [vmem:[%s784_s0 + $0x58] sm:$0xff] }
   0x5   :  { %v91_v30 = vmul.f32 %v420_v25, %v420_v25  ;;  %v92_v34 = vmul.f32 %v428_v29, %v428_v29  ;;  %v93_v38 = vmul.f32 %v436_v33, %v436_v33  ;;  %v452_v41 = vld [vmem:[%s784_s0 + $0x60] sm:$0xff]  ;;  %v94_v42 = vmul.f32 %v444_v37, %v444_v37  ;;  %v460_v45 = vld [vmem:[%s784_s0 + $0x68] sm:$0xff]  ;;  %v468_v49 = vld [vmem:[%s784_s0 + $0x70] sm:$0xff] }
   0x6   :  { %v48_v12 = vadd.f32 %v47_v8, %v380_v6  ;;  %v116_v15 = vadd.f32 %v115_v11, %v85_v7  ;;  %v95_v46 = vmul.f32 %v452_v41, %v452_v41  ;;  %v96_v50 = vmul.f32 %v460_v45, %v460_v45  ;;  %v476_v53 = vld [vmem:[%s784_s0 + $0x78] sm:$0xff]  ;;  %v484_v57 = vld [vmem:[%s784_s0 + $0x80] sm:$0xff]  ;;  %v492_v61 = vld [vmem:[%s784_s0 + $0x88] sm:$0xff] }
   0x7   :  { %v97_v54 = vmul.f32 %v468_v49, %v468_v49  ;;  %v98_v58 = vmul.f32 %v476_v53, %v476_v53  ;;  %v99_v62 = vmul.f32 %v484_v57, %v484_v57  ;;  %v500_v4 = vld [vmem:[%s784_s0 + $0x90] sm:$0xff]  ;;  %v100_v5 = vmul.f32 %v492_v61, %v492_v61 }
   0x8   :  { %v49_v16 = vadd.f32 %v48_v12, %v388_v9  ;;  %v117_v19 = vadd.f32 %v116_v15, %v86_v10  ;;  %v508_v10 = vld [vmem:[%s784_s0 + $0x98] sm:$0xff]  ;;  %v101_v11 = vmul.f32 %v500_v4, %v500_v4  ;;  %v516_v15 = vld [vmem:[%s784_s0 + $0xa0] sm:$0xff] }
   0xa   :  { %v50_v20 = vadd.f32 %v49_v16, %v396_v13  ;;  %v118_v23 = vadd.f32 %v117_v19, %v87_v14  ;;  %v102_v16 = vmul.f32 %v508_v10, %v508_v10 }
   0xc   :  { %v51_v24 = vadd.f32 %v50_v20, %v404_v17  ;;  %v119_v27 = vadd.f32 %v118_v23, %v88_v18  ;;  %v524_v20 = vld [vmem:[%s784_s0 + $0xa8] sm:$0xff] }
   0xe   :  { %v52_v28 = vadd.f32 %v51_v24, %v412_v21  ;;  %v120_v31 = vadd.f32 %v119_v27, %v89_v22  ;;  %v103_v22 = vmul.f32 %v516_v15, %v516_v15  ;;  %v104_v27 = vmul.f32 %v524_v20, %v524_v20 }
  0x10   :  { %v53_v32 = vadd.f32 %v52_v28, %v420_v25  ;;  %v121_v35 = vadd.f32 %v120_v31, %v90_v26  ;;  %v532_v26 = vld [vmem:[%s784_s0 + $0xb0] sm:$0xff]  ;;  %v540_v31 = vld [vmem:[%s784_s0 + $0xb8] sm:$0xff] }
  0x12   :  { %v54_v36 = vadd.f32 %v53_v32, %v428_v29  ;;  %v122_v39 = vadd.f32 %v121_v35, %v91_v30  ;;  %v105_v32 = vmul.f32 %v532_v26, %v532_v26 }
  0x14   :  { %v55_v40 = vadd.f32 %v54_v36, %v436_v33  ;;  %v123_v43 = vadd.f32 %v122_v39, %v92_v34  ;;  %v548_v36 = vld [vmem:[%s784_s0 + $0xc0] sm:$0xff] }
  0x16   :  { %v56_v44 = vadd.f32 %v55_v40, %v444_v37  ;;  %v124_v47 = vadd.f32 %v123_v43, %v93_v38  ;;  %v106_v38 = vmul.f32 %v540_v31, %v540_v31  ;;  %v107_v43 = vmul.f32 %v548_v36, %v548_v36 }
  0x18   :  { %v57_v48 = vadd.f32 %v56_v44, %v452_v41  ;;  %v125_v51 = vadd.f32 %v124_v47, %v94_v42  ;;  %v556_v42 = vld [vmem:[%s784_s0 + $0xc8] sm:$0xff]  ;;  %v564_v47 = vld [vmem:[%s784_s0 + $0xd0] sm:$0xff] }
  0x1a   :  { %v58_v52 = vadd.f32 %v57_v48, %v460_v45  ;;  %v126_v55 = vadd.f32 %v125_v51, %v95_v46  ;;  %v108_v48 = vmul.f32 %v556_v42, %v556_v42 }
  0x1c   :  { %v59_v56 = vadd.f32 %v58_v52, %v468_v49  ;;  %v127_v59 = vadd.f32 %v126_v55, %v96_v50  ;;  %v572_v52 = vld [vmem:[%s784_s0 + $0xd8] sm:$0xff] }
  0x1e   :  { %v60_v60 = vadd.f32 %v59_v56, %v476_v53  ;;  %v128_v63 = vadd.f32 %v127_v59, %v97_v54  ;;  %v109_v54 = vmul.f32 %v564_v47, %v564_v47  ;;  %v110_v59 = vmul.f32 %v572_v52, %v572_v52 }
  0x20   :  { %v61_v3 = vadd.f32 %v60_v60, %v484_v57  ;;  %v129_v7 = vadd.f32 %v128_v63, %v98_v58  ;;  %v580_v58 = vld [vmem:[%s784_s0 + $0xe0] sm:$0xff]  ;;  %v588_v63 = vld [vmem:[%s784_s0 + $0xe8] sm:$0xff] }
  0x22   :  { %v62_v8 = vadd.f32 %v61_v3, %v492_v61  ;;  %v130_v12 = vadd.f32 %v129_v7, %v99_v62  ;;  %v111_v3 = vmul.f32 %v580_v58, %v580_v58 }
  0x24   :  { %v63_v14 = vadd.f32 %v62_v8, %v500_v4  ;;  %v131_v18 = vadd.f32 %v130_v12, %v100_v5  ;;  %v596_v8 = vld [vmem:[%s784_s0 + $0xf0] sm:$0xff] }
  0x26   :  { %v64_v19 = vadd.f32 %v63_v14, %v508_v10  ;;  %v132_v23 = vadd.f32 %v131_v18, %v101_v11  ;;  %v112_v11 = vmul.f32 %v588_v63, %v588_v63  ;;  %v113_v18 = vmul.f32 %v596_v8, %v596_v8 }
  0x28   :  { %v65_v24 = vadd.f32 %v64_v19, %v516_v15  ;;  %v133_v28 = vadd.f32 %v132_v23, %v102_v16  ;;  %v604_v16 = vld [vmem:[%s784_s0 + $0xf8] sm:$0xff]  ;;  %s335_s0 = smov 64  }
  0x29   :  { %v114_v23 = vmul.f32 %v604_v16, %v604_v16 }
  0x2a   :  { %v66_v30 = vadd.f32 %v65_v24, %v524_v20  ;;  %v134_v34 = vadd.f32 %v133_v28, %v103_v22 }
  0x2c   :  { %v67_v35 = vadd.f32 %v66_v30, %v532_v26  ;;  %v135_v39 = vadd.f32 %v134_v34, %v104_v27 }
  0x2e   :  { %v68_v40 = vadd.f32 %v67_v35, %v540_v31  ;;  %v136_v44 = vadd.f32 %v135_v39, %v105_v32 }
  0x30   :  { %v69_v46 = vadd.f32 %v68_v40, %v548_v36  ;;  %v137_v50 = vadd.f32 %v136_v44, %v106_v38 }
  0x32   :  { %v70_v51 = vadd.f32 %v69_v46, %v556_v42  ;;  %v138_v55 = vadd.f32 %v137_v50, %v107_v43 }
  0x34   :  { %v71_v56 = vadd.f32 %v70_v51, %v564_v47  ;;  %v139_v60 = vadd.f32 %v138_v55, %v108_v48 }
  0x36   :  { %v72_v62 = vadd.f32 %v71_v56, %v572_v52  ;;  %v140_v5 = vadd.f32 %v139_v60, %v109_v54 }
  0x38   :  { %v73_v7 = vadd.f32 %v72_v62, %v580_v58  ;;  %v141_v12 = vadd.f32 %v140_v5, %v110_v59 }
  0x3a   :  { %v74_v14 = vadd.f32 %v73_v7, %v588_v63  ;;  %v142_v19 = vadd.f32 %v141_v12, %v111_v3 }
  0x3c   :  { %v75_v22 = vadd.f32 %v74_v14, %v596_v8  ;;  %v143_v24 = vadd.f32 %v142_v19, %v112_v11  ;;  %v174_v11 = vlaneseq  ;;  %v166_v14 = vld [vmem:[%s785_s1] sm:$0x1] }
  0x3e   :  { %v76_v27 = vadd.f32 %v75_v22, %v604_v16  ;;  %v144_v28 = vadd.f32 %v143_v24, %v113_v18  ;;  %v175_v12 = vshrl.u32 %v174_v11, 7 }
  0x40   :  { %v77_v30 = vrot.slane %v76_v27, 4  ;;  %v145_v32 = vadd.f32 %v144_v28, %v114_v23  ;;  %v176_v18 = vsub.s32 0, %v175_v12  ;;  %v170_v23 = vld [vmem:[%s786_s2] sm:$0x1] }
  0x42   :  { %v78_v34 = vadd.f32 %v77_v30, %v76_v27  ;;  %v146_v35 = vrot.slane %v145_v32, 4 }
  0x44   :  { %v79_v38 = vrot.slane %v78_v34, 2  ;;  %v147_v39 = vadd.f32 %v146_v35, %v145_v32 }
  0x46   :  { %v80_v40 = vadd.f32 %v79_v38, %v78_v34  ;;  %v148_v43 = vrot.slane %v147_v39, 2 }
  0x48   :  { %v81_v44 = vrot.slane %v80_v40, 1  ;;  %v149_v46 = vadd.f32 %v148_v43, %v147_v39 }
  0x4a   :  { %v82_v48 = vadd.f32 %v81_v44, %v80_v40  ;;  %v150_v50 = vrot.slane %v149_v46, 1 }
  0x4c   :  { %153 = vrot.lane.b32.xlu0 %v82_v48, %s335_s0  ;;  %v151_v51 = vadd.f32 %v150_v50, %v149_v46 }
  0x50   :  { %158 = vrot.lane.b32.xlu0 %v151_v51, %s335_s0 }
  0xbe   :  { %v154_v54 = vpop.permute.xlu0 %153 }
  0xbf   :  { %v156_v55 = vadd.f32 %v154_v54, %v82_v48 }
  0xc1   :  { %v162_v56 = vmul.f32 0.001953125, %v156_v55 }
  0xc2   :  { %v159_v59 = vpop.permute.xlu0 %158 }
  0xc3   :  { %v161_v60 = vadd.f32 %v159_v59, %v151_v51  ;;  %v164_v62 = vmul.f32 %v162_v56, %v162_v56 }
  0xc5   :  { %v163_v3 = vmul.f32 0.001953125, %v161_v60 }
  0xc7   :  { %v165_v5 = vsub.f32 %v163_v3, %v164_v62 }
  0xc9   :  { %v167_v7 = vadd.f32 1e-05, %v165_v5 }
  0xcb   :  { %333 = vrsqrt.f32 %v167_v7 }
  0xd5   :  { %v334_v19 = vpop.eup %333 }
  0xd6   :  { %v169_v22 = vmul.f32 %v334_v19, %v166_v14 }
  0xd8   :  { %v177_v24 = vrot.slane %v169_v22, %v176_v18  ;;  %v171_v27 = vmul.f32 %v169_v22, %v162_v56 }
  0xda   :  { %178 = vrot.lane.b32.xlu1 %v177_v24, %s335_s0  ;;  %v172_v28 = vsub.f32 %v170_v23, %v171_v27 }
  0xdc   :  { %v187_v30 = vrot.slane %v172_v28, %v176_v18 }
  0xde   :  { %188 = vrot.lane.b32.xlu1 %v187_v30, %s335_s0 }
 0x14c   :  { %v179_v32 = vpop.permute.xlu1 %178 }
 0x14d   :  { %v182_v34 = vsel %vm181_vm0, %v169_v22, %v179_v32 }
 0x14e   :  { %v195_v35 = vrot.slane %v182_v34, %v176_v18 }
 0x150   :  { %v196_v38 = vmul.f32 %v195_v35, %v359_v0  ;;  %v197_v39 = vmul.f32 %v195_v35, %v364_v1  ;;  %v198_v40 = vmul.f32 %v195_v35, %v369_v2  ;;  %v199_v43 = vmul.f32 %v195_v35, %v380_v6  ;;  %v189_v55 = vpop.permute.xlu1 %188 }
 0x151   :  { %v200_v44 = vmul.f32 %v195_v35, %v388_v9  ;;  %v201_v46 = vmul.f32 %v195_v35, %v396_v13  ;;  %v202_v48 = vmul.f32 %v195_v35, %v404_v17  ;;  %v203_v50 = vmul.f32 %v195_v35, %v412_v21 }
 0x152   :  { %v204_v51 = vmul.f32 %v195_v35, %v420_v25  ;;  %v205_v54 = vmul.f32 %v195_v35, %v428_v29  ;;  %v206_v0 = vmul.f32 %v195_v35, %v436_v33  ;;  %v207_v1 = vmul.f32 %v195_v35, %v444_v37 }
 0x153   :  { %v208_v2 = vmul.f32 %v195_v35, %v452_v41  ;;  %v209_v6 = vmul.f32 %v195_v35, %v460_v45  ;;  %v210_v9 = vmul.f32 %v195_v35, %v468_v49  ;;  %v211_v13 = vmul.f32 %v195_v35, %v476_v53 }
 0x154   :  { %v212_v17 = vmul.f32 %v195_v35, %v484_v57  ;;  %v213_v21 = vmul.f32 %v195_v35, %v492_v61  ;;  %v214_v25 = vmul.f32 %v195_v35, %v500_v4  ;;  %v215_v29 = vmul.f32 %v195_v35, %v508_v10 }
 0x155   :  { %v216_v33 = vmul.f32 %v195_v35, %v516_v15  ;;  %v217_v37 = vmul.f32 %v195_v35, %v524_v20  ;;  %v218_v41 = vmul.f32 %v195_v35, %v532_v26  ;;  %v219_v45 = vmul.f32 %v195_v35, %v540_v31 }
 0x156   :  { %v220_v49 = vmul.f32 %v195_v35, %v548_v36  ;;  %v191_v53 = vsel %vm181_vm0, %v172_v28, %v189_v55  ;;  %v221_v57 = vmul.f32 %v195_v35, %v556_v42  ;;  %v222_v61 = vmul.f32 %v195_v35, %v564_v47 }
 0x157   :  { %v223_v4 = vmul.f32 %v195_v35, %v572_v52  ;;  %v231_v56 = vrot.slane %v191_v53, %v176_v18  ;;  %v224_v10 = vmul.f32 %v195_v35, %v580_v58  ;;  %v225_v15 = vmul.f32 %v195_v35, %v588_v63 }
 0x158   :  { %v226_v20 = vmul.f32 %v195_v35, %v596_v8  ;;  %v227_v26 = vmul.f32 %v195_v35, %v604_v16 }
 0x159   :  { %v232_v31 = vadd.f32 %v231_v56, %v196_v38  ;;  %v233_v59 = vadd.f32 %v231_v56, %v197_v39  ;;  %v234_v36 = vadd.f32 %v231_v56, %v198_v40  ;;  %v235_v60 = vadd.f32 %v231_v56, %v199_v43 }
 0x15a   :  { %v236_v62 = vadd.f32 %v231_v56, %v200_v44  ;;  %v237_v3 = vadd.f32 %v231_v56, %v201_v46  ;;  %v238_v42 = vadd.f32 %v231_v56, %v202_v48  ;;  %v239_v5 = vadd.f32 %v231_v56, %v203_v50 }
 0x15b   :  { %v240_v47 = vadd.f32 %v231_v56, %v204_v51  ;;  %v241_v7 = vadd.f32 %v231_v56, %v205_v54  ;;  %v242_v52 = vadd.f32 %v231_v56, %v206_v0  ;;  %v243_v11 = vadd.f32 %v231_v56, %v207_v1 }
 0x15c   :  { %v244_v12 = vadd.f32 %v231_v56, %v208_v2  ;;  %v245_v58 = vadd.f32 %v231_v56, %v209_v6  ;;  %v246_v14 = vadd.f32 %v231_v56, %v210_v9  ;;  %v247_v63 = vadd.f32 %v231_v56, %v211_v13 }
 0x15d   :  { %v248_v18 = vadd.f32 %v231_v56, %v212_v17  ;;  %v249_v8 = vadd.f32 %v231_v56, %v213_v21  ;;  %v250_v19 = vadd.f32 %v231_v56, %v214_v25  ;;  %v251_v16 = vadd.f32 %v231_v56, %v215_v29 }
 0x15e   :  { %v652_v22 = vadd.f32 %v231_v56, %v216_v33  ;;  %v654_v23 = vadd.f32 %v231_v56, %v217_v37  ;;  %v656_v24 = vadd.f32 %v231_v56, %v218_v41  ;;  %v658_v27 = vadd.f32 %v231_v56, %v219_v45 }
 0x15f   :  { %v660_v28 = vadd.f32 %v231_v56, %v220_v49  ;;  %v662_v30 = vadd.f32 %v231_v56, %v221_v57  ;;  %v664_v32 = vadd.f32 %v231_v56, %v222_v61  ;;  %v666_v34 = vadd.f32 %v231_v56, %v223_v4 }
 0x160   :  { %v668_v35 = vadd.f32 %v231_v56, %v224_v10  ;;  %v670_v38 = vadd.f32 %v231_v56, %v225_v15  ;;  %v672_v39 = vadd.f32 %v231_v56, %v226_v20  ;;  %v674_v40 = vadd.f32 %v231_v56, %v227_v26 }
 0x161   :  { %v264_v43 = vmax.f32 %v232_v31, 0.0  ;;  %v265_v44 = vmax.f32 %v233_v59, 0.0  ;;  %v266_v46 = vmax.f32 %v234_v36, 0.0  ;;  %v267_v48 = vmax.f32 %v235_v60, 0.0 }
 0x162   :  { %v268_v50 = vmax.f32 %v236_v62, 0.0  ;;  %v269_v51 = vmax.f32 %v237_v3, 0.0  ;;  %v270_v54 = vmax.f32 %v238_v42, 0.0  ;;  %v271_v0 = vmax.f32 %v239_v5, 0.0 }
 0x163   :  { %v272_v1 = vmax.f32 %v240_v47, 0.0  ;;  %v273_v2 = vmax.f32 %v241_v7, 0.0  ;;  %v274_v6 = vmax.f32 %v242_v52, 0.0  ;;  %v275_v55 = vmax.f32 %v243_v11, 0.0  ;;  %296 = vst [vmem:[%s787_s3] sm:$0xff] %v264_v43  ;;  %297 = vst [vmem:[%s787_s3 + $0x8] sm:$0xff] %v265_v44 }
 0x164   :  { %298 = vst [vmem:[%s787_s3 + $0x10] sm:$0xff] %v266_v46  ;;  %299 = vst [vmem:[%s787_s3 + $0x18] sm:$0xff] %v267_v48  ;;  %v276_v9 = vmax.f32 %v244_v12, 0.0  ;;  %v277_v13 = vmax.f32 %v245_v58, 0.0  ;;  %v278_v17 = vmax.f32 %v246_v14, 0.0  ;;  %v279_v21 = vmax.f32 %v247_v63, 0.0 }
 0x165   :  { %300 = vst [vmem:[%s787_s3 + $0x20] sm:$0xff] %v268_v50  ;;  %301 = vst [vmem:[%s787_s3 + $0x28] sm:$0xff] %v269_v51  ;;  %v280_v25 = vmax.f32 %v248_v18, 0.0  ;;  %v281_v29 = vmax.f32 %v249_v8, 0.0  ;;  %v282_v33 = vmax.f32 %v250_v19, 0.0  ;;  %v283_v37 = vmax.f32 %v251_v16, 0.0 }
 0x166   :  { %302 = vst [vmem:[%s787_s3 + $0x30] sm:$0xff] %v270_v54  ;;  %303 = vst [vmem:[%s787_s3 + $0x38] sm:$0xff] %v271_v0  ;;  %v284_v41 = vmax.f32 %v652_v22, 0.0  ;;  %v285_v45 = vmax.f32 %v654_v23, 0.0  ;;  %v286_v49 = vmax.f32 %v656_v24, 0.0  ;;  %v287_v53 = vmax.f32 %v658_v27, 0.0 }
 0x167   :  { %304 = vst [vmem:[%s787_s3 + $0x40] sm:$0xff] %v272_v1  ;;  %305 = vst [vmem:[%s787_s3 + $0x48] sm:$0xff] %v273_v2  ;;  %v288_v57 = vmax.f32 %v660_v28, 0.0  ;;  %v289_v61 = vmax.f32 %v662_v30, 0.0  ;;  %v290_v4 = vmax.f32 %v664_v32, 0.0  ;;  %v291_v56 = vmax.f32 %v666_v34, 0.0 }
 0x168   :  { %306 = vst [vmem:[%s787_s3 + $0x50] sm:$0xff] %v274_v6  ;;  %307 = vst [vmem:[%s787_s3 + $0x58] sm:$0xff] %v275_v55  ;;  %v292_v10 = vmax.f32 %v668_v35, 0.0  ;;  %v293_v15 = vmax.f32 %v670_v38, 0.0  ;;  %v294_v20 = vmax.f32 %v672_v39, 0.0  ;;  %v295_v26 = vmax.f32 %v674_v40, 0.0 }
 0x169   :  { %308 = vst [vmem:[%s787_s3 + $0x60] sm:$0xff] %v276_v9  ;;  %309 = vst [vmem:[%s787_s3 + $0x68] sm:$0xff] %v277_v13 }
 0x16a   :  { %310 = vst [vmem:[%s787_s3 + $0x70] sm:$0xff] %v278_v17  ;;  %311 = vst [vmem:[%s787_s3 + $0x78] sm:$0xff] %v279_v21 }
 0x16b   :  { %312 = vst [vmem:[%s787_s3 + $0x80] sm:$0xff] %v280_v25  ;;  %313 = vst [vmem:[%s787_s3 + $0x88] sm:$0xff] %v281_v29 }
 0x16c   :  { %314 = vst [vmem:[%s787_s3 + $0x90] sm:$0xff] %v282_v33  ;;  %315 = vst [vmem:[%s787_s3 + $0x98] sm:$0xff] %v283_v37 }
 0x16d   :  { %316 = vst [vmem:[%s787_s3 + $0xa0] sm:$0xff] %v284_v41  ;;  %317 = vst [vmem:[%s787_s3 + $0xa8] sm:$0xff] %v285_v45 }
 0x16e   :  { %318 = vst [vmem:[%s787_s3 + $0xb0] sm:$0xff] %v286_v49  ;;  %319 = vst [vmem:[%s787_s3 + $0xb8] sm:$0xff] %v287_v53 }
 0x16f   :  { %320 = vst [vmem:[%s787_s3 + $0xc0] sm:$0xff] %v288_v57  ;;  %321 = vst [vmem:[%s787_s3 + $0xc8] sm:$0xff] %v289_v61 }
 0x170   :  { %322 = vst [vmem:[%s787_s3 + $0xd0] sm:$0xff] %v290_v4  ;;  %323 = vst [vmem:[%s787_s3 + $0xd8] sm:$0xff] %v291_v56 }
 0x171   :  { %324 = vst [vmem:[%s787_s3 + $0xe0] sm:$0xff] %v292_v10  ;;  %325 = vst [vmem:[%s787_s3 + $0xe8] sm:$0xff] %v293_v15 }
 0x172   :  { %326 = vst [vmem:[%s787_s3 + $0xf0] sm:$0xff] %v294_v20  ;;  %327 = vst [vmem:[%s787_s3 + $0xf8] sm:$0xff] %v295_v26 }

// kernel: _lambda_.41
= control target key start
LH: loop header
LB: loop body
LE: loop exit
PB: predicated region body
PF: predicated region fallthrough
CT: control target
= control target key end

     0   :  { %s1151_s9 = smov 0   ;;  %s1153_s10 = smov 0   ;;  %s1446_s0 = inlined_call_operand.vmem [shape: bf16[512,147], index: 0, kind: input, shape index: {}]   ;;  %s1447_s1 = inlined_call_operand.vmem [shape: bf16[147,64], index: 1, kind: input, shape index: {}]   ;;  %s1448_s2 = inlined_call_operand.vmem [shape: f32[512,64], index: 2, kind: output, shape index: {}]  }
   0x1   :  { %s1155_s11 = smov 0  }
   0x2 LB: > { %s31_s12 = sadd.s32 1, %s1127_s10  ;;  %p937_p0 = scmp.ge.s32.totalorder %s1131_s11, 1  ;;  %s1131_s11 = sphi %s1155_s11, %s12_s11   ;;  %s1127_s10 = sphi %s1153_s10, %s1450_s10   ;;  %s1123_s9 = sphi %s1151_s9, %s1449_s9  }
   0x3   : > { %p33_p1 = scmp.ge.s32.totalorder %s31_s12, 2  ;;  %p158_p2 = scmp.lt.s32.totalorder %s1131_s11, 3 }
   0x5   : > { %s1452_s12 = smov (%p33_p1, %s31_s12), 0  ;;  %p159_p3 = pnand %p937_p0, %p158_p2 }
   0x6   : > { %v1051_v0 = vld [vmem:[%s1447_s1] sm:$0xff] (!%p159_p3)   ;;  %v1133_v1 = vmov (!%p159_p3), 0   ;;  %v1052_v2 = vld [vmem:[%s1447_s1 + $0x8] sm:$0xff] (!%p159_p3)   ;;  %v1053_v3 = vld [vmem:[%s1447_s1 + $0x10] sm:$0xff] (!%p159_p3)   ;;  %s938_s19 = sshll.u32 (!%p159_p3), %s1123_s9, 5  ;;  %vm231_vm0 = vcmask (!%p159_p3), 523264  }
   0x7   : > { %162 = sbr.rel (%p159_p3) target bundleno = 320 (0x140), region = 28  ;;  %604 = vmatprep.subr.bf16.mxu0 (!%p159_p3), %v1133_v1  ;;  %1004 = vmatprep.subr.bf16.mxu1 (!%p159_p3), %v1133_v1  ;;  %p198_p4 = scmp.lt.s32.totalorder (!%p159_p3), %s938_s19, 63  ;;  %v1054_v4 = vld [vmem:[%s1447_s1 + $0x18] sm:$0xff] (!%p159_p3)   ;;  %v1055_v5 = vld [vmem:[%s1447_s1 + $0x20] sm:$0xff] (!%p159_p3)   ;;  %vm548_vm1 = vcmask (!%p159_p3), 154624   ;;  %v1134_v6 = vmov (!%p159_p3), 0.0  }
   0x8   : > { %605 = vmatpush1.bf16.msra.mxu0 (!%p159_p3), %v1051_v0  ;;  %1014 = vmatpush1.bf16.msra.mxu1 (!%p159_p3), %v1051_v0  ;;  %v1056_v9 = vld [vmem:[%s1447_s1 + $0x28] sm:$0xff] (!%p159_p3)   ;;  %v1057_v10 = vld [vmem:[%s1447_s1 + $0x30] sm:$0xff] (!%p159_p3)   ;;  %vm597_vm2 = vcmask (!%p159_p3), 1040384   ;;  %v1058_v11 = vld [vmem:[%s1447_s1 + $0x38] sm:$0xff] (!%p159_p3)   ;;  %vm598_vm3 = vcmask (!%p159_p3), 1041408   ;;  %v1135_v12 = vmov (!%p159_p3), 65535  }
   0x9   : > { %606 = vmatprep.subr.bf16.mxu0 (!%p159_p3), %v1133_v1  ;;  %1005 = vmatprep.subr.bf16.mxu1 (!%p159_p3), %v1133_v1  ;;  %v599_v13 = vsel (!%p159_p3), %vm597_vm2, 4294967295, %v1135_v12  ;;  %v1059_v14 = vld [vmem:[%s1447_s1 + $0x40] sm:$0xff] (!%p159_p3)   ;;  %v1060_v15 = vld [vmem:[%s1447_s1 + $0x48] ss:$0 sps:$4 sm:$0x33] (!%p159_p3)  }
   0xa   : > { %v600_v16 = vsel (!%p159_p3), %vm598_vm3, %v599_v13, 0 }
   0xb   : > { %v602_v17 = vand.u32 (!%p159_p3), %v1060_v15, %v600_v16 }
   0xc   : > { %607 = vmatpush1.bf16.msra.mxu0 (!%p159_p3), %v1052_v2  ;;  %1015 = vmatpush1.bf16.msra.mxu1 (!%p159_p3), %v1052_v2 }
   0xd   : > { %608 = vmatprep.subr.bf16.mxu0 (!%p159_p3), %v1133_v1  ;;  %1006 = vmatprep.subr.bf16.mxu1 (!%p159_p3), %v1133_v1 }
   0xe   : > { %s1454_s19 = smov (!%p198_p4, %s938_s19), 63 }
   0xf   : > { %s1003_s22 = sshll.u32 %s1454_s19, 3 }
  0x10   : > { %609 = vmatpush1.bf16.msra.mxu0 %v1053_v3  ;;  %1016 = vmatpush1.bf16.msra.mxu1 %v1053_v3  ;;  %s1192_s25 = scalar_lea.vmem %s1446_s0, %s1003_s22  ;;  %s1197_s28 = scalar_lea.vmem %s1448_s2, %s1003_s22 }
  0x11   : > { %610 = vmatprep.subr.bf16.mxu0 %v1133_v1  ;;  %1007 = vmatprep.subr.bf16.mxu1 %v1133_v1  ;;  %232 = vst.msk [vmem:[%s1197_s28] sm:$0xff] %vm231_vm0, %v1134_v6  ;;  %233 = vst.msk [vmem:[%s1197_s28 + $0x8] sm:$0xff] %vm231_vm0, %v1134_v6  ;;  %v1063_v7 = vld [vmem:[%s1192_s25 + $0x4] ss:$8 sps:$4 sm:$0xff]   ;;  %v1061_v18 = vld [vmem:[%s1192_s25] ss:$8 sps:$4 sm:$0xff]  }
  0x12   : > { %234 = vst.msk [vmem:[%s1197_s28 + $0x10] sm:$0xff] %vm231_vm0, %v1134_v6  ;;  %235 = vst.msk [vmem:[%s1197_s28 + $0x18] sm:$0xff] %vm231_vm0, %v1134_v6  ;;  %v1066_v8 = vld [vmem:[%s1192_s25 + $0x84] ss:$8 sps:$4 sm:$0xff]   ;;  %985 = vmatprep.mubr.msk.bf16.mxu0 %vm548_vm1, %v1063_v7  ;;  %v1064_v19 = vld [vmem:[%s1192_s25 + $0x80] ss:$8 sps:$4 sm:$0xff]  }
  0x13   : > { %236 = vst.msk [vmem:[%s1197_s28 + $0x20] sm:$0xff] %vm231_vm0, %v1134_v6  ;;  %237 = vst.msk [vmem:[%s1197_s28 + $0x28] sm:$0xff] %vm231_vm0, %v1134_v6  ;;  %993 = vmatprep.mubr.msk.bf16.mxu1 %vm548_vm1, %v1066_v8  ;;  %v1067_v20 = vld [vmem:[%s1192_s25 + $0x14] ss:$8 sps:$4 sm:$0xff]   ;;  %v1071_v22 = vld [vmem:[%s1192_s25 + $0x10] ss:$8 sps:$4 sm:$0xff]  }
  0x14   : > { %238 = vst.msk [vmem:[%s1197_s28 + $0x30] sm:$0xff] %vm231_vm0, %v1134_v6  ;;  %239 = vst.msk [vmem:[%s1197_s28 + $0x38] sm:$0xff] %vm231_vm0, %v1134_v6  ;;  %611 = vmatpush1.bf16.msra.mxu0 %v1054_v4  ;;  %1017 = vmatpush1.bf16.msra.mxu1 %v1054_v4  ;;  %v1069_v21 = vld [vmem:[%s1192_s25 + $0x94] ss:$8 sps:$4 sm:$0xff]   ;;  %v1072_v23 = vld [vmem:[%s1192_s25 + $0x90] ss:$8 sps:$4 sm:$0xff]  }
  0x15   : > { %240 = vst.msk [vmem:[%s1197_s28 + $0x40] sm:$0xff] %vm231_vm0, %v1134_v6  ;;  %241 = vst.msk [vmem:[%s1197_s28 + $0x48] sm:$0xff] %vm231_vm0, %v1134_v6  ;;  %612 = vmatprep.subr.bf16.mxu0 %v1133_v1  ;;  %1008 = vmatprep.subr.bf16.mxu1 %v1133_v1  ;;  %v1073_v24 = vld [vmem:[%s1192_s25 + $0x24] ss:$8 sps:$4 sm:$0xff]   ;;  %v1077_v26 = vld [vmem:[%s1192_s25 + $0x20] ss:$8 sps:$4 sm:$0xff]  }
  0x16   : > { %242 = vst.msk [vmem:[%s1197_s28 + $0x50] sm:$0xff] %vm231_vm0, %v1134_v6  ;;  %243 = vst.msk [vmem:[%s1197_s28 + $0x58] sm:$0xff] %vm231_vm0, %v1134_v6  ;;  %v1075_v25 = vld [vmem:[%s1192_s25 + $0xa4] ss:$8 sps:$4 sm:$0xff]   ;;  %v1078_v27 = vld [vmem:[%s1192_s25 + $0xa0] ss:$8 sps:$4 sm:$0xff]  }
  0x17   : > { %244 = vst.msk [vmem:[%s1197_s28 + $0x60] sm:$0xff] %vm231_vm0, %v1134_v6  ;;  %245 = vst.msk [vmem:[%s1197_s28 + $0x68] sm:$0xff] %vm231_vm0, %v1134_v6  ;;  %v1079_v28 = vld [vmem:[%s1192_s25 + $0x34] ss:$8 sps:$4 sm:$0xff]   ;;  %v1083_v30 = vld [vmem:[%s1192_s25 + $0x30] ss:$8 sps:$4 sm:$0xff]  }
  0x18   : > { %246 = vst.msk [vmem:[%s1197_s28 + $0x70] sm:$0xff] %vm231_vm0, %v1134_v6  ;;  %247 = vst.msk [vmem:[%s1197_s28 + $0x78] sm:$0xff] %vm231_vm0, %v1134_v6  ;;  %613 = vmatpush1.bf16.msra.mxu0 %v1055_v5  ;;  %1018 = vmatpush1.bf16.msra.mxu1 %v1055_v5  ;;  %v1081_v29 = vld [vmem:[%s1192_s25 + $0xb4] ss:$8 sps:$4 sm:$0xff]   ;;  %v1084_v31 = vld [vmem:[%s1192_s25 + $0xb0] ss:$8 sps:$4 sm:$0xff]  }
  0x19   : > { %248 = vst.msk [vmem:[%s1197_s28 + $0x80] sm:$0xff] %vm231_vm0, %v1134_v6  ;;  %249 = vst.msk [vmem:[%s1197_s28 + $0x88] sm:$0xff] %vm231_vm0, %v1134_v6  ;;  %614 = vmatprep.subr.bf16.mxu0 %v1133_v1  ;;  %1009 = vmatprep.subr.bf16.mxu1 %v1133_v1  ;;  %v1085_v32 = vld [vmem:[%s1192_s25 + $0x44] ss:$8 sps:$4 sm:$0xff]   ;;  %v1089_v34 = vld [vmem:[%s1192_s25 + $0x40] ss:$8 sps:$4 sm:$0xff]  }
  0x1a   : > { %250 = vst.msk [vmem:[%s1197_s28 + $0x90] sm:$0xff] %vm231_vm0, %v1134_v6  ;;  %251 = vst.msk [vmem:[%s1197_s28 + $0x98] sm:$0xff] %vm231_vm0, %v1134_v6  ;;  %v1087_v33 = vld [vmem:[%s1192_s25 + $0xc4] ss:$8 sps:$4 sm:$0xff]   ;;  %v1090_v35 = vld [vmem:[%s1192_s25 + $0xc0] ss:$8 sps:$4 sm:$0xff]  }
  0x1b   : > { %252 = vst.msk [vmem:[%s1197_s28 + $0xa0] sm:$0xff] %vm231_vm0, %v1134_v6  ;;  %253 = vst.msk [vmem:[%s1197_s28 + $0xa8] sm:$0xff] %vm231_vm0, %v1134_v6  ;;  %v1091_v36 = vld [vmem:[%s1192_s25 + $0x54] ss:$8 sps:$4 sm:$0xff]   ;;  %v1095_v38 = vld [vmem:[%s1192_s25 + $0x50] ss:$8 sps:$4 sm:$0xff]  }
  0x1c   : > { %254 = vst.msk [vmem:[%s1197_s28 + $0xb0] sm:$0xff] %vm231_vm0, %v1134_v6  ;;  %255 = vst.msk [vmem:[%s1197_s28 + $0xb8] sm:$0xff] %vm231_vm0, %v1134_v6  ;;  %615 = vmatpush1.bf16.msra.mxu0 %v1056_v9  ;;  %1019 = vmatpush1.bf16.msra.mxu1 %v1056_v9  ;;  %v1093_v37 = vld [vmem:[%s1192_s25 + $0xd4] ss:$8 sps:$4 sm:$0xff]   ;;  %v1096_v39 = vld [vmem:[%s1192_s25 + $0xd0] ss:$8 sps:$4 sm:$0xff]  }
  0x1d   : > { %256 = vst.msk [vmem:[%s1197_s28 + $0xc0] sm:$0xff] %vm231_vm0, %v1134_v6  ;;  %257 = vst.msk [vmem:[%s1197_s28 + $0xc8] sm:$0xff] %vm231_vm0, %v1134_v6  ;;  %616 = vmatprep.subr.bf16.mxu0 %v1133_v1  ;;  %1010 = vmatprep.subr.bf16.mxu1 %v1133_v1  ;;  %v1097_v40 = vld [vmem:[%s1192_s25 + $0x64] ss:$8 sps:$4 sm:$0xff]   ;;  %v1101_v42 = vld [vmem:[%s1192_s25 + $0x60] ss:$8 sps:$4 sm:$0xff]  }
  0x1e   : > { %258 = vst.msk [vmem:[%s1197_s28 + $0xd0] sm:$0xff] %vm231_vm0, %v1134_v6  ;;  %259 = vst.msk [vmem:[%s1197_s28 + $0xd8] sm:$0xff] %vm231_vm0, %v1134_v6  ;;  %v1099_v41 = vld [vmem:[%s1192_s25 + $0xe4] ss:$8 sps:$4 sm:$0xff]   ;;  %v1102_v43 = vld [vmem:[%s1192_s25 + $0xe0] ss:$8 sps:$4 sm:$0xff]  }
  0x1f   : > { %260 = vst.msk [vmem:[%s1197_s28 + $0xe0] sm:$0xff] %vm231_vm0, %v1134_v6  ;;  %261 = vst.msk [vmem:[%s1197_s28 + $0xe8] sm:$0xff] %vm231_vm0, %v1134_v6  ;;  %v1103_v44 = vld [vmem:[%s1192_s25 + $0x74] ss:$8 sps:$4 sm:$0xff]   ;;  %v1107_v46 = vld [vmem:[%s1192_s25 + $0x70] ss:$8 sps:$4 sm:$0xff]  }
  0x20   : > { %262 = vst.msk [vmem:[%s1197_s28 + $0xf0] sm:$0xff] %vm231_vm0, %v1134_v6  ;;  %263 = vst.msk [vmem:[%s1197_s28 + $0xf8] sm:$0xff] %vm231_vm0, %v1134_v6  ;;  %617 = vmatpush1.bf16.msra.mxu0 %v1057_v10  ;;  %1020 = vmatpush1.bf16.msra.mxu1 %v1057_v10  ;;  %v1105_v45 = vld [vmem:[%s1192_s25 + $0xf4] ss:$8 sps:$4 sm:$0xff]   ;;  %v1108_v47 = vld [vmem:[%s1192_s25 + $0xf0] ss:$8 sps:$4 sm:$0xff]  }
  0x21   : > { %618 = vmatprep.subr.bf16.mxu0 %v1133_v1  ;;  %1011 = vmatprep.subr.bf16.mxu1 %v1133_v1  ;;  %v264_v48 = vld [vmem:[%s1197_s28] sm:$0xff]  ;;  %v265_v52 = vld [vmem:[%s1197_s28 + $0x8] sm:$0xff]  ;;  %v266_v0 = vld [vmem:[%s1197_s28 + $0x10] sm:$0xff] }
  0x22   : > { %v280_v49 = vld [vmem:[%s1197_s28 + $0x80] sm:$0xff]  ;;  %v281_v53 = vld [vmem:[%s1197_s28 + $0x88] sm:$0xff]  ;;  %v267_v4 = vld [vmem:[%s1197_s28 + $0x18] sm:$0xff] }
  0x23   : > { %v283_v5 = vld [vmem:[%s1197_s28 + $0x98] sm:$0xff]  ;;  %v268_v16 = vld [vmem:[%s1197_s28 + $0x20] sm:$0xff] }
  0x24   : > { %619 = vmatpush1.bf16.msra.mxu0 %v1058_v11  ;;  %1021 = vmatpush1.bf16.msra.mxu1 %v1058_v11 }
  0x25   : > { %620 = vmatprep.subr.bf16.mxu0 %v1133_v1  ;;  %1012 = vmatprep.subr.bf16.mxu1 %v1133_v1 }
  0x28   : > { %621 = vmatpush1.bf16.msra.mxu0 %v1059_v14  ;;  %1022 = vmatpush1.bf16.msra.mxu1 %v1059_v14 }
  0x29   : > { %622 = vmatprep.subr.bf16.mxu0 %v1133_v1  ;;  %1013 = vmatprep.subr.bf16.mxu1 %v1133_v1  ;;  %v282_v1 = vld [vmem:[%s1197_s28 + $0x90] sm:$0xff] }
  0x2c   : > { %623 = vmatpush1.bf16.msra.mxu0 %v602_v17  ;;  %1023 = vmatpush1.bf16.msra.mxu1 %v602_v17  ;;  %v284_v17 = vld [vmem:[%s1197_s28 + $0xa0] sm:$0xff] }
  0x2f   : > { %637 = vmatmul.mubr.bf16.vlgmr.msra.gmra.mrb[0].mxu0 %v1061_v18  ;;  %701 = vmatmul.mubr.bf16.vlgmr.msra.gmra.mrb[0].mxu1 %v1064_v19 }
  0x30   : > { %986 = vmatprep.mubr.msk.bf16.mxu0 %vm548_vm1, %v1067_v20  ;;  %994 = vmatprep.mubr.msk.bf16.mxu1 %vm548_vm1, %v1069_v21  ;;  %v269_v20 = vld [vmem:[%s1197_s28 + $0x28] sm:$0xff] }
  0x31   : > { %v285_v21 = vld [vmem:[%s1197_s28 + $0xa8] sm:$0xff] }
  0x37   : > { %645 = vmatmul.mubr.bf16.gmra.mrb[4].mxu0 %v1071_v22  ;;  %709 = vmatmul.mubr.bf16.gmra.mrb[4].mxu1 %v1072_v23 }
  0x38   : > { %987 = vmatprep.mubr.msk.bf16.mxu0 %vm548_vm1, %v1073_v24  ;;  %995 = vmatprep.mubr.msk.bf16.mxu1 %vm548_vm1, %v1075_v25 }
  0x3f   : > { %653 = vmatmul.mubr.bf16.gmra.mrb[8].mxu0 %v1077_v26  ;;  %717 = vmatmul.mubr.bf16.gmra.mrb[8].mxu1 %v1078_v27 }
  0x40   : > { %988 = vmatprep.mubr.msk.bf16.mxu0 %vm548_vm1, %v1079_v28  ;;  %996 = vmatprep.mubr.msk.bf16.mxu1 %vm548_vm1, %v1081_v29 }
  0x47   : > { %661 = vmatmul.mubr.bf16.gmra.mrb[12].mxu0 %v1083_v30  ;;  %725 = vmatmul.mubr.bf16.gmra.mrb[12].mxu1 %v1084_v31 }
  0x48   : > { %989 = vmatprep.mubr.msk.bf16.mxu0 %vm548_vm1, %v1085_v32  ;;  %997 = vmatprep.mubr.msk.bf16.mxu1 %vm548_vm1, %v1087_v33  ;;  %v270_v32 = vld [vmem:[%s1197_s28 + $0x30] sm:$0xff] }
  0x49   : > { %v286_v33 = vld [vmem:[%s1197_s28 + $0xb0] sm:$0xff] }
  0x4f   : > { %669 = vmatmul.mubr.bf16.gmra.mrb[16].mxu0 %v1089_v34  ;;  %733 = vmatmul.mubr.bf16.gmra.mrb[16].mxu1 %v1090_v35 }
  0x50   : > { %990 = vmatprep.mubr.msk.bf16.mxu0 %vm548_vm1, %v1091_v36  ;;  %998 = vmatprep.mubr.msk.bf16.mxu1 %vm548_vm1, %v1093_v37  ;;  %v271_v36 = vld [vmem:[%s1197_s28 + $0x38] sm:$0xff] }
  0x51   : > { %v287_v37 = vld [vmem:[%s1197_s28 + $0xb8] sm:$0xff] }
  0x57   : > { %677 = vmatmul.mubr.bf16.gmra.mrb[20].mxu0 %v1095_v38  ;;  %741 = vmatmul.mubr.bf16.gmra.mrb[20].mxu1 %v1096_v39 }
  0x58   : > { %991 = vmatprep.mubr.msk.bf16.mxu0 %vm548_vm1, %v1097_v40  ;;  %999 = vmatprep.mubr.msk.bf16.mxu1 %vm548_vm1, %v1099_v41 }
  0x5f   : > { %685 = vmatmul.mubr.bf16.gmra.mrb[24].mxu0 %v1101_v42  ;;  %749 = vmatmul.mubr.bf16.gmra.mrb[24].mxu1 %v1102_v43 }
  0x60   : > { %992 = vmatprep.mubr.msk.bf16.mxu0 %vm548_vm1, %v1103_v44  ;;  %1000 = vmatprep.mubr.msk.bf16.mxu1 %vm548_vm1, %v1105_v45 }
  0x67   : > { %693 = vmatmul.mubr.bf16.gmra.mrb[28].mxu0 %v1107_v46  ;;  %757 = vmatmul.mubr.bf16.gmra.mrb[28].mxu1 %v1108_v47 }
 0x102   : > { %v638_v50 = vpop.f32.mrb[0].mxu0  ;;  %v702_v51 = vpop.f32.mrb[0].mxu1 }
 0x103   : > { %v765_v54 = vadd.f32 %v638_v50, %v264_v48  ;;  %v781_v55 = vadd.f32 %v702_v51, %v280_v49  ;;  %v640_v56 = vpop.f32.mrb[1].mxu0  ;;  %v704_v57 = vpop.f32.mrb[1].mxu1  ;;  %v272_v48 = vld [vmem:[%s1197_s28 + $0x40] sm:$0xff] }
 0x104   : > { %v641_v58 = vpop.f32.mrb[2].mxu0  ;;  %v705_v59 = vpop.f32.mrb[2].mxu1  ;;  %v288_v49 = vld [vmem:[%s1197_s28 + $0xc0] sm:$0xff] }
 0x105   : > { %798 = vst.msk [vmem:[%s1197_s28] sm:$0xff] %vm231_vm0, %v765_v54  ;;  %814 = vst.msk [vmem:[%s1197_s28 + $0x80] sm:$0xff] %vm231_vm0, %v781_v55  ;;  %v766_v60 = vadd.f32 %v641_v58, %v265_v52  ;;  %v782_v61 = vadd.f32 %v705_v59, %v281_v53  ;;  %v643_v62 = vpop.f32.mrb[3].mxu0  ;;  %v707_v63 = vpop.f32.mrb[3].mxu1  ;;  %v273_v52 = vld [vmem:[%s1197_s28 + $0x48] sm:$0xff] }
 0x106   : > { %v289_v53 = vld [vmem:[%s1197_s28 + $0xc8] sm:$0xff] }
 0x107   : > { %799 = vst.msk [vmem:[%s1197_s28 + $0x8] sm:$0xff] %vm231_vm0, %v766_v60  ;;  %815 = vst.msk [vmem:[%s1197_s28 + $0x88] sm:$0xff] %vm231_vm0, %v782_v61 }
 0x10a   : > { %v646_v2 = vpop.f32.mrb[4].mxu0  ;;  %v710_v3 = vpop.f32.mrb[4].mxu1 }
 0x10b   : > { %v767_v6 = vadd.f32 %v646_v2, %v266_v0  ;;  %v783_v7 = vadd.f32 %v710_v3, %v282_v1  ;;  %v648_v8 = vpop.f32.mrb[5].mxu0  ;;  %v712_v9 = vpop.f32.mrb[5].mxu1  ;;  %v274_v0 = vld [vmem:[%s1197_s28 + $0x50] sm:$0xff] }
 0x10c   : > { %v649_v10 = vpop.f32.mrb[6].mxu0  ;;  %v713_v11 = vpop.f32.mrb[6].mxu1  ;;  %v290_v1 = vld [vmem:[%s1197_s28 + $0xd0] sm:$0xff] }
 0x10d   : > { %800 = vst.msk [vmem:[%s1197_s28 + $0x10] sm:$0xff] %vm231_vm0, %v767_v6  ;;  %816 = vst.msk [vmem:[%s1197_s28 + $0x90] sm:$0xff] %vm231_vm0, %v783_v7  ;;  %v768_v12 = vadd.f32 %v649_v10, %v267_v4  ;;  %v784_v13 = vadd.f32 %v713_v11, %v283_v5  ;;  %v651_v14 = vpop.f32.mrb[7].mxu0  ;;  %v715_v15 = vpop.f32.mrb[7].mxu1  ;;  %v275_v4 = vld [vmem:[%s1197_s28 + $0x58] sm:$0xff] }
 0x10e   : > { %v291_v5 = vld [vmem:[%s1197_s28 + $0xd8] sm:$0xff] }
 0x10f   : > { %801 = vst.msk [vmem:[%s1197_s28 + $0x18] sm:$0xff] %vm231_vm0, %v768_v12  ;;  %817 = vst.msk [vmem:[%s1197_s28 + $0x98] sm:$0xff] %vm231_vm0, %v784_v13 }
 0x112   : > { %v654_v18 = vpop.f32.mrb[8].mxu0  ;;  %v718_v19 = vpop.f32.mrb[8].mxu1 }
 0x113   : > { %v769_v22 = vadd.f32 %v654_v18, %v268_v16  ;;  %v785_v23 = vadd.f32 %v718_v19, %v284_v17  ;;  %v656_v24 = vpop.f32.mrb[9].mxu0  ;;  %v720_v25 = vpop.f32.mrb[9].mxu1  ;;  %v276_v16 = vld [vmem:[%s1197_s28 + $0x60] sm:$0xff] }
 0x114   : > { %v657_v26 = vpop.f32.mrb[10].mxu0  ;;  %v721_v27 = vpop.f32.mrb[10].mxu1  ;;  %v292_v17 = vld [vmem:[%s1197_s28 + $0xe0] sm:$0xff] }
 0x115   : > { %802 = vst.msk [vmem:[%s1197_s28 + $0x20] sm:$0xff] %vm231_vm0, %v769_v22  ;;  %818 = vst.msk [vmem:[%s1197_s28 + $0xa0] sm:$0xff] %vm231_vm0, %v785_v23  ;;  %v770_v28 = vadd.f32 %v657_v26, %v269_v20  ;;  %v786_v29 = vadd.f32 %v721_v27, %v285_v21  ;;  %v659_v30 = vpop.f32.mrb[11].mxu0  ;;  %v723_v31 = vpop.f32.mrb[11].mxu1  ;;  %v277_v20 = vld [vmem:[%s1197_s28 + $0x68] sm:$0xff] }
 0x116   : > { %v293_v21 = vld [vmem:[%s1197_s28 + $0xe8] sm:$0xff] }
 0x117   : > { %803 = vst.msk [vmem:[%s1197_s28 + $0x28] sm:$0xff] %vm231_vm0, %v770_v28  ;;  %819 = vst.msk [vmem:[%s1197_s28 + $0xa8] sm:$0xff] %vm231_vm0, %v786_v29 }
 0x11a   : > { %v662_v34 = vpop.f32.mrb[12].mxu0  ;;  %v726_v35 = vpop.f32.mrb[12].mxu1 }
 0x11b   : > { %v771_v38 = vadd.f32 %v662_v34, %v270_v32  ;;  %v787_v39 = vadd.f32 %v726_v35, %v286_v33  ;;  %v664_v40 = vpop.f32.mrb[13].mxu0  ;;  %v728_v41 = vpop.f32.mrb[13].mxu1  ;;  %v278_v32 = vld [vmem:[%s1197_s28 + $0x70] sm:$0xff] }
 0x11c   : > { %v665_v42 = vpop.f32.mrb[14].mxu0  ;;  %v729_v43 = vpop.f32.mrb[14].mxu1  ;;  %v294_v33 = vld [vmem:[%s1197_s28 + $0xf0] sm:$0xff] }
 0x11d   : > { %804 = vst.msk [vmem:[%s1197_s28 + $0x30] sm:$0xff] %vm231_vm0, %v771_v38  ;;  %820 = vst.msk [vmem:[%s1197_s28 + $0xb0] sm:$0xff] %vm231_vm0, %v787_v39  ;;  %v772_v44 = vadd.f32 %v665_v42, %v271_v36  ;;  %v788_v45 = vadd.f32 %v729_v43, %v287_v37  ;;  %v667_v46 = vpop.f32.mrb[15].mxu0  ;;  %v731_v47 = vpop.f32.mrb[15].mxu1  ;;  %v279_v36 = vld [vmem:[%s1197_s28 + $0x78] sm:$0xff] }
 0x11e   : > { %v295_v37 = vld [vmem:[%s1197_s28 + $0xf8] sm:$0xff] }
 0x11f   : > { %805 = vst.msk [vmem:[%s1197_s28 + $0x38] sm:$0xff] %vm231_vm0, %v772_v44  ;;  %821 = vst.msk [vmem:[%s1197_s28 + $0xb8] sm:$0xff] %vm231_vm0, %v788_v45 }
 0x122   : > { %v670_v50 = vpop.f32.mrb[16].mxu0  ;;  %v734_v51 = vpop.f32.mrb[16].mxu1 }
 0x123   : > { %v773_v54 = vadd.f32 %v670_v50, %v272_v48  ;;  %v789_v55 = vadd.f32 %v734_v51, %v288_v49  ;;  %v672_v56 = vpop.f32.mrb[17].mxu0  ;;  %v736_v57 = vpop.f32.mrb[17].mxu1 }
 0x124   : > { %v673_v58 = vpop.f32.mrb[18].mxu0  ;;  %v737_v59 = vpop.f32.mrb[18].mxu1 }
 0x125   : > { %806 = vst.msk [vmem:[%s1197_s28 + $0x40] sm:$0xff] %vm231_vm0, %v773_v54  ;;  %822 = vst.msk [vmem:[%s1197_s28 + $0xc0] sm:$0xff] %vm231_vm0, %v789_v55  ;;  %v774_v60 = vadd.f32 %v673_v58, %v273_v52  ;;  %v790_v61 = vadd.f32 %v737_v59, %v289_v53  ;;  %v675_v62 = vpop.f32.mrb[19].mxu0  ;;  %v739_v63 = vpop.f32.mrb[19].mxu1 }
 0x127   : > { %807 = vst.msk [vmem:[%s1197_s28 + $0x48] sm:$0xff] %vm231_vm0, %v774_v60  ;;  %823 = vst.msk [vmem:[%s1197_s28 + $0xc8] sm:$0xff] %vm231_vm0, %v790_v61 }
 0x12a   : > { %v678_v2 = vpop.f32.mrb[20].mxu0  ;;  %v742_v3 = vpop.f32.mrb[20].mxu1 }
 0x12b   : > { %v775_v6 = vadd.f32 %v678_v2, %v274_v0  ;;  %v791_v7 = vadd.f32 %v742_v3, %v290_v1  ;;  %v680_v8 = vpop.f32.mrb[21].mxu0  ;;  %v744_v9 = vpop.f32.mrb[21].mxu1 }
 0x12c   : > { %v681_v10 = vpop.f32.mrb[22].mxu0  ;;  %v745_v11 = vpop.f32.mrb[22].mxu1 }
 0x12d   : > { %808 = vst.msk [vmem:[%s1197_s28 + $0x50] sm:$0xff] %vm231_vm0, %v775_v6  ;;  %824 = vst.msk [vmem:[%s1197_s28 + $0xd0] sm:$0xff] %vm231_vm0, %v791_v7  ;;  %v776_v12 = vadd.f32 %v681_v10, %v275_v4  ;;  %v792_v13 = vadd.f32 %v745_v11, %v291_v5  ;;  %v683_v14 = vpop.f32.mrb[23].mxu0  ;;  %v747_v15 = vpop.f32.mrb[23].mxu1 }
 0x12f   : > { %809 = vst.msk [vmem:[%s1197_s28 + $0x58] sm:$0xff] %vm231_vm0, %v776_v12  ;;  %825 = vst.msk [vmem:[%s1197_s28 + $0xd8] sm:$0xff] %vm231_vm0, %v792_v13 }
 0x132   : > { %v686_v18 = vpop.f32.mrb[24].mxu0  ;;  %v750_v19 = vpop.f32.mrb[24].mxu1 }
 0x133   : > { %v777_v22 = vadd.f32 %v686_v18, %v276_v16  ;;  %v793_v23 = vadd.f32 %v750_v19, %v292_v17  ;;  %v688_v24 = vpop.f32.mrb[25].mxu0  ;;  %v752_v25 = vpop.f32.mrb[25].mxu1 }
 0x134   : > { %v689_v26 = vpop.f32.mrb[26].mxu0  ;;  %v753_v27 = vpop.f32.mrb[26].mxu1 }
 0x135   : > { %810 = vst.msk [vmem:[%s1197_s28 + $0x60] sm:$0xff] %vm231_vm0, %v777_v22  ;;  %826 = vst.msk [vmem:[%s1197_s28 + $0xe0] sm:$0xff] %vm231_vm0, %v793_v23  ;;  %v778_v28 = vadd.f32 %v689_v26, %v277_v20  ;;  %v794_v29 = vadd.f32 %v753_v27, %v293_v21  ;;  %v691_v30 = vpop.f32.mrb[27].mxu0  ;;  %v755_v31 = vpop.f32.mrb[27].mxu1 }
 0x137   : > { %811 = vst.msk [vmem:[%s1197_s28 + $0x68] sm:$0xff] %vm231_vm0, %v778_v28  ;;  %827 = vst.msk [vmem:[%s1197_s28 + $0xe8] sm:$0xff] %vm231_vm0, %v794_v29 }
 0x13a   : > { %v694_v34 = vpop.f32.mrb[28].mxu0  ;;  %v758_v35 = vpop.f32.mrb[28].mxu1 }
 0x13b   : > { %v779_v38 = vadd.f32 %v694_v34, %v278_v32  ;;  %v795_v39 = vadd.f32 %v758_v35, %v294_v33  ;;  %v696_v40 = vpop.f32.mrb[29].mxu0  ;;  %v760_v41 = vpop.f32.mrb[29].mxu1 }
 0x13c   : > { %v697_v42 = vpop.f32.mrb[30].mxu0  ;;  %v761_v43 = vpop.f32.mrb[30].mxu1 }
 0x13d   : > { %812 = vst.msk [vmem:[%s1197_s28 + $0x70] sm:$0xff] %vm231_vm0, %v779_v38  ;;  %828 = vst.msk [vmem:[%s1197_s28 + $0xf0] sm:$0xff] %vm231_vm0, %v795_v39  ;;  %v780_v44 = vadd.f32 %v697_v42, %v279_v36  ;;  %v796_v45 = vadd.f32 %v761_v43, %v295_v37  ;;  %v699_v46 = vpop.f32.mrb[31].mxu0  ;;  %v763_v47 = vpop.f32.mrb[31].mxu1 }
 0x13f   : > { %813 = vst.msk [vmem:[%s1197_s28 + $0x78] sm:$0xff] %vm231_vm0, %v780_v44  ;;  %829 = vst.msk [vmem:[%s1197_s28 + $0xf8] sm:$0xff] %vm231_vm0, %v796_v45 }
 0x140 PF: > { %s12_s11 = sadd.s32 1, %s1131_s11   ;;  %s1449_s9 = smov %s1127_s10 }
 0x141   : > { %p9_p5 = scmp.ge.s32.totalorder %s12_s11, 4   ;;  %s1450_s10 = smov %s1452_s12 }
 0x143   :  { %11 = sbr.rel (!%p9_p5) target bundleno = 2 (0x2), region = 65 }

// kernel: _lambda_.43
= control target key start
LH: loop header
LB: loop body
LE: loop exit
PB: predicated region body
PF: predicated region fallthrough
CT: control target
= control target key end

     0   :  { %vm16_vm0 = vcmask 523264   ;;  %s1750_s1 = inlined_call_operand.vmem [shape: bf16[576,64], index: 1, kind: input, shape index: {}]   ;;  %s1751_s0 = inlined_call_operand.vmem [shape: bf16[128,576], index: 0, kind: input, shape index: {}]   ;;  %s1752_s2 = inlined_call_operand.vmem [shape: f32[128,64], index: 2, kind: output, shape index: {}]  }
   0x1   :  { %v1194_v0 = vld [vmem:[%s1750_s1 + $0x40] sm:$0xff]   ;;  %v1198_v4 = vld [vmem:[%s1750_s1 + $0x48] sm:$0xff]   ;;  %v1202_v8 = vld [vmem:[%s1750_s1 + $0x50] sm:$0xff]  }
   0x2   :  { %v1195_v1 = vld [vmem:[%s1750_s1 + $0xc0] sm:$0xff]   ;;  %1021 = vmatprep.subr.bf16.mxu0 %v1194_v0  ;;  %v1199_v5 = vld [vmem:[%s1750_s1 + $0xc8] sm:$0xff]   ;;  %v1203_v9 = vld [vmem:[%s1750_s1 + $0xd0] sm:$0xff]  }
   0x3   :  { %v1196_v2 = vld [vmem:[%s1750_s1] sm:$0xff]   ;;  %1085 = vmatprep.subr.bf16.mxu1 %v1195_v1  ;;  %v1200_v6 = vld [vmem:[%s1750_s1 + $0x8] sm:$0xff]   ;;  %v1204_v10 = vld [vmem:[%s1750_s1 + $0x10] sm:$0xff]  }
   0x4   :  { %v1197_v3 = vld [vmem:[%s1750_s1 + $0x80] sm:$0xff]   ;;  %1022 = vmatpush3.bf16.msra.mxu0 %v1196_v2  ;;  %v1201_v7 = vld [vmem:[%s1750_s1 + $0x88] sm:$0xff]   ;;  %v1205_v11 = vld [vmem:[%s1750_s1 + $0x90] sm:$0xff]  }
   0x5   :  { %1086 = vmatpush3.bf16.msra.mxu1 %v1197_v3  ;;  %1023 = vmatprep.subr.bf16.mxu0 %v1198_v4  ;;  %v1206_v12 = vld [vmem:[%s1750_s1 + $0x58] sm:$0xff]   ;;  %v1210_v16 = vld [vmem:[%s1750_s1 + $0x60] sm:$0xff]   ;;  %v1214_v20 = vld [vmem:[%s1750_s1 + $0x68] sm:$0xff]  }
   0x6   :  { %1087 = vmatprep.subr.bf16.mxu1 %v1199_v5  ;;  %v1207_v13 = vld [vmem:[%s1750_s1 + $0xd8] sm:$0xff]   ;;  %v1211_v17 = vld [vmem:[%s1750_s1 + $0xe0] sm:$0xff]   ;;  %v1215_v21 = vld [vmem:[%s1750_s1 + $0xe8] sm:$0xff]  }
   0x7   :  { %v1208_v14 = vld [vmem:[%s1750_s1 + $0x18] sm:$0xff]   ;;  %v1212_v18 = vld [vmem:[%s1750_s1 + $0x20] sm:$0xff]   ;;  %v1216_v22 = vld [vmem:[%s1750_s1 + $0x28] sm:$0xff]  }
   0x8   :  { %1024 = vmatpush3.bf16.msra.mxu0 %v1200_v6  ;;  %v1209_v15 = vld [vmem:[%s1750_s1 + $0x98] sm:$0xff]   ;;  %v1213_v19 = vld [vmem:[%s1750_s1 + $0xa0] sm:$0xff]   ;;  %v1217_v23 = vld [vmem:[%s1750_s1 + $0xa8] sm:$0xff]  }
   0x9   :  { %1088 = vmatpush3.bf16.msra.mxu1 %v1201_v7  ;;  %1025 = vmatprep.subr.bf16.mxu0 %v1202_v8  ;;  %v1218_v24 = vld [vmem:[%s1750_s1 + $0x70] sm:$0xff]   ;;  %v1222_v28 = vld [vmem:[%s1750_s1 + $0x78] sm:$0xff]   ;;  %v1231_v35 = vld [vmem:[%s1751_s0 + $0xc] ss:$20 sps:$4 sm:$0xff]  }
   0xa   :  { %1089 = vmatprep.subr.bf16.mxu1 %v1203_v9  ;;  %v1219_v25 = vld [vmem:[%s1750_s1 + $0xf0] sm:$0xff]   ;;  %v1223_v29 = vld [vmem:[%s1750_s1 + $0xf8] sm:$0xff]   ;;  %v1232_v36 = vld [vmem:[%s1750_s1 + $0x100] sm:$0xff]   ;;  %739 = vmatprep.mubr.bf16.mxu1 %v1231_v35 }
   0xb   :  { %v1220_v26 = vld [vmem:[%s1750_s1 + $0x30] sm:$0xff]   ;;  %v1224_v30 = vld [vmem:[%s1750_s1 + $0x38] sm:$0xff]   ;;  %v1233_v37 = vld [vmem:[%s1751_s0 + $0x2c] ss:$20 sps:$4 sm:$0xff]  }
   0xc   :  { %1026 = vmatpush3.bf16.msra.mxu0 %v1204_v10  ;;  %v1221_v27 = vld [vmem:[%s1750_s1 + $0xb0] sm:$0xff]   ;;  %v1225_v31 = vld [vmem:[%s1750_s1 + $0xb8] sm:$0xff]   ;;  %v1245_v42 = vld [vmem:[%s1750_s1 + $0x108] sm:$0xff]  }
   0xd   :  { %1090 = vmatpush3.bf16.msra.mxu1 %v1205_v11  ;;  %1027 = vmatprep.subr.bf16.mxu0 %v1206_v12  ;;  %v1226_v32 = vld [vmem:[%s1751_s0] ss:$20 sps:$4 sm:$0xff]   ;;  %v1228_v33 = vld [vmem:[%s1751_s0 + $0x4] ss:$20 sps:$4 sm:$0xff]   ;;  %v1229_v34 = vld [vmem:[%s1751_s0 + $0x8] ss:$20 sps:$4 sm:$0xff]  }
   0xe   :  { %1091 = vmatprep.subr.bf16.mxu1 %v1207_v13  ;;  %642 = vmatprep.mubr.bf16.mxu0 %v1228_v33  ;;  %v1235_v38 = vld [vmem:[%s1751_s0 + $0x34] ss:$20 sps:$4 sm:$0xff]   ;;  %v1238_v40 = vld [vmem:[%s1751_s0 + $0x30] ss:$20 sps:$4 sm:$0xff]   ;;  %v1244_v45 = vld [vmem:[%s1751_s0 + $0x58] ss:$20 sps:$4 sm:$0xff]  }
   0xf   :  { %v1237_v39 = vld [vmem:[%s1751_s0 + $0x28] ss:$20 sps:$4 sm:$0xff]   ;;  %v1243_v44 = vld [vmem:[%s1751_s0 + $0x50] ss:$20 sps:$4 sm:$0xff]   ;;  %v1250_v50 = vld [vmem:[%s1751_s0 + $0x78] ss:$20 sps:$4 sm:$0xff]  }
  0x10   :  { %1028 = vmatpush3.bf16.msra.mxu0 %v1208_v14  ;;  %v1239_v41 = vld [vmem:[%s1751_s0 + $0x54] ss:$20 sps:$4 sm:$0xff]   ;;  %v1241_v43 = vld [vmem:[%s1751_s0 + $0x5c] ss:$20 sps:$4 sm:$0xff]   ;;  %v1248_v48 = vld [vmem:[%s1751_s0 + $0x84] ss:$20 sps:$4 sm:$0xff]  }
  0x11   :  { %1092 = vmatpush3.bf16.msra.mxu1 %v1209_v15  ;;  %1029 = vmatprep.subr.bf16.mxu0 %v1210_v16  ;;  %v1258_v46 = vld [vmem:[%s1750_s1 + $0x110] sm:$0xff]   ;;  %v1271_v49 = vld [vmem:[%s1750_s1 + $0x118] sm:$0xff]   ;;  %v1254_v53 = vld [vmem:[%s1751_s0 + $0xac] ss:$20 sps:$4 sm:$0xff]   ;;  %v1286_v12 = vmov 0.0  }
  0x12   :  { %1093 = vmatprep.subr.bf16.mxu1 %v1211_v17  ;;  %v1246_v47 = vld [vmem:[%s1751_s0 + $0x7c] ss:$20 sps:$4 sm:$0xff]   ;;  %v1251_v51 = vld [vmem:[%s1751_s0 + $0x80] ss:$20 sps:$4 sm:$0xff]   ;;  %v1252_v52 = vld [vmem:[%s1751_s0 + $0xa4] ss:$20 sps:$4 sm:$0xff]  }
  0x13   :  { %v1256_v54 = vld [vmem:[%s1751_s0 + $0xa0] ss:$20 sps:$4 sm:$0xff]   ;;  %v1257_v55 = vld [vmem:[%s1751_s0 + $0xa8] ss:$20 sps:$4 sm:$0xff]   ;;  %v1264_v59 = vld [vmem:[%s1751_s0 + $0xd0] ss:$20 sps:$4 sm:$0xff]  }
  0x14   :  { %1030 = vmatpush3.bf16.msra.mxu0 %v1212_v18  ;;  %v1259_v56 = vld [vmem:[%s1751_s0 + $0xcc] ss:$20 sps:$4 sm:$0xff]   ;;  %v1261_v57 = vld [vmem:[%s1751_s0 + $0xd4] ss:$20 sps:$4 sm:$0xff]   ;;  %v1267_v61 = vld [vmem:[%s1751_s0 + $0xfc] ss:$20 sps:$4 sm:$0xff]  }
  0x15   :  { %1094 = vmatpush3.bf16.msra.mxu1 %v1213_v19  ;;  %1031 = vmatprep.subr.bf16.mxu0 %v1214_v20  ;;  %v1263_v58 = vld [vmem:[%s1751_s0 + $0xc8] ss:$20 sps:$4 sm:$0xff]   ;;  %v1269_v62 = vld [vmem:[%s1751_s0 + $0xf0] ss:$20 sps:$4 sm:$0xff]   ;;  %v1270_v63 = vld [vmem:[%s1751_s0 + $0xf8] ss:$20 sps:$4 sm:$0xff]  }
  0x16   :  { %1095 = vmatprep.subr.bf16.mxu1 %v1215_v21  ;;  %v1265_v60 = vld [vmem:[%s1751_s0 + $0xf4] ss:$20 sps:$4 sm:$0xff]   ;;  %v1272_v0 = vld [vmem:[%s1751_s0 + $0x11c] ss:$20 sps:$4 sm:$0xff]   ;;  %v1274_v1 = vld [vmem:[%s1751_s0 + $0x124] ss:$20 sps:$4 sm:$0xff]  }
  0x17   :  { %v1276_v2 = vld [vmem:[%s1751_s0 + $0x118] ss:$20 sps:$4 sm:$0xff]   ;;  %v1277_v3 = vld [vmem:[%s1751_s0 + $0x120] ss:$20 sps:$4 sm:$0xff]   ;;  %v1278_v4 = vld [vmem:[%s1751_s0 + $0x10] ss:$20 sps:$4 sm:$0xff]  }
  0x18   :  { %1032 = vmatpush3.bf16.msra.mxu0 %v1216_v22  ;;  %v1279_v5 = vld [vmem:[%s1751_s0 + $0xb0] ss:$20 sps:$4 sm:$0xff]   ;;  %v1280_v6 = vld [vmem:[%s1751_s0 + $0x38] ss:$20 sps:$4 sm:$0xff]   ;;  %v1282_v8 = vld [vmem:[%s1751_s0 + $0x60] ss:$20 sps:$4 sm:$0xff]  }
  0x19   :  { %1096 = vmatpush3.bf16.msra.mxu1 %v1217_v23  ;;  %1033 = vmatprep.subr.bf16.mxu0 %v1218_v24  ;;  %v1281_v7 = vld [vmem:[%s1751_s0 + $0xd8] ss:$20 sps:$4 sm:$0xff]   ;;  %v1283_v9 = vld [vmem:[%s1751_s0 + $0x100] ss:$20 sps:$4 sm:$0xff]   ;;  %v1284_v10 = vld [vmem:[%s1751_s0 + $0x88] ss:$20 sps:$4 sm:$0xff]  }
  0x1a   :  { %1097 = vmatprep.subr.bf16.mxu1 %v1219_v25  ;;  %v1285_v11 = vld [vmem:[%s1751_s0 + $0x128] ss:$20 sps:$4 sm:$0xff]   ;;  %19 = vst.msk [vmem:[%s1752_s2 + $0x10] sm:$0xff] %vm16_vm0, %v1286_v12  ;;  %17 = vst.msk [vmem:[%s1752_s2] sm:$0xff] %vm16_vm0, %v1286_v12 }
  0x1b   :  { %18 = vst.msk [vmem:[%s1752_s2 + $0x8] sm:$0xff] %vm16_vm0, %v1286_v12  ;;  %20 = vst.msk [vmem:[%s1752_s2 + $0x18] sm:$0xff] %vm16_vm0, %v1286_v12 }
  0x1c   :  { %1034 = vmatpush3.bf16.msra.mxu0 %v1220_v26  ;;  %21 = vst.msk [vmem:[%s1752_s2 + $0x20] sm:$0xff] %vm16_vm0, %v1286_v12  ;;  %22 = vst.msk [vmem:[%s1752_s2 + $0x28] sm:$0xff] %vm16_vm0, %v1286_v12 }
  0x1d   :  { %1098 = vmatpush3.bf16.msra.mxu1 %v1221_v27  ;;  %1035 = vmatprep.subr.bf16.mxu0 %v1222_v28  ;;  %23 = vst.msk [vmem:[%s1752_s2 + $0x30] sm:$0xff] %vm16_vm0, %v1286_v12  ;;  %24 = vst.msk [vmem:[%s1752_s2 + $0x38] sm:$0xff] %vm16_vm0, %v1286_v12 }
  0x1e   :  { %1099 = vmatprep.subr.bf16.mxu1 %v1223_v29  ;;  %25 = vst.msk [vmem:[%s1752_s2 + $0x40] sm:$0xff] %vm16_vm0, %v1286_v12  ;;  %26 = vst.msk [vmem:[%s1752_s2 + $0x48] sm:$0xff] %vm16_vm0, %v1286_v12 }
  0x1f   :  { %27 = vst.msk [vmem:[%s1752_s2 + $0x50] sm:$0xff] %vm16_vm0, %v1286_v12  ;;  %28 = vst.msk [vmem:[%s1752_s2 + $0x58] sm:$0xff] %vm16_vm0, %v1286_v12 }
  0x20   :  { %1036 = vmatpush3.bf16.msra.mxu0 %v1224_v30  ;;  %29 = vst.msk [vmem:[%s1752_s2 + $0x60] sm:$0xff] %vm16_vm0, %v1286_v12  ;;  %30 = vst.msk [vmem:[%s1752_s2 + $0x68] sm:$0xff] %vm16_vm0, %v1286_v12 }
  0x21   :  { %1100 = vmatpush3.bf16.msra.mxu1 %v1225_v31  ;;  %1161 = vmatprep.subr.bf16.mxu0 %v1232_v36  ;;  %31 = vst.msk [vmem:[%s1752_s2 + $0x70] sm:$0xff] %vm16_vm0, %v1286_v12  ;;  %32 = vst.msk [vmem:[%s1752_s2 + $0x78] sm:$0xff] %vm16_vm0, %v1286_v12 }
  0x22   :  { %1185 = vmatprep.subr.bf16.mxu1 %v1232_v36 }
  0x23   :  { %643 = vmatmul.mubr.bf16.vlgmr.msra.gmra.mrb[0].mxu0 %v1226_v32 }
  0x24   :  { %740 = vmatmul.mubr.bf16.vlgmr.msra.gmra.mrb[0].mxu1 %v1229_v34  ;;  %1162 = vmatpush3.bf16.msra.mxu0 %v1232_v36 }
  0x25   :  { %1189 = vmatpush3.bf16.msra.mxu1 %v1232_v36  ;;  %650 = vmatprep.mubr.bf16.mxu0 %v1233_v37 }
  0x26   :  { %747 = vmatprep.mubr.bf16.mxu1 %v1235_v38  ;;  %1163 = vmatprep.subr.bf16.mxu0 %v1245_v42 }
  0x27   :  { %1186 = vmatprep.subr.bf16.mxu1 %v1245_v42 }
  0x28   :  { %1164 = vmatpush3.bf16.msra.mxu0 %v1245_v42 }
  0x29   :  { %1190 = vmatpush3.bf16.msra.mxu1 %v1245_v42  ;;  %1165 = vmatprep.subr.bf16.mxu0 %v1258_v46 }
  0x2a   :  { %1187 = vmatprep.subr.bf16.mxu1 %v1258_v46 }
  0x2b   :  { %651 = vmatmul.mubr.bf16.gmra.mrb[4].mxu0 %v1237_v39 }
  0x2c   :  { %748 = vmatmul.mubr.bf16.gmra.mrb[4].mxu1 %v1238_v40  ;;  %658 = vmatprep.mubr.bf16.mxu0 %v1239_v41 }
  0x2d   :  { %755 = vmatprep.mubr.bf16.mxu1 %v1241_v43  ;;  %1166 = vmatpush3.bf16.msra.mxu0 %v1258_v46 }
  0x2e   :  { %1191 = vmatpush3.bf16.msra.mxu1 %v1258_v46  ;;  %1167 = vmatprep.subr.bf16.mxu0 %v1271_v49 }
  0x2f   :  { %1188 = vmatprep.subr.bf16.mxu1 %v1271_v49 }
  0x31   :  { %1168 = vmatpush3.bf16.msra.mxu0 %v1271_v49 }
  0x32   :  { %1192 = vmatpush3.bf16.msra.mxu1 %v1271_v49 }
  0x33   :  { %659 = vmatmul.mubr.bf16.gmra.mrb[8].mxu0 %v1243_v44 }
  0x34   :  { %756 = vmatmul.mubr.bf16.gmra.mrb[8].mxu1 %v1244_v45  ;;  %666 = vmatprep.mubr.bf16.mxu0 %v1246_v47 }
  0x35   :  { %763 = vmatprep.mubr.bf16.mxu1 %v1248_v48 }
  0x3b   :  { %667 = vmatmul.mubr.bf16.gmra.mrb[12].mxu0 %v1250_v50 }
  0x3c   :  { %764 = vmatmul.mubr.bf16.gmra.mrb[12].mxu1 %v1251_v51  ;;  %674 = vmatprep.mubr.bf16.mxu0 %v1252_v52 }
  0x3d   :  { %771 = vmatprep.mubr.bf16.mxu1 %v1254_v53 }
  0x43   :  { %675 = vmatmul.mubr.bf16.gmra.mrb[16].mxu0 %v1256_v54 }
  0x44   :  { %772 = vmatmul.mubr.bf16.gmra.mrb[16].mxu1 %v1257_v55  ;;  %682 = vmatprep.mubr.bf16.mxu0 %v1259_v56 }
  0x45   :  { %779 = vmatprep.mubr.bf16.mxu1 %v1261_v57 }
  0x4b   :  { %683 = vmatmul.mubr.bf16.gmra.mrb[20].mxu0 %v1263_v58 }
  0x4c   :  { %780 = vmatmul.mubr.bf16.gmra.mrb[20].mxu1 %v1264_v59  ;;  %690 = vmatprep.mubr.bf16.mxu0 %v1265_v60 }
  0x4d   :  { %787 = vmatprep.mubr.bf16.mxu1 %v1267_v61 }
  0x53   :  { %691 = vmatmul.mubr.bf16.gmra.mrb[24].mxu0 %v1269_v62 }
  0x54   :  { %788 = vmatmul.mubr.bf16.gmra.mrb[24].mxu1 %v1270_v63  ;;  %698 = vmatprep.mubr.bf16.mxu0 %v1272_v0 }
  0x55   :  { %795 = vmatprep.mubr.bf16.mxu1 %v1274_v1 }
  0x5b   :  { %699 = vmatmul.mubr.bf16.gmra.mrb[28].mxu0 %v1276_v2 }
  0x5c   :  { %796 = vmatmul.mubr.bf16.gmra.mrb[28].mxu1 %v1277_v3  ;;  %1169 = vmatprep.mubr.msk.bf16.mxu0 %vm16_vm0, %v1278_v4 }
  0x5d   :  { %1177 = vmatprep.mubr.msk.bf16.mxu1 %vm16_vm0, %v1279_v5 }
  0x63   :  { %1170 = vmatmul.mubr.msk.bf16.vlgmr.msra.gmra.mrb[32].mxu0 %vm16_vm0, %v1280_v6 }
  0x64   :  { %1178 = vmatmul.mubr.msk.bf16.vlgmr.msra.gmra.mrb[32].mxu1 %vm16_vm0, %v1281_v7  ;;  %1173 = vmatprep.mubr.msk.bf16.mxu0 %vm16_vm0, %v1282_v8 }
  0x65   :  { %1181 = vmatprep.mubr.msk.bf16.mxu1 %vm16_vm0, %v1283_v9 }
  0x6b   :  { %1174 = vmatmul.mubr.msk.bf16.gmra.mrb[36].mxu0 %vm16_vm0, %v1284_v10 }
  0x6c   :  { %1182 = vmatmul.mubr.msk.bf16.gmra.mrb[36].mxu1 %vm16_vm0, %v1285_v11 }
  0xf6   :  { %v1037_v13 = vpop.f32.mrb[0].mxu0 }
  0xf7   :  { %v1101_v14 = vpop.f32.mrb[0].mxu1  ;;  %v1038_v15 = vpop.f32.mrb[1].mxu0 }
  0xf8   :  { %v1039_v16 = vadd.f32 %v1038_v15, %v1037_v13  ;;  %v1102_v17 = vpop.f32.mrb[1].mxu1  ;;  %v1040_v18 = vpop.f32.mrb[2].mxu0 }
  0xf9   :  { %v1103_v19 = vadd.f32 %v1102_v17, %v1101_v14  ;;  %v1104_v20 = vpop.f32.mrb[2].mxu1  ;;  %v1041_v21 = vpop.f32.mrb[3].mxu0 }
  0xfa   :  { %v1042_v22 = vadd.f32 %v1041_v21, %v1040_v18  ;;  %v1105_v23 = vpop.f32.mrb[3].mxu1 }
  0xfb   :  { %v1106_v24 = vadd.f32 %v1105_v23, %v1104_v20  ;;  %v1602_v25 = vadd.f32 %v1103_v19, %v1039_v16 }
  0xfd   :  { %v1604_v26 = vadd.f32 %v1106_v24, %v1042_v22 }
  0xfe   :  { %v1043_v27 = vpop.f32.mrb[4].mxu0 }
  0xff   :  { %v1107_v28 = vpop.f32.mrb[4].mxu1  ;;  %v1044_v29 = vpop.f32.mrb[5].mxu0 }
 0x100   :  { %v1045_v30 = vadd.f32 %v1044_v29, %v1043_v27  ;;  %v1108_v31 = vpop.f32.mrb[5].mxu1  ;;  %v1046_v32 = vpop.f32.mrb[6].mxu0 }
 0x101   :  { %v1109_v33 = vadd.f32 %v1108_v31, %v1107_v28  ;;  %v1110_v34 = vpop.f32.mrb[6].mxu1  ;;  %v1047_v35 = vpop.f32.mrb[7].mxu0 }
 0x102   :  { %v1048_v36 = vadd.f32 %v1047_v35, %v1046_v32  ;;  %v1111_v37 = vpop.f32.mrb[7].mxu1 }
 0x103   :  { %v1112_v38 = vadd.f32 %v1111_v37, %v1110_v34  ;;  %v1606_v39 = vadd.f32 %v1109_v33, %v1045_v30 }
 0x105   :  { %v1608_v40 = vadd.f32 %v1112_v38, %v1048_v36 }
 0x106   :  { %v1049_v41 = vpop.f32.mrb[8].mxu0 }
 0x107   :  { %v1113_v42 = vpop.f32.mrb[8].mxu1  ;;  %v1050_v43 = vpop.f32.mrb[9].mxu0 }
 0x108   :  { %v1051_v44 = vadd.f32 %v1050_v43, %v1049_v41  ;;  %v1114_v45 = vpop.f32.mrb[9].mxu1  ;;  %v1052_v46 = vpop.f32.mrb[10].mxu0 }
 0x109   :  { %v1115_v47 = vadd.f32 %v1114_v45, %v1113_v42  ;;  %v1116_v48 = vpop.f32.mrb[10].mxu1  ;;  %v1053_v49 = vpop.f32.mrb[11].mxu0 }
 0x10a   :  { %v1054_v50 = vadd.f32 %v1053_v49, %v1052_v46  ;;  %v1117_v51 = vpop.f32.mrb[11].mxu1 }
 0x10b   :  { %v1118_v52 = vadd.f32 %v1117_v51, %v1116_v48  ;;  %v1610_v53 = vadd.f32 %v1115_v47, %v1051_v44 }
 0x10d   :  { %v1612_v54 = vadd.f32 %v1118_v52, %v1054_v50 }
 0x10e   :  { %v1055_v55 = vpop.f32.mrb[12].mxu0 }
 0x10f   :  { %v1119_v56 = vpop.f32.mrb[12].mxu1  ;;  %v1056_v57 = vpop.f32.mrb[13].mxu0 }
 0x110   :  { %v1057_v58 = vadd.f32 %v1056_v57, %v1055_v55  ;;  %v1120_v59 = vpop.f32.mrb[13].mxu1  ;;  %v1058_v60 = vpop.f32.mrb[14].mxu0 }
 0x111   :  { %v1121_v61 = vadd.f32 %v1120_v59, %v1119_v56  ;;  %v1122_v62 = vpop.f32.mrb[14].mxu1  ;;  %v1059_v63 = vpop.f32.mrb[15].mxu0 }
 0x112   :  { %v1060_v0 = vadd.f32 %v1059_v63, %v1058_v60  ;;  %v1123_v1 = vpop.f32.mrb[15].mxu1 }
 0x113   :  { %v1124_v2 = vadd.f32 %v1123_v1, %v1122_v62  ;;  %v1614_v3 = vadd.f32 %v1121_v61, %v1057_v58 }
 0x115   :  { %v1616_v4 = vadd.f32 %v1124_v2, %v1060_v0 }
 0x116   :  { %v1061_v5 = vpop.f32.mrb[16].mxu0 }
 0x117   :  { %v1125_v6 = vpop.f32.mrb[16].mxu1  ;;  %v1062_v7 = vpop.f32.mrb[17].mxu0 }
 0x118   :  { %v1063_v8 = vadd.f32 %v1062_v7, %v1061_v5  ;;  %v1126_v9 = vpop.f32.mrb[17].mxu1  ;;  %v1064_v10 = vpop.f32.mrb[18].mxu0  ;;  %v35_v5 = vld [vmem:[%s1752_s2 + $0x10] sm:$0xff] }
 0x119   :  { %v1127_v11 = vadd.f32 %v1126_v9, %v1125_v6  ;;  %v1128_v12 = vpop.f32.mrb[18].mxu1  ;;  %v1065_v13 = vpop.f32.mrb[19].mxu0 }
 0x11a   :  { %v1066_v14 = vadd.f32 %v1065_v13, %v1064_v10  ;;  %v1129_v15 = vpop.f32.mrb[19].mxu1  ;;  %v33_v10 = vld [vmem:[%s1752_s2] sm:$0xff] }
 0x11b   :  { %v1130_v16 = vadd.f32 %v1129_v15, %v1128_v12  ;;  %v774_v17 = vadd.f32 %v1127_v11, %v1063_v8  ;;  %v43_v8 = vld [vmem:[%s1752_s2 + $0x50] sm:$0xff] }
 0x11d   :  { %v1618_v18 = vadd.f32 %v1130_v16, %v1066_v14  ;;  %v41_v14 = vld [vmem:[%s1752_s2 + $0x40] sm:$0xff] }
 0x11e   :  { %v1067_v19 = vpop.f32.mrb[20].mxu0 }
 0x11f   :  { %v1131_v20 = vpop.f32.mrb[20].mxu1  ;;  %v1068_v21 = vpop.f32.mrb[21].mxu0 }
 0x120   :  { %v1069_v22 = vadd.f32 %v1068_v21, %v1067_v19  ;;  %v1132_v23 = vpop.f32.mrb[21].mxu1  ;;  %v1070_v24 = vpop.f32.mrb[22].mxu0 }
 0x121   :  { %v1133_v27 = vadd.f32 %v1132_v23, %v1131_v20  ;;  %v1134_v28 = vpop.f32.mrb[22].mxu1  ;;  %v1071_v29 = vpop.f32.mrb[23].mxu0 }
 0x122   :  { %v1072_v30 = vadd.f32 %v1071_v29, %v1070_v24  ;;  %v1135_v31 = vpop.f32.mrb[23].mxu1 }
 0x123   :  { %v1136_v32 = vadd.f32 %v1135_v31, %v1134_v28  ;;  %v782_v33 = vadd.f32 %v1133_v27, %v1069_v22  ;;  %v44_v22 = vld [vmem:[%s1752_s2 + $0x58] sm:$0xff] }
 0x125   :  { %v785_v34 = vadd.f32 %v1136_v32, %v1072_v30 }
 0x126   :  { %v1073_v35 = vpop.f32.mrb[24].mxu0 }
 0x127   :  { %v1137_v36 = vpop.f32.mrb[24].mxu1  ;;  %v1074_v37 = vpop.f32.mrb[25].mxu0 }
 0x128   :  { %v1075_v38 = vadd.f32 %v1074_v37, %v1073_v35  ;;  %v1138_v41 = vpop.f32.mrb[25].mxu1  ;;  %v1076_v42 = vpop.f32.mrb[26].mxu0  ;;  %v39_v35 = vld [vmem:[%s1752_s2 + $0x30] sm:$0xff] }
 0x129   :  { %v1139_v43 = vadd.f32 %v1138_v41, %v1137_v36  ;;  %v1140_v44 = vpop.f32.mrb[26].mxu1  ;;  %v1077_v45 = vpop.f32.mrb[27].mxu0 }
 0x12a   :  { %v1078_v46 = vadd.f32 %v1077_v45, %v1076_v42  ;;  %v1141_v47 = vpop.f32.mrb[27].mxu1  ;;  %v37_v42 = vld [vmem:[%s1752_s2 + $0x20] sm:$0xff] }
 0x12b   :  { %v1142_v48 = vadd.f32 %v1141_v47, %v1140_v44  ;;  %v1620_v49 = vadd.f32 %v1139_v43, %v1075_v38  ;;  %v47_v38 = vld [vmem:[%s1752_s2 + $0x70] sm:$0xff] }
 0x12d   :  { %v1622_v50 = vadd.f32 %v1142_v48, %v1078_v46  ;;  %v45_v46 = vld [vmem:[%s1752_s2 + $0x60] sm:$0xff] }
 0x12e   :  { %v1079_v51 = vpop.f32.mrb[28].mxu0 }
 0x12f   :  { %v1143_v52 = vpop.f32.mrb[28].mxu1  ;;  %v1080_v55 = vpop.f32.mrb[29].mxu0 }
 0x130   :  { %v1081_v56 = vadd.f32 %v1080_v55, %v1079_v51  ;;  %v1144_v57 = vpop.f32.mrb[29].mxu1  ;;  %v1082_v58 = vpop.f32.mrb[30].mxu0 }
 0x131   :  { %v1145_v59 = vadd.f32 %v1144_v57, %v1143_v52  ;;  %v1146_v60 = vpop.f32.mrb[30].mxu1  ;;  %v1083_v61 = vpop.f32.mrb[31].mxu0  ;;  %v38_v57 = vld [vmem:[%s1752_s2 + $0x28] sm:$0xff] }
 0x132   :  { %v1084_v62 = vadd.f32 %v1083_v61, %v1082_v58  ;;  %v1147_v63 = vpop.f32.mrb[31].mxu1 }
 0x133   :  { %v1148_v0 = vadd.f32 %v1147_v63, %v1146_v60  ;;  %v798_v1 = vadd.f32 %v1145_v59, %v1081_v56  ;;  %v48_v56 = vld [vmem:[%s1752_s2 + $0x78] sm:$0xff] }
 0x135   :  { %v1624_v2 = vadd.f32 %v1148_v0, %v1084_v62 }
 0x136   :  { %v1171_v6 = vpop.f32.mrb[32].mxu0 }
 0x137   :  { %v847_v7 = vadd.f32 %v1171_v6, %v1606_v39  ;;  %v1179_v9 = vpop.f32.mrb[32].mxu1  ;;  %v838_v11 = vpop.f32.mrb[33].mxu0  ;;  %v36_v39 = vld [vmem:[%s1752_s2 + $0x18] sm:$0xff] }
 0x138   :  { %v879_v12 = vadd.f32 %v1179_v9, %v782_v33  ;;  %v839_v13 = vadd.f32 %v838_v11, %v1602_v25  ;;  %v870_v15 = vpop.f32.mrb[33].mxu1  ;;  %v1172_v16 = vpop.f32.mrb[34].mxu0  ;;  %v34_v25 = vld [vmem:[%s1752_s2 + $0x8] sm:$0xff] }
 0x139   :  { %v903_v19 = vadd.f32 %v847_v7, %v35_v5  ;;  %v871_v20 = vadd.f32 %v870_v15, %v774_v17  ;;  %v850_v21 = vadd.f32 %v1172_v16, %v1608_v40  ;;  %v1180_v23 = vpop.f32.mrb[34].mxu1  ;;  %v841_v24 = vpop.f32.mrb[35].mxu0  ;;  %v42_v17 = vld [vmem:[%s1752_s2 + $0x48] sm:$0xff] }
 0x13a   :  { %v911_v27 = vadd.f32 %v879_v12, %v43_v8  ;;  %v901_v28 = vadd.f32 %v839_v13, %v33_v10  ;;  %v882_v29 = vadd.f32 %v1180_v23, %v785_v34  ;;  %v842_v30 = vadd.f32 %v841_v24, %v1604_v26  ;;  %v873_v40 = vpop.f32.mrb[35].mxu1 }
 0x13b   :  { %919 = vst.msk [vmem:[%s1752_s2 + $0x10] sm:$0xff] %vm16_vm0, %v903_v19  ;;  %v909_v31 = vadd.f32 %v871_v20, %v41_v14  ;;  %v904_v32 = vadd.f32 %v850_v21, %v36_v39  ;;  %v874_v33 = vadd.f32 %v873_v40, %v1618_v18 }
 0x13c   :  { %927 = vst.msk [vmem:[%s1752_s2 + $0x50] sm:$0xff] %vm16_vm0, %v911_v27  ;;  %917 = vst.msk [vmem:[%s1752_s2] sm:$0xff] %vm16_vm0, %v901_v28  ;;  %v912_v26 = vadd.f32 %v882_v29, %v44_v22  ;;  %v902_v34 = vadd.f32 %v842_v30, %v34_v25 }
 0x13d   :  { %925 = vst.msk [vmem:[%s1752_s2 + $0x40] sm:$0xff] %vm16_vm0, %v909_v31  ;;  %920 = vst.msk [vmem:[%s1752_s2 + $0x18] sm:$0xff] %vm16_vm0, %v904_v32  ;;  %v910_v18 = vadd.f32 %v874_v33, %v42_v17 }
 0x13e   :  { %928 = vst.msk [vmem:[%s1752_s2 + $0x58] sm:$0xff] %vm16_vm0, %v912_v26  ;;  %918 = vst.msk [vmem:[%s1752_s2 + $0x8] sm:$0xff] %vm16_vm0, %v902_v34  ;;  %v1175_v36 = vpop.f32.mrb[36].mxu0 }
 0x13f   :  { %926 = vst.msk [vmem:[%s1752_s2 + $0x48] sm:$0xff] %vm16_vm0, %v910_v18  ;;  %v863_v37 = vadd.f32 %v1175_v36, %v1614_v3  ;;  %v1183_v41 = vpop.f32.mrb[36].mxu1  ;;  %v854_v43 = vpop.f32.mrb[37].mxu0  ;;  %v40_v3 = vld [vmem:[%s1752_s2 + $0x38] sm:$0xff] }
 0x140   :  { %v895_v44 = vadd.f32 %v1183_v41, %v798_v1  ;;  %v855_v45 = vadd.f32 %v854_v43, %v1610_v53  ;;  %v886_v47 = vpop.f32.mrb[37].mxu1  ;;  %v1176_v48 = vpop.f32.mrb[38].mxu0 }
 0x141   :  { %v907_v51 = vadd.f32 %v863_v37, %v39_v35  ;;  %v887_v52 = vadd.f32 %v886_v47, %v1620_v49  ;;  %v866_v55 = vadd.f32 %v1176_v48, %v1616_v4  ;;  %v1184_v53 = vpop.f32.mrb[38].mxu1  ;;  %v857_v58 = vpop.f32.mrb[39].mxu0  ;;  %v46_v4 = vld [vmem:[%s1752_s2 + $0x68] sm:$0xff] }
 0x142   :  { %v915_v59 = vadd.f32 %v895_v44, %v47_v38  ;;  %v905_v60 = vadd.f32 %v855_v45, %v37_v42  ;;  %v898_v61 = vadd.f32 %v1184_v53, %v1624_v2  ;;  %v858_v62 = vadd.f32 %v857_v58, %v1612_v54  ;;  %v889_v49 = vpop.f32.mrb[39].mxu1 }
 0x143   :  { %923 = vst.msk [vmem:[%s1752_s2 + $0x30] sm:$0xff] %vm16_vm0, %v907_v51  ;;  %v913_v63 = vadd.f32 %v887_v52, %v45_v46  ;;  %v908_v0 = vadd.f32 %v866_v55, %v40_v3  ;;  %v890_v1 = vadd.f32 %v889_v49, %v1622_v50 }
 0x144   :  { %931 = vst.msk [vmem:[%s1752_s2 + $0x70] sm:$0xff] %vm16_vm0, %v915_v59  ;;  %921 = vst.msk [vmem:[%s1752_s2 + $0x20] sm:$0xff] %vm16_vm0, %v905_v60  ;;  %v916_v54 = vadd.f32 %v898_v61, %v48_v56  ;;  %v906_v2 = vadd.f32 %v858_v62, %v38_v57 }
 0x145   :  { %929 = vst.msk [vmem:[%s1752_s2 + $0x60] sm:$0xff] %vm16_vm0, %v913_v63  ;;  %924 = vst.msk [vmem:[%s1752_s2 + $0x38] sm:$0xff] %vm16_vm0, %v908_v0  ;;  %v914_v50 = vadd.f32 %v890_v1, %v46_v4 }
 0x146   :  { %932 = vst.msk [vmem:[%s1752_s2 + $0x78] sm:$0xff] %vm16_vm0, %v916_v54  ;;  %922 = vst.msk [vmem:[%s1752_s2 + $0x28] sm:$0xff] %vm16_vm0, %v906_v2 }
 0x147   :  { %930 = vst.msk [vmem:[%s1752_s2 + $0x68] sm:$0xff] %vm16_vm0, %v914_v50 }

// kernel: _lambda_.44
= control target key start
LH: loop header
LB: loop body
LE: loop exit
PB: predicated region body
PF: predicated region fallthrough
CT: control target
= control target key end

     0   :  { %s143_s28 = smov 64   ;;  %v78_v51 = vlaneseq  ;;  %vm85_vm0 = vcmask 523264   ;;  %s260_s0 = inlined_call_operand.vmem [shape: f32[64,128], index: 0, kind: input, shape index: {}]   ;;  %s261_s1 = inlined_call_operand.vmem [shape: f32[1,64], index: 1, kind: input, shape index: {}]   ;;  %s262_s2 = inlined_call_operand.vmem [shape: f32[1,64], index: 2, kind: input, shape index: {}]   ;;  %s263_s3 = inlined_call_operand.vmem [shape: f32[64,128], index: 3, kind: output, shape index: {}]  }
   0x1   :  { %v167_v0 = vld [vmem:[%s260_s0] sm:$0xff]  ;;  %v172_v1 = vld [vmem:[%s260_s0 + $0x8] sm:$0xff]  ;;  %v177_v2 = vld [vmem:[%s260_s0 + $0x10] sm:$0xff] }
   0x2   :  { %v22_v3 = vadd.f32 %v172_v1, %v167_v0  ;;  %v35_v4 = vmul.f32 %v167_v0, %v167_v0  ;;  %v36_v5 = vmul.f32 %v172_v1, %v172_v1  ;;  %v37_v6 = vmul.f32 %v177_v2, %v177_v2  ;;  %v190_v7 = vld [vmem:[%s260_s0 + $0x18] sm:$0xff]  ;;  %v198_v11 = vld [vmem:[%s260_s0 + $0x20] sm:$0xff]  ;;  %v206_v15 = vld [vmem:[%s260_s0 + $0x28] sm:$0xff] }
   0x3   :  { %v38_v9 = vmul.f32 %v190_v7, %v190_v7  ;;  %v39_v13 = vmul.f32 %v198_v11, %v198_v11  ;;  %v40_v17 = vmul.f32 %v206_v15, %v206_v15  ;;  %v214_v19 = vld [vmem:[%s260_s0 + $0x30] sm:$0xff]  ;;  %v21_v23 = vld [vmem:[%s260_s0 + $0x38] sm:$0xff]  ;;  %v79_v52 = vshrl.u32 %v78_v51, 7  ;;  %v70_v53 = vld [vmem:[%s261_s1] sm:$0x1] }
   0x4   :  { %v23_v8 = vadd.f32 %v22_v3, %v177_v2  ;;  %v43_v10 = vadd.f32 %v36_v5, %v35_v4  ;;  %v41_v21 = vmul.f32 %v214_v19, %v214_v19  ;;  %v42_v25 = vmul.f32 %v21_v23, %v21_v23  ;;  %v74_v57 = vld [vmem:[%s262_s2] sm:$0x1] }
   0x5   :  { %v80_v54 = vsub.s32 0, %v79_v52 }
   0x6   :  { %v24_v12 = vadd.f32 %v23_v8, %v190_v7  ;;  %v44_v14 = vadd.f32 %v43_v10, %v37_v6 }
   0x8   :  { %v25_v16 = vadd.f32 %v24_v12, %v198_v11  ;;  %v45_v18 = vadd.f32 %v44_v14, %v38_v9 }
   0xa   :  { %v26_v20 = vadd.f32 %v25_v16, %v206_v15  ;;  %v46_v22 = vadd.f32 %v45_v18, %v39_v13 }
   0xc   :  { %v27_v24 = vadd.f32 %v26_v20, %v214_v19  ;;  %v47_v26 = vadd.f32 %v46_v22, %v40_v17 }
   0xe   :  { %v28_v27 = vadd.f32 %v27_v24, %v21_v23  ;;  %v48_v28 = vadd.f32 %v47_v26, %v41_v21 }
  0x10   :  { %v29_v29 = vrot.slane %v28_v27, 4  ;;  %v49_v30 = vadd.f32 %v48_v28, %v42_v25 }
  0x12   :  { %v30_v31 = vadd.f32 %v29_v29, %v28_v27  ;;  %v50_v32 = vrot.slane %v49_v30, 4 }
  0x14   :  { %v31_v33 = vrot.slane %v30_v31, 2  ;;  %v51_v34 = vadd.f32 %v50_v32, %v49_v30 }
  0x16   :  { %v32_v35 = vadd.f32 %v31_v33, %v30_v31  ;;  %v52_v36 = vrot.slane %v51_v34, 2 }
  0x18   :  { %v33_v37 = vrot.slane %v32_v35, 1  ;;  %v53_v38 = vadd.f32 %v52_v36, %v51_v34 }
  0x1a   :  { %v34_v39 = vadd.f32 %v33_v37, %v32_v35  ;;  %v54_v40 = vrot.slane %v53_v38, 1 }
  0x1c   :  { %57 = vrot.lane.b32.xlu0 %v34_v39, %s143_s28  ;;  %v55_v41 = vadd.f32 %v54_v40, %v53_v38 }
  0x20   :  { %62 = vrot.lane.b32.xlu0 %v55_v41, %s143_s28 }
  0x8e   :  { %v58_v42 = vpop.permute.xlu0 %57 }
  0x8f   :  { %v60_v43 = vadd.f32 %v58_v42, %v34_v39 }
  0x91   :  { %v66_v44 = vmul.f32 0.0078125, %v60_v43 }
  0x92   :  { %v63_v45 = vpop.permute.xlu0 %62 }
  0x93   :  { %v65_v46 = vadd.f32 %v63_v45, %v55_v41  ;;  %v68_v47 = vmul.f32 %v66_v44, %v66_v44 }
  0x95   :  { %v67_v48 = vmul.f32 0.0078125, %v65_v46 }
  0x97   :  { %v69_v49 = vsub.f32 %v67_v48, %v68_v47 }
  0x99   :  { %v71_v50 = vadd.f32 1e-05, %v69_v49 }
  0x9b   :  { %141 = vrsqrt.f32 %v71_v50 }
  0xa5   :  { %v142_v55 = vpop.eup %141 }
  0xa6   :  { %v73_v56 = vmul.f32 %v142_v55, %v70_v53 }
  0xa8   :  { %v81_v58 = vrot.slane %v73_v56, %v80_v54  ;;  %v75_v59 = vmul.f32 %v73_v56, %v66_v44 }
  0xaa   :  { %82 = vrot.lane.b32.xlu1 %v81_v58, %s143_s28  ;;  %v76_v60 = vsub.f32 %v74_v57, %v75_v59 }
  0xac   :  { %v91_v61 = vrot.slane %v76_v60, %v80_v54 }
  0xae   :  { %92 = vrot.lane.b32.xlu1 %v91_v61, %s143_s28 }
 0x11c   :  { %v83_v62 = vpop.permute.xlu1 %82 }
 0x11d   :  { %v86_v63 = vsel %vm85_vm0, %v73_v56, %v83_v62 }
 0x11e   :  { %v99_v3 = vrot.slane %v86_v63, %v80_v54 }
 0x120   :  { %v93_v4 = vpop.permute.xlu1 %92  ;;  %v100_v5 = vmul.f32 %v99_v3, %v167_v0  ;;  %v101_v8 = vmul.f32 %v99_v3, %v172_v1  ;;  %v102_v9 = vmul.f32 %v99_v3, %v177_v2  ;;  %v103_v10 = vmul.f32 %v99_v3, %v190_v7 }
 0x121   :  { %v95_v6 = vsel %vm85_vm0, %v76_v60, %v93_v4  ;;  %v104_v13 = vmul.f32 %v99_v3, %v198_v11  ;;  %v105_v14 = vmul.f32 %v99_v3, %v206_v15  ;;  %v106_v16 = vmul.f32 %v99_v3, %v214_v19 }
 0x122   :  { %v111_v12 = vrot.slane %v95_v6, %v80_v54  ;;  %v107_v17 = vmul.f32 %v99_v3, %v21_v23 }
 0x124   :  { %v112_v18 = vadd.f32 %v111_v12, %v100_v5  ;;  %v113_v20 = vadd.f32 %v111_v12, %v101_v8  ;;  %v114_v21 = vadd.f32 %v111_v12, %v102_v9  ;;  %v115_v22 = vadd.f32 %v111_v12, %v103_v10 }
 0x125   :  { %v116_v0 = vadd.f32 %v111_v12, %v104_v13  ;;  %v117_v24 = vadd.f32 %v111_v12, %v105_v14  ;;  %v118_v25 = vadd.f32 %v111_v12, %v106_v16  ;;  %v119_v1 = vadd.f32 %v111_v12, %v107_v17 }
 0x126   :  { %v120_v26 = vmax.f32 %v112_v18, 0.0  ;;  %v121_v2 = vmax.f32 %v113_v20, 0.0  ;;  %v122_v27 = vmax.f32 %v114_v21, 0.0  ;;  %v123_v7 = vmax.f32 %v115_v22, 0.0 }
 0x127   :  { %v124_v28 = vmax.f32 %v116_v0, 0.0  ;;  %v125_v29 = vmax.f32 %v117_v24, 0.0  ;;  %v126_v11 = vmax.f32 %v118_v25, 0.0  ;;  %v127_v30 = vmax.f32 %v119_v1, 0.0 }
 0x128   :  { %128 = vst [vmem:[%s263_s3] sm:$0xff] %v120_v26  ;;  %129 = vst [vmem:[%s263_s3 + $0x8] sm:$0xff] %v121_v2 }
 0x129   :  { %130 = vst [vmem:[%s263_s3 + $0x10] sm:$0xff] %v122_v27  ;;  %131 = vst [vmem:[%s263_s3 + $0x18] sm:$0xff] %v123_v7 }
 0x12a   :  { %132 = vst [vmem:[%s263_s3 + $0x20] sm:$0xff] %v124_v28  ;;  %133 = vst [vmem:[%s263_s3 + $0x28] sm:$0xff] %v125_v29 }
 0x12b   :  { %134 = vst [vmem:[%s263_s3 + $0x30] sm:$0xff] %v126_v11  ;;  %135 = vst [vmem:[%s263_s3 + $0x38] sm:$0xff] %v127_v30 }

// kernel: _lambda_.46
= control target key start
LH: loop header
LB: loop body
LE: loop exit
PB: predicated region body
PF: predicated region fallthrough
CT: control target
= control target key end

     0   :  { %v81_v51 = vlaneseq  ;;  %vm88_vm0 = vcmask 523264   ;;  %s314_s0 = inlined_call_operand.vmem [shape: f32[64,128], index: 0, kind: input, shape index: {}]   ;;  %s315_s2 = inlined_call_operand.vmem [shape: f32[1,64], index: 2, kind: input, shape index: {}]   ;;  %s316_s3 = inlined_call_operand.vmem [shape: f32[1,64], index: 3, kind: input, shape index: {}]   ;;  %s317_s1 = inlined_call_operand.vmem [shape: f32[64,128], index: 1, kind: input, shape index: {}]   ;;  %s318_s4 = inlined_call_operand.vmem [shape: f32[64,128], index: 4, kind: output, shape index: {}]  }
   0x1   :  { %v191_v0 = vld [vmem:[%s314_s0] sm:$0xff]  ;;  %v196_v1 = vld [vmem:[%s314_s0 + $0x8] sm:$0xff]  ;;  %v201_v2 = vld [vmem:[%s314_s0 + $0x10] sm:$0xff] }
   0x2   :  { %v25_v3 = vadd.f32 %v196_v1, %v191_v0  ;;  %v38_v4 = vmul.f32 %v191_v0, %v191_v0  ;;  %v39_v5 = vmul.f32 %v196_v1, %v196_v1  ;;  %v40_v6 = vmul.f32 %v201_v2, %v201_v2  ;;  %v214_v7 = vld [vmem:[%s314_s0 + $0x18] sm:$0xff]  ;;  %v222_v11 = vld [vmem:[%s314_s0 + $0x20] sm:$0xff]  ;;  %v230_v15 = vld [vmem:[%s314_s0 + $0x28] sm:$0xff] }
   0x3   :  { %v41_v9 = vmul.f32 %v214_v7, %v214_v7  ;;  %v42_v13 = vmul.f32 %v222_v11, %v222_v11  ;;  %v43_v17 = vmul.f32 %v230_v15, %v230_v15  ;;  %v238_v19 = vld [vmem:[%s314_s0 + $0x30] sm:$0xff]  ;;  %v246_v23 = vld [vmem:[%s314_s0 + $0x38] sm:$0xff]  ;;  %s162_s0 = smov 64   ;;  %v82_v52 = vshrl.u32 %v81_v51, 7  ;;  %v73_v53 = vld [vmem:[%s315_s2] sm:$0x1] }
   0x4   :  { %v26_v8 = vadd.f32 %v25_v3, %v201_v2  ;;  %v46_v10 = vadd.f32 %v39_v5, %v38_v4  ;;  %v44_v21 = vmul.f32 %v238_v19, %v238_v19  ;;  %v45_v25 = vmul.f32 %v246_v23, %v246_v23  ;;  %v77_v57 = vld [vmem:[%s316_s3] sm:$0x1] }
   0x5   :  { %v83_v54 = vsub.s32 0, %v82_v52 }
   0x6   :  { %v27_v12 = vadd.f32 %v26_v8, %v214_v7  ;;  %v47_v14 = vadd.f32 %v46_v10, %v40_v6 }
   0x8   :  { %v28_v16 = vadd.f32 %v27_v12, %v222_v11  ;;  %v48_v18 = vadd.f32 %v47_v14, %v41_v9  ;;  %v123_v12 = vld [vmem:[%s317_s1] sm:$0xff] }
   0xa   :  { %v29_v20 = vadd.f32 %v28_v16, %v230_v15  ;;  %v49_v22 = vadd.f32 %v48_v18, %v42_v13  ;;  %v124_v13 = vld [vmem:[%s317_s1 + $0x8] sm:$0xff]  ;;  %v127_v18 = vld [vmem:[%s317_s1 + $0x20] sm:$0xff] }
   0xc   :  { %v30_v24 = vadd.f32 %v29_v20, %v238_v19  ;;  %v50_v26 = vadd.f32 %v49_v22, %v43_v17 }
   0xe   :  { %v31_v27 = vadd.f32 %v30_v24, %v246_v23  ;;  %v51_v28 = vadd.f32 %v50_v26, %v44_v21 }
  0x10   :  { %v32_v29 = vrot.slane %v31_v27, 4  ;;  %v52_v30 = vadd.f32 %v51_v28, %v45_v25 }
  0x12   :  { %v33_v31 = vadd.f32 %v32_v29, %v31_v27  ;;  %v53_v32 = vrot.slane %v52_v30, 4 }
  0x14   :  { %v34_v33 = vrot.slane %v33_v31, 2  ;;  %v54_v34 = vadd.f32 %v53_v32, %v52_v30 }
  0x16   :  { %v35_v35 = vadd.f32 %v34_v33, %v33_v31  ;;  %v55_v36 = vrot.slane %v54_v34, 2 }
  0x18   :  { %v36_v37 = vrot.slane %v35_v35, 1  ;;  %v56_v38 = vadd.f32 %v55_v36, %v54_v34 }
  0x1a   :  { %v37_v39 = vadd.f32 %v36_v37, %v35_v35  ;;  %v57_v40 = vrot.slane %v56_v38, 1 }
  0x1c   :  { %60 = vrot.lane.b32.xlu0 %v37_v39, %s162_s0  ;;  %v58_v41 = vadd.f32 %v57_v40, %v56_v38 }
  0x20   :  { %65 = vrot.lane.b32.xlu0 %v58_v41, %s162_s0 }
  0x8e   :  { %v61_v42 = vpop.permute.xlu0 %60 }
  0x8f   :  { %v63_v43 = vadd.f32 %v61_v42, %v37_v39 }
  0x91   :  { %v69_v44 = vmul.f32 0.0078125, %v63_v43 }
  0x92   :  { %v66_v45 = vpop.permute.xlu0 %65 }
  0x93   :  { %v68_v46 = vadd.f32 %v66_v45, %v58_v41  ;;  %v71_v47 = vmul.f32 %v69_v44, %v69_v44 }
  0x95   :  { %v70_v48 = vmul.f32 0.0078125, %v68_v46 }
  0x97   :  { %v72_v49 = vsub.f32 %v70_v48, %v71_v47 }
  0x99   :  { %v74_v50 = vadd.f32 1e-05, %v72_v49 }
  0x9b   :  { %160 = vrsqrt.f32 %v74_v50 }
  0xa5   :  { %v161_v55 = vpop.eup %160 }
  0xa6   :  { %v76_v56 = vmul.f32 %v161_v55, %v73_v53 }
  0xa8   :  { %v84_v58 = vrot.slane %v76_v56, %v83_v54  ;;  %v78_v59 = vmul.f32 %v76_v56, %v69_v44 }
  0xaa   :  { %85 = vrot.lane.b32.xlu1 %v84_v58, %s162_s0  ;;  %v79_v60 = vsub.f32 %v77_v57, %v78_v59 }
  0xac   :  { %v94_v61 = vrot.slane %v79_v60, %v83_v54 }
  0xae   :  { %95 = vrot.lane.b32.xlu1 %v94_v61, %s162_s0 }
 0x11c   :  { %v86_v62 = vpop.permute.xlu1 %85 }
 0x11d   :  { %v89_v63 = vsel %vm88_vm0, %v76_v56, %v86_v62 }
 0x11e   :  { %v102_v3 = vrot.slane %v89_v63, %v83_v54 }
 0x120   :  { %v96_v4 = vpop.permute.xlu1 %95  ;;  %v103_v5 = vmul.f32 %v102_v3, %v191_v0  ;;  %v104_v8 = vmul.f32 %v102_v3, %v196_v1  ;;  %v105_v9 = vmul.f32 %v102_v3, %v201_v2  ;;  %v106_v10 = vmul.f32 %v102_v3, %v214_v7  ;;  %v125_v2 = vld [vmem:[%s317_s1 + $0x10] sm:$0xff]  ;;  %v126_v7 = vld [vmem:[%s317_s1 + $0x18] sm:$0xff] }
 0x121   :  { %v98_v6 = vsel %vm88_vm0, %v79_v60, %v96_v4  ;;  %v107_v16 = vmul.f32 %v102_v3, %v222_v11  ;;  %v108_v0 = vmul.f32 %v102_v3, %v230_v15  ;;  %v109_v17 = vmul.f32 %v102_v3, %v238_v19  ;;  %v128_v11 = vld [vmem:[%s317_s1 + $0x28] sm:$0xff]  ;;  %v129_v15 = vld [vmem:[%s317_s1 + $0x30] sm:$0xff]  ;;  %v130_v19 = vld [vmem:[%s317_s1 + $0x38] sm:$0xff] }
 0x122   :  { %v114_v14 = vrot.slane %v98_v6, %v83_v54  ;;  %v110_v1 = vmul.f32 %v102_v3, %v246_v23 }
 0x124   :  { %v115_v20 = vadd.f32 %v114_v14, %v103_v5  ;;  %v116_v21 = vadd.f32 %v114_v14, %v104_v8  ;;  %v117_v22 = vadd.f32 %v114_v14, %v105_v9  ;;  %v118_v23 = vadd.f32 %v114_v14, %v106_v10 }
 0x125   :  { %v119_v24 = vadd.f32 %v114_v14, %v107_v16  ;;  %v120_v25 = vadd.f32 %v114_v14, %v108_v0  ;;  %v121_v26 = vadd.f32 %v114_v14, %v109_v17  ;;  %v122_v27 = vadd.f32 %v114_v14, %v110_v1 }
 0x126   :  { %v131_v28 = vadd.f32 %v123_v12, %v115_v20  ;;  %v132_v29 = vadd.f32 %v124_v13, %v116_v21  ;;  %v133_v30 = vadd.f32 %v125_v2, %v117_v22  ;;  %v134_v31 = vadd.f32 %v126_v7, %v118_v23 }
 0x127   :  { %v135_v32 = vadd.f32 %v127_v18, %v119_v24  ;;  %v136_v33 = vadd.f32 %v128_v11, %v120_v25  ;;  %v137_v34 = vadd.f32 %v129_v15, %v121_v26  ;;  %v138_v35 = vadd.f32 %v130_v19, %v122_v27 }
 0x128   :  { %v139_v36 = vmax.f32 %v131_v28, 0.0  ;;  %v140_v37 = vmax.f32 %v132_v29, 0.0  ;;  %v141_v38 = vmax.f32 %v133_v30, 0.0  ;;  %v142_v39 = vmax.f32 %v134_v31, 0.0 }
 0x129   :  { %v143_v40 = vmax.f32 %v135_v32, 0.0  ;;  %v144_v41 = vmax.f32 %v136_v33, 0.0  ;;  %v145_v42 = vmax.f32 %v137_v34, 0.0  ;;  %v146_v43 = vmax.f32 %v138_v35, 0.0 }
 0x12a   :  { %147 = vst [vmem:[%s318_s4] sm:$0xff] %v139_v36  ;;  %148 = vst [vmem:[%s318_s4 + $0x8] sm:$0xff] %v140_v37 }
 0x12b   :  { %149 = vst [vmem:[%s318_s4 + $0x10] sm:$0xff] %v141_v38  ;;  %150 = vst [vmem:[%s318_s4 + $0x18] sm:$0xff] %v142_v39 }
 0x12c   :  { %151 = vst [vmem:[%s318_s4 + $0x20] sm:$0xff] %v143_v40  ;;  %152 = vst [vmem:[%s318_s4 + $0x28] sm:$0xff] %v144_v41 }
 0x12d   :  { %153 = vst [vmem:[%s318_s4 + $0x30] sm:$0xff] %v145_v42  ;;  %154 = vst [vmem:[%s318_s4 + $0x38] sm:$0xff] %v146_v43 }

// kernel: _lambda_.51
= control target key start
LH: loop header
LB: loop body
LE: loop exit
PB: predicated region body
PF: predicated region fallthrough
CT: control target
= control target key end

     0   :  { %vm374_vm0 = vcmask 523264   ;;  %s878_s1 = inlined_call_operand.vmem [shape: bf16[576,128], index: 1, kind: input, shape index: {}]   ;;  %s879_s0 = inlined_call_operand.vmem [shape: bf16[32,576], index: 0, kind: input, shape index: {}]   ;;  %s880_s2 = inlined_call_operand.vmem [shape: f32[32,128], index: 2, kind: output, shape index: {}]  }
   0x1   :  { %v663_v0 = vld [vmem:[%s878_s1 + $0x40] sm:$0xff]   ;;  %v667_v4 = vld [vmem:[%s878_s1 + $0x48] sm:$0xff]   ;;  %v671_v8 = vld [vmem:[%s878_s1 + $0x50] sm:$0xff]  }
   0x2   :  { %v664_v1 = vld [vmem:[%s878_s1 + $0xc0] sm:$0xff]   ;;  %588 = vmatprep.subr.bf16.mxu0 %v663_v0  ;;  %v668_v5 = vld [vmem:[%s878_s1 + $0xc8] sm:$0xff]   ;;  %v672_v9 = vld [vmem:[%s878_s1 + $0xd0] sm:$0xff]  }
   0x3   :  { %v665_v2 = vld [vmem:[%s878_s1] sm:$0xff]   ;;  %616 = vmatprep.subr.bf16.mxu1 %v664_v1  ;;  %v669_v6 = vld [vmem:[%s878_s1 + $0x8] sm:$0xff]   ;;  %v673_v10 = vld [vmem:[%s878_s1 + $0x10] sm:$0xff]  }
   0x4   :  { %v666_v3 = vld [vmem:[%s878_s1 + $0x80] sm:$0xff]   ;;  %589 = vmatpush3.bf16.msra.mxu0 %v665_v2  ;;  %v670_v7 = vld [vmem:[%s878_s1 + $0x88] sm:$0xff]   ;;  %v674_v11 = vld [vmem:[%s878_s1 + $0x90] sm:$0xff]  }
   0x5   :  { %617 = vmatpush3.bf16.msra.mxu1 %v666_v3  ;;  %590 = vmatprep.subr.bf16.mxu0 %v667_v4  ;;  %v675_v12 = vld [vmem:[%s878_s1 + $0x58] sm:$0xff]   ;;  %v679_v16 = vld [vmem:[%s878_s1 + $0x60] sm:$0xff]   ;;  %v683_v20 = vld [vmem:[%s878_s1 + $0x68] sm:$0xff]  }
   0x6   :  { %618 = vmatprep.subr.bf16.mxu1 %v668_v5  ;;  %v676_v13 = vld [vmem:[%s878_s1 + $0xd8] sm:$0xff]   ;;  %v680_v17 = vld [vmem:[%s878_s1 + $0xe0] sm:$0xff]   ;;  %v684_v21 = vld [vmem:[%s878_s1 + $0xe8] sm:$0xff]  }
   0x7   :  { %v677_v14 = vld [vmem:[%s878_s1 + $0x18] sm:$0xff]   ;;  %v681_v18 = vld [vmem:[%s878_s1 + $0x20] sm:$0xff]   ;;  %v685_v22 = vld [vmem:[%s878_s1 + $0x28] sm:$0xff]  }
   0x8   :  { %591 = vmatpush3.bf16.msra.mxu0 %v669_v6  ;;  %v678_v15 = vld [vmem:[%s878_s1 + $0x98] sm:$0xff]   ;;  %v682_v19 = vld [vmem:[%s878_s1 + $0xa0] sm:$0xff]   ;;  %v686_v23 = vld [vmem:[%s878_s1 + $0xa8] sm:$0xff]  }
   0x9   :  { %619 = vmatpush3.bf16.msra.mxu1 %v670_v7  ;;  %592 = vmatprep.subr.bf16.mxu0 %v671_v8  ;;  %v687_v24 = vld [vmem:[%s878_s1 + $0x70] sm:$0xff]   ;;  %v691_v28 = vld [vmem:[%s878_s1 + $0x78] sm:$0xff]   ;;  %v700_v35 = vld [vmem:[%s879_s0 + $0xc] ss:$20 sps:$4 sm:$0xff]  }
   0xa   :  { %620 = vmatprep.subr.bf16.mxu1 %v672_v9  ;;  %v688_v25 = vld [vmem:[%s878_s1 + $0xf0] sm:$0xff]   ;;  %v692_v29 = vld [vmem:[%s878_s1 + $0xf8] sm:$0xff]   ;;  %v701_v36 = vld [vmem:[%s878_s1 + $0x100] sm:$0xff]   ;;  %462 = vmatprep.mubr.bf16.mxu1 %v700_v35 }
   0xb   :  { %v689_v26 = vld [vmem:[%s878_s1 + $0x30] sm:$0xff]   ;;  %v693_v30 = vld [vmem:[%s878_s1 + $0x38] sm:$0xff]   ;;  %v702_v37 = vld [vmem:[%s878_s1 + $0x108] sm:$0xff]  }
   0xc   :  { %593 = vmatpush3.bf16.msra.mxu0 %v673_v10  ;;  %v690_v27 = vld [vmem:[%s878_s1 + $0xb0] sm:$0xff]   ;;  %v694_v31 = vld [vmem:[%s878_s1 + $0xb8] sm:$0xff]   ;;  %v703_v38 = vld [vmem:[%s879_s0 + $0x2c] ss:$20 sps:$4 sm:$0xff]  }
   0xd   :  { %621 = vmatpush3.bf16.msra.mxu1 %v674_v11  ;;  %594 = vmatprep.subr.bf16.mxu0 %v675_v12  ;;  %v695_v32 = vld [vmem:[%s879_s0] ss:$20 sps:$4 sm:$0xff]   ;;  %v697_v33 = vld [vmem:[%s879_s0 + $0x4] ss:$20 sps:$4 sm:$0xff]   ;;  %v698_v34 = vld [vmem:[%s879_s0 + $0x8] ss:$20 sps:$4 sm:$0xff]  }
   0xe   :  { %622 = vmatprep.subr.bf16.mxu1 %v676_v13  ;;  %413 = vmatprep.mubr.bf16.mxu0 %v697_v33  ;;  %v705_v39 = vld [vmem:[%s879_s0 + $0x34] ss:$20 sps:$4 sm:$0xff]   ;;  %v708_v42 = vld [vmem:[%s879_s0 + $0x30] ss:$20 sps:$4 sm:$0xff]   ;;  %v710_v44 = vld [vmem:[%s878_s1 + $0x118] sm:$0xff]  }
   0xf   :  { %v707_v40 = vld [vmem:[%s879_s0 + $0x28] ss:$20 sps:$4 sm:$0xff]   ;;  %v709_v41 = vld [vmem:[%s878_s1 + $0x110] sm:$0xff]   ;;  %v712_v45 = vld [vmem:[%s879_s0 + $0x38] ss:$20 sps:$4 sm:$0xff]  }
  0x10   :  { %595 = vmatpush3.bf16.msra.mxu0 %v677_v14  ;;  %v711_v43 = vld [vmem:[%s879_s0 + $0x10] ss:$20 sps:$4 sm:$0xff]  }
  0x11   :  { %623 = vmatpush3.bf16.msra.mxu1 %v678_v15  ;;  %596 = vmatprep.subr.bf16.mxu0 %v679_v16 }
  0x12   :  { %624 = vmatprep.subr.bf16.mxu1 %v680_v17 }
  0x14   :  { %597 = vmatpush3.bf16.msra.mxu0 %v681_v18 }
  0x15   :  { %625 = vmatpush3.bf16.msra.mxu1 %v682_v19  ;;  %598 = vmatprep.subr.bf16.mxu0 %v683_v20 }
  0x16   :  { %626 = vmatprep.subr.bf16.mxu1 %v684_v21 }
  0x18   :  { %599 = vmatpush3.bf16.msra.mxu0 %v685_v22 }
  0x19   :  { %627 = vmatpush3.bf16.msra.mxu1 %v686_v23  ;;  %600 = vmatprep.subr.bf16.mxu0 %v687_v24 }
  0x1a   :  { %628 = vmatprep.subr.bf16.mxu1 %v688_v25 }
  0x1c   :  { %601 = vmatpush3.bf16.msra.mxu0 %v689_v26 }
  0x1d   :  { %629 = vmatpush3.bf16.msra.mxu1 %v690_v27  ;;  %602 = vmatprep.subr.bf16.mxu0 %v691_v28 }
  0x1e   :  { %630 = vmatprep.subr.bf16.mxu1 %v692_v29 }
  0x20   :  { %603 = vmatpush3.bf16.msra.mxu0 %v693_v30 }
  0x21   :  { %631 = vmatpush3.bf16.msra.mxu1 %v694_v31  ;;  %650 = vmatprep.subr.bf16.mxu0 %v701_v36 }
  0x23   :  { %414 = vmatmul.mubr.bf16.vlgmr.msra.gmra.mrb[0].mxu0 %v695_v32 }
  0x24   :  { %463 = vmatmul.mubr.bf16.vlgmr.msra.gmra.mrb[0].mxu1 %v698_v34  ;;  %651 = vmatpush3.bf16.msra.mxu0 %v701_v36 }
  0x25   :  { %652 = vmatprep.subr.bf16.mxu0 %v702_v37  ;;  %421 = vmatprep.mubr.bf16.mxu0 %v703_v38 }
  0x26   :  { %470 = vmatprep.mubr.bf16.mxu1 %v705_v39 }
  0x28   :  { %653 = vmatpush3.bf16.msra.mxu0 %v702_v37 }
  0x29   :  { %654 = vmatprep.subr.bf16.mxu0 %v709_v41 }
  0x2b   :  { %422 = vmatmul.mubr.bf16.gmra.mrb[4].mxu0 %v707_v40 }
  0x2c   :  { %471 = vmatmul.mubr.bf16.gmra.mrb[4].mxu1 %v708_v42  ;;  %658 = vmatprep.mubr.msk.bf16.mxu0 %vm374_vm0, %v711_v43 }
  0x2d   :  { %655 = vmatpush3.bf16.msra.mxu0 %v709_v41 }
  0x2e   :  { %656 = vmatprep.subr.bf16.mxu0 %v710_v44 }
  0x31   :  { %657 = vmatpush3.bf16.msra.mxu0 %v710_v44 }
  0x34   :  { %659 = vmatmul.mubr.msk.bf16.vlgmr.msra.gmra.mrb[8].mxu0 %vm374_vm0, %v712_v45 }
  0xf6   :  { %v604_v46 = vpop.f32.mrb[0].mxu0 }
  0xf7   :  { %v632_v47 = vpop.f32.mrb[0].mxu1  ;;  %v605_v48 = vpop.f32.mrb[1].mxu0 }
  0xf8   :  { %v606_v49 = vadd.f32 %v605_v48, %v604_v46  ;;  %v633_v50 = vpop.f32.mrb[1].mxu1  ;;  %v607_v51 = vpop.f32.mrb[2].mxu0 }
  0xf9   :  { %v634_v52 = vadd.f32 %v633_v50, %v632_v47  ;;  %v635_v53 = vpop.f32.mrb[2].mxu1  ;;  %v608_v54 = vpop.f32.mrb[3].mxu0 }
  0xfa   :  { %v609_v55 = vadd.f32 %v608_v54, %v607_v51  ;;  %v636_v56 = vpop.f32.mrb[3].mxu1 }
  0xfb   :  { %v637_v57 = vadd.f32 %v636_v56, %v635_v53  ;;  %v465_v58 = vadd.f32 %v634_v52, %v606_v49 }
  0xfd   :  { %v468_v59 = vadd.f32 %v637_v57, %v609_v55 }
  0xfe   :  { %v610_v60 = vpop.f32.mrb[4].mxu0 }
  0xff   :  { %v638_v61 = vpop.f32.mrb[4].mxu1  ;;  %v611_v62 = vpop.f32.mrb[5].mxu0 }
 0x100   :  { %v612_v63 = vadd.f32 %v611_v62, %v610_v60  ;;  %v639_v0 = vpop.f32.mrb[5].mxu1  ;;  %v613_v1 = vpop.f32.mrb[6].mxu0 }
 0x101   :  { %v640_v2 = vadd.f32 %v639_v0, %v638_v61  ;;  %v641_v3 = vpop.f32.mrb[6].mxu1  ;;  %v614_v4 = vpop.f32.mrb[7].mxu0 }
 0x102   :  { %v615_v5 = vadd.f32 %v614_v4, %v613_v1  ;;  %v642_v6 = vpop.f32.mrb[7].mxu1 }
 0x103   :  { %v643_v7 = vadd.f32 %v642_v6, %v641_v3  ;;  %v473_v8 = vadd.f32 %v640_v2, %v612_v63 }
 0x105   :  { %v476_v9 = vadd.f32 %v643_v7, %v615_v5 }
 0x107   :  { %v660_v10 = vpop.f32.mrb[8].mxu0 }
 0x108   :  { %v522_v11 = vadd.f32 %v660_v10, %v473_v8  ;;  %v513_v12 = vpop.f32.mrb[9].mxu0 }
 0x109   :  { %v514_v13 = vadd.f32 %v513_v12, %v465_v58  ;;  %v661_v14 = vpop.f32.mrb[10].mxu0 }
 0x10a   :  { %v525_v15 = vadd.f32 %v661_v14, %v476_v9  ;;  %v516_v16 = vpop.f32.mrb[11].mxu0  ;;  %534 = vst [vmem:[%s880_s2 + $0x10] sm:$0xff] %v522_v11 }
 0x10b   :  { %v517_v17 = vadd.f32 %v516_v16, %v468_v59  ;;  %532 = vst [vmem:[%s880_s2] sm:$0xff] %v514_v13 }
 0x10c   :  { %535 = vst [vmem:[%s880_s2 + $0x18] sm:$0xff] %v525_v15 }
 0x10d   :  { %533 = vst [vmem:[%s880_s2 + $0x8] sm:$0xff] %v517_v17 }

// kernel: _lambda_.52
= control target key start
LH: loop header
LB: loop body
LE: loop exit
PB: predicated region body
PF: predicated region fallthrough
CT: control target
= control target key end

     0   :  { %v52_v31 = vlaneseq  ;;  %s135_s0 = inlined_call_operand.vmem [shape: f32[32,128], index: 0, kind: input, shape index: {}]   ;;  %s136_s1 = inlined_call_operand.vmem [shape: f32[1,128], index: 1, kind: input, shape index: {}]   ;;  %s137_s2 = inlined_call_operand.vmem [shape: f32[1,128], index: 2, kind: input, shape index: {}]   ;;  %s138_s3 = inlined_call_operand.vmem [shape: f32[32,128], index: 3, kind: output, shape index: {}]  }
   0x1   :  { %v14_v0 = vld [vmem:[%s135_s0] sm:$0xff]  ;;  %v15_v1 = vld [vmem:[%s135_s0 + $0x8] sm:$0xff]  ;;  %v16_v2 = vld [vmem:[%s135_s0 + $0x10] sm:$0xff] }
   0x2   :  { %v17_v3 = vld [vmem:[%s135_s0 + $0x18] sm:$0xff]  ;;  %v18_v4 = vadd.f32 %v15_v1, %v14_v0  ;;  %v27_v5 = vmul.f32 %v14_v0, %v14_v0  ;;  %v28_v6 = vmul.f32 %v15_v1, %v15_v1  ;;  %v29_v7 = vmul.f32 %v16_v2, %v16_v2  ;;  %v44_v33 = vld [vmem:[%s136_s1] sm:$0x1] }
   0x3   :  { %v30_v9 = vmul.f32 %v17_v3, %v17_v3  ;;  %v53_v32 = vshrl.u32 %v52_v31, 7  ;;  %v48_v37 = vld [vmem:[%s137_s2] sm:$0x1] }
   0x4   :  { %v19_v8 = vadd.f32 %v18_v4, %v16_v2  ;;  %v31_v10 = vadd.f32 %v28_v6, %v27_v5 }
   0x5   :  { %v54_v34 = vsub.s32 0, %v53_v32 }
   0x6   :  { %v20_v11 = vadd.f32 %v19_v8, %v17_v3  ;;  %v32_v12 = vadd.f32 %v31_v10, %v29_v7 }
   0x8   :  { %v21_v13 = vrot.slane %v20_v11, 4  ;;  %v33_v14 = vadd.f32 %v32_v12, %v30_v9 }
   0xa   :  { %v22_v15 = vadd.f32 %v21_v13, %v20_v11  ;;  %v34_v16 = vrot.slane %v33_v14, 4 }
   0xc   :  { %v23_v17 = vrot.slane %v22_v15, 2  ;;  %v35_v18 = vadd.f32 %v34_v16, %v33_v14 }
   0xe   :  { %v24_v19 = vadd.f32 %v23_v17, %v22_v15  ;;  %v36_v20 = vrot.slane %v35_v18, 2 }
  0x10   :  { %v25_v21 = vrot.slane %v24_v19, 1  ;;  %v37_v22 = vadd.f32 %v36_v20, %v35_v18 }
  0x12   :  { %v26_v23 = vadd.f32 %v25_v21, %v24_v19  ;;  %v38_v24 = vrot.slane %v37_v22, 1 }
  0x14   :  { %v39_v25 = vadd.f32 %v38_v24, %v37_v22  ;;  %v40_v26 = vmul.f32 0.03125, %v26_v23 }
  0x16   :  { %v41_v27 = vmul.f32 0.03125, %v39_v25  ;;  %v42_v28 = vmul.f32 %v40_v26, %v40_v26 }
  0x18   :  { %v43_v29 = vsub.f32 %v41_v27, %v42_v28 }
  0x1a   :  { %v45_v30 = vadd.f32 1e-05, %v43_v29 }
  0x1c   :  { %83 = vrsqrt.f32 %v45_v30 }
  0x26   :  { %v84_v35 = vpop.eup %83 }
  0x27   :  { %v47_v36 = vmul.f32 %v84_v35, %v44_v33 }
  0x29   :  { %v49_v38 = vmul.f32 %v47_v36, %v40_v26  ;;  %v55_v39 = vrot.slane %v47_v36, %v54_v34 }
  0x2b   :  { %v50_v40 = vsub.f32 %v48_v37, %v49_v38  ;;  %v57_v41 = vmul.f32 %v55_v39, %v14_v0  ;;  %v58_v42 = vmul.f32 %v55_v39, %v15_v1  ;;  %v59_v43 = vmul.f32 %v55_v39, %v16_v2 }
  0x2c   :  { %v60_v44 = vmul.f32 %v55_v39, %v17_v3 }
  0x2d   :  { %v65_v45 = vrot.slane %v50_v40, %v54_v34 }
  0x2f   :  { %v67_v46 = vadd.f32 %v65_v45, %v57_v41  ;;  %v68_v47 = vadd.f32 %v65_v45, %v58_v42  ;;  %v69_v48 = vadd.f32 %v65_v45, %v59_v43  ;;  %v70_v49 = vadd.f32 %v65_v45, %v60_v44 }
  0x31   :  { %v71_v50 = vmax.f32 %v67_v46, 0.0  ;;  %v72_v51 = vmax.f32 %v68_v47, 0.0  ;;  %v73_v52 = vmax.f32 %v69_v48, 0.0  ;;  %v74_v53 = vmax.f32 %v70_v49, 0.0 }
  0x33   :  { %75 = vst [vmem:[%s138_s3] sm:$0xff] %v71_v50  ;;  %76 = vst [vmem:[%s138_s3 + $0x8] sm:$0xff] %v72_v51 }
  0x34   :  { %77 = vst [vmem:[%s138_s3 + $0x10] sm:$0xff] %v73_v52  ;;  %78 = vst [vmem:[%s138_s3 + $0x18] sm:$0xff] %v74_v53 }

// kernel: _lambda_.53
= control target key start
LH: loop header
LB: loop body
LE: loop exit
PB: predicated region body
PF: predicated region fallthrough
CT: control target
= control target key end

     0   :  { %s948_s9 = smov 0   ;;  %s950_s10 = smov 0   ;;  %s1084_s0 = inlined_call_operand.vmem [shape: bf16[32,1152], index: 0, kind: input, shape index: {}]   ;;  %s1085_s1 = inlined_call_operand.vmem [shape: bf16[1152,128], index: 1, kind: input, shape index: {}]   ;;  %s1086_s2 = inlined_call_operand.vmem [shape: f32[32,128], index: 2, kind: output, shape index: {}]  }
   0x1   :  { %s952_s11 = smov 0   ;;  %s954_s12 = smov 0  }
   0x2   :  { %s956_s13 = smov 0  }
   0x3 LB: > { %s24_s14 = sadd.s32 1, %s926_s12  ;;  %p47_p1 = scmp.ne.s32.totalorder %s918_s10, %s914_s9  ;;  %s930_s13 = sphi %s956_s13, %s12_s13   ;;  %s926_s12 = sphi %s954_s12, %s1090_s12   ;;  %s922_s11 = sphi %s952_s11, %s1089_s11   ;;  %s918_s10 = sphi %s950_s10, %s1088_s10   ;;  %s914_s9 = sphi %s948_s9, %s1087_s9  }
   0x4   : > { %p25_p0 = scmp.ge.s32.totalorder %s24_s14, 3  ;;  %p48_p2 = scmp.eq.s32.totalorder %s930_s13, 0 }
   0x5   : > { %s40_s16 = sadd.s32 1, %s918_s10  ;;  %p711_p5 = scmp.ge.s32.totalorder %s930_s13, 3 }
   0x6   : > { %s1092_s14 = smov (%p25_p0, %s24_s14), 0  ;;  %p49_p3 = por %p48_p2, %p47_p1 }
   0x7   : > { %s36_s15 = ssub.s32 %s926_s12, %s1092_s14  ;;  %129 = sbr.rel (%p711_p5) target bundleno = 23 (0x17), region = 16 }
   0x8   : > { %p38_p4 = scmp.eq.s32.totalorder %s36_s15, 0 }
   0xa   : > { %s983_s17 = scalar_select %p38_p4, %s918_s10, %s40_s16  }
   0xe   : > { %132 = sbr.rel (!%p49_p3) target bundleno = 23 (0x17), region = 20  ;;  %s134_s18 = sand.u32 (%p49_p3), 1, %s918_s10  }
   0xf   : > { %s758_s19 = smul.u32 (%p49_p3), 12, %s926_s12 }
  0x10   : > { %s817_s20 = smul.u32 (%p49_p3), 48, %s134_s18 }
  0x11   : > { %s142_s23 = scalar_lea.vmem (%p49_p3), %s1084_s0, %s758_s19 }
  0x12   : > { %v157_v0 = vld [vmem:[%s142_s23] sm:$0xff] (%p49_p3)  ;;  %v161_v2 = vld [vmem:[%s142_s23 + $0x48] sm:$0xff] (%p49_p3)  ;;  %s136_s24 = scalar_lea.vmem (%p49_p3), [#allocation2], %s817_s20  ;;  %v717_v6 = vld [vmem:[%s142_s23 + $0x50] sm:$0xf] (%p49_p3) }
  0x13   : > { %v159_v1 = vld [vmem:[%s142_s23 + $0x24] sm:$0xff] (%p49_p3)  ;;  %158 = vst [vmem:[%s136_s24] sm:$0xff] (%p49_p3), %v157_v0  ;;  %162 = vst [vmem:[%s136_s24 + $0x18] sm:$0xff] (%p49_p3), %v161_v2  ;;  %v163_v3 = vld [vmem:[%s142_s23 + $0x6c] sm:$0xff] (%p49_p3) }
  0x14   : > { %160 = vst [vmem:[%s136_s24 + $0xc] sm:$0xff] (%p49_p3), %v159_v1  ;;  %v713_v4 = vld [vmem:[%s142_s23 + $0x8] sm:$0xf] (%p49_p3)  ;;  %v715_v5 = vld [vmem:[%s142_s23 + $0x2c] sm:$0xf] (%p49_p3)  ;;  %164 = vst [vmem:[%s136_s24 + $0x24] sm:$0xff] (%p49_p3), %v163_v3 }
  0x15   : > { %714 = vst [vmem:[%s136_s24 + $0x8] sm:$0xf] %v713_v4  ;;  %716 = vst [vmem:[%s136_s24 + $0x14] sm:$0xf] %v715_v5  ;;  %v719_v7 = vld [vmem:[%s142_s23 + $0x74] sm:$0xf] }
  0x16   : > { %718 = vst [vmem:[%s136_s24 + $0x20] sm:$0xf] %v717_v6  ;;  %720 = vst [vmem:[%s136_s24 + $0x2c] sm:$0xf] %v719_v7 }
  0x17 PF: > { %p721_p6 = scmp.ge.s32.totalorder %s930_s13, 1  ;;  %p196_p7 = scmp.lt.s32.totalorder %s930_s13, 4 }
  0x19   : > { %p197_p8 = pnand %p721_p6, %p196_p7 }
  0x1a   : > { %s203_s25 = sand.u32 (!%p197_p8), 1, %s914_s9   ;;  %s237_s26 = smul.u32 (!%p197_p8), 48, %s922_s11 }
  0x1b   : > { %200 = sbr.rel (%p197_p8) target bundleno = 304 (0x130), region = 50  ;;  %p723_p10 = scmp.ne.s32.totalorder (!%p197_p8), %s922_s11, 0 }
  0x1c   : > { %s818_s27 = smul.u32 (!%p197_p8), 48, %s203_s25  ;;  %p238_p9 = scmp.lt.s32.totalorder (!%p197_p8), %s237_s26, 143 }
  0x1e   : > { %s1000_s4 = scalar_lea.vmem (!%p197_p8), [#allocation2], %s818_s27 }
  0x22   : > { %s1094_s26 = smov (!%p238_p9, %s237_s26), 143  ;;  %259 = sbr.rel (%p723_p10) target bundleno = 41 (0x29), region = 58 }
  0x23   : > { %s722_s28 = sshll.u32 %s1094_s26, 2  ;;  %v932_v8 = vmov (!%p723_p10), 0.0  }
  0x24   : > { %s998_s3 = scalar_lea.vmem %s1085_s1, %s722_s28  ;;  %260 = vst [vmem:[%s1086_s2] sm:$0xff] (!%p723_p10), %v932_v8  ;;  %261 = vst [vmem:[%s1086_s2 + $0x8] sm:$0xff] (!%p723_p10), %v932_v8 }
  0x25   : > { %262 = vst [vmem:[%s1086_s2 + $0x10] sm:$0xff] (!%p723_p10), %v932_v8  ;;  %263 = vst [vmem:[%s1086_s2 + $0x18] sm:$0xff] (!%p723_p10), %v932_v8 }
  0x29 PF: > { %v860_v9 = vld [vmem:[%s998_s3 + $0x40] sm:$0xff]   ;;  %v863_v12 = vld [vmem:[%s998_s3 + $0x48] sm:$0xff]   ;;  %v866_v15 = vld [vmem:[%s998_s3 + $0x50] sm:$0xff]  }
  0x2a   : > { %v861_v10 = vld [vmem:[%s998_s3] sm:$0xff]   ;;  %759 = vmatprep.subr.bf16.mxu0 %v860_v9  ;;  %v864_v13 = vld [vmem:[%s998_s3 + $0x8] sm:$0xff]   ;;  %v867_v16 = vld [vmem:[%s998_s3 + $0x10] sm:$0xff]  }
  0x2b   : > { %v862_v11 = vld [vmem:[%s998_s3 + $0x80] sm:$0xff]   ;;  %760 = vmatpush3.bf16.msra.mxu0 %v861_v10  ;;  %v865_v14 = vld [vmem:[%s998_s3 + $0x88] sm:$0xff]   ;;  %v868_v17 = vld [vmem:[%s998_s3 + $0x90] sm:$0xff]  }
  0x2c   : > { %797 = vmatprep.subr.bf16.mxu1 %v862_v11  ;;  %761 = vmatprep.subr.bf16.mxu0 %v863_v12  ;;  %v869_v18 = vld [vmem:[%s998_s3 + $0x58] sm:$0xff]   ;;  %v872_v21 = vld [vmem:[%s998_s3 + $0x60] sm:$0xff]   ;;  %v875_v24 = vld [vmem:[%s998_s3 + $0x68] sm:$0xff]  }
  0x2d   : > { %798 = vmatpush3.bf16.msra.mxu1 %v862_v11  ;;  %v870_v19 = vld [vmem:[%s998_s3 + $0x18] sm:$0xff]   ;;  %v874_v22 = vld [vmem:[%s998_s3 + $0xa0] sm:$0xff]   ;;  %v877_v25 = vld [vmem:[%s998_s3 + $0xa8] sm:$0xff]  }
  0x2e   : > { %799 = vmatprep.subr.bf16.mxu1 %v865_v14  ;;  %v871_v20 = vld [vmem:[%s998_s3 + $0x98] sm:$0xff]   ;;  %v873_v23 = vld [vmem:[%s998_s3 + $0x20] sm:$0xff]   ;;  %v876_v26 = vld [vmem:[%s998_s3 + $0x28] sm:$0xff]  }
  0x2f   : > { %762 = vmatpush3.bf16.msra.mxu0 %v864_v13  ;;  %v878_v27 = vld [vmem:[%s998_s3 + $0x70] sm:$0xff]   ;;  %v881_v30 = vld [vmem:[%s998_s3 + $0x78] sm:$0xff]   ;;  %v264_v45 = vld [vmem:[%s1086_s2] sm:$0xff] }
  0x30   : > { %763 = vmatprep.subr.bf16.mxu0 %v866_v15  ;;  %v879_v28 = vld [vmem:[%s998_s3 + $0x30] sm:$0xff]   ;;  %v883_v31 = vld [vmem:[%s998_s3 + $0xb8] sm:$0xff]   ;;  %v265_v50 = vld [vmem:[%s1086_s2 + $0x8] sm:$0xff] }
  0x31   : > { %800 = vmatpush3.bf16.msra.mxu1 %v865_v14  ;;  %v880_v29 = vld [vmem:[%s998_s3 + $0xb0] sm:$0xff]   ;;  %v882_v34 = vld [vmem:[%s998_s3 + $0x38] sm:$0xff]  }
  0x32   : > { %801 = vmatprep.subr.bf16.mxu1 %v868_v17  ;;  %v886_v32 = vld [vmem:[%s1000_s4 + $0x4] ss:$12 sps:$4 sm:$0xff]   ;;  %v887_v33 = vld [vmem:[%s1000_s4 + $0x8] ss:$12 sps:$4 sm:$0xff]   ;;  %v884_v35 = vld [vmem:[%s1000_s4] ss:$12 sps:$4 sm:$0xff]  }
  0x33   : > { %764 = vmatpush3.bf16.msra.mxu0 %v867_v16  ;;  %532 = vmatprep.mubr.bf16.mxu0 %v886_v32  ;;  %v889_v36 = vld [vmem:[%s1000_s4 + $0x1c] ss:$12 sps:$4 sm:$0xff]   ;;  %v888_v37 = vld [vmem:[%s1000_s4 + $0x20] ss:$12 sps:$4 sm:$0xff]   ;;  %v891_v38 = vld [vmem:[%s1000_s4 + $0x18] ss:$12 sps:$4 sm:$0xff]  }
  0x34   : > { %765 = vmatprep.subr.bf16.mxu0 %v869_v18  ;;  %813 = vmatprep.mubr.bf16.mxu1 %v887_v33  ;;  %v266_v59 = vld [vmem:[%s1086_s2 + $0x10] sm:$0xff]  ;;  %v267_v63 = vld [vmem:[%s1086_s2 + $0x18] sm:$0xff] }
  0x35   : > { %802 = vmatpush3.bf16.msra.mxu1 %v868_v17 }
  0x36   : > { %803 = vmatprep.subr.bf16.mxu1 %v871_v20 }
  0x37   : > { %766 = vmatpush3.bf16.msra.mxu0 %v870_v19 }
  0x38   : > { %767 = vmatprep.subr.bf16.mxu0 %v872_v21 }
  0x39   : > { %804 = vmatpush3.bf16.msra.mxu1 %v871_v20 }
  0x3a   : > { %805 = vmatprep.subr.bf16.mxu1 %v874_v22 }
  0x3b   : > { %768 = vmatpush3.bf16.msra.mxu0 %v873_v23 }
  0x3c   : > { %769 = vmatprep.subr.bf16.mxu0 %v875_v24 }
  0x3d   : > { %806 = vmatpush3.bf16.msra.mxu1 %v874_v22 }
  0x3e   : > { %807 = vmatprep.subr.bf16.mxu1 %v877_v25 }
  0x3f   : > { %770 = vmatpush3.bf16.msra.mxu0 %v876_v26 }
  0x40   : > { %771 = vmatprep.subr.bf16.mxu0 %v878_v27 }
  0x41   : > { %808 = vmatpush3.bf16.msra.mxu1 %v877_v25 }
  0x42   : > { %809 = vmatprep.subr.bf16.mxu1 %v880_v29 }
  0x43   : > { %772 = vmatpush3.bf16.msra.mxu0 %v879_v28 }
  0x44   : > { %773 = vmatprep.subr.bf16.mxu0 %v881_v30 }
  0x45   : > { %810 = vmatpush3.bf16.msra.mxu1 %v880_v29 }
  0x46   : > { %811 = vmatprep.subr.bf16.mxu1 %v883_v31 }
  0x47   : > { %774 = vmatpush3.bf16.msra.mxu0 %v882_v34 }
  0x49   : > { %812 = vmatpush3.bf16.msra.mxu1 %v883_v31 }
  0x4a   : > { %533 = vmatmul.mubr.bf16.vlgmr.msra.gmra.mrb[0].mxu0 %v884_v35 }
  0x4b   : > { %540 = vmatprep.mubr.bf16.mxu0 %v889_v36 }
  0x4c   : > { %814 = vmatmul.mubr.bf16.vlgmr.msra.gmra.mrb[0].mxu1 %v888_v37 }
  0x52   : > { %541 = vmatmul.mubr.bf16.gmra.mrb[4].mxu0 %v891_v38 }
 0x11d   : > { %v775_v39 = vpop.f32.mrb[0].mxu0 }
 0x11e   : > { %v776_v40 = vpop.f32.mrb[1].mxu0 }
 0x11f   : > { %v777_v41 = vadd.f32 %v776_v40, %v775_v39  ;;  %v778_v42 = vpop.f32.mrb[2].mxu0  ;;  %v815_v43 = vpop.f32.mrb[0].mxu1 }
 0x120   : > { %v779_v44 = vpop.f32.mrb[3].mxu0  ;;  %v583_v46 = vpop.f32.mrb[1].mxu1 }
 0x121   : > { %v780_v47 = vadd.f32 %v779_v44, %v778_v42  ;;  %v584_v48 = vadd.f32 %v777_v41, %v583_v46  ;;  %v816_v49 = vpop.f32.mrb[2].mxu1 }
 0x122   : > { %v586_v51 = vpop.f32.mrb[3].mxu1 }
 0x123   : > { %v598_v52 = vadd.f32 %v584_v48, %v264_v45  ;;  %v587_v53 = vadd.f32 %v780_v47, %v586_v51 }
 0x125   : > { %602 = vst [vmem:[%s1086_s2] sm:$0xff] %v598_v52  ;;  %v599_v54 = vadd.f32 %v587_v53, %v265_v50  ;;  %v781_v55 = vpop.f32.mrb[4].mxu0 }
 0x126   : > { %v782_v56 = vpop.f32.mrb[5].mxu0 }
 0x127   : > { %603 = vst [vmem:[%s1086_s2 + $0x8] sm:$0xff] %v599_v54  ;;  %v783_v57 = vadd.f32 %v782_v56, %v781_v55  ;;  %v784_v58 = vpop.f32.mrb[6].mxu0 }
 0x128   : > { %v785_v60 = vpop.f32.mrb[7].mxu0 }
 0x129   : > { %v592_v61 = vadd.f32 %v815_v43, %v783_v57  ;;  %v786_v62 = vadd.f32 %v785_v60, %v784_v58 }
 0x12b   : > { %v600_v0 = vadd.f32 %v592_v61, %v266_v59  ;;  %v595_v1 = vadd.f32 %v816_v49, %v786_v62 }
 0x12d   : > { %604 = vst [vmem:[%s1086_s2 + $0x10] sm:$0xff] %v600_v0  ;;  %v601_v2 = vadd.f32 %v595_v1, %v267_v63 }
 0x12f   : > { %605 = vst [vmem:[%s1086_s2 + $0x18] sm:$0xff] %v601_v2 }
 0x130 PF: > { %s12_s13 = sadd.s32 1, %s930_s13   ;;  %s1087_s9 = smov %s918_s10 }
 0x131   : > { %p9_p11 = scmp.ge.s32.totalorder %s12_s13, 5   ;;  %s1088_s10 = smov %s983_s17 }
 0x132   : > { %s1089_s11 = smov %s926_s12  ;;  %s1090_s12 = smov %s1092_s14 }
 0x133   :  { %11 = sbr.rel (!%p9_p11) target bundleno = 3 (0x3), region = 102 }

// kernel: _lambda_.54
= control target key start
LH: loop header
LB: loop body
LE: loop exit
PB: predicated region body
PF: predicated region fallthrough
CT: control target
= control target key end

     0   :  { %vm70_vm0 = vcmask 523264   ;;  %s216_s1 = inlined_call_operand.vmem [shape: bf16[64,128], index: 1, kind: input, shape index: {}]   ;;  %s217_s0 = inlined_call_operand.vmem [shape: bf16[32,64], index: 0, kind: input, shape index: {}]   ;;  %s218_s2 = inlined_call_operand.vmem [shape: f32[32,128], index: 2, kind: output, shape index: {}]  }
   0x1   :  { %v165_v0 = vld [vmem:[%s216_s1] sm:$0xff]   ;;  %v166_v1 = vld [vmem:[%s216_s1 + $0x8] sm:$0xff]   ;;  %v167_v2 = vld [vmem:[%s216_s1 + $0x10] sm:$0xff]  }
   0x2   :  { %152 = vmatprep.subr.bf16.mxu0 %v165_v0  ;;  %v169_v3 = vld [vmem:[%s217_s0] sm:$0xff]   ;;  %v168_v4 = vld [vmem:[%s216_s1 + $0x18] sm:$0xff]   ;;  %v170_v5 = vld [vmem:[%s217_s0 + $0x8] sm:$0xff]  }
   0x3   :  { %153 = vmatpush3.bf16.msra.mxu0 %v165_v0  ;;  %160 = vmatprep.mubr.msk.bf16.mxu0 %vm70_vm0, %v169_v3 }
   0x4   :  { %154 = vmatprep.subr.bf16.mxu0 %v166_v1 }
   0x7   :  { %155 = vmatpush3.bf16.msra.mxu0 %v166_v1 }
   0x8   :  { %156 = vmatprep.subr.bf16.mxu0 %v167_v2 }
   0xb   :  { %157 = vmatpush3.bf16.msra.mxu0 %v167_v2 }
   0xc   :  { %158 = vmatprep.subr.bf16.mxu0 %v168_v4 }
   0xf   :  { %159 = vmatpush3.bf16.msra.mxu0 %v168_v4 }
  0x12   :  { %161 = vmatmul.mubr.msk.bf16.vlgmr.msra.gmra.mrb[0].mxu0 %vm70_vm0, %v170_v5 }
  0xe5   :  { %v162_v6 = vpop.f32.mrb[0].mxu0 }
  0xe6   :  { %v111_v7 = vpop.f32.mrb[1].mxu0  ;;  %132 = vst [vmem:[%s218_s2 + $0x10] sm:$0xff] %v162_v6 }
  0xe7   :  { %v163_v8 = vpop.f32.mrb[2].mxu0  ;;  %130 = vst [vmem:[%s218_s2] sm:$0xff] %v111_v7 }
  0xe8   :  { %v114_v9 = vpop.f32.mrb[3].mxu0  ;;  %133 = vst [vmem:[%s218_s2 + $0x18] sm:$0xff] %v163_v8 }
  0xe9   :  { %131 = vst [vmem:[%s218_s2 + $0x8] sm:$0xff] %v114_v9 }

// kernel: _lambda_.55
= control target key start
LH: loop header
LB: loop body
LE: loop exit
PB: predicated region body
PF: predicated region fallthrough
CT: control target
= control target key end

     0   :  { %v52_v31 = vlaneseq  ;;  %s131_s0 = inlined_call_operand.vmem [shape: f32[32,128], index: 0, kind: input, shape index: {}]   ;;  %s132_s1 = inlined_call_operand.vmem [shape: f32[1,128], index: 1, kind: input, shape index: {}]   ;;  %s133_s2 = inlined_call_operand.vmem [shape: f32[1,128], index: 2, kind: input, shape index: {}]   ;;  %s134_s3 = inlined_call_operand.vmem [shape: f32[32,128], index: 3, kind: output, shape index: {}]  }
   0x1   :  { %v14_v0 = vld [vmem:[%s131_s0] sm:$0xff]  ;;  %v15_v1 = vld [vmem:[%s131_s0 + $0x8] sm:$0xff]  ;;  %v16_v2 = vld [vmem:[%s131_s0 + $0x10] sm:$0xff] }
   0x2   :  { %v17_v3 = vld [vmem:[%s131_s0 + $0x18] sm:$0xff]  ;;  %v18_v4 = vadd.f32 %v15_v1, %v14_v0  ;;  %v27_v5 = vmul.f32 %v14_v0, %v14_v0  ;;  %v28_v6 = vmul.f32 %v15_v1, %v15_v1  ;;  %v29_v7 = vmul.f32 %v16_v2, %v16_v2  ;;  %v44_v33 = vld [vmem:[%s132_s1] sm:$0x1] }
   0x3   :  { %v30_v9 = vmul.f32 %v17_v3, %v17_v3  ;;  %v53_v32 = vshrl.u32 %v52_v31, 7  ;;  %v48_v37 = vld [vmem:[%s133_s2] sm:$0x1] }
   0x4   :  { %v19_v8 = vadd.f32 %v18_v4, %v16_v2  ;;  %v31_v10 = vadd.f32 %v28_v6, %v27_v5 }
   0x5   :  { %v54_v34 = vsub.s32 0, %v53_v32 }
   0x6   :  { %v20_v11 = vadd.f32 %v19_v8, %v17_v3  ;;  %v32_v12 = vadd.f32 %v31_v10, %v29_v7 }
   0x8   :  { %v21_v13 = vrot.slane %v20_v11, 4  ;;  %v33_v14 = vadd.f32 %v32_v12, %v30_v9 }
   0xa   :  { %v22_v15 = vadd.f32 %v21_v13, %v20_v11  ;;  %v34_v16 = vrot.slane %v33_v14, 4 }
   0xc   :  { %v23_v17 = vrot.slane %v22_v15, 2  ;;  %v35_v18 = vadd.f32 %v34_v16, %v33_v14 }
   0xe   :  { %v24_v19 = vadd.f32 %v23_v17, %v22_v15  ;;  %v36_v20 = vrot.slane %v35_v18, 2 }
  0x10   :  { %v25_v21 = vrot.slane %v24_v19, 1  ;;  %v37_v22 = vadd.f32 %v36_v20, %v35_v18 }
  0x12   :  { %v26_v23 = vadd.f32 %v25_v21, %v24_v19  ;;  %v38_v24 = vrot.slane %v37_v22, 1 }
  0x14   :  { %v39_v25 = vadd.f32 %v38_v24, %v37_v22  ;;  %v40_v26 = vmul.f32 0.03125, %v26_v23 }
  0x16   :  { %v41_v27 = vmul.f32 0.03125, %v39_v25  ;;  %v42_v28 = vmul.f32 %v40_v26, %v40_v26 }
  0x18   :  { %v43_v29 = vsub.f32 %v41_v27, %v42_v28 }
  0x1a   :  { %v45_v30 = vadd.f32 1e-05, %v43_v29 }
  0x1c   :  { %79 = vrsqrt.f32 %v45_v30 }
  0x26   :  { %v80_v35 = vpop.eup %79 }
  0x27   :  { %v47_v36 = vmul.f32 %v80_v35, %v44_v33 }
  0x29   :  { %v49_v38 = vmul.f32 %v47_v36, %v40_v26  ;;  %v55_v39 = vrot.slane %v47_v36, %v54_v34 }
  0x2b   :  { %v50_v40 = vsub.f32 %v48_v37, %v49_v38  ;;  %v57_v41 = vmul.f32 %v55_v39, %v14_v0  ;;  %v58_v42 = vmul.f32 %v55_v39, %v15_v1  ;;  %v59_v43 = vmul.f32 %v55_v39, %v16_v2 }
  0x2c   :  { %v60_v44 = vmul.f32 %v55_v39, %v17_v3 }
  0x2d   :  { %v65_v45 = vrot.slane %v50_v40, %v54_v34 }
  0x2f   :  { %v67_v46 = vadd.f32 %v65_v45, %v57_v41  ;;  %v68_v47 = vadd.f32 %v65_v45, %v58_v42  ;;  %v69_v48 = vadd.f32 %v65_v45, %v59_v43  ;;  %v70_v49 = vadd.f32 %v65_v45, %v60_v44 }
  0x31   :  { %71 = vst [vmem:[%s134_s3] sm:$0xff] %v67_v46  ;;  %72 = vst [vmem:[%s134_s3 + $0x8] sm:$0xff] %v68_v47 }
  0x32   :  { %73 = vst [vmem:[%s134_s3 + $0x10] sm:$0xff] %v69_v48  ;;  %74 = vst [vmem:[%s134_s3 + $0x18] sm:$0xff] %v70_v49 }

// kernel: _lambda_.56
= control target key start
LH: loop header
LB: loop body
LE: loop exit
PB: predicated region body
PF: predicated region fallthrough
CT: control target
= control target key end

     0   :  { %v55_v31 = vlaneseq  ;;  %s163_s0 = inlined_call_operand.vmem [shape: f32[32,128], index: 0, kind: input, shape index: {}]   ;;  %s164_s2 = inlined_call_operand.vmem [shape: f32[1,128], index: 2, kind: input, shape index: {}]   ;;  %s165_s3 = inlined_call_operand.vmem [shape: f32[1,128], index: 3, kind: input, shape index: {}]   ;;  %s166_s1 = inlined_call_operand.vmem [shape: f32[32,128], index: 1, kind: input, shape index: {}]   ;;  %s167_s4 = inlined_call_operand.vmem [shape: f32[32,128], index: 4, kind: output, shape index: {}]  }
   0x1   :  { %v17_v0 = vld [vmem:[%s163_s0] sm:$0xff]  ;;  %v18_v1 = vld [vmem:[%s163_s0 + $0x8] sm:$0xff]  ;;  %v19_v2 = vld [vmem:[%s163_s0 + $0x10] sm:$0xff] }
   0x2   :  { %v20_v3 = vld [vmem:[%s163_s0 + $0x18] sm:$0xff]  ;;  %v21_v4 = vadd.f32 %v18_v1, %v17_v0  ;;  %v30_v5 = vmul.f32 %v17_v0, %v17_v0  ;;  %v31_v6 = vmul.f32 %v18_v1, %v18_v1  ;;  %v32_v7 = vmul.f32 %v19_v2, %v19_v2  ;;  %v47_v33 = vld [vmem:[%s164_s2] sm:$0x1]  ;;  %v75_v47 = vld [vmem:[%s166_s1 + $0x8] sm:$0xff] }
   0x3   :  { %v33_v9 = vmul.f32 %v20_v3, %v20_v3  ;;  %v56_v32 = vshrl.u32 %v55_v31, 7  ;;  %v51_v37 = vld [vmem:[%s165_s3] sm:$0x1]  ;;  %v76_v48 = vld [vmem:[%s166_s1 + $0x10] sm:$0xff]  ;;  %v77_v49 = vld [vmem:[%s166_s1 + $0x18] sm:$0xff] }
   0x4   :  { %v22_v8 = vadd.f32 %v21_v4, %v19_v2  ;;  %v34_v10 = vadd.f32 %v31_v6, %v30_v5  ;;  %v74_v46 = vld [vmem:[%s166_s1] sm:$0xff] }
   0x5   :  { %v57_v34 = vsub.s32 0, %v56_v32 }
   0x6   :  { %v23_v11 = vadd.f32 %v22_v8, %v20_v3  ;;  %v35_v12 = vadd.f32 %v34_v10, %v32_v7 }
   0x8   :  { %v24_v13 = vrot.slane %v23_v11, 4  ;;  %v36_v14 = vadd.f32 %v35_v12, %v33_v9 }
   0xa   :  { %v25_v15 = vadd.f32 %v24_v13, %v23_v11  ;;  %v37_v16 = vrot.slane %v36_v14, 4 }
   0xc   :  { %v26_v17 = vrot.slane %v25_v15, 2  ;;  %v38_v18 = vadd.f32 %v37_v16, %v36_v14 }
   0xe   :  { %v27_v19 = vadd.f32 %v26_v17, %v25_v15  ;;  %v39_v20 = vrot.slane %v38_v18, 2 }
  0x10   :  { %v28_v21 = vrot.slane %v27_v19, 1  ;;  %v40_v22 = vadd.f32 %v39_v20, %v38_v18 }
  0x12   :  { %v29_v23 = vadd.f32 %v28_v21, %v27_v19  ;;  %v41_v24 = vrot.slane %v40_v22, 1 }
  0x14   :  { %v42_v25 = vadd.f32 %v41_v24, %v40_v22  ;;  %v43_v26 = vmul.f32 0.03125, %v29_v23 }
  0x16   :  { %v44_v27 = vmul.f32 0.03125, %v42_v25  ;;  %v45_v28 = vmul.f32 %v43_v26, %v43_v26 }
  0x18   :  { %v46_v29 = vsub.f32 %v44_v27, %v45_v28 }
  0x1a   :  { %v48_v30 = vadd.f32 1e-05, %v46_v29 }
  0x1c   :  { %94 = vrsqrt.f32 %v48_v30 }
  0x26   :  { %v95_v35 = vpop.eup %94 }
  0x27   :  { %v50_v36 = vmul.f32 %v95_v35, %v47_v33 }
  0x29   :  { %v52_v38 = vmul.f32 %v50_v36, %v43_v26  ;;  %v58_v39 = vrot.slane %v50_v36, %v57_v34 }
  0x2b   :  { %v53_v40 = vsub.f32 %v51_v37, %v52_v38  ;;  %v60_v41 = vmul.f32 %v58_v39, %v17_v0  ;;  %v61_v42 = vmul.f32 %v58_v39, %v18_v1  ;;  %v62_v43 = vmul.f32 %v58_v39, %v19_v2 }
  0x2c   :  { %v63_v44 = vmul.f32 %v58_v39, %v20_v3 }
  0x2d   :  { %v68_v45 = vrot.slane %v53_v40, %v57_v34 }
  0x2f   :  { %v70_v50 = vadd.f32 %v68_v45, %v60_v41  ;;  %v71_v51 = vadd.f32 %v68_v45, %v61_v42  ;;  %v72_v52 = vadd.f32 %v68_v45, %v62_v43  ;;  %v73_v53 = vadd.f32 %v68_v45, %v63_v44 }
  0x31   :  { %v78_v54 = vadd.f32 %v74_v46, %v70_v50  ;;  %v79_v55 = vadd.f32 %v75_v47, %v71_v51  ;;  %v80_v56 = vadd.f32 %v76_v48, %v72_v52  ;;  %v81_v57 = vadd.f32 %v77_v49, %v73_v53 }
  0x33   :  { %v82_v58 = vmax.f32 %v78_v54, 0.0  ;;  %v83_v59 = vmax.f32 %v79_v55, 0.0  ;;  %v84_v60 = vmax.f32 %v80_v56, 0.0  ;;  %v85_v61 = vmax.f32 %v81_v57, 0.0 }
  0x35   :  { %86 = vst [vmem:[%s167_s4] sm:$0xff] %v82_v58  ;;  %87 = vst [vmem:[%s167_s4 + $0x8] sm:$0xff] %v83_v59 }
  0x36   :  { %88 = vst [vmem:[%s167_s4 + $0x10] sm:$0xff] %v84_v60  ;;  %89 = vst [vmem:[%s167_s4 + $0x18] sm:$0xff] %v85_v61 }

// kernel: _lambda_.62
= control target key start
LH: loop header
LB: loop body
LE: loop exit
PB: predicated region body
PF: predicated region fallthrough
CT: control target
= control target key end

     0   :  { %v135_v38 = vmov 1966171168   ;;  %v61_v40 = vlaneseq  ;;  %s188_s0 = inlined_call_operand.vmem [shape: f32[8,256], index: 0, kind: input, shape index: {}]   ;;  %s189_s1 = inlined_call_operand.vmem [shape: f32[1,256], index: 1, kind: input, shape index: {}]   ;;  %s190_s2 = inlined_call_operand.vmem [shape: f32[1,256], index: 2, kind: input, shape index: {}]   ;;  %s191_s3 = inlined_call_operand.vmem [shape: f32[8,256], index: 3, kind: output, shape index: {}]  }
   0x1   :  { %v159_v0 = vld [vmem:[%s188_s0] sm:$0xff]  ;;  %v164_v1 = vld [vmem:[%s188_s0 + $0x8] sm:$0xff]  ;;  %v59_v39 = vunpack.c.l.s4 %v135_v38 }
   0x2   :  { %v16_v2 = vrot.slane %v159_v0, 4  ;;  %v22_v3 = vrot.slane %v164_v1, 4  ;;  %v28_v4 = vmul.f32 %v159_v0, %v159_v0  ;;  %v29_v5 = vmul.f32 %v164_v1, %v164_v1  ;;  %v50_v48 = vld [vmem:[%s189_s1] sm:$0x3] }
   0x3   :  { %v60_v41 = vunpack.c.0.s8 %v59_v39  ;;  %v62_v42 = vshrl.u32 %v61_v40, 7  ;;  %v74_v59 = vld [vmem:[%s190_s2] sm:$0x3] }
   0x4   :  { %v17_v6 = vadd.f32 %v16_v2, %v159_v0  ;;  %v23_v7 = vadd.f32 %v22_v3, %v164_v1  ;;  %v30_v8 = vrot.slane %v28_v4, 4  ;;  %v36_v9 = vrot.slane %v29_v5, 4 }
   0x5   :  { %v63_v44 = vsub.s32 %v60_v41, %v62_v42  ;;  %v78_v50 = vsub.s32 0, %v62_v42  ;;  %v82_v51 = vsub.s32 1, %v62_v42 }
   0x6   :  { %v18_v10 = vrot.slane %v17_v6, 2  ;;  %v24_v11 = vrot.slane %v23_v7, 2  ;;  %v31_v12 = vadd.f32 %v30_v8, %v28_v4  ;;  %v37_v13 = vadd.f32 %v36_v9, %v29_v5 }
   0x8   :  { %v19_v14 = vadd.f32 %v18_v10, %v17_v6  ;;  %v25_v15 = vadd.f32 %v24_v11, %v23_v7  ;;  %v32_v16 = vrot.slane %v31_v12, 2  ;;  %v38_v17 = vrot.slane %v37_v13, 2 }
   0xa   :  { %v20_v18 = vrot.slane %v19_v14, 1  ;;  %v26_v19 = vrot.slane %v25_v15, 1  ;;  %v33_v20 = vadd.f32 %v32_v16, %v31_v12  ;;  %v39_v21 = vadd.f32 %v38_v17, %v37_v13 }
   0xc   :  { %v21_v22 = vadd.f32 %v20_v18, %v19_v14  ;;  %v27_v23 = vadd.f32 %v26_v19, %v25_v15  ;;  %v34_v24 = vrot.slane %v33_v20, 1  ;;  %v40_v25 = vrot.slane %v39_v21, 1 }
   0xe   :  { %v35_v26 = vadd.f32 %v34_v24, %v33_v20  ;;  %v41_v27 = vadd.f32 %v40_v25, %v39_v21  ;;  %v42_v28 = vmul.f32 0.125, %v21_v22  ;;  %v43_v29 = vmul.f32 0.125, %v27_v23 }
  0x10   :  { %v44_v30 = vmul.f32 0.125, %v35_v26  ;;  %v45_v31 = vmul.f32 0.125, %v41_v27  ;;  %v46_v32 = vmul.f32 %v42_v28, %v42_v28  ;;  %v47_v33 = vmul.f32 %v43_v29, %v43_v29 }
  0x12   :  { %v48_v34 = vsub.f32 %v44_v30, %v46_v32  ;;  %v49_v35 = vsub.f32 %v45_v31, %v47_v33 }
  0x14   :  { %v51_v36 = vadd.f32 1e-05, %v48_v34  ;;  %v52_v37 = vadd.f32 1e-05, %v49_v35 }
  0x16   :  { %131 = vrsqrt.f32 %v51_v36 }
  0x17   :  { %133 = vrsqrt.f32 %v52_v37 }
  0x20   :  { %v132_v43 = vpop.eup %131 }
  0x21   :  { %v134_v45 = vpop.eup %133 }
  0x22   :  { %v57_v46 = vcombine.low %v132_v43, %v134_v45 }
  0x24   :  { %v64_v47 = vrot.slane %v57_v46, %v63_v44 }
  0x26   :  { %v71_v49 = vrot.slane %v64_v47, %v63_v44 }
  0x28   :  { %v73_v52 = vmul.f32 %v71_v49, %v50_v48 }
  0x2a   :  { %v79_v53 = vrot.slane %v73_v52, %v78_v50  ;;  %v83_v54 = vrot.slane %v73_v52, %v82_v51 }
  0x2c   :  { %v86_v55 = vmul.f32 %v79_v53, %v42_v28  ;;  %v87_v56 = vmul.f32 %v83_v54, %v43_v29  ;;  %v107_v62 = vmul.f32 %v79_v53, %v159_v0  ;;  %v108_v63 = vmul.f32 %v83_v54, %v164_v1 }
  0x2e   :  { %v90_v57 = vcombine.low %v86_v55, %v87_v56 }
  0x30   :  { %v97_v58 = vrot.slane %v90_v57, %v63_v44 }
  0x32   :  { %v104_v60 = vrot.slane %v97_v58, %v63_v44 }
  0x34   :  { %v106_v61 = vsub.f32 %v74_v59, %v104_v60 }
  0x36   :  { %v113_v2 = vrot.slane %v106_v61, %v78_v50  ;;  %v117_v3 = vrot.slane %v106_v61, %v82_v51 }
  0x38   :  { %v120_v4 = vadd.f32 %v113_v2, %v107_v62  ;;  %v121_v5 = vadd.f32 %v117_v3, %v108_v63 }
  0x3a   :  { %v122_v6 = vmax.f32 %v120_v4, 0.0  ;;  %v123_v7 = vmax.f32 %v121_v5, 0.0 }
  0x3c   :  { %124 = vst [vmem:[%s191_s3] sm:$0xff] %v122_v6  ;;  %125 = vst [vmem:[%s191_s3 + $0x8] sm:$0xff] %v123_v7 }

// kernel: _lambda_.61
= control target key start
LH: loop header
LB: loop body
LE: loop exit
PB: predicated region body
PF: predicated region fallthrough
CT: control target
= control target key end

     0   :  { %s938_s9 = smov 0   ;;  %s940_s10 = smov 0   ;;  %s1043_s0 = inlined_call_operand.vmem [shape: bf16[8,1152], index: 0, kind: input, shape index: {}]   ;;  %s1044_s1 = inlined_call_operand.vmem [shape: bf16[1152,256], index: 1, kind: input, shape index: {}]   ;;  %s1045_s2 = inlined_call_operand.vmem [shape: f32[8,256], index: 2, kind: output, shape index: {}]  }
   0x1   :  { %s942_s11 = smov 0  }
   0x2 LB: > { %s24_s12 = sadd.s32 1, %s915_s10  ;;  %p735_p0 = scmp.ge.s32.totalorder %s919_s11, 1  ;;  %s919_s11 = sphi %s942_s11, %s12_s11   ;;  %s915_s10 = sphi %s940_s10, %s1047_s10   ;;  %s911_s9 = sphi %s938_s9, %s1046_s9  }
   0x3   : > { %p25_p1 = scmp.ge.s32.totalorder %s24_s12, 3  ;;  %p159_p2 = scmp.lt.s32.totalorder %s919_s11, 4 }
   0x5   : > { %s1049_s12 = smov (%p25_p1, %s24_s12), 0  ;;  %p160_p3 = pnand %p735_p0, %p159_p2 }
   0x6   : > { %s199_s13 = smul.u32 (!%p160_p3), 3, %s911_s9  ;;  %p739_p6 = scmp.ne.s32.totalorder (!%p160_p3), %s911_s9, 0 }
   0x7   : > { %163 = sbr.rel (%p160_p3) target bundleno = 307 (0x133), region = 28 }
   0x8   : > { %s209_s14 = smul.u32 (!%p160_p3), 48, %s911_s9  ;;  %p202_p4 = scmp.lt.s32.totalorder (!%p160_p3), %s199_s13, 8 }
   0xa   : > { %p211_p5 = scmp.lt.s32.totalorder (!%p160_p3), %s209_s14, 143 }
   0xe   : > { %s1051_s13 = smov (!%p202_p4, %s199_s13), 8  ;;  %s1053_s14 = smov (!%p211_p5, %s209_s14), 143 }
   0xf   : > { %s736_s15 = sshll.u32 %s1051_s13, 2  ;;  %s795_s19 = sshll.u32 %s1053_s14, 3  ;;  %v921_v0 = vmov (!%p739_p6), 0.0  }
  0x10   : > { %s959_s18 = scalar_lea.vmem %s1043_s0, %s736_s15  ;;  %s964_s22 = scalar_lea.vmem %s1044_s1, %s795_s19  ;;  %236 = vst [vmem:[%s1045_s2] sm:$0xff] (!%p739_p6), %v921_v0  ;;  %237 = vst [vmem:[%s1045_s2 + $0x8] sm:$0xff] (!%p739_p6), %v921_v0 }
  0x11   : > { %235 = sbr.rel (%p739_p6) target bundleno = 24 (0x18), region = 32 }
  0x18 PF: > { %v822_v1 = vld [vmem:[%s964_s22 + $0x4] ss:$8 sps:$4 sm:$0xff]   ;;  %v824_v2 = vld [vmem:[%s964_s22] ss:$8 sps:$4 sm:$0xff]   ;;  %v922_v3 = vmov 0  }
  0x19   : > { %614 = vmatprep.mubr.bf16.mxu1 %v922_v3  ;;  %541 = vmatprep.subr.bf16.mxu0 %v822_v1  ;;  %v825_v4 = vld [vmem:[%s964_s22 + $0x14] ss:$8 sps:$4 sm:$0xff]   ;;  %v827_v5 = vld [vmem:[%s964_s22 + $0x10] ss:$8 sps:$4 sm:$0xff]   ;;  %v828_v6 = vld [vmem:[%s964_s22 + $0x24] ss:$8 sps:$4 sm:$0xff]  }
  0x1a   : > { %542 = vmatpush1.bf16.msra.mxu0 %v824_v2  ;;  %v830_v7 = vld [vmem:[%s964_s22 + $0x20] ss:$8 sps:$4 sm:$0xff]   ;;  %v831_v8 = vld [vmem:[%s964_s22 + $0x34] ss:$8 sps:$4 sm:$0xff]   ;;  %v833_v9 = vld [vmem:[%s964_s22 + $0x30] ss:$8 sps:$4 sm:$0xff]  }
  0x1b   : > { %543 = vmatprep.subr.bf16.mxu0 %v825_v4  ;;  %v846_v10 = vld [vmem:[%s964_s22 + $0x104] ss:$8 sps:$4 sm:$0xff]   ;;  %v848_v11 = vld [vmem:[%s964_s22 + $0x100] ss:$8 sps:$4 sm:$0xff]   ;;  %v852_v13 = vld [vmem:[%s964_s22 + $0x114] ss:$8 sps:$4 sm:$0xff]  }
  0x1c   : > { %v834_v12 = vld [vmem:[%s964_s22 + $0x44] ss:$8 sps:$4 sm:$0xff]   ;;  %582 = vmatprep.subr.bf16.mxu1 %v846_v10  ;;  %v854_v14 = vld [vmem:[%s964_s22 + $0x110] ss:$8 sps:$4 sm:$0xff]   ;;  %v836_v15 = vld [vmem:[%s964_s22 + $0x40] ss:$8 sps:$4 sm:$0xff]  }
  0x1d   : > { %583 = vmatpush1.bf16.msra.mxu1 %v848_v11  ;;  %v837_v16 = vld [vmem:[%s964_s22 + $0x54] ss:$8 sps:$4 sm:$0xff]   ;;  %v858_v17 = vld [vmem:[%s964_s22 + $0x124] ss:$8 sps:$4 sm:$0xff]   ;;  %v860_v18 = vld [vmem:[%s964_s22 + $0x120] ss:$8 sps:$4 sm:$0xff]  }
  0x1e   : > { %544 = vmatpush1.bf16.msra.mxu0 %v827_v5  ;;  %584 = vmatprep.subr.bf16.mxu1 %v852_v13  ;;  %v839_v19 = vld [vmem:[%s964_s22 + $0x50] ss:$8 sps:$4 sm:$0xff]   ;;  %v864_v20 = vld [vmem:[%s964_s22 + $0x134] ss:$8 sps:$4 sm:$0xff]   ;;  %v840_v21 = vld [vmem:[%s964_s22 + $0x64] ss:$8 sps:$4 sm:$0xff]  }
  0x1f   : > { %545 = vmatprep.subr.bf16.mxu0 %v828_v6  ;;  %v866_v22 = vld [vmem:[%s964_s22 + $0x130] ss:$8 sps:$4 sm:$0xff]   ;;  %v842_v23 = vld [vmem:[%s964_s22 + $0x60] ss:$8 sps:$4 sm:$0xff]   ;;  %v870_v24 = vld [vmem:[%s964_s22 + $0x144] ss:$8 sps:$4 sm:$0xff]  }
  0x20   : > { %v843_v25 = vld [vmem:[%s964_s22 + $0x74] ss:$8 sps:$4 sm:$0xff]   ;;  %v872_v26 = vld [vmem:[%s964_s22 + $0x140] ss:$8 sps:$4 sm:$0xff]   ;;  %v845_v27 = vld [vmem:[%s964_s22 + $0x70] ss:$8 sps:$4 sm:$0xff]  }
  0x21   : > { %585 = vmatpush1.bf16.msra.mxu1 %v854_v14  ;;  %v876_v28 = vld [vmem:[%s964_s22 + $0x154] ss:$8 sps:$4 sm:$0xff]   ;;  %v849_v29 = vld [vmem:[%s964_s22 + $0x84] ss:$8 sps:$4 sm:$0xff]   ;;  %v878_v30 = vld [vmem:[%s964_s22 + $0x150] ss:$8 sps:$4 sm:$0xff]  }
  0x22   : > { %546 = vmatpush1.bf16.msra.mxu0 %v830_v7  ;;  %586 = vmatprep.subr.bf16.mxu1 %v858_v17  ;;  %v851_v31 = vld [vmem:[%s964_s22 + $0x80] ss:$8 sps:$4 sm:$0xff]   ;;  %v882_v32 = vld [vmem:[%s964_s22 + $0x164] ss:$8 sps:$4 sm:$0xff]   ;;  %v855_v33 = vld [vmem:[%s964_s22 + $0x94] ss:$8 sps:$4 sm:$0xff]  }
  0x23   : > { %547 = vmatprep.subr.bf16.mxu0 %v831_v8  ;;  %v240_v34 = vld [vmem:[%s959_s18] sm:$0xff]  ;;  %v857_v37 = vld [vmem:[%s964_s22 + $0x90] ss:$8 sps:$4 sm:$0xff]   ;;  %v888_v38 = vld [vmem:[%s964_s22 + $0x174] ss:$8 sps:$4 sm:$0xff]  }
  0x24   : > { %v741_v35 = vcombine.high %v240_v34, %v240_v34  ;;  %v884_v36 = vld [vmem:[%s964_s22 + $0x160] ss:$8 sps:$4 sm:$0xff]   ;;  %v861_v39 = vld [vmem:[%s964_s22 + $0xa4] ss:$8 sps:$4 sm:$0xff]   ;;  %v890_v40 = vld [vmem:[%s964_s22 + $0x170] ss:$8 sps:$4 sm:$0xff]   ;;  %v740_v53 = vcombine.low %v240_v34, %v240_v34 }
  0x25   : > { %587 = vmatpush1.bf16.msra.mxu1 %v860_v18  ;;  %v863_v41 = vld [vmem:[%s964_s22 + $0xa0] ss:$8 sps:$4 sm:$0xff]   ;;  %v867_v42 = vld [vmem:[%s964_s22 + $0xb4] ss:$8 sps:$4 sm:$0xff]   ;;  %v869_v44 = vld [vmem:[%s964_s22 + $0xb0] ss:$8 sps:$4 sm:$0xff]  }
  0x26   : > { %548 = vmatpush1.bf16.msra.mxu0 %v833_v9  ;;  %588 = vmatprep.subr.bf16.mxu1 %v864_v20  ;;  %v894_v43 = vld [vmem:[%s959_s18 + $0x8] ss:$0 sps:$4 sm:$0xff]   ;;  %v873_v45 = vld [vmem:[%s964_s22 + $0xc4] ss:$8 sps:$4 sm:$0xff]   ;;  %v879_v47 = vld [vmem:[%s964_s22 + $0xd4] ss:$8 sps:$4 sm:$0xff]  }
  0x27   : > { %549 = vmatprep.subr.bf16.mxu0 %v834_v12  ;;  %573 = vmatprep.mubr.bf16.mxu0 %v741_v35  ;;  %v875_v46 = vld [vmem:[%s964_s22 + $0xc0] ss:$8 sps:$4 sm:$0xff]   ;;  %v881_v48 = vld [vmem:[%s964_s22 + $0xd0] ss:$8 sps:$4 sm:$0xff]   ;;  %v885_v49 = vld [vmem:[%s964_s22 + $0xe4] ss:$8 sps:$4 sm:$0xff]  }
  0x28   : > { %v887_v50 = vld [vmem:[%s964_s22 + $0xe0] ss:$8 sps:$4 sm:$0xff]   ;;  %v891_v51 = vld [vmem:[%s964_s22 + $0xf4] ss:$8 sps:$4 sm:$0xff]   ;;  %v893_v52 = vld [vmem:[%s964_s22 + $0xf0] ss:$8 sps:$4 sm:$0xff]  }
  0x29   : > { %589 = vmatpush1.bf16.msra.mxu1 %v866_v22  ;;  %v238_v58 = vld [vmem:[%s1045_s2] sm:$0xff]  ;;  %v239_v61 = vld [vmem:[%s1045_s2 + $0x8] sm:$0xff] }
  0x2a   : > { %550 = vmatpush1.bf16.msra.mxu0 %v836_v15  ;;  %590 = vmatprep.subr.bf16.mxu1 %v870_v24 }
  0x2b   : > { %551 = vmatprep.subr.bf16.mxu0 %v837_v16 }
  0x2d   : > { %591 = vmatpush1.bf16.msra.mxu1 %v872_v26 }
  0x2e   : > { %552 = vmatpush1.bf16.msra.mxu0 %v839_v19  ;;  %592 = vmatprep.subr.bf16.mxu1 %v876_v28 }
  0x2f   : > { %553 = vmatprep.subr.bf16.mxu0 %v840_v21 }
  0x31   : > { %593 = vmatpush1.bf16.msra.mxu1 %v878_v30 }
  0x32   : > { %554 = vmatpush1.bf16.msra.mxu0 %v842_v23  ;;  %594 = vmatprep.subr.bf16.mxu1 %v882_v32 }
  0x33   : > { %555 = vmatprep.subr.bf16.mxu0 %v843_v25 }
  0x35   : > { %595 = vmatpush1.bf16.msra.mxu1 %v884_v36 }
  0x36   : > { %556 = vmatpush1.bf16.msra.mxu0 %v845_v27  ;;  %596 = vmatprep.subr.bf16.mxu1 %v888_v38 }
  0x37   : > { %557 = vmatprep.subr.bf16.mxu0 %v849_v29 }
  0x39   : > { %597 = vmatpush1.bf16.msra.mxu1 %v890_v40 }
  0x3a   : > { %558 = vmatpush1.bf16.msra.mxu0 %v851_v31 }
  0x3b   : > { %559 = vmatprep.subr.bf16.mxu0 %v855_v33 }
  0x3c   : > { %615 = vmatmul.mubr.bf16.vlgmr.msra.gmra.mrb[0].mxu1 %v894_v43 }
  0x3e   : > { %560 = vmatpush1.bf16.msra.mxu0 %v857_v37 }
  0x3f   : > { %561 = vmatprep.subr.bf16.mxu0 %v861_v39 }
  0x42   : > { %562 = vmatpush1.bf16.msra.mxu0 %v863_v41 }
  0x43   : > { %563 = vmatprep.subr.bf16.mxu0 %v867_v42 }
  0x46   : > { %564 = vmatpush1.bf16.msra.mxu0 %v869_v44 }
  0x47   : > { %565 = vmatprep.subr.bf16.mxu0 %v873_v45 }
  0x4a   : > { %566 = vmatpush1.bf16.msra.mxu0 %v875_v46 }
  0x4b   : > { %567 = vmatprep.subr.bf16.mxu0 %v879_v47 }
  0x4e   : > { %568 = vmatpush1.bf16.msra.mxu0 %v881_v48 }
  0x4f   : > { %569 = vmatprep.subr.bf16.mxu0 %v885_v49 }
  0x52   : > { %570 = vmatpush1.bf16.msra.mxu0 %v887_v50 }
  0x53   : > { %571 = vmatprep.subr.bf16.mxu0 %v891_v51 }
  0x56   : > { %572 = vmatpush1.bf16.msra.mxu0 %v893_v52 }
  0x59   : > { %574 = vmatmul.mubr.bf16.vlgmr.msra.gmra.mrb[0].mxu0 %v740_v53 }
 0x10f   : > { %v616_v54 = vpop.f32.mrb[0].mxu1 }
 0x110   : > { %v618_v55 = vpop.f32.mrb[1].mxu1 }
 0x111   : > { %v620_v56 = vpop.f32.mrb[2].mxu1 }
 0x112   : > { %v621_v57 = vpop.f32.mrb[3].mxu1 }
 0x12c   : > { %v575_v59 = vpop.f32.mrb[0].mxu0 }
 0x12d   : > { %v617_v60 = vadd.f32 %v616_v54, %v575_v59  ;;  %v577_v62 = vpop.f32.mrb[1].mxu0 }
 0x12e   : > { %v619_v63 = vadd.f32 %v618_v55, %v577_v62  ;;  %v579_v0 = vpop.f32.mrb[2].mxu0 }
 0x12f   : > { %v623_v1 = vadd.f32 %v617_v60, %v238_v58  ;;  %v580_v2 = vpop.f32.mrb[3].mxu0 }
 0x130   : > { %v624_v3 = vadd.f32 %v619_v63, %v239_v61 }
 0x131   : > { %625 = vst [vmem:[%s1045_s2] sm:$0xff] %v623_v1 }
 0x132   : > { %626 = vst [vmem:[%s1045_s2 + $0x8] sm:$0xff] %v624_v3 }
 0x133 PF: > { %s12_s11 = sadd.s32 1, %s919_s11   ;;  %s1046_s9 = smov %s915_s10 }
 0x134   : > { %p9_p7 = scmp.ge.s32.totalorder %s12_s11, 5   ;;  %s1047_s10 = smov %s1049_s12 }
 0x136   :  { %11 = sbr.rel (!%p9_p7) target bundleno = 2 (0x2), region = 65 }

// kernel: _lambda_.64
= control target key start
LH: loop header
LB: loop body
LE: loop exit
PB: predicated region body
PF: predicated region fallthrough
CT: control target
= control target key end

     0   :  { %v208_v1 = vmov 0   ;;  %s281_s1 = inlined_call_operand.vmem [shape: bf16[128,256], index: 1, kind: input, shape index: {}]   ;;  %s282_s0 = inlined_call_operand.vmem [shape: bf16[8,128], index: 0, kind: input, shape index: {}]   ;;  %s283_s2 = inlined_call_operand.vmem [shape: f32[8,256], index: 2, kind: output, shape index: {}]  }
   0x1   :  { %v184_v0 = vld [vmem:[%s281_s1 + $0x4] ss:$8 sps:$4 sm:$0xff]   ;;  %149 = vmatprep.mubr.bf16.mxu0 %v208_v1  ;;  %v186_v2 = vld [vmem:[%s281_s1] ss:$8 sps:$4 sm:$0xff]   ;;  %v187_v3 = vld [vmem:[%s281_s1 + $0x14] ss:$8 sps:$4 sm:$0xff]  }
   0x2   :  { %117 = vmatprep.subr.bf16.mxu0 %v184_v0  ;;  %v189_v4 = vld [vmem:[%s281_s1 + $0x10] ss:$8 sps:$4 sm:$0xff]   ;;  %v190_v5 = vld [vmem:[%s281_s1 + $0x24] ss:$8 sps:$4 sm:$0xff]   ;;  %v192_v6 = vld [vmem:[%s281_s1 + $0x20] ss:$8 sps:$4 sm:$0xff]  }
   0x3   :  { %118 = vmatpush1.bf16.msra.mxu0 %v186_v2  ;;  %v193_v7 = vld [vmem:[%s281_s1 + $0x34] ss:$8 sps:$4 sm:$0xff]   ;;  %v195_v8 = vld [vmem:[%s281_s1 + $0x30] ss:$8 sps:$4 sm:$0xff]   ;;  %v196_v9 = vld [vmem:[%s281_s1 + $0x44] ss:$8 sps:$4 sm:$0xff]  }
   0x4   :  { %119 = vmatprep.subr.bf16.mxu0 %v187_v3  ;;  %v198_v10 = vld [vmem:[%s281_s1 + $0x40] ss:$8 sps:$4 sm:$0xff]   ;;  %v199_v11 = vld [vmem:[%s281_s1 + $0x54] ss:$8 sps:$4 sm:$0xff]   ;;  %v201_v12 = vld [vmem:[%s281_s1 + $0x50] ss:$8 sps:$4 sm:$0xff]  }
   0x5   :  { %v202_v13 = vld [vmem:[%s281_s1 + $0x64] ss:$8 sps:$4 sm:$0xff]   ;;  %v204_v14 = vld [vmem:[%s281_s1 + $0x60] ss:$8 sps:$4 sm:$0xff]   ;;  %v205_v15 = vld [vmem:[%s281_s1 + $0x74] ss:$8 sps:$4 sm:$0xff]  }
   0x6   :  { %v207_v16 = vld [vmem:[%s281_s1 + $0x70] ss:$8 sps:$4 sm:$0xff]   ;;  %v20_v17 = vld [vmem:[%s282_s0] sm:$0xf] }
   0x7   :  { %120 = vmatpush1.bf16.msra.mxu0 %v189_v4 }
   0x8   :  { %121 = vmatprep.subr.bf16.mxu0 %v190_v5 }
   0xb   :  { %122 = vmatpush1.bf16.msra.mxu0 %v192_v6 }
   0xc   :  { %123 = vmatprep.subr.bf16.mxu0 %v193_v7 }
   0xf   :  { %124 = vmatpush1.bf16.msra.mxu0 %v195_v8 }
  0x10   :  { %125 = vmatprep.subr.bf16.mxu0 %v196_v9 }
  0x13   :  { %126 = vmatpush1.bf16.msra.mxu0 %v198_v10 }
  0x14   :  { %127 = vmatprep.subr.bf16.mxu0 %v199_v11 }
  0x17   :  { %128 = vmatpush1.bf16.msra.mxu0 %v201_v12 }
  0x18   :  { %129 = vmatprep.subr.bf16.mxu0 %v202_v13 }
  0x1b   :  { %130 = vmatpush1.bf16.msra.mxu0 %v204_v14 }
  0x1c   :  { %131 = vmatprep.subr.bf16.mxu0 %v205_v15 }
  0x1f   :  { %132 = vmatpush1.bf16.msra.mxu0 %v207_v16 }
  0x22   :  { %150 = vmatmul.mubr.bf16.vlgmr.msra.gmra.mrb[0].mxu0 %v20_v17 }
  0xf5   :  { %v151_v18 = vpop.f32.mrb[0].mxu0 }
  0xf6   :  { %v153_v19 = vpop.f32.mrb[1].mxu0  ;;  %160 = vst [vmem:[%s283_s2] sm:$0xff] %v151_v18 }
  0xf7   :  { %v155_v20 = vpop.f32.mrb[2].mxu0  ;;  %161 = vst [vmem:[%s283_s2 + $0x8] sm:$0xff] %v153_v19 }
  0xf8   :  { %v156_v21 = vpop.f32.mrb[3].mxu0 }

// kernel: _lambda_.63
= control target key start
LH: loop header
LB: loop body
LE: loop exit
PB: predicated region body
PF: predicated region fallthrough
CT: control target
= control target key end

     0   :  { %s938_s9 = smov 0   ;;  %s940_s10 = smov 0   ;;  %s1043_s0 = inlined_call_operand.vmem [shape: bf16[8,2304], index: 0, kind: input, shape index: {}]   ;;  %s1044_s1 = inlined_call_operand.vmem [shape: bf16[2304,256], index: 1, kind: input, shape index: {}]   ;;  %s1045_s2 = inlined_call_operand.vmem [shape: f32[8,256], index: 2, kind: output, shape index: {}]  }
   0x1   :  { %s942_s11 = smov 0  }
   0x2 LB: > { %s24_s12 = sadd.s32 1, %s915_s10  ;;  %p735_p0 = scmp.ge.s32.totalorder %s919_s11, 1  ;;  %s919_s11 = sphi %s942_s11, %s12_s11   ;;  %s915_s10 = sphi %s940_s10, %s1047_s10   ;;  %s911_s9 = sphi %s938_s9, %s1046_s9  }
   0x3   : > { %p25_p1 = scmp.ge.s32.totalorder %s24_s12, 6  ;;  %p159_p2 = scmp.lt.s32.totalorder %s919_s11, 7 }
   0x5   : > { %s1049_s12 = smov (%p25_p1, %s24_s12), 0  ;;  %p160_p3 = pnand %p735_p0, %p159_p2 }
   0x6   : > { %s199_s13 = smul.u32 (!%p160_p3), 3, %s911_s9  ;;  %p739_p6 = scmp.ne.s32.totalorder (!%p160_p3), %s911_s9, 0 }
   0x7   : > { %163 = sbr.rel (%p160_p3) target bundleno = 307 (0x133), region = 28 }
   0x8   : > { %s209_s14 = smul.u32 (!%p160_p3), 48, %s911_s9  ;;  %p202_p4 = scmp.lt.s32.totalorder (!%p160_p3), %s199_s13, 17 }
   0xa   : > { %p211_p5 = scmp.lt.s32.totalorder (!%p160_p3), %s209_s14, 287 }
   0xe   : > { %s1051_s13 = smov (!%p202_p4, %s199_s13), 17  ;;  %s1053_s14 = smov (!%p211_p5, %s209_s14), 287 }
   0xf   : > { %s736_s15 = sshll.u32 %s1051_s13, 2  ;;  %s795_s19 = sshll.u32 %s1053_s14, 3  ;;  %v921_v0 = vmov (!%p739_p6), 0.0  }
  0x10   : > { %s959_s18 = scalar_lea.vmem %s1043_s0, %s736_s15  ;;  %s964_s22 = scalar_lea.vmem %s1044_s1, %s795_s19  ;;  %236 = vst [vmem:[%s1045_s2] sm:$0xff] (!%p739_p6), %v921_v0  ;;  %237 = vst [vmem:[%s1045_s2 + $0x8] sm:$0xff] (!%p739_p6), %v921_v0 }
  0x11   : > { %235 = sbr.rel (%p739_p6) target bundleno = 24 (0x18), region = 32 }
  0x18 PF: > { %v822_v1 = vld [vmem:[%s964_s22 + $0x4] ss:$8 sps:$4 sm:$0xff]   ;;  %v824_v2 = vld [vmem:[%s964_s22] ss:$8 sps:$4 sm:$0xff]   ;;  %v922_v3 = vmov 0  }
  0x19   : > { %614 = vmatprep.mubr.bf16.mxu1 %v922_v3  ;;  %541 = vmatprep.subr.bf16.mxu0 %v822_v1  ;;  %v825_v4 = vld [vmem:[%s964_s22 + $0x14] ss:$8 sps:$4 sm:$0xff]   ;;  %v827_v5 = vld [vmem:[%s964_s22 + $0x10] ss:$8 sps:$4 sm:$0xff]   ;;  %v828_v6 = vld [vmem:[%s964_s22 + $0x24] ss:$8 sps:$4 sm:$0xff]  }
  0x1a   : > { %542 = vmatpush1.bf16.msra.mxu0 %v824_v2  ;;  %v830_v7 = vld [vmem:[%s964_s22 + $0x20] ss:$8 sps:$4 sm:$0xff]   ;;  %v831_v8 = vld [vmem:[%s964_s22 + $0x34] ss:$8 sps:$4 sm:$0xff]   ;;  %v833_v9 = vld [vmem:[%s964_s22 + $0x30] ss:$8 sps:$4 sm:$0xff]  }
  0x1b   : > { %543 = vmatprep.subr.bf16.mxu0 %v825_v4  ;;  %v846_v10 = vld [vmem:[%s964_s22 + $0x104] ss:$8 sps:$4 sm:$0xff]   ;;  %v848_v11 = vld [vmem:[%s964_s22 + $0x100] ss:$8 sps:$4 sm:$0xff]   ;;  %v852_v13 = vld [vmem:[%s964_s22 + $0x114] ss:$8 sps:$4 sm:$0xff]  }
  0x1c   : > { %v834_v12 = vld [vmem:[%s964_s22 + $0x44] ss:$8 sps:$4 sm:$0xff]   ;;  %582 = vmatprep.subr.bf16.mxu1 %v846_v10  ;;  %v854_v14 = vld [vmem:[%s964_s22 + $0x110] ss:$8 sps:$4 sm:$0xff]   ;;  %v836_v15 = vld [vmem:[%s964_s22 + $0x40] ss:$8 sps:$4 sm:$0xff]  }
  0x1d   : > { %583 = vmatpush1.bf16.msra.mxu1 %v848_v11  ;;  %v837_v16 = vld [vmem:[%s964_s22 + $0x54] ss:$8 sps:$4 sm:$0xff]   ;;  %v858_v17 = vld [vmem:[%s964_s22 + $0x124] ss:$8 sps:$4 sm:$0xff]   ;;  %v860_v18 = vld [vmem:[%s964_s22 + $0x120] ss:$8 sps:$4 sm:$0xff]  }
  0x1e   : > { %544 = vmatpush1.bf16.msra.mxu0 %v827_v5  ;;  %584 = vmatprep.subr.bf16.mxu1 %v852_v13  ;;  %v839_v19 = vld [vmem:[%s964_s22 + $0x50] ss:$8 sps:$4 sm:$0xff]   ;;  %v864_v20 = vld [vmem:[%s964_s22 + $0x134] ss:$8 sps:$4 sm:$0xff]   ;;  %v840_v21 = vld [vmem:[%s964_s22 + $0x64] ss:$8 sps:$4 sm:$0xff]  }
  0x1f   : > { %545 = vmatprep.subr.bf16.mxu0 %v828_v6  ;;  %v866_v22 = vld [vmem:[%s964_s22 + $0x130] ss:$8 sps:$4 sm:$0xff]   ;;  %v842_v23 = vld [vmem:[%s964_s22 + $0x60] ss:$8 sps:$4 sm:$0xff]   ;;  %v870_v24 = vld [vmem:[%s964_s22 + $0x144] ss:$8 sps:$4 sm:$0xff]  }
  0x20   : > { %v843_v25 = vld [vmem:[%s964_s22 + $0x74] ss:$8 sps:$4 sm:$0xff]   ;;  %v872_v26 = vld [vmem:[%s964_s22 + $0x140] ss:$8 sps:$4 sm:$0xff]   ;;  %v845_v27 = vld [vmem:[%s964_s22 + $0x70] ss:$8 sps:$4 sm:$0xff]  }
  0x21   : > { %585 = vmatpush1.bf16.msra.mxu1 %v854_v14  ;;  %v876_v28 = vld [vmem:[%s964_s22 + $0x154] ss:$8 sps:$4 sm:$0xff]   ;;  %v849_v29 = vld [vmem:[%s964_s22 + $0x84] ss:$8 sps:$4 sm:$0xff]   ;;  %v878_v30 = vld [vmem:[%s964_s22 + $0x150] ss:$8 sps:$4 sm:$0xff]  }
  0x22   : > { %546 = vmatpush1.bf16.msra.mxu0 %v830_v7  ;;  %586 = vmatprep.subr.bf16.mxu1 %v858_v17  ;;  %v851_v31 = vld [vmem:[%s964_s22 + $0x80] ss:$8 sps:$4 sm:$0xff]   ;;  %v882_v32 = vld [vmem:[%s964_s22 + $0x164] ss:$8 sps:$4 sm:$0xff]   ;;  %v855_v33 = vld [vmem:[%s964_s22 + $0x94] ss:$8 sps:$4 sm:$0xff]  }
  0x23   : > { %547 = vmatprep.subr.bf16.mxu0 %v831_v8  ;;  %v240_v34 = vld [vmem:[%s959_s18] sm:$0xff]  ;;  %v857_v37 = vld [vmem:[%s964_s22 + $0x90] ss:$8 sps:$4 sm:$0xff]   ;;  %v888_v38 = vld [vmem:[%s964_s22 + $0x174] ss:$8 sps:$4 sm:$0xff]  }
  0x24   : > { %v741_v35 = vcombine.high %v240_v34, %v240_v34  ;;  %v884_v36 = vld [vmem:[%s964_s22 + $0x160] ss:$8 sps:$4 sm:$0xff]   ;;  %v861_v39 = vld [vmem:[%s964_s22 + $0xa4] ss:$8 sps:$4 sm:$0xff]   ;;  %v890_v40 = vld [vmem:[%s964_s22 + $0x170] ss:$8 sps:$4 sm:$0xff]   ;;  %v740_v53 = vcombine.low %v240_v34, %v240_v34 }
  0x25   : > { %587 = vmatpush1.bf16.msra.mxu1 %v860_v18  ;;  %v863_v41 = vld [vmem:[%s964_s22 + $0xa0] ss:$8 sps:$4 sm:$0xff]   ;;  %v867_v42 = vld [vmem:[%s964_s22 + $0xb4] ss:$8 sps:$4 sm:$0xff]   ;;  %v869_v44 = vld [vmem:[%s964_s22 + $0xb0] ss:$8 sps:$4 sm:$0xff]  }
  0x26   : > { %548 = vmatpush1.bf16.msra.mxu0 %v833_v9  ;;  %588 = vmatprep.subr.bf16.mxu1 %v864_v20  ;;  %v894_v43 = vld [vmem:[%s959_s18 + $0x8] ss:$0 sps:$4 sm:$0xff]   ;;  %v873_v45 = vld [vmem:[%s964_s22 + $0xc4] ss:$8 sps:$4 sm:$0xff]   ;;  %v879_v47 = vld [vmem:[%s964_s22 + $0xd4] ss:$8 sps:$4 sm:$0xff]  }
  0x27   : > { %549 = vmatprep.subr.bf16.mxu0 %v834_v12  ;;  %573 = vmatprep.mubr.bf16.mxu0 %v741_v35  ;;  %v875_v46 = vld [vmem:[%s964_s22 + $0xc0] ss:$8 sps:$4 sm:$0xff]   ;;  %v881_v48 = vld [vmem:[%s964_s22 + $0xd0] ss:$8 sps:$4 sm:$0xff]   ;;  %v885_v49 = vld [vmem:[%s964_s22 + $0xe4] ss:$8 sps:$4 sm:$0xff]  }
  0x28   : > { %v887_v50 = vld [vmem:[%s964_s22 + $0xe0] ss:$8 sps:$4 sm:$0xff]   ;;  %v891_v51 = vld [vmem:[%s964_s22 + $0xf4] ss:$8 sps:$4 sm:$0xff]   ;;  %v893_v52 = vld [vmem:[%s964_s22 + $0xf0] ss:$8 sps:$4 sm:$0xff]  }
  0x29   : > { %589 = vmatpush1.bf16.msra.mxu1 %v866_v22  ;;  %v238_v58 = vld [vmem:[%s1045_s2] sm:$0xff]  ;;  %v239_v61 = vld [vmem:[%s1045_s2 + $0x8] sm:$0xff] }
  0x2a   : > { %550 = vmatpush1.bf16.msra.mxu0 %v836_v15  ;;  %590 = vmatprep.subr.bf16.mxu1 %v870_v24 }
  0x2b   : > { %551 = vmatprep.subr.bf16.mxu0 %v837_v16 }
  0x2d   : > { %591 = vmatpush1.bf16.msra.mxu1 %v872_v26 }
  0x2e   : > { %552 = vmatpush1.bf16.msra.mxu0 %v839_v19  ;;  %592 = vmatprep.subr.bf16.mxu1 %v876_v28 }
  0x2f   : > { %553 = vmatprep.subr.bf16.mxu0 %v840_v21 }
  0x31   : > { %593 = vmatpush1.bf16.msra.mxu1 %v878_v30 }
  0x32   : > { %554 = vmatpush1.bf16.msra.mxu0 %v842_v23  ;;  %594 = vmatprep.subr.bf16.mxu1 %v882_v32 }
  0x33   : > { %555 = vmatprep.subr.bf16.mxu0 %v843_v25 }
  0x35   : > { %595 = vmatpush1.bf16.msra.mxu1 %v884_v36 }
  0x36   : > { %556 = vmatpush1.bf16.msra.mxu0 %v845_v27  ;;  %596 = vmatprep.subr.bf16.mxu1 %v888_v38 }
  0x37   : > { %557 = vmatprep.subr.bf16.mxu0 %v849_v29 }
  0x39   : > { %597 = vmatpush1.bf16.msra.mxu1 %v890_v40 }
  0x3a   : > { %558 = vmatpush1.bf16.msra.mxu0 %v851_v31 }
  0x3b   : > { %559 = vmatprep.subr.bf16.mxu0 %v855_v33 }
  0x3c   : > { %615 = vmatmul.mubr.bf16.vlgmr.msra.gmra.mrb[0].mxu1 %v894_v43 }
  0x3e   : > { %560 = vmatpush1.bf16.msra.mxu0 %v857_v37 }
  0x3f   : > { %561 = vmatprep.subr.bf16.mxu0 %v861_v39 }
  0x42   : > { %562 = vmatpush1.bf16.msra.mxu0 %v863_v41 }
  0x43   : > { %563 = vmatprep.subr.bf16.mxu0 %v867_v42 }
  0x46   : > { %564 = vmatpush1.bf16.msra.mxu0 %v869_v44 }
  0x47   : > { %565 = vmatprep.subr.bf16.mxu0 %v873_v45 }
  0x4a   : > { %566 = vmatpush1.bf16.msra.mxu0 %v875_v46 }
  0x4b   : > { %567 = vmatprep.subr.bf16.mxu0 %v879_v47 }
  0x4e   : > { %568 = vmatpush1.bf16.msra.mxu0 %v881_v48 }
  0x4f   : > { %569 = vmatprep.subr.bf16.mxu0 %v885_v49 }
  0x52   : > { %570 = vmatpush1.bf16.msra.mxu0 %v887_v50 }
  0x53   : > { %571 = vmatprep.subr.bf16.mxu0 %v891_v51 }
  0x56   : > { %572 = vmatpush1.bf16.msra.mxu0 %v893_v52 }
  0x59   : > { %574 = vmatmul.mubr.bf16.vlgmr.msra.gmra.mrb[0].mxu0 %v740_v53 }
 0x10f   : > { %v616_v54 = vpop.f32.mrb[0].mxu1 }
 0x110   : > { %v618_v55 = vpop.f32.mrb[1].mxu1 }
 0x111   : > { %v620_v56 = vpop.f32.mrb[2].mxu1 }
 0x112   : > { %v621_v57 = vpop.f32.mrb[3].mxu1 }
 0x12c   : > { %v575_v59 = vpop.f32.mrb[0].mxu0 }
 0x12d   : > { %v617_v60 = vadd.f32 %v616_v54, %v575_v59  ;;  %v577_v62 = vpop.f32.mrb[1].mxu0 }
 0x12e   : > { %v619_v63 = vadd.f32 %v618_v55, %v577_v62  ;;  %v579_v0 = vpop.f32.mrb[2].mxu0 }
 0x12f   : > { %v623_v1 = vadd.f32 %v617_v60, %v238_v58  ;;  %v580_v2 = vpop.f32.mrb[3].mxu0 }
 0x130   : > { %v624_v3 = vadd.f32 %v619_v63, %v239_v61 }
 0x131   : > { %625 = vst [vmem:[%s1045_s2] sm:$0xff] %v623_v1 }
 0x132   : > { %626 = vst [vmem:[%s1045_s2 + $0x8] sm:$0xff] %v624_v3 }
 0x133 PF: > { %s12_s11 = sadd.s32 1, %s919_s11   ;;  %s1046_s9 = smov %s915_s10 }
 0x134   : > { %p9_p7 = scmp.ge.s32.totalorder %s12_s11, 8   ;;  %s1047_s10 = smov %s1049_s12 }
 0x136   :  { %11 = sbr.rel (!%p9_p7) target bundleno = 2 (0x2), region = 65 }

// kernel: _lambda_.65
= control target key start
LH: loop header
LB: loop body
LE: loop exit
PB: predicated region body
PF: predicated region fallthrough
CT: control target
= control target key end

     0   :  { %v133_v38 = vmov 1966171168   ;;  %v61_v40 = vlaneseq  ;;  %s186_s0 = inlined_call_operand.vmem [shape: f32[8,256], index: 0, kind: input, shape index: {}]   ;;  %s187_s1 = inlined_call_operand.vmem [shape: f32[1,256], index: 1, kind: input, shape index: {}]   ;;  %s188_s2 = inlined_call_operand.vmem [shape: f32[1,256], index: 2, kind: input, shape index: {}]   ;;  %s189_s3 = inlined_call_operand.vmem [shape: f32[8,256], index: 3, kind: output, shape index: {}]  }
   0x1   :  { %v157_v0 = vld [vmem:[%s186_s0] sm:$0xff]  ;;  %v162_v1 = vld [vmem:[%s186_s0 + $0x8] sm:$0xff]  ;;  %v59_v39 = vunpack.c.l.s4 %v133_v38 }
   0x2   :  { %v16_v2 = vrot.slane %v157_v0, 4  ;;  %v22_v3 = vrot.slane %v162_v1, 4  ;;  %v28_v4 = vmul.f32 %v157_v0, %v157_v0  ;;  %v29_v5 = vmul.f32 %v162_v1, %v162_v1  ;;  %v50_v48 = vld [vmem:[%s187_s1] sm:$0x3] }
   0x3   :  { %v60_v41 = vunpack.c.0.s8 %v59_v39  ;;  %v62_v42 = vshrl.u32 %v61_v40, 7  ;;  %v74_v59 = vld [vmem:[%s188_s2] sm:$0x3] }
   0x4   :  { %v17_v6 = vadd.f32 %v16_v2, %v157_v0  ;;  %v23_v7 = vadd.f32 %v22_v3, %v162_v1  ;;  %v30_v8 = vrot.slane %v28_v4, 4  ;;  %v36_v9 = vrot.slane %v29_v5, 4 }
   0x5   :  { %v63_v44 = vsub.s32 %v60_v41, %v62_v42  ;;  %v78_v50 = vsub.s32 0, %v62_v42  ;;  %v82_v51 = vsub.s32 1, %v62_v42 }
   0x6   :  { %v18_v10 = vrot.slane %v17_v6, 2  ;;  %v24_v11 = vrot.slane %v23_v7, 2  ;;  %v31_v12 = vadd.f32 %v30_v8, %v28_v4  ;;  %v37_v13 = vadd.f32 %v36_v9, %v29_v5 }
   0x8   :  { %v19_v14 = vadd.f32 %v18_v10, %v17_v6  ;;  %v25_v15 = vadd.f32 %v24_v11, %v23_v7  ;;  %v32_v16 = vrot.slane %v31_v12, 2  ;;  %v38_v17 = vrot.slane %v37_v13, 2 }
   0xa   :  { %v20_v18 = vrot.slane %v19_v14, 1  ;;  %v26_v19 = vrot.slane %v25_v15, 1  ;;  %v33_v20 = vadd.f32 %v32_v16, %v31_v12  ;;  %v39_v21 = vadd.f32 %v38_v17, %v37_v13 }
   0xc   :  { %v21_v22 = vadd.f32 %v20_v18, %v19_v14  ;;  %v27_v23 = vadd.f32 %v26_v19, %v25_v15  ;;  %v34_v24 = vrot.slane %v33_v20, 1  ;;  %v40_v25 = vrot.slane %v39_v21, 1 }
   0xe   :  { %v35_v26 = vadd.f32 %v34_v24, %v33_v20  ;;  %v41_v27 = vadd.f32 %v40_v25, %v39_v21  ;;  %v42_v28 = vmul.f32 0.125, %v21_v22  ;;  %v43_v29 = vmul.f32 0.125, %v27_v23 }
  0x10   :  { %v44_v30 = vmul.f32 0.125, %v35_v26  ;;  %v45_v31 = vmul.f32 0.125, %v41_v27  ;;  %v46_v32 = vmul.f32 %v42_v28, %v42_v28  ;;  %v47_v33 = vmul.f32 %v43_v29, %v43_v29 }
  0x12   :  { %v48_v34 = vsub.f32 %v44_v30, %v46_v32  ;;  %v49_v35 = vsub.f32 %v45_v31, %v47_v33 }
  0x14   :  { %v51_v36 = vadd.f32 1e-05, %v48_v34  ;;  %v52_v37 = vadd.f32 1e-05, %v49_v35 }
  0x16   :  { %129 = vrsqrt.f32 %v51_v36 }
  0x17   :  { %131 = vrsqrt.f32 %v52_v37 }
  0x20   :  { %v130_v43 = vpop.eup %129 }
  0x21   :  { %v132_v45 = vpop.eup %131 }
  0x22   :  { %v57_v46 = vcombine.low %v130_v43, %v132_v45 }
  0x24   :  { %v64_v47 = vrot.slane %v57_v46, %v63_v44 }
  0x26   :  { %v71_v49 = vrot.slane %v64_v47, %v63_v44 }
  0x28   :  { %v73_v52 = vmul.f32 %v71_v49, %v50_v48 }
  0x2a   :  { %v79_v53 = vrot.slane %v73_v52, %v78_v50  ;;  %v83_v54 = vrot.slane %v73_v52, %v82_v51 }
  0x2c   :  { %v86_v55 = vmul.f32 %v79_v53, %v42_v28  ;;  %v87_v56 = vmul.f32 %v83_v54, %v43_v29  ;;  %v107_v62 = vmul.f32 %v79_v53, %v157_v0  ;;  %v108_v63 = vmul.f32 %v83_v54, %v162_v1 }
  0x2e   :  { %v90_v57 = vcombine.low %v86_v55, %v87_v56 }
  0x30   :  { %v97_v58 = vrot.slane %v90_v57, %v63_v44 }
  0x32   :  { %v104_v60 = vrot.slane %v97_v58, %v63_v44 }
  0x34   :  { %v106_v61 = vsub.f32 %v74_v59, %v104_v60 }
  0x36   :  { %v113_v2 = vrot.slane %v106_v61, %v78_v50  ;;  %v117_v3 = vrot.slane %v106_v61, %v82_v51 }
  0x38   :  { %v120_v4 = vadd.f32 %v113_v2, %v107_v62  ;;  %v121_v5 = vadd.f32 %v117_v3, %v108_v63 }
  0x3a   :  { %122 = vst [vmem:[%s189_s3] sm:$0xff] %v120_v4  ;;  %123 = vst [vmem:[%s189_s3 + $0x8] sm:$0xff] %v121_v5 }

// kernel: _lambda_.66
= control target key start
LH: loop header
LB: loop body
LE: loop exit
PB: predicated region body
PF: predicated region fallthrough
CT: control target
= control target key end

     0   :  { %v142_v38 = vmov 1966171168   ;;  %v64_v40 = vlaneseq  ;;  %s206_s0 = inlined_call_operand.vmem [shape: f32[8,256], index: 0, kind: input, shape index: {}]   ;;  %s207_s2 = inlined_call_operand.vmem [shape: f32[1,256], index: 2, kind: input, shape index: {}]   ;;  %s208_s3 = inlined_call_operand.vmem [shape: f32[1,256], index: 3, kind: input, shape index: {}]   ;;  %s209_s1 = inlined_call_operand.vmem [shape: f32[8,256], index: 1, kind: input, shape index: {}]   ;;  %s210_s4 = inlined_call_operand.vmem [shape: f32[8,256], index: 4, kind: output, shape index: {}]  }
   0x1   :  { %v171_v0 = vld [vmem:[%s206_s0] sm:$0xff]  ;;  %v176_v1 = vld [vmem:[%s206_s0 + $0x8] sm:$0xff]  ;;  %v62_v39 = vunpack.c.l.s4 %v142_v38 }
   0x2   :  { %v19_v2 = vrot.slane %v171_v0, 4  ;;  %v25_v3 = vrot.slane %v176_v1, 4  ;;  %v31_v4 = vmul.f32 %v171_v0, %v171_v0  ;;  %v32_v5 = vmul.f32 %v176_v1, %v176_v1  ;;  %v53_v48 = vld [vmem:[%s207_s2] sm:$0x3] }
   0x3   :  { %v63_v41 = vunpack.c.0.s8 %v62_v39  ;;  %v65_v42 = vshrl.u32 %v64_v40, 7  ;;  %v77_v59 = vld [vmem:[%s208_s3] sm:$0x3] }
   0x4   :  { %v20_v6 = vadd.f32 %v19_v2, %v171_v0  ;;  %v26_v7 = vadd.f32 %v25_v3, %v176_v1  ;;  %v33_v8 = vrot.slane %v31_v4, 4  ;;  %v39_v9 = vrot.slane %v32_v5, 4 }
   0x5   :  { %v66_v44 = vsub.s32 %v63_v41, %v65_v42  ;;  %v81_v50 = vsub.s32 0, %v65_v42  ;;  %v85_v51 = vsub.s32 1, %v65_v42 }
   0x6   :  { %v21_v10 = vrot.slane %v20_v6, 2  ;;  %v27_v11 = vrot.slane %v26_v7, 2  ;;  %v34_v12 = vadd.f32 %v33_v8, %v31_v4  ;;  %v40_v13 = vadd.f32 %v39_v9, %v32_v5  ;;  %v125_v4 = vld [vmem:[%s209_s1] sm:$0xff]  ;;  %v126_v5 = vld [vmem:[%s209_s1 + $0x8] sm:$0xff] }
   0x8   :  { %v22_v14 = vadd.f32 %v21_v10, %v20_v6  ;;  %v28_v15 = vadd.f32 %v27_v11, %v26_v7  ;;  %v35_v16 = vrot.slane %v34_v12, 2  ;;  %v41_v17 = vrot.slane %v40_v13, 2 }
   0xa   :  { %v23_v18 = vrot.slane %v22_v14, 1  ;;  %v29_v19 = vrot.slane %v28_v15, 1  ;;  %v36_v20 = vadd.f32 %v35_v16, %v34_v12  ;;  %v42_v21 = vadd.f32 %v41_v17, %v40_v13 }
   0xc   :  { %v24_v22 = vadd.f32 %v23_v18, %v22_v14  ;;  %v30_v23 = vadd.f32 %v29_v19, %v28_v15  ;;  %v37_v24 = vrot.slane %v36_v20, 1  ;;  %v43_v25 = vrot.slane %v42_v21, 1 }
   0xe   :  { %v38_v26 = vadd.f32 %v37_v24, %v36_v20  ;;  %v44_v27 = vadd.f32 %v43_v25, %v42_v21  ;;  %v45_v28 = vmul.f32 0.125, %v24_v22  ;;  %v46_v29 = vmul.f32 0.125, %v30_v23 }
  0x10   :  { %v47_v30 = vmul.f32 0.125, %v38_v26  ;;  %v48_v31 = vmul.f32 0.125, %v44_v27  ;;  %v49_v32 = vmul.f32 %v45_v28, %v45_v28  ;;  %v50_v33 = vmul.f32 %v46_v29, %v46_v29 }
  0x12   :  { %v51_v34 = vsub.f32 %v47_v30, %v49_v32  ;;  %v52_v35 = vsub.f32 %v48_v31, %v50_v33 }
  0x14   :  { %v54_v36 = vadd.f32 1e-05, %v51_v34  ;;  %v55_v37 = vadd.f32 1e-05, %v52_v35 }
  0x16   :  { %138 = vrsqrt.f32 %v54_v36 }
  0x17   :  { %140 = vrsqrt.f32 %v55_v37 }
  0x20   :  { %v139_v43 = vpop.eup %138 }
  0x21   :  { %v141_v45 = vpop.eup %140 }
  0x22   :  { %v60_v46 = vcombine.low %v139_v43, %v141_v45 }
  0x24   :  { %v67_v47 = vrot.slane %v60_v46, %v66_v44 }
  0x26   :  { %v74_v49 = vrot.slane %v67_v47, %v66_v44 }
  0x28   :  { %v76_v52 = vmul.f32 %v74_v49, %v53_v48 }
  0x2a   :  { %v82_v53 = vrot.slane %v76_v52, %v81_v50  ;;  %v86_v54 = vrot.slane %v76_v52, %v85_v51 }
  0x2c   :  { %v89_v55 = vmul.f32 %v82_v53, %v45_v28  ;;  %v90_v56 = vmul.f32 %v86_v54, %v46_v29  ;;  %v110_v62 = vmul.f32 %v82_v53, %v171_v0  ;;  %v111_v63 = vmul.f32 %v86_v54, %v176_v1 }
  0x2e   :  { %v93_v57 = vcombine.low %v89_v55, %v90_v56 }
  0x30   :  { %v100_v58 = vrot.slane %v93_v57, %v66_v44 }
  0x32   :  { %v107_v60 = vrot.slane %v100_v58, %v66_v44 }
  0x34   :  { %v109_v61 = vsub.f32 %v77_v59, %v107_v60 }
  0x36   :  { %v116_v2 = vrot.slane %v109_v61, %v81_v50  ;;  %v120_v3 = vrot.slane %v109_v61, %v85_v51 }
  0x38   :  { %v123_v6 = vadd.f32 %v116_v2, %v110_v62  ;;  %v124_v7 = vadd.f32 %v120_v3, %v111_v63 }
  0x3a   :  { %v127_v8 = vadd.f32 %v125_v4, %v123_v6  ;;  %v128_v9 = vadd.f32 %v126_v5, %v124_v7 }
  0x3c   :  { %v129_v10 = vmax.f32 %v127_v8, 0.0  ;;  %v130_v11 = vmax.f32 %v128_v9, 0.0 }
  0x3e   :  { %131 = vst [vmem:[%s210_s4] sm:$0xff] %v129_v10  ;;  %132 = vst [vmem:[%s210_s4 + $0x8] sm:$0xff] %v130_v11 }

// kernel: _lambda_.72
= control target key start
LH: loop header
LB: loop body
LE: loop exit
PB: predicated region body
PF: predicated region fallthrough
CT: control target
= control target key end

     0   :  { %v20_v0 = vlaneseq  ;;  %v300_v2 = vmov 1983009808   ;;  %vm37_vm0 = vcmask 1041408   ;;  %s368_s0 = inlined_call_operand.vmem [shape: f32[2,512], index: 0, kind: input, shape index: {}]   ;;  %s369_s1 = inlined_call_operand.vmem [shape: f32[1,512], index: 1, kind: input, shape index: {}]   ;;  %s370_s2 = inlined_call_operand.vmem [shape: f32[1,512], index: 2, kind: input, shape index: {}]   ;;  %s371_s3 = inlined_call_operand.vmem [shape: f32[2,512], index: 3, kind: output, shape index: {}]  }
   0x1   :  { %v325_v1 = vld [vmem:[%s368_s0] sm:$0xff]  ;;  %v18_v3 = vunpack.c.l.s4 %v300_v2 }
   0x2   :  { %v327_v4 = vshrl.u32 %v20_v0, 7  ;;  %v66_v5 = vmul.f32 %v325_v1, %v325_v1  ;;  %v16_v6 = vcombine.high %v325_v1, %v325_v1 }
   0x3   :  { %v19_v7 = vunpack.c.0.s8 %v18_v3 }
   0x4   :  { %v68_v8 = vcombine.high %v66_v5, %v66_v5 }
   0x5   :  { %v334_v9 = vsub.s32 %v19_v7, %v327_v4 }
   0x7   :  { %v23_v10 = vrot.slane %v325_v1, %v334_v9  ;;  %v30_v11 = vrot.slane %v16_v6, %v334_v9  ;;  %v75_v12 = vrot.slane %v66_v5, %v334_v9  ;;  %v82_v13 = vrot.slane %v68_v8, %v334_v9 }
   0x9   :  { %v31_v14 = vcombine.high %v23_v10, %v23_v10  ;;  %v32_v15 = vcombine.high %v30_v11, %v30_v11  ;;  %v38_v16 = vsel %vm37_vm0, %v23_v10, 0.0  ;;  %v52_v17 = vsel %vm37_vm0, %v30_v11, 0.0 }
   0xa   :  { %v39_v18 = vrot.slane %v38_v16, 4  ;;  %v53_v19 = vrot.slane %v52_v17, 4  ;;  %v83_v20 = vcombine.high %v75_v12, %v75_v12  ;;  %v84_v21 = vcombine.high %v82_v13, %v82_v13 }
   0xb   :  { %v45_v22 = vsel %vm37_vm0, %v31_v14, 0.0  ;;  %v59_v23 = vsel %vm37_vm0, %v32_v15, 0.0  ;;  %v89_v24 = vsel %vm37_vm0, %v75_v12, 0.0  ;;  %v103_v25 = vsel %vm37_vm0, %v82_v13, 0.0 }
   0xc   :  { %v40_v26 = vadd.f32 %v39_v18, %v38_v16  ;;  %v46_v27 = vrot.slane %v45_v22, 4  ;;  %v54_v28 = vadd.f32 %v53_v19, %v52_v17  ;;  %v60_v29 = vrot.slane %v59_v23, 4 }
   0xd   :  { %v90_v30 = vrot.slane %v89_v24, 4  ;;  %v96_v31 = vsel %vm37_vm0, %v83_v20, 0.0  ;;  %v104_v32 = vrot.slane %v103_v25, 4  ;;  %v110_v33 = vsel %vm37_vm0, %v84_v21, 0.0 }
   0xe   :  { %v41_v34 = vrot.slane %v40_v26, 2  ;;  %v47_v35 = vadd.f32 %v46_v27, %v45_v22  ;;  %v55_v36 = vrot.slane %v54_v28, 2  ;;  %v61_v37 = vadd.f32 %v60_v29, %v59_v23 }
   0xf   :  { %v91_v38 = vadd.f32 %v90_v30, %v89_v24  ;;  %v97_v39 = vrot.slane %v96_v31, 4  ;;  %v105_v40 = vadd.f32 %v104_v32, %v103_v25  ;;  %v111_v41 = vrot.slane %v110_v33, 4 }
  0x10   :  { %v42_v42 = vadd.f32 %v41_v34, %v40_v26  ;;  %v48_v43 = vrot.slane %v47_v35, 2  ;;  %v56_v44 = vadd.f32 %v55_v36, %v54_v28  ;;  %v62_v45 = vrot.slane %v61_v37, 2 }
  0x11   :  { %v92_v46 = vrot.slane %v91_v38, 2  ;;  %v98_v47 = vadd.f32 %v97_v39, %v96_v31  ;;  %v106_v48 = vrot.slane %v105_v40, 2  ;;  %v112_v49 = vadd.f32 %v111_v41, %v110_v33 }
  0x12   :  { %v43_v50 = vrot.slane %v42_v42, 1  ;;  %v49_v51 = vadd.f32 %v48_v43, %v47_v35  ;;  %v57_v52 = vrot.slane %v56_v44, 1  ;;  %v63_v53 = vadd.f32 %v62_v45, %v61_v37 }
  0x13   :  { %v93_v54 = vadd.f32 %v92_v46, %v91_v38  ;;  %v99_v55 = vrot.slane %v98_v47, 2  ;;  %v107_v56 = vadd.f32 %v106_v48, %v105_v40  ;;  %v113_v57 = vrot.slane %v112_v49, 2  ;;  %v133_v46 = vld [vmem:[%s369_s1] sm:$0xf] }
  0x14   :  { %v44_v58 = vadd.f32 %v43_v50, %v42_v42  ;;  %v50_v59 = vrot.slane %v49_v51, 1  ;;  %v58_v60 = vadd.f32 %v57_v52, %v56_v44  ;;  %v64_v61 = vrot.slane %v63_v53, 1 }
  0x15   :  { %v94_v62 = vrot.slane %v93_v54, 1  ;;  %v100_v63 = vadd.f32 %v99_v55, %v98_v47  ;;  %v108_v0 = vrot.slane %v107_v56, 1  ;;  %v114_v2 = vadd.f32 %v113_v57, %v112_v49 }
  0x16   :  { %v51_v3 = vadd.f32 %v50_v59, %v49_v51  ;;  %v65_v5 = vadd.f32 %v64_v61, %v63_v53  ;;  %v117_v6 = vmul.f32 0.5, %v44_v58  ;;  %v119_v7 = vmul.f32 0.5, %v58_v60 }
  0x17   :  { %v95_v8 = vadd.f32 %v94_v62, %v93_v54  ;;  %v101_v10 = vrot.slane %v100_v63, 1  ;;  %v109_v11 = vadd.f32 %v108_v0, %v107_v56  ;;  %v115_v12 = vrot.slane %v114_v2, 1 }
  0x18   :  { %v118_v13 = vmul.f32 0.5, %v51_v3  ;;  %v120_v14 = vmul.f32 0.5, %v65_v5  ;;  %v125_v15 = vmul.f32 %v117_v6, %v117_v6  ;;  %v127_v16 = vmul.f32 %v119_v7, %v119_v7 }
  0x19   :  { %v102_v17 = vadd.f32 %v101_v10, %v100_v63  ;;  %v116_v18 = vadd.f32 %v115_v12, %v114_v2  ;;  %v121_v19 = vmul.f32 0.5, %v95_v8  ;;  %v123_v20 = vmul.f32 0.5, %v109_v11 }
  0x1a   :  { %v126_v21 = vmul.f32 %v118_v13, %v118_v13  ;;  %v128_v22 = vmul.f32 %v120_v14, %v120_v14  ;;  %v301_v33 = vmov 1966171168   ;;  %v176_v47 = vsub.s32 0, %v327_v4 }
  0x1b   :  { %v122_v23 = vmul.f32 0.5, %v102_v17  ;;  %v124_v24 = vmul.f32 0.5, %v116_v18  ;;  %v129_v25 = vsub.f32 %v121_v19, %v125_v15  ;;  %v131_v26 = vsub.f32 %v123_v20, %v127_v16 }
  0x1c   :  { %v149_v34 = vunpack.c.l.s4 %v301_v33  ;;  %v180_v49 = vsub.s32 1, %v327_v4  ;;  %v184_v50 = vsub.s32 2, %v327_v4  ;;  %v188_v51 = vsub.s32 3, %v327_v4 }
  0x1d   :  { %v130_v27 = vsub.f32 %v122_v23, %v126_v21  ;;  %v132_v28 = vsub.f32 %v124_v24, %v128_v22  ;;  %v134_v29 = vadd.f32 1e-05, %v129_v25  ;;  %v136_v30 = vadd.f32 1e-05, %v131_v26 }
  0x1e   :  { %v150_v35 = vunpack.c.0.s8 %v149_v34 }
  0x1f   :  { %v135_v31 = vadd.f32 1e-05, %v130_v27  ;;  %v137_v32 = vadd.f32 1e-05, %v132_v28  ;;  %292 = vrsqrt.f32 %v134_v29 }
  0x20   :  { %294 = vrsqrt.f32 %v136_v30  ;;  %v153_v38 = vsub.s32 %v150_v35, %v327_v4  ;;  %v172_v4 = vld [vmem:[%s370_s2] sm:$0xf] }
  0x21   :  { %296 = vrsqrt.f32 %v135_v31 }
  0x22   :  { %298 = vrsqrt.f32 %v137_v32 }
  0x29   :  { %v293_v36 = vpop.eup %292 }
  0x2a   :  { %v295_v37 = vpop.eup %294 }
  0x2b   :  { %v297_v39 = vpop.eup %296 }
  0x2c   :  { %v299_v40 = vpop.eup %298  ;;  %v146_v41 = vcombine.low %v293_v36, %v297_v39 }
  0x2d   :  { %v147_v42 = vcombine.low %v295_v37, %v299_v40 }
  0x2e   :  { %v154_v43 = vrot.slane %v146_v41, %v153_v38 }
  0x2f   :  { %v161_v44 = vrot.slane %v147_v42, %v153_v38 }
  0x31   :  { %v162_v45 = vcombine.low %v154_v43, %v161_v44 }
  0x33   :  { %v169_v48 = vrot.slane %v162_v45, %v153_v38 }
  0x35   :  { %v171_v52 = vmul.f32 %v169_v48, %v133_v46 }
  0x37   :  { %v177_v53 = vrot.slane %v171_v52, %v176_v47  ;;  %v181_v54 = vrot.slane %v171_v52, %v180_v49  ;;  %v185_v55 = vrot.slane %v171_v52, %v184_v50  ;;  %v189_v56 = vrot.slane %v171_v52, %v188_v51 }
  0x39   :  { %v194_v57 = vmul.f32 %v177_v53, %v117_v6  ;;  %v195_v58 = vmul.f32 %v181_v54, %v118_v13  ;;  %v196_v59 = vmul.f32 %v185_v55, %v119_v7  ;;  %v197_v60 = vmul.f32 %v189_v56, %v120_v14 }
  0x3a   :  { %v228_v63 = vcombine.low %v177_v53, %v181_v54  ;;  %v229_v0 = vcombine.low %v185_v55, %v189_v56 }
  0x3b   :  { %v202_v61 = vcombine.low %v194_v57, %v195_v58  ;;  %v203_v62 = vcombine.low %v196_v59, %v197_v60 }
  0x3c   :  { %v236_v8 = vrot.slane %v228_v63, %v334_v9  ;;  %v243_v10 = vrot.slane %v229_v0, %v334_v9 }
  0x3d   :  { %v210_v2 = vrot.slane %v202_v61, %v153_v38  ;;  %v217_v3 = vrot.slane %v203_v62, %v153_v38 }
  0x3e   :  { %v244_v12 = vcombine.low %v236_v8, %v243_v10 }
  0x3f   :  { %v218_v5 = vcombine.low %v210_v2, %v217_v3 }
  0x40   :  { %v246_v18 = vmul.f32 %v244_v12, %v325_v1 }
  0x41   :  { %v225_v11 = vrot.slane %v218_v5, %v153_v38 }
  0x43   :  { %v227_v6 = vsub.f32 %v172_v4, %v225_v11 }
  0x45   :  { %v251_v7 = vrot.slane %v227_v6, %v176_v47  ;;  %v255_v13 = vrot.slane %v227_v6, %v180_v49  ;;  %v259_v14 = vrot.slane %v227_v6, %v184_v50  ;;  %v263_v15 = vrot.slane %v227_v6, %v188_v51 }
  0x47   :  { %v264_v16 = vcombine.low %v251_v7, %v255_v13  ;;  %v265_v17 = vcombine.low %v259_v14, %v263_v15 }
  0x49   :  { %v272_v19 = vrot.slane %v264_v16, %v334_v9  ;;  %v279_v20 = vrot.slane %v265_v17, %v334_v9 }
  0x4b   :  { %v280_v21 = vcombine.low %v272_v19, %v279_v20 }
  0x4d   :  { %v282_v22 = vadd.f32 %v280_v21, %v246_v18 }
  0x4f   :  { %v283_v23 = vmax.f32 %v282_v22, 0.0 }
  0x51   :  { %284 = vst [vmem:[%s371_s3] sm:$0xff] %v283_v23 }

// kernel: _lambda_.71
= control target key start
LH: loop header
LB: loop body
LE: loop exit
PB: predicated region body
PF: predicated region fallthrough
CT: control target
= control target key end

     0   :  { %s1240_s9 = smov 0   ;;  %s1242_s10 = smov 0   ;;  %s1500_s0 = inlined_call_operand.vmem [shape: bf16[2,2304], index: 0, kind: input, shape index: {}]   ;;  %s1501_s1 = inlined_call_operand.vmem [shape: bf16[2304,512], index: 1, kind: input, shape index: {}]   ;;  %s1502_s2 = inlined_call_operand.vmem [shape: f32[2,512], index: 2, kind: output, shape index: {}]  }
   0x1   :  { %s1244_s11 = smov 0   ;;  %s1246_s12 = smov 0  }
   0x2   :  { %s1248_s13 = smov 0   ;;  %s1250_s14 = smov 0  }
   0x3   :  { %s1252_s15 = smov 0  }
   0x4 LB: > { %s24_s16 = sadd.s32 1, %s1211_s13  ;;  %s27_s17 = sadd.s32 1, %s1215_s14  ;;  %s1219_s15 = sphi %s1252_s15, %s12_s15   ;;  %s1215_s14 = sphi %s1250_s14, %s1508_s14   ;;  %s1211_s13 = sphi %s1248_s13, %s1507_s13   ;;  %s1207_s12 = sphi %s1246_s12, %s1506_s12   ;;  %s1203_s11 = sphi %s1244_s11, %s1505_s11   ;;  %s1199_s10 = sphi %s1242_s10, %s1504_s10   ;;  %s1195_s9 = sphi %s1240_s9, %s1503_s9  }
   0x5   : > { %p25_p0 = scmp.ge.s32.totalorder %s24_s16, 6  ;;  %p75_p1 = scmp.ne.s32.totalorder %s1199_s10, %s1195_s9 }
   0x6   : > { %p76_p2 = scmp.eq.s32.totalorder %s1219_s15, 0  ;;  %s68_s21 = sadd.s32 1, %s1199_s10 }
   0x7   : > { %s1510_s16 = smov (%p25_p0, %s24_s16), 0  ;;  %s1512_s17 = smov (!%p25_p0, %s27_s17), %s1215_s14 }
   0x8   : > { %p77_p3 = por %p76_p2, %p75_p1  ;;  %p29_p4 = scmp.ge.s32.totalorder %s1512_s17, 2 }
   0x9   : > { %s63_s18 = ssub.s32 %s1211_s13, %s1510_s16  ;;  %p969_p6 = scmp.ge.s32.totalorder %s1219_s15, 12 }
   0xa   : > { %s1514_s17 = smov (%p29_p4, %s1512_s17), 0 }
   0xb   : > { %s64_s19 = ssub.s32 %s1215_s14, %s1514_s17  ;;  %129 = sbr.rel (%p969_p6) target bundleno = 50 (0x32), region = 16 }
   0xc   : > { %s65_s20 = sor.u32 %s64_s19, %s63_s18 }
   0xd   : > { %p66_p5 = scmp.eq.s32.totalorder %s65_s20, 0 }
   0xf   : > { %s1291_s22 = scalar_select %p66_p5, %s1199_s10, %s68_s21  }
  0x12   : > { %144 = sbr.rel (!%p77_p3) target bundleno = 50 (0x32), region = 24  ;;  %s146_s23 = sand.u32 (%p77_p3), 1, %s1199_s10  }
  0x13   : > { %s1031_s24 = smul.u32 (%p77_p3), 384, %s146_s23  ;;  %s970_s25 = sshll.u32 (%p77_p3), %s1215_s14, 1 }
  0x14   : > { %s1028_s26 = smul.u32 (%p77_p3), 192, %s1211_s13 }
  0x15   : > { %s1305_s4 = scalar_lea.vmem (%p77_p3), [#allocation2], %s1031_s24 }
  0x16   : > { %s152_s27 = sadd.s32 (%p77_p3), %s1028_s26, %s970_s25 }
  0x17   : > { %s972_s28 = sshll.u32 (%p77_p3), %s152_s27, 2 }
  0x18   : > { %s1300_s3 = scalar_lea.vmem (%p77_p3), %s1501_s1, %s972_s28 }
  0x19   : > { %v276_v0 = vld [vmem:[%s1300_s3] sm:$0xff]  ;;  %v278_v1 = vld [vmem:[%s1300_s3 + $0x10] sm:$0xff] }
  0x1a   : > { %v280_v2 = vld [vmem:[%s1300_s3 + $0x20] sm:$0xff]  ;;  %277 = vst [vmem:[%s1305_s4] sm:$0xff] %v276_v0  ;;  %279 = vst [vmem:[%s1305_s4 + $0x8] sm:$0xff] %v278_v1  ;;  %v282_v3 = vld [vmem:[%s1300_s3 + $0x30] sm:$0xff] }
  0x1b   : > { %281 = vst [vmem:[%s1305_s4 + $0x10] sm:$0xff] %v280_v2  ;;  %v284_v4 = vld [vmem:[%s1300_s3 + $0x40] sm:$0xff]  ;;  %v286_v5 = vld [vmem:[%s1300_s3 + $0x50] sm:$0xff]  ;;  %283 = vst [vmem:[%s1305_s4 + $0x18] sm:$0xff] %v282_v3 }
  0x1c   : > { %285 = vst [vmem:[%s1305_s4 + $0x20] sm:$0xff] %v284_v4  ;;  %287 = vst [vmem:[%s1305_s4 + $0x28] sm:$0xff] %v286_v5  ;;  %v288_v6 = vld [vmem:[%s1300_s3 + $0x60] sm:$0xff]  ;;  %v290_v7 = vld [vmem:[%s1300_s3 + $0x70] sm:$0xff] }
  0x1d   : > { %v292_v8 = vld [vmem:[%s1300_s3 + $0x80] sm:$0xff]  ;;  %289 = vst [vmem:[%s1305_s4 + $0x30] sm:$0xff] %v288_v6  ;;  %291 = vst [vmem:[%s1305_s4 + $0x38] sm:$0xff] %v290_v7  ;;  %v294_v9 = vld [vmem:[%s1300_s3 + $0x90] sm:$0xff] }
  0x1e   : > { %293 = vst [vmem:[%s1305_s4 + $0x40] sm:$0xff] %v292_v8  ;;  %v296_v10 = vld [vmem:[%s1300_s3 + $0xa0] sm:$0xff]  ;;  %v298_v11 = vld [vmem:[%s1300_s3 + $0xb0] sm:$0xff]  ;;  %295 = vst [vmem:[%s1305_s4 + $0x48] sm:$0xff] %v294_v9 }
  0x1f   : > { %297 = vst [vmem:[%s1305_s4 + $0x50] sm:$0xff] %v296_v10  ;;  %299 = vst [vmem:[%s1305_s4 + $0x58] sm:$0xff] %v298_v11  ;;  %v300_v12 = vld [vmem:[%s1300_s3 + $0xc0] sm:$0xff]  ;;  %v302_v13 = vld [vmem:[%s1300_s3 + $0xd0] sm:$0xff] }
  0x20   : > { %v304_v14 = vld [vmem:[%s1300_s3 + $0xe0] sm:$0xff]  ;;  %301 = vst [vmem:[%s1305_s4 + $0x60] sm:$0xff] %v300_v12  ;;  %303 = vst [vmem:[%s1305_s4 + $0x68] sm:$0xff] %v302_v13  ;;  %v306_v15 = vld [vmem:[%s1300_s3 + $0xf0] sm:$0xff] }
  0x21   : > { %305 = vst [vmem:[%s1305_s4 + $0x70] sm:$0xff] %v304_v14  ;;  %v308_v16 = vld [vmem:[%s1300_s3 + $0x100] sm:$0xff]  ;;  %v310_v17 = vld [vmem:[%s1300_s3 + $0x110] sm:$0xff]  ;;  %307 = vst [vmem:[%s1305_s4 + $0x78] sm:$0xff] %v306_v15 }
  0x22   : > { %309 = vst [vmem:[%s1305_s4 + $0x80] sm:$0xff] %v308_v16  ;;  %311 = vst [vmem:[%s1305_s4 + $0x88] sm:$0xff] %v310_v17  ;;  %v312_v18 = vld [vmem:[%s1300_s3 + $0x120] sm:$0xff]  ;;  %v314_v19 = vld [vmem:[%s1300_s3 + $0x130] sm:$0xff] }
  0x23   : > { %v316_v20 = vld [vmem:[%s1300_s3 + $0x140] sm:$0xff]  ;;  %313 = vst [vmem:[%s1305_s4 + $0x90] sm:$0xff] %v312_v18  ;;  %315 = vst [vmem:[%s1305_s4 + $0x98] sm:$0xff] %v314_v19  ;;  %v318_v21 = vld [vmem:[%s1300_s3 + $0x150] sm:$0xff] }
  0x24   : > { %317 = vst [vmem:[%s1305_s4 + $0xa0] sm:$0xff] %v316_v20  ;;  %v320_v22 = vld [vmem:[%s1300_s3 + $0x160] sm:$0xff]  ;;  %v322_v23 = vld [vmem:[%s1300_s3 + $0x170] sm:$0xff]  ;;  %319 = vst [vmem:[%s1305_s4 + $0xa8] sm:$0xff] %v318_v21 }
  0x25   : > { %321 = vst [vmem:[%s1305_s4 + $0xb0] sm:$0xff] %v320_v22  ;;  %323 = vst [vmem:[%s1305_s4 + $0xb8] sm:$0xff] %v322_v23  ;;  %v324_v24 = vld [vmem:[%s1300_s3 + $0x180] sm:$0xff]  ;;  %v326_v25 = vld [vmem:[%s1300_s3 + $0x190] sm:$0xff] }
  0x26   : > { %v328_v26 = vld [vmem:[%s1300_s3 + $0x1a0] sm:$0xff]  ;;  %325 = vst [vmem:[%s1305_s4 + $0xc0] sm:$0xff] %v324_v24  ;;  %327 = vst [vmem:[%s1305_s4 + $0xc8] sm:$0xff] %v326_v25  ;;  %v330_v27 = vld [vmem:[%s1300_s3 + $0x1b0] sm:$0xff] }
  0x27   : > { %329 = vst [vmem:[%s1305_s4 + $0xd0] sm:$0xff] %v328_v26  ;;  %v332_v28 = vld [vmem:[%s1300_s3 + $0x1c0] sm:$0xff]  ;;  %v334_v29 = vld [vmem:[%s1300_s3 + $0x1d0] sm:$0xff]  ;;  %331 = vst [vmem:[%s1305_s4 + $0xd8] sm:$0xff] %v330_v27 }
  0x28   : > { %333 = vst [vmem:[%s1305_s4 + $0xe0] sm:$0xff] %v332_v28  ;;  %335 = vst [vmem:[%s1305_s4 + $0xe8] sm:$0xff] %v334_v29  ;;  %v336_v30 = vld [vmem:[%s1300_s3 + $0x1e0] sm:$0xff]  ;;  %v338_v31 = vld [vmem:[%s1300_s3 + $0x1f0] sm:$0xff] }
  0x29   : > { %v340_v32 = vld [vmem:[%s1300_s3 + $0x200] sm:$0xff]  ;;  %337 = vst [vmem:[%s1305_s4 + $0xf0] sm:$0xff] %v336_v30  ;;  %339 = vst [vmem:[%s1305_s4 + $0xf8] sm:$0xff] %v338_v31  ;;  %v342_v33 = vld [vmem:[%s1300_s3 + $0x210] sm:$0xff] }
  0x2a   : > { %341 = vst [vmem:[%s1305_s4 + $0x100] sm:$0xff] %v340_v32  ;;  %v344_v34 = vld [vmem:[%s1300_s3 + $0x220] sm:$0xff]  ;;  %v346_v35 = vld [vmem:[%s1300_s3 + $0x230] sm:$0xff]  ;;  %343 = vst [vmem:[%s1305_s4 + $0x108] sm:$0xff] %v342_v33 }
  0x2b   : > { %345 = vst [vmem:[%s1305_s4 + $0x110] sm:$0xff] %v344_v34  ;;  %347 = vst [vmem:[%s1305_s4 + $0x118] sm:$0xff] %v346_v35  ;;  %v348_v36 = vld [vmem:[%s1300_s3 + $0x240] sm:$0xff]  ;;  %v350_v37 = vld [vmem:[%s1300_s3 + $0x250] sm:$0xff] }
  0x2c   : > { %v352_v38 = vld [vmem:[%s1300_s3 + $0x260] sm:$0xff]  ;;  %349 = vst [vmem:[%s1305_s4 + $0x120] sm:$0xff] %v348_v36  ;;  %351 = vst [vmem:[%s1305_s4 + $0x128] sm:$0xff] %v350_v37  ;;  %v354_v39 = vld [vmem:[%s1300_s3 + $0x270] sm:$0xff] }
  0x2d   : > { %353 = vst [vmem:[%s1305_s4 + $0x130] sm:$0xff] %v352_v38  ;;  %v356_v40 = vld [vmem:[%s1300_s3 + $0x280] sm:$0xff]  ;;  %v358_v41 = vld [vmem:[%s1300_s3 + $0x290] sm:$0xff]  ;;  %355 = vst [vmem:[%s1305_s4 + $0x138] sm:$0xff] %v354_v39 }
  0x2e   : > { %357 = vst [vmem:[%s1305_s4 + $0x140] sm:$0xff] %v356_v40  ;;  %359 = vst [vmem:[%s1305_s4 + $0x148] sm:$0xff] %v358_v41  ;;  %v360_v42 = vld [vmem:[%s1300_s3 + $0x2a0] sm:$0xff]  ;;  %v362_v43 = vld [vmem:[%s1300_s3 + $0x2b0] sm:$0xff] }
  0x2f   : > { %v364_v44 = vld [vmem:[%s1300_s3 + $0x2c0] sm:$0xff]  ;;  %361 = vst [vmem:[%s1305_s4 + $0x150] sm:$0xff] %v360_v42  ;;  %363 = vst [vmem:[%s1305_s4 + $0x158] sm:$0xff] %v362_v43  ;;  %v366_v45 = vld [vmem:[%s1300_s3 + $0x2d0] sm:$0xff] }
  0x30   : > { %365 = vst [vmem:[%s1305_s4 + $0x160] sm:$0xff] %v364_v44  ;;  %v368_v46 = vld [vmem:[%s1300_s3 + $0x2e0] sm:$0xff]  ;;  %v370_v47 = vld [vmem:[%s1300_s3 + $0x2f0] sm:$0xff]  ;;  %367 = vst [vmem:[%s1305_s4 + $0x168] sm:$0xff] %v366_v45 }
  0x31   : > { %369 = vst [vmem:[%s1305_s4 + $0x170] sm:$0xff] %v368_v46  ;;  %371 = vst [vmem:[%s1305_s4 + $0x178] sm:$0xff] %v370_v47 }
  0x32 PF: > { %p973_p7 = scmp.ge.s32.totalorder %s1219_s15, 1  ;;  %p376_p8 = scmp.lt.s32.totalorder %s1219_s15, 13 }
  0x34   : > { %p377_p9 = pnand %p973_p7, %p376_p8 }
  0x35   : > { %s383_s5 = sand.u32 (!%p377_p9), 1, %s1195_s9   ;;  %s416_s6 = smul.u32 (!%p377_p9), 3, %s1203_s11 }
  0x36   : > { %380 = sbr.rel (%p377_p9) target bundleno = 357 (0x165), region = 62  ;;  %s974_s8 = sshll.u32 (!%p377_p9), %s1207_s12, 1 }
  0x37   : > { %s1032_s7 = smul.u32 (!%p377_p9), 384, %s383_s5  ;;  %p419_p10 = scmp.lt.s32.totalorder (!%p377_p9), %s416_s6, 17 }
  0x38   : > { %p430_p11 = scmp.lt.s32.totalorder (!%p377_p9), %s974_s8, 3  ;;  %p976_p12 = scmp.ne.s32.totalorder (!%p377_p9), %s1203_s11, 0 }
  0x39   : > { %s1416_s9 = scalar_lea.vmem (!%p377_p9), [#allocation2], %s1032_s7 }
  0x3d   : > { %s1516_s6 = smov (!%p419_p10, %s416_s6), 17  ;;  %s1518_s8 = smov (!%p430_p11, %s974_s8), 3 }
  0x3e   : > { %s423_s20 = scalar_lea.vmem %s1500_s0, %s1516_s6  ;;  %s975_s21 = sshll.u32 %s1518_s8, 1  ;;  %v1221_v48 = vmov (!%p976_p12), 0.0  }
  0x3f   : > { %s1414_s25 = scalar_lea.vmem %s1502_s2, %s975_s21  ;;  %441 = sbr.rel (%p976_p12) target bundleno = 70 (0x46), region = 70 }
  0x40   : > { %442 = vst [vmem:[%s1414_s25] sm:$0xf] (!%p976_p12), %v1221_v48 }
  0x46 PF: > { %v1093_v49 = vld [vmem:[%s1416_s9 + $0x4] ss:$8 sps:$4 sm:$0xff]   ;;  %v1095_v50 = vld [vmem:[%s1416_s9] ss:$8 sps:$4 sm:$0xff]   ;;  %v1222_v51 = vmov 0   ;;  %v505_v12 = vlaneseq }
  0x47   : > { %833 = vmatprep.mubr.bf16.mxu0 %v1222_v51  ;;  %760 = vmatprep.subr.bf16.mxu1 %v1093_v49  ;;  %v1096_v52 = vld [vmem:[%s1416_s9 + $0x14] ss:$8 sps:$4 sm:$0xff]   ;;  %v1098_v53 = vld [vmem:[%s1416_s9 + $0x10] ss:$8 sps:$4 sm:$0xff]   ;;  %v1099_v54 = vld [vmem:[%s1416_s9 + $0x24] ss:$8 sps:$4 sm:$0xff]  }
  0x48   : > { %761 = vmatpush1.bf16.msra.mxu1 %v1095_v50  ;;  %v1101_v55 = vld [vmem:[%s1416_s9 + $0x20] ss:$8 sps:$4 sm:$0xff]   ;;  %v1102_v56 = vld [vmem:[%s1416_s9 + $0x34] ss:$8 sps:$4 sm:$0xff]   ;;  %v1104_v57 = vld [vmem:[%s1416_s9 + $0x30] ss:$8 sps:$4 sm:$0xff]  }
  0x49   : > { %762 = vmatprep.subr.bf16.mxu1 %v1096_v52  ;;  %v1117_v58 = vld [vmem:[%s1416_s9 + $0x104] ss:$8 sps:$4 sm:$0xff]   ;;  %v1119_v59 = vld [vmem:[%s1416_s9 + $0x100] ss:$8 sps:$4 sm:$0xff]   ;;  %v1123_v61 = vld [vmem:[%s1416_s9 + $0x114] ss:$8 sps:$4 sm:$0xff]  }
  0x4a   : > { %v1105_v60 = vld [vmem:[%s1416_s9 + $0x44] ss:$8 sps:$4 sm:$0xff]   ;;  %801 = vmatprep.subr.bf16.mxu0 %v1117_v58  ;;  %v1125_v62 = vld [vmem:[%s1416_s9 + $0x110] ss:$8 sps:$4 sm:$0xff]   ;;  %v1107_v63 = vld [vmem:[%s1416_s9 + $0x40] ss:$8 sps:$4 sm:$0xff]  }
  0x4b   : > { %802 = vmatpush1.bf16.msra.mxu0 %v1119_v59  ;;  %v1108_v0 = vld [vmem:[%s1416_s9 + $0x54] ss:$8 sps:$4 sm:$0xff]   ;;  %v1129_v1 = vld [vmem:[%s1416_s9 + $0x124] ss:$8 sps:$4 sm:$0xff]   ;;  %v1131_v2 = vld [vmem:[%s1416_s9 + $0x120] ss:$8 sps:$4 sm:$0xff]  }
  0x4c   : > { %763 = vmatpush1.bf16.msra.mxu1 %v1098_v53  ;;  %803 = vmatprep.subr.bf16.mxu0 %v1123_v61  ;;  %v1110_v3 = vld [vmem:[%s1416_s9 + $0x50] ss:$8 sps:$4 sm:$0xff]   ;;  %v1135_v4 = vld [vmem:[%s1416_s9 + $0x134] ss:$8 sps:$4 sm:$0xff]   ;;  %v1111_v5 = vld [vmem:[%s1416_s9 + $0x64] ss:$8 sps:$4 sm:$0xff]  }
  0x4d   : > { %764 = vmatprep.subr.bf16.mxu1 %v1099_v54  ;;  %v1137_v6 = vld [vmem:[%s1416_s9 + $0x130] ss:$8 sps:$4 sm:$0xff]   ;;  %v1113_v7 = vld [vmem:[%s1416_s9 + $0x60] ss:$8 sps:$4 sm:$0xff]   ;;  %v1141_v8 = vld [vmem:[%s1416_s9 + $0x144] ss:$8 sps:$4 sm:$0xff]  }
  0x4e   : > { %v1114_v9 = vld [vmem:[%s1416_s9 + $0x74] ss:$8 sps:$4 sm:$0xff]   ;;  %v1223_v10 = vmov 1966171168   ;;  %v1143_v13 = vld [vmem:[%s1416_s9 + $0x140] ss:$8 sps:$4 sm:$0xff]  }
  0x4f   : > { %804 = vmatpush1.bf16.msra.mxu0 %v1125_v62  ;;  %v503_v11 = vunpack.c.l.s4 %v1223_v10  ;;  %v1116_v14 = vld [vmem:[%s1416_s9 + $0x70] ss:$8 sps:$4 sm:$0xff]   ;;  %v1147_v15 = vld [vmem:[%s1416_s9 + $0x154] ss:$8 sps:$4 sm:$0xff]   ;;  %v1120_v16 = vld [vmem:[%s1416_s9 + $0x84] ss:$8 sps:$4 sm:$0xff]  }
  0x50   : > { %765 = vmatpush1.bf16.msra.mxu1 %v1101_v55  ;;  %805 = vmatprep.subr.bf16.mxu0 %v1129_v1  ;;  %v1448_v18 = vshrl.u32 %v505_v12, 7  ;;  %v1149_v19 = vld [vmem:[%s1416_s9 + $0x150] ss:$8 sps:$4 sm:$0xff]   ;;  %v1122_v20 = vld [vmem:[%s1416_s9 + $0x80] ss:$8 sps:$4 sm:$0xff]  }
  0x51   : > { %766 = vmatprep.subr.bf16.mxu1 %v1102_v56  ;;  %v504_v17 = vunpack.c.0.s8 %v503_v11  ;;  %v1153_v21 = vld [vmem:[%s1416_s9 + $0x164] ss:$8 sps:$4 sm:$0xff]   ;;  %v1126_v22 = vld [vmem:[%s1416_s9 + $0x94] ss:$8 sps:$4 sm:$0xff]   ;;  %v1155_v26 = vld [vmem:[%s1416_s9 + $0x160] ss:$8 sps:$4 sm:$0xff]  }
  0x52   : > { %v977_v23 = vld.sshfl [vmem:[%s423_s20] sm:$0x13 pattern:$0x75316420]  ;;  %v1128_v27 = vld [vmem:[%s1416_s9 + $0x90] ss:$8 sps:$4 sm:$0xff]  }
  0x53   : > { %806 = vmatpush1.bf16.msra.mxu0 %v1131_v2  ;;  %v507_v24 = vsub.s32 %v504_v17, %v1448_v18  ;;  %v501_v25 = vcombine.high %v977_v23, %v977_v23  ;;  %v1159_v28 = vld [vmem:[%s1416_s9 + $0x174] ss:$8 sps:$4 sm:$0xff]   ;;  %v1132_v30 = vld [vmem:[%s1416_s9 + $0xa4] ss:$8 sps:$4 sm:$0xff]   ;;  %v1161_v32 = vld [vmem:[%s1416_s9 + $0x170] ss:$8 sps:$4 sm:$0xff]  }
  0x54   : > { %767 = vmatpush1.bf16.msra.mxu1 %v1104_v57  ;;  %807 = vmatprep.subr.bf16.mxu0 %v1135_v4  ;;  %v1134_v33 = vld [vmem:[%s1416_s9 + $0xa0] ss:$8 sps:$4 sm:$0xff]   ;;  %v1138_v34 = vld [vmem:[%s1416_s9 + $0xb4] ss:$8 sps:$4 sm:$0xff]   ;;  %v1140_v36 = vld [vmem:[%s1416_s9 + $0xb0] ss:$8 sps:$4 sm:$0xff]  }
  0x55   : > { %768 = vmatprep.subr.bf16.mxu1 %v1105_v60  ;;  %v515_v29 = vrot.slane %v501_v25, %v507_v24  ;;  %v508_v31 = vrot.slane %v977_v23, %v507_v24  ;;  %v1144_v37 = vld [vmem:[%s1416_s9 + $0xc4] ss:$8 sps:$4 sm:$0xff]   ;;  %v1146_v38 = vld [vmem:[%s1416_s9 + $0xc0] ss:$8 sps:$4 sm:$0xff]   ;;  %v1150_v39 = vld [vmem:[%s1416_s9 + $0xd4] ss:$8 sps:$4 sm:$0xff]  }
  0x56   : > { %v1152_v40 = vld [vmem:[%s1416_s9 + $0xd0] ss:$8 sps:$4 sm:$0xff]   ;;  %v1156_v41 = vld [vmem:[%s1416_s9 + $0xe4] ss:$8 sps:$4 sm:$0xff]   ;;  %v1158_v42 = vld [vmem:[%s1416_s9 + $0xe0] ss:$8 sps:$4 sm:$0xff]  }
  0x57   : > { %808 = vmatpush1.bf16.msra.mxu0 %v1137_v6  ;;  %792 = vmatprep.mubr.bf16.mxu1 %v515_v29  ;;  %v516_v35 = vcombine.high %v508_v31, %v508_v31  ;;  %v1162_v43 = vld [vmem:[%s1416_s9 + $0xf4] ss:$8 sps:$4 sm:$0xff]   ;;  %v1164_v44 = vld [vmem:[%s1416_s9 + $0xf0] ss:$8 sps:$4 sm:$0xff]   ;;  %v1224_v49 = vmov 1983009808  }
  0x58   : > { %769 = vmatpush1.bf16.msra.mxu1 %v1107_v63  ;;  %809 = vmatprep.subr.bf16.mxu0 %v1141_v8  ;;  %v846_v50 = vunpack.c.l.s4 %v1224_v49  ;;  %v443_v60 = vld [vmem:[%s1414_s25] sm:$0xf] }
  0x59   : > { %770 = vmatprep.subr.bf16.mxu1 %v1108_v0 }
  0x5a   : > { %v847_v51 = vunpack.c.0.s8 %v846_v50 }
  0x5b   : > { %810 = vmatpush1.bf16.msra.mxu0 %v1143_v13 }
  0x5c   : > { %771 = vmatpush1.bf16.msra.mxu1 %v1110_v3  ;;  %811 = vmatprep.subr.bf16.mxu0 %v1147_v15  ;;  %v850_v56 = vsub.s32 %v847_v51, %v1448_v18 }
  0x5d   : > { %772 = vmatprep.subr.bf16.mxu1 %v1111_v5 }
  0x5f   : > { %812 = vmatpush1.bf16.msra.mxu0 %v1149_v19 }
  0x60   : > { %773 = vmatpush1.bf16.msra.mxu1 %v1113_v7  ;;  %813 = vmatprep.subr.bf16.mxu0 %v1153_v21 }
  0x61   : > { %774 = vmatprep.subr.bf16.mxu1 %v1114_v9 }
  0x63   : > { %814 = vmatpush1.bf16.msra.mxu0 %v1155_v26 }
  0x64   : > { %775 = vmatpush1.bf16.msra.mxu1 %v1116_v14  ;;  %815 = vmatprep.subr.bf16.mxu0 %v1159_v28 }
  0x65   : > { %776 = vmatprep.subr.bf16.mxu1 %v1120_v16 }
  0x67   : > { %816 = vmatpush1.bf16.msra.mxu0 %v1161_v32 }
  0x68   : > { %777 = vmatpush1.bf16.msra.mxu1 %v1122_v20 }
  0x69   : > { %778 = vmatprep.subr.bf16.mxu1 %v1126_v22 }
  0x6a   : > { %834 = vmatmul.mubr.bf16.vlgmr.msra.gmra.mrb[0].mxu0 %v516_v35 }
  0x6c   : > { %779 = vmatpush1.bf16.msra.mxu1 %v1128_v27 }
  0x6d   : > { %780 = vmatprep.subr.bf16.mxu1 %v1132_v30 }
  0x70   : > { %781 = vmatpush1.bf16.msra.mxu1 %v1134_v33 }
  0x71   : > { %782 = vmatprep.subr.bf16.mxu1 %v1138_v34 }
  0x74   : > { %783 = vmatpush1.bf16.msra.mxu1 %v1140_v36 }
  0x75   : > { %784 = vmatprep.subr.bf16.mxu1 %v1144_v37 }
  0x78   : > { %785 = vmatpush1.bf16.msra.mxu1 %v1146_v38 }
  0x79   : > { %786 = vmatprep.subr.bf16.mxu1 %v1150_v39 }
  0x7c   : > { %787 = vmatpush1.bf16.msra.mxu1 %v1152_v40 }
  0x7d   : > { %788 = vmatprep.subr.bf16.mxu1 %v1156_v41 }
  0x80   : > { %789 = vmatpush1.bf16.msra.mxu1 %v1158_v42 }
  0x81   : > { %790 = vmatprep.subr.bf16.mxu1 %v1162_v43 }
  0x84   : > { %791 = vmatpush1.bf16.msra.mxu1 %v1164_v44 }
  0x87   : > { %793 = vmatmul.mubr.bf16.vlgmr.msra.gmra.mrb[0].mxu1 %v508_v31 }
 0x13d   : > { %v835_v45 = vpop.f32.mrb[0].mxu0 }
 0x13e   : > { %v837_v46 = vpop.f32.mrb[1].mxu0 }
 0x13f   : > { %v839_v47 = vpop.f32.mrb[2].mxu0 }
 0x140   : > { %v840_v48 = vpop.f32.mrb[3].mxu0 }
 0x15a   : > { %v794_v52 = vpop.f32.mrb[0].mxu1 }
 0x15b   : > { %v836_v53 = vadd.f32 %v835_v45, %v794_v52  ;;  %v796_v54 = vpop.f32.mrb[1].mxu1 }
 0x15c   : > { %v838_v55 = vadd.f32 %v837_v46, %v796_v54  ;;  %v798_v57 = vpop.f32.mrb[2].mxu1 }
 0x15d   : > { %v799_v58 = vpop.f32.mrb[3].mxu1 }
 0x15e   : > { %v844_v59 = vcombine.low %v836_v53, %v838_v55 }
 0x160   : > { %v851_v61 = vrot.slane %v844_v59, %v850_v56 }
 0x162   : > { %v853_v62 = vadd.f32 %v851_v61, %v443_v60 }
 0x164   : > { %854 = vst [vmem:[%s1414_s25] sm:$0xf] %v853_v62 }
 0x165 PF: > { %s12_s15 = sadd.s32 1, %s1219_s15   ;;  %s1503_s9 = smov %s1199_s10 }
 0x166   : > { %p9_p13 = scmp.ge.s32.totalorder %s12_s15, 14   ;;  %s1504_s10 = smov %s1291_s22 }
 0x167   : > { %s1505_s11 = smov %s1211_s13  ;;  %s1506_s12 = smov %s1215_s14 }
 0x168   : > { %s1507_s13 = smov %s1510_s16  ;;  %s1508_s14 = smov %s1514_s17 }
 0x169   :  { %11 = sbr.rel (!%p9_p13) target bundleno = 4 (0x4), region = 108 }

// kernel: _lambda_.73
= control target key start
LH: loop header
LB: loop body
LE: loop exit
PB: predicated region body
PF: predicated region fallthrough
CT: control target
= control target key end

     0   :  { %s1441_s9 = smov 0   ;;  %s1443_s10 = smov 0   ;;  %s1749_s0 = inlined_call_operand.vmem [shape: bf16[2,4608], index: 0, kind: input, shape index: {}]   ;;  %s1750_s1 = inlined_call_operand.vmem [shape: bf16[4608,512], index: 1, kind: input, shape index: {}]   ;;  %s1751_s2 = inlined_call_operand.vmem [shape: f32[2,512], index: 2, kind: output, shape index: {}]  }
   0x1   :  { %s1445_s11 = smov 0   ;;  %s1447_s12 = smov 0  }
   0x2   :  { %s1449_s13 = smov 0   ;;  %s1451_s14 = smov 0  }
   0x3   :  { %s1453_s15 = smov 0  }
   0x4 LB: > { %s24_s16 = sadd.s32 1, %s1413_s13  ;;  %s27_s17 = sadd.s32 1, %s1417_s14  ;;  %s1421_s15 = sphi %s1453_s15, %s12_s15   ;;  %s1417_s14 = sphi %s1451_s14, %s1757_s14   ;;  %s1413_s13 = sphi %s1449_s13, %s1756_s13   ;;  %s1409_s12 = sphi %s1447_s12, %s1755_s12   ;;  %s1405_s11 = sphi %s1445_s11, %s1754_s11   ;;  %s1401_s10 = sphi %s1443_s10, %s1753_s10   ;;  %s1397_s9 = sphi %s1441_s9, %s1752_s9  }
   0x5   : > { %p25_p0 = scmp.ge.s32.totalorder %s24_s16, 9  ;;  %p75_p1 = scmp.ne.s32.totalorder %s1401_s10, %s1397_s9 }
   0x6   : > { %p76_p2 = scmp.eq.s32.totalorder %s1421_s15, 0  ;;  %s68_s21 = sadd.s32 1, %s1401_s10 }
   0x7   : > { %s1759_s16 = smov (%p25_p0, %s24_s16), 0  ;;  %s1761_s17 = smov (!%p25_p0, %s27_s17), %s1417_s14 }
   0x8   : > { %p77_p3 = por %p76_p2, %p75_p1  ;;  %p29_p4 = scmp.ge.s32.totalorder %s1761_s17, 2 }
   0x9   : > { %s63_s18 = ssub.s32 %s1413_s13, %s1759_s16  ;;  %p1130_p6 = scmp.ge.s32.totalorder %s1421_s15, 18 }
   0xa   : > { %s1763_s17 = smov (%p29_p4, %s1761_s17), 0 }
   0xb   : > { %s64_s19 = ssub.s32 %s1417_s14, %s1763_s17  ;;  %129 = sbr.rel (%p1130_p6) target bundleno = 57 (0x39), region = 16 }
   0xc   : > { %s65_s20 = sor.u32 %s64_s19, %s63_s18 }
   0xd   : > { %p66_p5 = scmp.eq.s32.totalorder %s65_s20, 0 }
   0xf   : > { %s1492_s22 = scalar_select %p66_p5, %s1401_s10, %s68_s21  }
  0x12   : > { %144 = sbr.rel (!%p77_p3) target bundleno = 57 (0x39), region = 24  ;;  %s146_s23 = sand.u32 (%p77_p3), 1, %s1401_s10  }
  0x13   : > { %s1133_s24 = sshll.u32 (%p77_p3), %s1417_s14, 1  ;;  %s1131_s25 = sshll.u32 (%p77_p3), %s146_s23, 9 }
  0x14   : > { %s1209_s26 = sshll.u32 (%p77_p3), %s1413_s13, 8  ;;  %s1506_s4 = scalar_lea.vmem (%p77_p3), [#allocation2], %s1131_s25 }
  0x15   : > { %s152_s27 = sadd.s32 (%p77_p3), %s1209_s26, %s1133_s24 }
  0x16   : > { %s1135_s28 = sshll.u32 (%p77_p3), %s152_s27, 2 }
  0x17   : > { %s1501_s3 = scalar_lea.vmem (%p77_p3), %s1750_s1, %s1135_s28 }
  0x18   : > { %v308_v0 = vld [vmem:[%s1501_s3] sm:$0xff] (%p77_p3)  ;;  %v310_v1 = vld [vmem:[%s1501_s3 + $0x10] sm:$0xff] (%p77_p3) }
  0x19   : > { %v312_v2 = vld [vmem:[%s1501_s3 + $0x20] sm:$0xff]  ;;  %309 = vst [vmem:[%s1506_s4] sm:$0xff] %v308_v0  ;;  %311 = vst [vmem:[%s1506_s4 + $0x8] sm:$0xff] %v310_v1  ;;  %v314_v3 = vld [vmem:[%s1501_s3 + $0x30] sm:$0xff] }
  0x1a   : > { %313 = vst [vmem:[%s1506_s4 + $0x10] sm:$0xff] %v312_v2  ;;  %v316_v4 = vld [vmem:[%s1501_s3 + $0x40] sm:$0xff]  ;;  %v318_v5 = vld [vmem:[%s1501_s3 + $0x50] sm:$0xff]  ;;  %315 = vst [vmem:[%s1506_s4 + $0x18] sm:$0xff] %v314_v3 }
  0x1b   : > { %317 = vst [vmem:[%s1506_s4 + $0x20] sm:$0xff] %v316_v4  ;;  %319 = vst [vmem:[%s1506_s4 + $0x28] sm:$0xff] %v318_v5  ;;  %v320_v6 = vld [vmem:[%s1501_s3 + $0x60] sm:$0xff]  ;;  %v322_v7 = vld [vmem:[%s1501_s3 + $0x70] sm:$0xff] }
  0x1c   : > { %v324_v8 = vld [vmem:[%s1501_s3 + $0x80] sm:$0xff]  ;;  %321 = vst [vmem:[%s1506_s4 + $0x30] sm:$0xff] %v320_v6  ;;  %323 = vst [vmem:[%s1506_s4 + $0x38] sm:$0xff] %v322_v7  ;;  %v326_v9 = vld [vmem:[%s1501_s3 + $0x90] sm:$0xff] }
  0x1d   : > { %325 = vst [vmem:[%s1506_s4 + $0x40] sm:$0xff] %v324_v8  ;;  %v328_v10 = vld [vmem:[%s1501_s3 + $0xa0] sm:$0xff]  ;;  %v330_v11 = vld [vmem:[%s1501_s3 + $0xb0] sm:$0xff]  ;;  %327 = vst [vmem:[%s1506_s4 + $0x48] sm:$0xff] %v326_v9 }
  0x1e   : > { %329 = vst [vmem:[%s1506_s4 + $0x50] sm:$0xff] %v328_v10  ;;  %331 = vst [vmem:[%s1506_s4 + $0x58] sm:$0xff] %v330_v11  ;;  %v332_v12 = vld [vmem:[%s1501_s3 + $0xc0] sm:$0xff]  ;;  %v334_v13 = vld [vmem:[%s1501_s3 + $0xd0] sm:$0xff] }
  0x1f   : > { %v336_v14 = vld [vmem:[%s1501_s3 + $0xe0] sm:$0xff]  ;;  %333 = vst [vmem:[%s1506_s4 + $0x60] sm:$0xff] %v332_v12  ;;  %335 = vst [vmem:[%s1506_s4 + $0x68] sm:$0xff] %v334_v13  ;;  %v338_v15 = vld [vmem:[%s1501_s3 + $0xf0] sm:$0xff] }
  0x20   : > { %337 = vst [vmem:[%s1506_s4 + $0x70] sm:$0xff] %v336_v14  ;;  %v340_v16 = vld [vmem:[%s1501_s3 + $0x100] sm:$0xff]  ;;  %v342_v17 = vld [vmem:[%s1501_s3 + $0x110] sm:$0xff]  ;;  %339 = vst [vmem:[%s1506_s4 + $0x78] sm:$0xff] %v338_v15 }
  0x21   : > { %341 = vst [vmem:[%s1506_s4 + $0x80] sm:$0xff] %v340_v16  ;;  %343 = vst [vmem:[%s1506_s4 + $0x88] sm:$0xff] %v342_v17  ;;  %v344_v18 = vld [vmem:[%s1501_s3 + $0x120] sm:$0xff]  ;;  %v346_v19 = vld [vmem:[%s1501_s3 + $0x130] sm:$0xff] }
  0x22   : > { %v348_v20 = vld [vmem:[%s1501_s3 + $0x140] sm:$0xff]  ;;  %345 = vst [vmem:[%s1506_s4 + $0x90] sm:$0xff] %v344_v18  ;;  %347 = vst [vmem:[%s1506_s4 + $0x98] sm:$0xff] %v346_v19  ;;  %v350_v21 = vld [vmem:[%s1501_s3 + $0x150] sm:$0xff] }
  0x23   : > { %349 = vst [vmem:[%s1506_s4 + $0xa0] sm:$0xff] %v348_v20  ;;  %v352_v22 = vld [vmem:[%s1501_s3 + $0x160] sm:$0xff]  ;;  %v354_v23 = vld [vmem:[%s1501_s3 + $0x170] sm:$0xff]  ;;  %351 = vst [vmem:[%s1506_s4 + $0xa8] sm:$0xff] %v350_v21 }
  0x24   : > { %353 = vst [vmem:[%s1506_s4 + $0xb0] sm:$0xff] %v352_v22  ;;  %355 = vst [vmem:[%s1506_s4 + $0xb8] sm:$0xff] %v354_v23  ;;  %v356_v24 = vld [vmem:[%s1501_s3 + $0x180] sm:$0xff]  ;;  %v358_v25 = vld [vmem:[%s1501_s3 + $0x190] sm:$0xff] }
  0x25   : > { %v360_v26 = vld [vmem:[%s1501_s3 + $0x1a0] sm:$0xff]  ;;  %357 = vst [vmem:[%s1506_s4 + $0xc0] sm:$0xff] %v356_v24  ;;  %359 = vst [vmem:[%s1506_s4 + $0xc8] sm:$0xff] %v358_v25  ;;  %v362_v27 = vld [vmem:[%s1501_s3 + $0x1b0] sm:$0xff] }
  0x26   : > { %361 = vst [vmem:[%s1506_s4 + $0xd0] sm:$0xff] %v360_v26  ;;  %v364_v28 = vld [vmem:[%s1501_s3 + $0x1c0] sm:$0xff]  ;;  %v366_v29 = vld [vmem:[%s1501_s3 + $0x1d0] sm:$0xff]  ;;  %363 = vst [vmem:[%s1506_s4 + $0xd8] sm:$0xff] %v362_v27 }
  0x27   : > { %365 = vst [vmem:[%s1506_s4 + $0xe0] sm:$0xff] %v364_v28  ;;  %367 = vst [vmem:[%s1506_s4 + $0xe8] sm:$0xff] %v366_v29  ;;  %v368_v30 = vld [vmem:[%s1501_s3 + $0x1e0] sm:$0xff]  ;;  %v370_v31 = vld [vmem:[%s1501_s3 + $0x1f0] sm:$0xff] }
  0x28   : > { %v372_v32 = vld [vmem:[%s1501_s3 + $0x200] sm:$0xff]  ;;  %369 = vst [vmem:[%s1506_s4 + $0xf0] sm:$0xff] %v368_v30  ;;  %371 = vst [vmem:[%s1506_s4 + $0xf8] sm:$0xff] %v370_v31  ;;  %v374_v33 = vld [vmem:[%s1501_s3 + $0x210] sm:$0xff] }
  0x29   : > { %373 = vst [vmem:[%s1506_s4 + $0x100] sm:$0xff] %v372_v32  ;;  %v376_v34 = vld [vmem:[%s1501_s3 + $0x220] sm:$0xff]  ;;  %v378_v35 = vld [vmem:[%s1501_s3 + $0x230] sm:$0xff]  ;;  %375 = vst [vmem:[%s1506_s4 + $0x108] sm:$0xff] %v374_v33 }
  0x2a   : > { %377 = vst [vmem:[%s1506_s4 + $0x110] sm:$0xff] %v376_v34  ;;  %379 = vst [vmem:[%s1506_s4 + $0x118] sm:$0xff] %v378_v35  ;;  %v380_v36 = vld [vmem:[%s1501_s3 + $0x240] sm:$0xff]  ;;  %v382_v37 = vld [vmem:[%s1501_s3 + $0x250] sm:$0xff] }
  0x2b   : > { %v384_v38 = vld [vmem:[%s1501_s3 + $0x260] sm:$0xff]  ;;  %381 = vst [vmem:[%s1506_s4 + $0x120] sm:$0xff] %v380_v36  ;;  %383 = vst [vmem:[%s1506_s4 + $0x128] sm:$0xff] %v382_v37  ;;  %v386_v39 = vld [vmem:[%s1501_s3 + $0x270] sm:$0xff] }
  0x2c   : > { %385 = vst [vmem:[%s1506_s4 + $0x130] sm:$0xff] %v384_v38  ;;  %v388_v40 = vld [vmem:[%s1501_s3 + $0x280] sm:$0xff]  ;;  %v390_v41 = vld [vmem:[%s1501_s3 + $0x290] sm:$0xff]  ;;  %387 = vst [vmem:[%s1506_s4 + $0x138] sm:$0xff] %v386_v39 }
  0x2d   : > { %389 = vst [vmem:[%s1506_s4 + $0x140] sm:$0xff] %v388_v40  ;;  %391 = vst [vmem:[%s1506_s4 + $0x148] sm:$0xff] %v390_v41  ;;  %v392_v42 = vld [vmem:[%s1501_s3 + $0x2a0] sm:$0xff]  ;;  %v394_v43 = vld [vmem:[%s1501_s3 + $0x2b0] sm:$0xff] }
  0x2e   : > { %v396_v44 = vld [vmem:[%s1501_s3 + $0x2c0] sm:$0xff]  ;;  %393 = vst [vmem:[%s1506_s4 + $0x150] sm:$0xff] %v392_v42  ;;  %395 = vst [vmem:[%s1506_s4 + $0x158] sm:$0xff] %v394_v43  ;;  %v398_v45 = vld [vmem:[%s1501_s3 + $0x2d0] sm:$0xff] }
  0x2f   : > { %397 = vst [vmem:[%s1506_s4 + $0x160] sm:$0xff] %v396_v44  ;;  %v400_v46 = vld [vmem:[%s1501_s3 + $0x2e0] sm:$0xff]  ;;  %v402_v47 = vld [vmem:[%s1501_s3 + $0x2f0] sm:$0xff]  ;;  %399 = vst [vmem:[%s1506_s4 + $0x168] sm:$0xff] %v398_v45 }
  0x30   : > { %401 = vst [vmem:[%s1506_s4 + $0x170] sm:$0xff] %v400_v46  ;;  %403 = vst [vmem:[%s1506_s4 + $0x178] sm:$0xff] %v402_v47  ;;  %v404_v48 = vld [vmem:[%s1501_s3 + $0x300] sm:$0xff]  ;;  %v406_v49 = vld [vmem:[%s1501_s3 + $0x310] sm:$0xff] }
  0x31   : > { %v408_v50 = vld [vmem:[%s1501_s3 + $0x320] sm:$0xff]  ;;  %405 = vst [vmem:[%s1506_s4 + $0x180] sm:$0xff] %v404_v48  ;;  %407 = vst [vmem:[%s1506_s4 + $0x188] sm:$0xff] %v406_v49  ;;  %v410_v51 = vld [vmem:[%s1501_s3 + $0x330] sm:$0xff] }
  0x32   : > { %409 = vst [vmem:[%s1506_s4 + $0x190] sm:$0xff] %v408_v50  ;;  %v412_v52 = vld [vmem:[%s1501_s3 + $0x340] sm:$0xff]  ;;  %v414_v53 = vld [vmem:[%s1501_s3 + $0x350] sm:$0xff]  ;;  %411 = vst [vmem:[%s1506_s4 + $0x198] sm:$0xff] %v410_v51 }
  0x33   : > { %413 = vst [vmem:[%s1506_s4 + $0x1a0] sm:$0xff] %v412_v52  ;;  %415 = vst [vmem:[%s1506_s4 + $0x1a8] sm:$0xff] %v414_v53  ;;  %v416_v54 = vld [vmem:[%s1501_s3 + $0x360] sm:$0xff]  ;;  %v418_v55 = vld [vmem:[%s1501_s3 + $0x370] sm:$0xff] }
  0x34   : > { %v420_v56 = vld [vmem:[%s1501_s3 + $0x380] sm:$0xff]  ;;  %417 = vst [vmem:[%s1506_s4 + $0x1b0] sm:$0xff] %v416_v54  ;;  %419 = vst [vmem:[%s1506_s4 + $0x1b8] sm:$0xff] %v418_v55  ;;  %v422_v57 = vld [vmem:[%s1501_s3 + $0x390] sm:$0xff] }
  0x35   : > { %421 = vst [vmem:[%s1506_s4 + $0x1c0] sm:$0xff] %v420_v56  ;;  %v424_v58 = vld [vmem:[%s1501_s3 + $0x3a0] sm:$0xff]  ;;  %v426_v59 = vld [vmem:[%s1501_s3 + $0x3b0] sm:$0xff]  ;;  %423 = vst [vmem:[%s1506_s4 + $0x1c8] sm:$0xff] %v422_v57 }
  0x36   : > { %425 = vst [vmem:[%s1506_s4 + $0x1d0] sm:$0xff] %v424_v58  ;;  %427 = vst [vmem:[%s1506_s4 + $0x1d8] sm:$0xff] %v426_v59  ;;  %v428_v60 = vld [vmem:[%s1501_s3 + $0x3c0] sm:$0xff]  ;;  %v430_v61 = vld [vmem:[%s1501_s3 + $0x3d0] sm:$0xff] }
  0x37   : > { %v432_v62 = vld [vmem:[%s1501_s3 + $0x3e0] sm:$0xff]  ;;  %429 = vst [vmem:[%s1506_s4 + $0x1e0] sm:$0xff] %v428_v60  ;;  %431 = vst [vmem:[%s1506_s4 + $0x1e8] sm:$0xff] %v430_v61  ;;  %v434_v63 = vld [vmem:[%s1501_s3 + $0x3f0] sm:$0xff] }
  0x38   : > { %433 = vst [vmem:[%s1506_s4 + $0x1f0] sm:$0xff] %v432_v62  ;;  %435 = vst [vmem:[%s1506_s4 + $0x1f8] sm:$0xff] %v434_v63 }
  0x39 PF: > { %p1136_p7 = scmp.ge.s32.totalorder %s1421_s15, 1  ;;  %p440_p8 = scmp.lt.s32.totalorder %s1421_s15, 19 }
  0x3b   : > { %p441_p9 = pnand %p1136_p7, %p440_p8 }
  0x3c   : > { %s447_s5 = sand.u32 (!%p441_p9), 1, %s1397_s9   ;;  %s1138_s6 = sshll.u32 (!%p441_p9), %s1405_s11, 2 }
  0x3d   : > { %444 = sbr.rel (%p441_p9) target bundleno = 365 (0x16d), region = 62  ;;  %s1137_s7 = sshll.u32 (!%p441_p9), %s447_s5, 9 }
  0x3e   : > { %p483_p10 = scmp.lt.s32.totalorder (!%p441_p9), %s1138_s6, 35  ;;  %s1139_s8 = sshll.u32 (!%p441_p9), %s1409_s12, 1 }
  0x3f   : > { %p494_p11 = scmp.lt.s32.totalorder (!%p441_p9), %s1139_s8, 3  ;;  %s1649_s9 = scalar_lea.vmem (!%p441_p9), [#allocation2], %s1137_s7 }
  0x40   : > { %p1141_p12 = scmp.ne.s32.totalorder (!%p441_p9), %s1405_s11, 0 }
  0x44   : > { %s1765_s6 = smov (!%p483_p10, %s1138_s6), 35  ;;  %s1767_s8 = smov (!%p494_p11, %s1139_s8), 3 }
  0x45   : > { %s487_s20 = scalar_lea.vmem %s1749_s0, %s1765_s6  ;;  %s1140_s21 = sshll.u32 %s1767_s8, 1  ;;  %v1423_v0 = vmov (!%p1141_p12), 0.0  }
  0x46   : > { %s1647_s25 = scalar_lea.vmem %s1751_s2, %s1140_s21  ;;  %504 = sbr.rel (%p1141_p12) target bundleno = 77 (0x4d), region = 70 }
  0x47   : > { %505 = vst [vmem:[%s1647_s25] sm:$0xf] (!%p1141_p12), %v1423_v0 }
  0x4d PF: > { %v1271_v1 = vld [vmem:[%s1649_s9 + $0x4] ss:$8 sps:$4 sm:$0xff]   ;;  %v1275_v3 = vld [vmem:[%s1649_s9] ss:$8 sps:$4 sm:$0xff]   ;;  %v1277_v5 = vld [vmem:[%s1649_s9 + $0x14] ss:$8 sps:$4 sm:$0xff]   ;;  %v584_v41 = vlaneseq }
  0x4e   : > { %v1273_v2 = vld [vmem:[%s1649_s9 + $0x104] ss:$8 sps:$4 sm:$0xff]   ;;  %921 = vmatprep.subr.bf16.mxu1 %v1271_v1  ;;  %v1276_v4 = vld [vmem:[%s1649_s9 + $0x100] ss:$8 sps:$4 sm:$0xff]   ;;  %v1279_v6 = vld [vmem:[%s1649_s9 + $0x114] ss:$8 sps:$4 sm:$0xff]  }
  0x4f   : > { %962 = vmatprep.subr.bf16.mxu0 %v1273_v2  ;;  %922 = vmatpush1.bf16.msra.mxu1 %v1275_v3  ;;  %v1281_v7 = vld [vmem:[%s1649_s9 + $0x10] ss:$8 sps:$4 sm:$0xff]   ;;  %v1283_v9 = vld [vmem:[%s1649_s9 + $0x24] ss:$8 sps:$4 sm:$0xff]   ;;  %v1287_v11 = vld [vmem:[%s1649_s9 + $0x20] ss:$8 sps:$4 sm:$0xff]  }
  0x50   : > { %963 = vmatpush1.bf16.msra.mxu0 %v1276_v4  ;;  %923 = vmatprep.subr.bf16.mxu1 %v1277_v5  ;;  %v1282_v8 = vld [vmem:[%s1649_s9 + $0x110] ss:$8 sps:$4 sm:$0xff]   ;;  %v1285_v10 = vld [vmem:[%s1649_s9 + $0x124] ss:$8 sps:$4 sm:$0xff]   ;;  %v1288_v12 = vld [vmem:[%s1649_s9 + $0x120] ss:$8 sps:$4 sm:$0xff]  }
  0x51   : > { %964 = vmatprep.subr.bf16.mxu0 %v1279_v6  ;;  %v1289_v13 = vld [vmem:[%s1649_s9 + $0x34] ss:$8 sps:$4 sm:$0xff]   ;;  %v1293_v15 = vld [vmem:[%s1649_s9 + $0x30] ss:$8 sps:$4 sm:$0xff]   ;;  %v1295_v17 = vld [vmem:[%s1649_s9 + $0x44] ss:$8 sps:$4 sm:$0xff]  }
  0x52   : > { %v1291_v14 = vld [vmem:[%s1649_s9 + $0x134] ss:$8 sps:$4 sm:$0xff]   ;;  %v1294_v16 = vld [vmem:[%s1649_s9 + $0x130] ss:$8 sps:$4 sm:$0xff]   ;;  %v1297_v18 = vld [vmem:[%s1649_s9 + $0x144] ss:$8 sps:$4 sm:$0xff]  }
  0x53   : > { %924 = vmatpush1.bf16.msra.mxu1 %v1281_v7  ;;  %v1299_v19 = vld [vmem:[%s1649_s9 + $0x40] ss:$8 sps:$4 sm:$0xff]   ;;  %v1301_v21 = vld [vmem:[%s1649_s9 + $0x54] ss:$8 sps:$4 sm:$0xff]   ;;  %v1305_v23 = vld [vmem:[%s1649_s9 + $0x50] ss:$8 sps:$4 sm:$0xff]  }
  0x54   : > { %965 = vmatpush1.bf16.msra.mxu0 %v1282_v8  ;;  %925 = vmatprep.subr.bf16.mxu1 %v1283_v9  ;;  %v1300_v20 = vld [vmem:[%s1649_s9 + $0x140] ss:$8 sps:$4 sm:$0xff]   ;;  %v1303_v22 = vld [vmem:[%s1649_s9 + $0x154] ss:$8 sps:$4 sm:$0xff]   ;;  %v1306_v24 = vld [vmem:[%s1649_s9 + $0x150] ss:$8 sps:$4 sm:$0xff]  }
  0x55   : > { %966 = vmatprep.subr.bf16.mxu0 %v1285_v10  ;;  %v1307_v25 = vld [vmem:[%s1649_s9 + $0x64] ss:$8 sps:$4 sm:$0xff]   ;;  %v1311_v27 = vld [vmem:[%s1649_s9 + $0x60] ss:$8 sps:$4 sm:$0xff]   ;;  %v1313_v29 = vld [vmem:[%s1649_s9 + $0x74] ss:$8 sps:$4 sm:$0xff]  }
  0x56   : > { %v1309_v26 = vld [vmem:[%s1649_s9 + $0x164] ss:$8 sps:$4 sm:$0xff]   ;;  %v1312_v28 = vld [vmem:[%s1649_s9 + $0x160] ss:$8 sps:$4 sm:$0xff]   ;;  %v1315_v30 = vld [vmem:[%s1649_s9 + $0x174] ss:$8 sps:$4 sm:$0xff]  }
  0x57   : > { %926 = vmatpush1.bf16.msra.mxu1 %v1287_v11  ;;  %v1317_v31 = vld [vmem:[%s1649_s9 + $0x70] ss:$8 sps:$4 sm:$0xff]   ;;  %v1319_v33 = vld [vmem:[%s1649_s9 + $0x84] ss:$8 sps:$4 sm:$0xff]   ;;  %v1323_v35 = vld [vmem:[%s1649_s9 + $0x80] ss:$8 sps:$4 sm:$0xff]  }
  0x58   : > { %967 = vmatpush1.bf16.msra.mxu0 %v1288_v12  ;;  %927 = vmatprep.subr.bf16.mxu1 %v1289_v13  ;;  %v1318_v32 = vld [vmem:[%s1649_s9 + $0x170] ss:$8 sps:$4 sm:$0xff]   ;;  %v1321_v34 = vld [vmem:[%s1649_s9 + $0x184] ss:$8 sps:$4 sm:$0xff]   ;;  %v1324_v36 = vld [vmem:[%s1649_s9 + $0x180] ss:$8 sps:$4 sm:$0xff]  }
  0x59   : > { %968 = vmatprep.subr.bf16.mxu0 %v1291_v14  ;;  %v1325_v37 = vld [vmem:[%s1649_s9 + $0x94] ss:$8 sps:$4 sm:$0xff]   ;;  %v1424_v39 = vmov 1966171168   ;;  %v1329_v42 = vld [vmem:[%s1649_s9 + $0x90] ss:$8 sps:$4 sm:$0xff]  }
  0x5a   : > { %v1327_v38 = vld [vmem:[%s1649_s9 + $0x194] ss:$8 sps:$4 sm:$0xff]   ;;  %v582_v40 = vunpack.c.l.s4 %v1424_v39  ;;  %v1330_v43 = vld [vmem:[%s1649_s9 + $0x190] ss:$8 sps:$4 sm:$0xff]   ;;  %v1331_v44 = vld [vmem:[%s1649_s9 + $0xa4] ss:$8 sps:$4 sm:$0xff]  }
  0x5b   : > { %928 = vmatpush1.bf16.msra.mxu1 %v1293_v15  ;;  %v1333_v45 = vld [vmem:[%s1649_s9 + $0x1a4] ss:$8 sps:$4 sm:$0xff]   ;;  %v1695_v47 = vshrl.u32 %v584_v41, 7  ;;  %v1335_v48 = vld [vmem:[%s1649_s9 + $0xa0] ss:$8 sps:$4 sm:$0xff]  }
  0x5c   : > { %969 = vmatpush1.bf16.msra.mxu0 %v1294_v16  ;;  %929 = vmatprep.subr.bf16.mxu1 %v1295_v17  ;;  %v583_v46 = vunpack.c.0.s8 %v582_v40  ;;  %v1336_v49 = vld [vmem:[%s1649_s9 + $0x1a0] ss:$8 sps:$4 sm:$0xff]   ;;  %v1337_v50 = vld [vmem:[%s1649_s9 + $0xb4] ss:$8 sps:$4 sm:$0xff]   ;;  %v1341_v54 = vld [vmem:[%s1649_s9 + $0xb0] ss:$8 sps:$4 sm:$0xff]  }
  0x5d   : > { %970 = vmatprep.subr.bf16.mxu0 %v1297_v18  ;;  %v1339_v51 = vld [vmem:[%s1649_s9 + $0x1b4] ss:$8 sps:$4 sm:$0xff]   ;;  %v1142_v53 = vld.sshfl [vmem:[%s487_s20] sm:$0x33 pattern:$0x75316420] }
  0x5e   : > { %v586_v52 = vsub.s32 %v583_v46, %v1695_v47  ;;  %v1342_v55 = vld [vmem:[%s1649_s9 + $0x1b0] ss:$8 sps:$4 sm:$0xff]   ;;  %v580_v56 = vcombine.high %v1142_v53, %v1142_v53  ;;  %v1343_v57 = vld [vmem:[%s1649_s9 + $0xc4] ss:$8 sps:$4 sm:$0xff]   ;;  %v1347_v60 = vld [vmem:[%s1649_s9 + $0xc0] ss:$8 sps:$4 sm:$0xff]  }
  0x5f   : > { %930 = vmatpush1.bf16.msra.mxu1 %v1299_v19  ;;  %v1345_v58 = vld [vmem:[%s1649_s9 + $0x1c4] ss:$8 sps:$4 sm:$0xff]   ;;  %v1348_v61 = vld [vmem:[%s1649_s9 + $0x1c0] ss:$8 sps:$4 sm:$0xff]   ;;  %v1349_v63 = vld [vmem:[%s1649_s9 + $0xd4] ss:$8 sps:$4 sm:$0xff]  }
  0x60   : > { %971 = vmatpush1.bf16.msra.mxu0 %v1300_v20  ;;  %931 = vmatprep.subr.bf16.mxu1 %v1301_v21  ;;  %v594_v59 = vrot.slane %v580_v56, %v586_v52  ;;  %v1351_v0 = vld [vmem:[%s1649_s9 + $0x1d4] ss:$8 sps:$4 sm:$0xff]   ;;  %v1353_v1 = vld [vmem:[%s1649_s9 + $0xd0] ss:$8 sps:$4 sm:$0xff]   ;;  %v1355_v3 = vld [vmem:[%s1649_s9 + $0xe4] ss:$8 sps:$4 sm:$0xff]   ;;  %v587_v9 = vrot.slane %v1142_v53, %v586_v52 }
  0x61   : > { %972 = vmatprep.subr.bf16.mxu0 %v1303_v22  ;;  %v1354_v2 = vld [vmem:[%s1649_s9 + $0x1d0] ss:$8 sps:$4 sm:$0xff]   ;;  %v1357_v4 = vld [vmem:[%s1649_s9 + $0x1e4] ss:$8 sps:$4 sm:$0xff]   ;;  %v1359_v5 = vld [vmem:[%s1649_s9 + $0xe0] ss:$8 sps:$4 sm:$0xff]  }
  0x62   : > { %v596_v62 = vcombine.high %v594_v59, %v594_v59  ;;  %953 = vmatprep.mubr.bf16.mxu1 %v594_v59  ;;  %v1360_v6 = vld [vmem:[%s1649_s9 + $0x1e0] ss:$8 sps:$4 sm:$0xff]   ;;  %v1361_v7 = vld [vmem:[%s1649_s9 + $0xf4] ss:$8 sps:$4 sm:$0xff]   ;;  %v1365_v10 = vld [vmem:[%s1649_s9 + $0xf0] ss:$8 sps:$4 sm:$0xff]   ;;  %v595_v12 = vcombine.high %v587_v9, %v587_v9 }
  0x63   : > { %932 = vmatpush1.bf16.msra.mxu1 %v1305_v23  ;;  %v1363_v8 = vld [vmem:[%s1649_s9 + $0x1f4] ss:$8 sps:$4 sm:$0xff]   ;;  %v1366_v11 = vld [vmem:[%s1649_s9 + $0x1f0] ss:$8 sps:$4 sm:$0xff]   ;;  %v1425_v13 = vmov 1983009808  }
  0x64   : > { %973 = vmatpush1.bf16.msra.mxu0 %v1306_v24  ;;  %933 = vmatprep.subr.bf16.mxu1 %v1307_v25  ;;  %v1007_v14 = vunpack.c.l.s4 %v1425_v13 }
  0x65   : > { %974 = vmatprep.subr.bf16.mxu0 %v1309_v26  ;;  %994 = vmatprep.mubr.bf16.mxu0 %v596_v62 }
  0x66   : > { %v1008_v15 = vunpack.c.0.s8 %v1007_v14 }
  0x67   : > { %934 = vmatpush1.bf16.msra.mxu1 %v1311_v27 }
  0x68   : > { %975 = vmatpush1.bf16.msra.mxu0 %v1312_v28  ;;  %935 = vmatprep.subr.bf16.mxu1 %v1313_v29  ;;  %v1011_v22 = vsub.s32 %v1008_v15, %v1695_v47  ;;  %v506_v28 = vld [vmem:[%s1647_s25] sm:$0xf] }
  0x69   : > { %976 = vmatprep.subr.bf16.mxu0 %v1315_v30 }
  0x6b   : > { %936 = vmatpush1.bf16.msra.mxu1 %v1317_v31 }
  0x6c   : > { %977 = vmatpush1.bf16.msra.mxu0 %v1318_v32  ;;  %937 = vmatprep.subr.bf16.mxu1 %v1319_v33 }
  0x6d   : > { %978 = vmatprep.subr.bf16.mxu0 %v1321_v34 }
  0x6f   : > { %938 = vmatpush1.bf16.msra.mxu1 %v1323_v35 }
  0x70   : > { %979 = vmatpush1.bf16.msra.mxu0 %v1324_v36  ;;  %939 = vmatprep.subr.bf16.mxu1 %v1325_v37 }
  0x71   : > { %980 = vmatprep.subr.bf16.mxu0 %v1327_v38 }
  0x73   : > { %940 = vmatpush1.bf16.msra.mxu1 %v1329_v42 }
  0x74   : > { %981 = vmatpush1.bf16.msra.mxu0 %v1330_v43  ;;  %941 = vmatprep.subr.bf16.mxu1 %v1331_v44 }
  0x75   : > { %982 = vmatprep.subr.bf16.mxu0 %v1333_v45 }
  0x77   : > { %942 = vmatpush1.bf16.msra.mxu1 %v1335_v48 }
  0x78   : > { %983 = vmatpush1.bf16.msra.mxu0 %v1336_v49  ;;  %943 = vmatprep.subr.bf16.mxu1 %v1337_v50 }
  0x79   : > { %984 = vmatprep.subr.bf16.mxu0 %v1339_v51 }
  0x7b   : > { %944 = vmatpush1.bf16.msra.mxu1 %v1341_v54 }
  0x7c   : > { %985 = vmatpush1.bf16.msra.mxu0 %v1342_v55  ;;  %945 = vmatprep.subr.bf16.mxu1 %v1343_v57 }
  0x7d   : > { %986 = vmatprep.subr.bf16.mxu0 %v1345_v58 }
  0x7f   : > { %946 = vmatpush1.bf16.msra.mxu1 %v1347_v60 }
  0x80   : > { %987 = vmatpush1.bf16.msra.mxu0 %v1348_v61  ;;  %947 = vmatprep.subr.bf16.mxu1 %v1349_v63 }
  0x81   : > { %988 = vmatprep.subr.bf16.mxu0 %v1351_v0 }
  0x83   : > { %948 = vmatpush1.bf16.msra.mxu1 %v1353_v1 }
  0x84   : > { %989 = vmatpush1.bf16.msra.mxu0 %v1354_v2  ;;  %949 = vmatprep.subr.bf16.mxu1 %v1355_v3 }
  0x85   : > { %990 = vmatprep.subr.bf16.mxu0 %v1357_v4 }
  0x87   : > { %950 = vmatpush1.bf16.msra.mxu1 %v1359_v5 }
  0x88   : > { %991 = vmatpush1.bf16.msra.mxu0 %v1360_v6  ;;  %951 = vmatprep.subr.bf16.mxu1 %v1361_v7 }
  0x89   : > { %992 = vmatprep.subr.bf16.mxu0 %v1363_v8 }
  0x8b   : > { %952 = vmatpush1.bf16.msra.mxu1 %v1365_v10 }
  0x8c   : > { %993 = vmatpush1.bf16.msra.mxu0 %v1366_v11 }
  0x8e   : > { %954 = vmatmul.mubr.bf16.vlgmr.msra.gmra.mrb[0].mxu1 %v587_v9 }
  0x8f   : > { %995 = vmatmul.mubr.bf16.vlgmr.msra.gmra.mrb[0].mxu0 %v595_v12 }
 0x161   : > { %v955_v16 = vpop.f32.mrb[0].mxu1 }
 0x162   : > { %v996_v17 = vpop.f32.mrb[0].mxu0  ;;  %v957_v19 = vpop.f32.mrb[1].mxu1 }
 0x163   : > { %v997_v18 = vadd.f32 %v996_v17, %v955_v16  ;;  %v998_v20 = vpop.f32.mrb[1].mxu0  ;;  %v959_v23 = vpop.f32.mrb[2].mxu1 }
 0x164   : > { %v999_v21 = vadd.f32 %v998_v20, %v957_v19  ;;  %v1000_v24 = vpop.f32.mrb[2].mxu0  ;;  %v960_v25 = vpop.f32.mrb[3].mxu1 }
 0x165   : > { %v1001_v26 = vpop.f32.mrb[3].mxu0 }
 0x166   : > { %v1005_v27 = vcombine.low %v997_v18, %v999_v21 }
 0x168   : > { %v1012_v29 = vrot.slane %v1005_v27, %v1011_v22 }
 0x16a   : > { %v1014_v30 = vadd.f32 %v1012_v29, %v506_v28 }
 0x16c   : > { %1015 = vst [vmem:[%s1647_s25] sm:$0xf] %v1014_v30 }
 0x16d PF: > { %s12_s15 = sadd.s32 1, %s1421_s15   ;;  %s1752_s9 = smov %s1401_s10 }
 0x16e   : > { %p9_p13 = scmp.ge.s32.totalorder %s12_s15, 20   ;;  %s1753_s10 = smov %s1492_s22 }
 0x16f   : > { %s1754_s11 = smov %s1413_s13  ;;  %s1755_s12 = smov %s1417_s14 }
 0x170   : > { %s1756_s13 = smov %s1759_s16  ;;  %s1757_s14 = smov %s1763_s17 }
 0x171   :  { %11 = sbr.rel (!%p9_p13) target bundleno = 4 (0x4), region = 108 }

// kernel: _lambda_.74
= control target key start
LH: loop header
LB: loop body
LE: loop exit
PB: predicated region body
PF: predicated region fallthrough
CT: control target
= control target key end

     0   :  { %s959_s9 = smov 0   ;;  %s961_s10 = smov 0   ;;  %s1138_s0 = inlined_call_operand.vmem [shape: bf16[2,256], index: 0, kind: input, shape index: {}]   ;;  %s1139_s1 = inlined_call_operand.vmem [shape: bf16[256,512], index: 1, kind: input, shape index: {}]   ;;  %s1140_s2 = inlined_call_operand.vmem [shape: f32[2,512], index: 2, kind: output, shape index: {}]  }
   0x1   :  { %s963_s11 = smov 0   ;;  %s965_s12 = smov 0  }
   0x2   :  { %s967_s13 = smov 0  }
   0x3 LB: > { %s27_s14 = sadd.s32 1, %s935_s12  ;;  %p75_p1 = scmp.ne.s32.totalorder %s927_s10, %s923_s9  ;;  %s939_s13 = sphi %s967_s13, %s12_s13   ;;  %s935_s12 = sphi %s965_s12, %s1144_s12   ;;  %s931_s11 = sphi %s963_s11, %s1143_s11   ;;  %s927_s10 = sphi %s961_s10, %s1142_s10   ;;  %s923_s9 = sphi %s959_s9, %s1141_s9  }
   0x4   : > { %p29_p0 = scmp.ge.s32.totalorder %s27_s14, 2  ;;  %p76_p2 = scmp.eq.s32.totalorder %s939_s13, 0 }
   0x5   : > { %s68_s16 = sadd.s32 1, %s927_s10  ;;  %p766_p5 = scmp.ge.s32.totalorder %s939_s13, 2 }
   0x6   : > { %s1146_s14 = smov (%p29_p0, %s27_s14), 0  ;;  %p77_p3 = por %p76_p2, %p75_p1 }
   0x7   : > { %s64_s15 = ssub.s32 %s935_s12, %s1146_s14  ;;  %141 = sbr.rel (%p766_p5) target bundleno = 34 (0x22), region = 20 }
   0x8   : > { %p66_p4 = scmp.eq.s32.totalorder %s64_s15, 0 }
   0xa   : > { %s994_s17 = scalar_select %p66_p4, %s927_s10, %s68_s16  }
   0xe   : > { %144 = sbr.rel (!%p77_p3) target bundleno = 34 (0x22), region = 24  ;;  %s146_s18 = sand.u32 (%p77_p3), 1, %s927_s10  }
   0xf   : > { %s809_s19 = sshll.u32 (%p77_p3), %s935_s12, 3  ;;  %s767_s20 = sshll.u32 (%p77_p3), %s146_s18, 8 }
  0x10   : > { %s1002_s23 = scalar_lea.vmem (%p77_p3), %s1139_s1, %s809_s19  ;;  %s1007_s24 = scalar_lea.vmem (%p77_p3), [#allocation2], %s767_s20 }
  0x11   : > { %v244_v0 = vld [vmem:[%s1002_s23] sm:$0xff] (%p77_p3)  ;;  %v246_v1 = vld [vmem:[%s1002_s23 + $0x10] sm:$0xff] (%p77_p3) }
  0x12   : > { %v248_v2 = vld [vmem:[%s1002_s23 + $0x20] sm:$0xff] (%p77_p3)  ;;  %245 = vst [vmem:[%s1007_s24] sm:$0xff] (%p77_p3), %v244_v0  ;;  %247 = vst [vmem:[%s1007_s24 + $0x8] sm:$0xff] (%p77_p3), %v246_v1  ;;  %v250_v3 = vld [vmem:[%s1002_s23 + $0x30] sm:$0xff] (%p77_p3) }
  0x13   : > { %249 = vst [vmem:[%s1007_s24 + $0x10] sm:$0xff] (%p77_p3), %v248_v2  ;;  %v252_v4 = vld [vmem:[%s1002_s23 + $0x40] sm:$0xff] (%p77_p3)  ;;  %v254_v5 = vld [vmem:[%s1002_s23 + $0x50] sm:$0xff] (%p77_p3)  ;;  %251 = vst [vmem:[%s1007_s24 + $0x18] sm:$0xff] (%p77_p3), %v250_v3 }
  0x14   : > { %253 = vst [vmem:[%s1007_s24 + $0x20] sm:$0xff] (%p77_p3), %v252_v4  ;;  %255 = vst [vmem:[%s1007_s24 + $0x28] sm:$0xff] (%p77_p3), %v254_v5  ;;  %v256_v6 = vld [vmem:[%s1002_s23 + $0x60] sm:$0xff] (%p77_p3)  ;;  %v258_v7 = vld [vmem:[%s1002_s23 + $0x70] sm:$0xff] (%p77_p3) }
  0x15   : > { %v260_v8 = vld [vmem:[%s1002_s23 + $0x80] sm:$0xff]  ;;  %257 = vst [vmem:[%s1007_s24 + $0x30] sm:$0xff] %v256_v6  ;;  %259 = vst [vmem:[%s1007_s24 + $0x38] sm:$0xff] %v258_v7  ;;  %v262_v9 = vld [vmem:[%s1002_s23 + $0x90] sm:$0xff] }
  0x16   : > { %261 = vst [vmem:[%s1007_s24 + $0x40] sm:$0xff] %v260_v8  ;;  %v264_v10 = vld [vmem:[%s1002_s23 + $0xa0] sm:$0xff]  ;;  %v266_v11 = vld [vmem:[%s1002_s23 + $0xb0] sm:$0xff]  ;;  %263 = vst [vmem:[%s1007_s24 + $0x48] sm:$0xff] %v262_v9 }
  0x17   : > { %265 = vst [vmem:[%s1007_s24 + $0x50] sm:$0xff] %v264_v10  ;;  %267 = vst [vmem:[%s1007_s24 + $0x58] sm:$0xff] %v266_v11  ;;  %v268_v12 = vld [vmem:[%s1002_s23 + $0xc0] sm:$0xff]  ;;  %v270_v13 = vld [vmem:[%s1002_s23 + $0xd0] sm:$0xff] }
  0x18   : > { %v272_v14 = vld [vmem:[%s1002_s23 + $0xe0] sm:$0xff]  ;;  %269 = vst [vmem:[%s1007_s24 + $0x60] sm:$0xff] %v268_v12  ;;  %271 = vst [vmem:[%s1007_s24 + $0x68] sm:$0xff] %v270_v13  ;;  %v274_v15 = vld [vmem:[%s1002_s23 + $0xf0] sm:$0xff] }
  0x19   : > { %273 = vst [vmem:[%s1007_s24 + $0x70] sm:$0xff] %v272_v14  ;;  %v276_v16 = vld [vmem:[%s1002_s23 + $0x100] sm:$0xff]  ;;  %v278_v17 = vld [vmem:[%s1002_s23 + $0x110] sm:$0xff]  ;;  %275 = vst [vmem:[%s1007_s24 + $0x78] sm:$0xff] %v274_v15 }
  0x1a   : > { %277 = vst [vmem:[%s1007_s24 + $0x80] sm:$0xff] %v276_v16  ;;  %279 = vst [vmem:[%s1007_s24 + $0x88] sm:$0xff] %v278_v17  ;;  %v280_v18 = vld [vmem:[%s1002_s23 + $0x120] sm:$0xff]  ;;  %v282_v19 = vld [vmem:[%s1002_s23 + $0x130] sm:$0xff] }
  0x1b   : > { %v284_v20 = vld [vmem:[%s1002_s23 + $0x140] sm:$0xff]  ;;  %281 = vst [vmem:[%s1007_s24 + $0x90] sm:$0xff] %v280_v18  ;;  %283 = vst [vmem:[%s1007_s24 + $0x98] sm:$0xff] %v282_v19  ;;  %v286_v21 = vld [vmem:[%s1002_s23 + $0x150] sm:$0xff] }
  0x1c   : > { %285 = vst [vmem:[%s1007_s24 + $0xa0] sm:$0xff] %v284_v20  ;;  %v288_v22 = vld [vmem:[%s1002_s23 + $0x160] sm:$0xff]  ;;  %v290_v23 = vld [vmem:[%s1002_s23 + $0x170] sm:$0xff]  ;;  %287 = vst [vmem:[%s1007_s24 + $0xa8] sm:$0xff] %v286_v21 }
  0x1d   : > { %289 = vst [vmem:[%s1007_s24 + $0xb0] sm:$0xff] %v288_v22  ;;  %291 = vst [vmem:[%s1007_s24 + $0xb8] sm:$0xff] %v290_v23  ;;  %v292_v24 = vld [vmem:[%s1002_s23 + $0x180] sm:$0xff]  ;;  %v294_v25 = vld [vmem:[%s1002_s23 + $0x190] sm:$0xff] }
  0x1e   : > { %v296_v26 = vld [vmem:[%s1002_s23 + $0x1a0] sm:$0xff]  ;;  %293 = vst [vmem:[%s1007_s24 + $0xc0] sm:$0xff] %v292_v24  ;;  %295 = vst [vmem:[%s1007_s24 + $0xc8] sm:$0xff] %v294_v25  ;;  %v298_v27 = vld [vmem:[%s1002_s23 + $0x1b0] sm:$0xff] }
  0x1f   : > { %297 = vst [vmem:[%s1007_s24 + $0xd0] sm:$0xff] %v296_v26  ;;  %v300_v28 = vld [vmem:[%s1002_s23 + $0x1c0] sm:$0xff]  ;;  %v302_v29 = vld [vmem:[%s1002_s23 + $0x1d0] sm:$0xff]  ;;  %299 = vst [vmem:[%s1007_s24 + $0xd8] sm:$0xff] %v298_v27 }
  0x20   : > { %301 = vst [vmem:[%s1007_s24 + $0xe0] sm:$0xff] %v300_v28  ;;  %303 = vst [vmem:[%s1007_s24 + $0xe8] sm:$0xff] %v302_v29  ;;  %v304_v30 = vld [vmem:[%s1002_s23 + $0x1e0] sm:$0xff]  ;;  %v306_v31 = vld [vmem:[%s1002_s23 + $0x1f0] sm:$0xff] }
  0x21   : > { %305 = vst [vmem:[%s1007_s24 + $0xf0] sm:$0xff] %v304_v30  ;;  %307 = vst [vmem:[%s1007_s24 + $0xf8] sm:$0xff] %v306_v31 }
  0x22 PF: > { %p770_p6 = scmp.ge.s32.totalorder %s939_s13, 1  ;;  %p312_p7 = scmp.lt.s32.totalorder %s939_s13, 3 }
  0x24   : > { %p313_p8 = pnand %p770_p6, %p312_p7 }
  0x25   : > { %s319_s25 = sand.u32 (!%p313_p8), 1, %s923_s9   ;;  %v1076_v32 = vld.sshfl [vmem:[%s1138_s0] sm:$0x11 pattern:$0x75316420] (!%p313_p8)  ;;  %v424_v33 = vlaneseq (!%p313_p8)  ;;  %s772_s30 = sshll.u32 (!%p313_p8), %s931_s11, 1 }
  0x26   : > { %316 = sbr.rel (%p313_p8) target bundleno = 325 (0x145), region = 62  ;;  %s771_s28 = sshll.u32 (!%p313_p8), %s319_s25, 8  ;;  %v941_v34 = vmov (!%p313_p8), 1966171168   ;;  %v420_v39 = vcombine.high (!%p313_p8), %v1076_v32, %v1076_v32  ;;  %v942_v10 = vmov (!%p313_p8), 0.0  }
  0x27   : > { %v422_v35 = vunpack.c.l.s4 (!%p313_p8), %v941_v34  ;;  %v1078_v36 = vshrl.u32 (!%p313_p8), %v424_v33, 7  ;;  %s1080_s29 = scalar_lea.vmem (!%p313_p8), [#allocation2], %s771_s28  ;;  %p366_p9 = scmp.lt.s32.totalorder (!%p313_p8), %s772_s30, 3  ;;  %v943_v11 = vmov (!%p313_p8), 1983009808  }
  0x28   : > { %v853_v37 = vld [vmem:[%s1080_s29 + $0x4] ss:$8 sps:$4 sm:$0xff] (!%p313_p8)   ;;  %v855_v38 = vld [vmem:[%s1080_s29] ss:$8 sps:$4 sm:$0xff] (!%p313_p8)   ;;  %v856_v41 = vld [vmem:[%s1080_s29 + $0x14] ss:$8 sps:$4 sm:$0xff] (!%p313_p8)   ;;  %v642_v12 = vunpack.c.l.s4 (!%p313_p8), %v943_v11 }
  0x29   : > { %v423_v40 = vunpack.c.0.s8 (!%p313_p8), %v422_v35  ;;  %597 = vmatprep.subr.bf16.mxu0 (!%p313_p8), %v853_v37  ;;  %v858_v42 = vld [vmem:[%s1080_s29 + $0x10] ss:$8 sps:$4 sm:$0xff] (!%p313_p8)   ;;  %v859_v44 = vld [vmem:[%s1080_s29 + $0x24] ss:$8 sps:$4 sm:$0xff] (!%p313_p8)   ;;  %v861_v46 = vld [vmem:[%s1080_s29 + $0x20] ss:$8 sps:$4 sm:$0xff] (!%p313_p8)  }
  0x2a   : > { %598 = vmatpush1.bf16.msra.mxu0 (!%p313_p8), %v855_v38  ;;  %v862_v47 = vld [vmem:[%s1080_s29 + $0x34] ss:$8 sps:$4 sm:$0xff] (!%p313_p8)   ;;  %v864_v48 = vld [vmem:[%s1080_s29 + $0x30] ss:$8 sps:$4 sm:$0xff] (!%p313_p8)   ;;  %v865_v49 = vld [vmem:[%s1080_s29 + $0x44] ss:$8 sps:$4 sm:$0xff] (!%p313_p8)   ;;  %v643_v13 = vunpack.c.0.s8 (!%p313_p8), %v642_v12 }
  0x2b   : > { %v426_v43 = vsub.s32 (!%p313_p8), %v423_v40, %v1078_v36  ;;  %599 = vmatprep.subr.bf16.mxu0 (!%p313_p8), %v856_v41  ;;  %v867_v50 = vld [vmem:[%s1080_s29 + $0x40] ss:$8 sps:$4 sm:$0xff] (!%p313_p8)   ;;  %v868_v51 = vld [vmem:[%s1080_s29 + $0x54] ss:$8 sps:$4 sm:$0xff] (!%p313_p8)   ;;  %v870_v52 = vld [vmem:[%s1080_s29 + $0x50] ss:$8 sps:$4 sm:$0xff] (!%p313_p8)  }
  0x2c   : > { %v871_v53 = vld [vmem:[%s1080_s29 + $0x64] ss:$8 sps:$4 sm:$0xff] (!%p313_p8)   ;;  %v873_v54 = vld [vmem:[%s1080_s29 + $0x60] ss:$8 sps:$4 sm:$0xff] (!%p313_p8)   ;;  %v874_v55 = vld [vmem:[%s1080_s29 + $0x74] ss:$8 sps:$4 sm:$0xff] (!%p313_p8)   ;;  %v646_v15 = vsub.s32 (!%p313_p8), %v643_v13, %v1078_v36 }
  0x2d   : > { %v434_v45 = vrot.slane %v420_v39, %v426_v43  ;;  %v876_v56 = vld [vmem:[%s1080_s29 + $0x70] ss:$8 sps:$4 sm:$0xff]   ;;  %v877_v57 = vld [vmem:[%s1080_s29 + $0x84] ss:$8 sps:$4 sm:$0xff]   ;;  %v879_v58 = vld [vmem:[%s1080_s29 + $0x80] ss:$8 sps:$4 sm:$0xff]   ;;  %v427_v9 = vrot.slane %v1076_v32, %v426_v43 }
  0x2e   : > { %600 = vmatpush1.bf16.msra.mxu0 %v858_v42  ;;  %v880_v59 = vld [vmem:[%s1080_s29 + $0x94] ss:$8 sps:$4 sm:$0xff]   ;;  %v882_v60 = vld [vmem:[%s1080_s29 + $0x90] ss:$8 sps:$4 sm:$0xff]   ;;  %v883_v61 = vld [vmem:[%s1080_s29 + $0xa4] ss:$8 sps:$4 sm:$0xff]  }
  0x2f   : > { %629 = vmatprep.mubr.bf16.mxu0 %v434_v45  ;;  %601 = vmatprep.subr.bf16.mxu0 %v859_v44  ;;  %v885_v62 = vld [vmem:[%s1080_s29 + $0xa0] ss:$8 sps:$4 sm:$0xff]   ;;  %v886_v63 = vld [vmem:[%s1080_s29 + $0xb4] ss:$8 sps:$4 sm:$0xff]   ;;  %v888_v0 = vld [vmem:[%s1080_s29 + $0xb0] ss:$8 sps:$4 sm:$0xff]  }
  0x30   : > { %v889_v1 = vld [vmem:[%s1080_s29 + $0xc4] ss:$8 sps:$4 sm:$0xff]   ;;  %v891_v2 = vld [vmem:[%s1080_s29 + $0xc0] ss:$8 sps:$4 sm:$0xff]   ;;  %v892_v3 = vld [vmem:[%s1080_s29 + $0xd4] ss:$8 sps:$4 sm:$0xff]  }
  0x31   : > { %v894_v4 = vld [vmem:[%s1080_s29 + $0xd0] ss:$8 sps:$4 sm:$0xff]   ;;  %v895_v5 = vld [vmem:[%s1080_s29 + $0xe4] ss:$8 sps:$4 sm:$0xff]   ;;  %v897_v6 = vld [vmem:[%s1080_s29 + $0xe0] ss:$8 sps:$4 sm:$0xff]  }
  0x32   : > { %602 = vmatpush1.bf16.msra.mxu0 %v861_v46  ;;  %v898_v7 = vld [vmem:[%s1080_s29 + $0xf4] ss:$8 sps:$4 sm:$0xff]   ;;  %v900_v8 = vld [vmem:[%s1080_s29 + $0xf0] ss:$8 sps:$4 sm:$0xff]   ;;  %s1148_s30 = smov (!%p366_p9, %s772_s30), 3 }
  0x33   : > { %603 = vmatprep.subr.bf16.mxu0 %v862_v47  ;;  %s773_s3 = sshll.u32 %s1148_s30, 1 }
  0x34   : > { %s371_s6 = scalar_lea.vmem %s1140_s2, %s773_s3 }
  0x35   : > { %377 = vst [vmem:[%s371_s6] sm:$0xf] %v942_v10 }
  0x36   : > { %604 = vmatpush1.bf16.msra.mxu0 %v864_v48 }
  0x37   : > { %605 = vmatprep.subr.bf16.mxu0 %v865_v49 }
  0x3a   : > { %606 = vmatpush1.bf16.msra.mxu0 %v867_v50 }
  0x3b   : > { %607 = vmatprep.subr.bf16.mxu0 %v868_v51 }
  0x3c   : > { %v378_v19 = vld [vmem:[%s371_s6] sm:$0xf] }
  0x3e   : > { %608 = vmatpush1.bf16.msra.mxu0 %v870_v52 }
  0x3f   : > { %609 = vmatprep.subr.bf16.mxu0 %v871_v53 }
  0x42   : > { %610 = vmatpush1.bf16.msra.mxu0 %v873_v54 }
  0x43   : > { %611 = vmatprep.subr.bf16.mxu0 %v874_v55 }
  0x46   : > { %612 = vmatpush1.bf16.msra.mxu0 %v876_v56 }
  0x47   : > { %613 = vmatprep.subr.bf16.mxu0 %v877_v57 }
  0x4a   : > { %614 = vmatpush1.bf16.msra.mxu0 %v879_v58 }
  0x4b   : > { %615 = vmatprep.subr.bf16.mxu0 %v880_v59 }
  0x4e   : > { %616 = vmatpush1.bf16.msra.mxu0 %v882_v60 }
  0x4f   : > { %617 = vmatprep.subr.bf16.mxu0 %v883_v61 }
  0x52   : > { %618 = vmatpush1.bf16.msra.mxu0 %v885_v62 }
  0x53   : > { %619 = vmatprep.subr.bf16.mxu0 %v886_v63 }
  0x56   : > { %620 = vmatpush1.bf16.msra.mxu0 %v888_v0 }
  0x57   : > { %621 = vmatprep.subr.bf16.mxu0 %v889_v1 }
  0x5a   : > { %622 = vmatpush1.bf16.msra.mxu0 %v891_v2 }
  0x5b   : > { %623 = vmatprep.subr.bf16.mxu0 %v892_v3 }
  0x5e   : > { %624 = vmatpush1.bf16.msra.mxu0 %v894_v4 }
  0x5f   : > { %625 = vmatprep.subr.bf16.mxu0 %v895_v5 }
  0x62   : > { %626 = vmatpush1.bf16.msra.mxu0 %v897_v6 }
  0x63   : > { %627 = vmatprep.subr.bf16.mxu0 %v898_v7 }
  0x66   : > { %628 = vmatpush1.bf16.msra.mxu0 %v900_v8 }
  0x69   : > { %630 = vmatmul.mubr.bf16.vlgmr.msra.gmra.mrb[0].mxu0 %v427_v9 }
 0x13c   : > { %v631_v14 = vpop.f32.mrb[0].mxu0 }
 0x13d   : > { %v633_v16 = vpop.f32.mrb[1].mxu0 }
 0x13e   : > { %v640_v17 = vcombine.low %v631_v14, %v633_v16  ;;  %v635_v18 = vpop.f32.mrb[2].mxu0 }
 0x13f   : > { %v636_v20 = vpop.f32.mrb[3].mxu0 }
 0x140   : > { %v647_v21 = vrot.slane %v640_v17, %v646_v15 }
 0x142   : > { %v649_v22 = vadd.f32 %v647_v21, %v378_v19 }
 0x144   : > { %650 = vst [vmem:[%s371_s6] sm:$0xf] %v649_v22 }
 0x145 PF: > { %s12_s13 = sadd.s32 1, %s939_s13   ;;  %s1141_s9 = smov %s927_s10 }
 0x146   : > { %p9_p10 = scmp.ge.s32.totalorder %s12_s13, 4   ;;  %s1142_s10 = smov %s994_s17 }
 0x147   : > { %s1143_s11 = smov %s935_s12  ;;  %s1144_s12 = smov %s1146_s14 }
 0x148   :  { %11 = sbr.rel (!%p9_p10) target bundleno = 3 (0x3), region = 108 }

// kernel: _lambda_.76
= control target key start
LH: loop header
LB: loop body
LE: loop exit
PB: predicated region body
PF: predicated region fallthrough
CT: control target
= control target key end

     0   :  { %v23_v0 = vlaneseq  ;;  %v305_v2 = vmov 1983009808   ;;  %vm40_vm0 = vcmask 1041408   ;;  %s381_s0 = inlined_call_operand.vmem [shape: f32[2,512], index: 0, kind: input, shape index: {}]   ;;  %s382_s2 = inlined_call_operand.vmem [shape: f32[1,512], index: 2, kind: input, shape index: {}]   ;;  %s383_s3 = inlined_call_operand.vmem [shape: f32[1,512], index: 3, kind: input, shape index: {}]   ;;  %s384_s1 = inlined_call_operand.vmem [shape: f32[2,512], index: 1, kind: input, shape index: {}]   ;;  %s385_s4 = inlined_call_operand.vmem [shape: f32[2,512], index: 4, kind: output, shape index: {}]  }
   0x1   :  { %v335_v1 = vld [vmem:[%s381_s0] sm:$0xff]  ;;  %v21_v3 = vunpack.c.l.s4 %v305_v2 }
   0x2   :  { %v337_v4 = vshrl.u32 %v23_v0, 7  ;;  %v69_v5 = vmul.f32 %v335_v1, %v335_v1  ;;  %v19_v6 = vcombine.high %v335_v1, %v335_v1 }
   0x3   :  { %v22_v7 = vunpack.c.0.s8 %v21_v3 }
   0x4   :  { %v71_v8 = vcombine.high %v69_v5, %v69_v5 }
   0x5   :  { %v344_v9 = vsub.s32 %v22_v7, %v337_v4 }
   0x7   :  { %v26_v10 = vrot.slane %v335_v1, %v344_v9  ;;  %v33_v11 = vrot.slane %v19_v6, %v344_v9  ;;  %v78_v12 = vrot.slane %v69_v5, %v344_v9  ;;  %v85_v13 = vrot.slane %v71_v8, %v344_v9 }
   0x9   :  { %v34_v14 = vcombine.high %v26_v10, %v26_v10  ;;  %v35_v15 = vcombine.high %v33_v11, %v33_v11  ;;  %v41_v16 = vsel %vm40_vm0, %v26_v10, 0.0  ;;  %v55_v17 = vsel %vm40_vm0, %v33_v11, 0.0 }
   0xa   :  { %v42_v18 = vrot.slane %v41_v16, 4  ;;  %v56_v19 = vrot.slane %v55_v17, 4  ;;  %v86_v20 = vcombine.high %v78_v12, %v78_v12  ;;  %v87_v21 = vcombine.high %v85_v13, %v85_v13 }
   0xb   :  { %v48_v22 = vsel %vm40_vm0, %v34_v14, 0.0  ;;  %v62_v23 = vsel %vm40_vm0, %v35_v15, 0.0  ;;  %v92_v24 = vsel %vm40_vm0, %v78_v12, 0.0  ;;  %v106_v25 = vsel %vm40_vm0, %v85_v13, 0.0 }
   0xc   :  { %v43_v26 = vadd.f32 %v42_v18, %v41_v16  ;;  %v49_v27 = vrot.slane %v48_v22, 4  ;;  %v57_v28 = vadd.f32 %v56_v19, %v55_v17  ;;  %v63_v29 = vrot.slane %v62_v23, 4 }
   0xd   :  { %v93_v30 = vrot.slane %v92_v24, 4  ;;  %v99_v31 = vsel %vm40_vm0, %v86_v20, 0.0  ;;  %v107_v32 = vrot.slane %v106_v25, 4  ;;  %v113_v33 = vsel %vm40_vm0, %v87_v21, 0.0 }
   0xe   :  { %v44_v34 = vrot.slane %v43_v26, 2  ;;  %v50_v35 = vadd.f32 %v49_v27, %v48_v22  ;;  %v58_v36 = vrot.slane %v57_v28, 2  ;;  %v64_v37 = vadd.f32 %v63_v29, %v62_v23 }
   0xf   :  { %v94_v38 = vadd.f32 %v93_v30, %v92_v24  ;;  %v100_v39 = vrot.slane %v99_v31, 4  ;;  %v108_v40 = vadd.f32 %v107_v32, %v106_v25  ;;  %v114_v41 = vrot.slane %v113_v33, 4 }
  0x10   :  { %v45_v42 = vadd.f32 %v44_v34, %v43_v26  ;;  %v51_v43 = vrot.slane %v50_v35, 2  ;;  %v59_v44 = vadd.f32 %v58_v36, %v57_v28  ;;  %v65_v45 = vrot.slane %v64_v37, 2 }
  0x11   :  { %v95_v46 = vrot.slane %v94_v38, 2  ;;  %v101_v47 = vadd.f32 %v100_v39, %v99_v31  ;;  %v109_v48 = vrot.slane %v108_v40, 2  ;;  %v115_v49 = vadd.f32 %v114_v41, %v113_v33 }
  0x12   :  { %v46_v50 = vrot.slane %v45_v42, 1  ;;  %v52_v51 = vadd.f32 %v51_v43, %v50_v35  ;;  %v60_v52 = vrot.slane %v59_v44, 1  ;;  %v66_v53 = vadd.f32 %v65_v45, %v64_v37 }
  0x13   :  { %v96_v54 = vadd.f32 %v95_v46, %v94_v38  ;;  %v102_v55 = vrot.slane %v101_v47, 2  ;;  %v110_v56 = vadd.f32 %v109_v48, %v108_v40  ;;  %v116_v57 = vrot.slane %v115_v49, 2  ;;  %v136_v46 = vld [vmem:[%s382_s2] sm:$0xf] }
  0x14   :  { %v47_v58 = vadd.f32 %v46_v50, %v45_v42  ;;  %v53_v59 = vrot.slane %v52_v51, 1  ;;  %v61_v60 = vadd.f32 %v60_v52, %v59_v44  ;;  %v67_v61 = vrot.slane %v66_v53, 1 }
  0x15   :  { %v97_v62 = vrot.slane %v96_v54, 1  ;;  %v103_v63 = vadd.f32 %v102_v55, %v101_v47  ;;  %v111_v0 = vrot.slane %v110_v56, 1  ;;  %v117_v2 = vadd.f32 %v116_v57, %v115_v49 }
  0x16   :  { %v54_v3 = vadd.f32 %v53_v59, %v52_v51  ;;  %v68_v5 = vadd.f32 %v67_v61, %v66_v53  ;;  %v120_v6 = vmul.f32 0.5, %v47_v58  ;;  %v122_v7 = vmul.f32 0.5, %v61_v60 }
  0x17   :  { %v98_v8 = vadd.f32 %v97_v62, %v96_v54  ;;  %v104_v10 = vrot.slane %v103_v63, 1  ;;  %v112_v11 = vadd.f32 %v111_v0, %v110_v56  ;;  %v118_v12 = vrot.slane %v117_v2, 1 }
  0x18   :  { %v121_v13 = vmul.f32 0.5, %v54_v3  ;;  %v123_v14 = vmul.f32 0.5, %v68_v5  ;;  %v128_v15 = vmul.f32 %v120_v6, %v120_v6  ;;  %v130_v16 = vmul.f32 %v122_v7, %v122_v7 }
  0x19   :  { %v105_v17 = vadd.f32 %v104_v10, %v103_v63  ;;  %v119_v18 = vadd.f32 %v118_v12, %v117_v2  ;;  %v124_v19 = vmul.f32 0.5, %v98_v8  ;;  %v126_v20 = vmul.f32 0.5, %v112_v11 }
  0x1a   :  { %v129_v21 = vmul.f32 %v121_v13, %v121_v13  ;;  %v131_v22 = vmul.f32 %v123_v14, %v123_v14  ;;  %v306_v33 = vmov 1966171168   ;;  %v179_v47 = vsub.s32 0, %v337_v4 }
  0x1b   :  { %v125_v23 = vmul.f32 0.5, %v105_v17  ;;  %v127_v24 = vmul.f32 0.5, %v119_v18  ;;  %v132_v25 = vsub.f32 %v124_v19, %v128_v15  ;;  %v134_v26 = vsub.f32 %v126_v20, %v130_v16 }
  0x1c   :  { %v152_v34 = vunpack.c.l.s4 %v306_v33  ;;  %v183_v49 = vsub.s32 1, %v337_v4  ;;  %v187_v50 = vsub.s32 2, %v337_v4  ;;  %v191_v51 = vsub.s32 3, %v337_v4 }
  0x1d   :  { %v133_v27 = vsub.f32 %v125_v23, %v129_v21  ;;  %v135_v28 = vsub.f32 %v127_v24, %v131_v22  ;;  %v137_v29 = vadd.f32 1e-05, %v132_v25  ;;  %v139_v30 = vadd.f32 1e-05, %v134_v26  ;;  %v286_v22 = vld [vmem:[%s384_s1] sm:$0xff] }
  0x1e   :  { %v153_v35 = vunpack.c.0.s8 %v152_v34 }
  0x1f   :  { %v138_v31 = vadd.f32 1e-05, %v133_v27  ;;  %v140_v32 = vadd.f32 1e-05, %v135_v28  ;;  %297 = vrsqrt.f32 %v137_v29 }
  0x20   :  { %299 = vrsqrt.f32 %v139_v30  ;;  %v156_v38 = vsub.s32 %v153_v35, %v337_v4  ;;  %v175_v4 = vld [vmem:[%s383_s3] sm:$0xf] }
  0x21   :  { %301 = vrsqrt.f32 %v138_v31 }
  0x22   :  { %303 = vrsqrt.f32 %v140_v32 }
  0x29   :  { %v298_v36 = vpop.eup %297 }
  0x2a   :  { %v300_v37 = vpop.eup %299 }
  0x2b   :  { %v302_v39 = vpop.eup %301 }
  0x2c   :  { %v304_v40 = vpop.eup %303  ;;  %v149_v41 = vcombine.low %v298_v36, %v302_v39 }
  0x2d   :  { %v150_v42 = vcombine.low %v300_v37, %v304_v40 }
  0x2e   :  { %v157_v43 = vrot.slane %v149_v41, %v156_v38 }
  0x2f   :  { %v164_v44 = vrot.slane %v150_v42, %v156_v38 }
  0x31   :  { %v165_v45 = vcombine.low %v157_v43, %v164_v44 }
  0x33   :  { %v172_v48 = vrot.slane %v165_v45, %v156_v38 }
  0x35   :  { %v174_v52 = vmul.f32 %v172_v48, %v136_v46 }
  0x37   :  { %v180_v53 = vrot.slane %v174_v52, %v179_v47  ;;  %v184_v54 = vrot.slane %v174_v52, %v183_v49  ;;  %v188_v55 = vrot.slane %v174_v52, %v187_v50  ;;  %v192_v56 = vrot.slane %v174_v52, %v191_v51 }
  0x39   :  { %v197_v57 = vmul.f32 %v180_v53, %v120_v6  ;;  %v198_v58 = vmul.f32 %v184_v54, %v121_v13  ;;  %v199_v59 = vmul.f32 %v188_v55, %v122_v7  ;;  %v200_v60 = vmul.f32 %v192_v56, %v123_v14 }
  0x3a   :  { %v231_v63 = vcombine.low %v180_v53, %v184_v54  ;;  %v232_v0 = vcombine.low %v188_v55, %v192_v56 }
  0x3b   :  { %v205_v61 = vcombine.low %v197_v57, %v198_v58  ;;  %v206_v62 = vcombine.low %v199_v59, %v200_v60 }
  0x3c   :  { %v239_v8 = vrot.slane %v231_v63, %v344_v9  ;;  %v246_v10 = vrot.slane %v232_v0, %v344_v9 }
  0x3d   :  { %v213_v2 = vrot.slane %v205_v61, %v156_v38  ;;  %v220_v3 = vrot.slane %v206_v62, %v156_v38 }
  0x3e   :  { %v247_v12 = vcombine.low %v239_v8, %v246_v10 }
  0x3f   :  { %v221_v5 = vcombine.low %v213_v2, %v220_v3 }
  0x40   :  { %v249_v18 = vmul.f32 %v247_v12, %v335_v1 }
  0x41   :  { %v228_v11 = vrot.slane %v221_v5, %v156_v38 }
  0x43   :  { %v230_v6 = vsub.f32 %v175_v4, %v228_v11 }
  0x45   :  { %v254_v7 = vrot.slane %v230_v6, %v179_v47  ;;  %v258_v13 = vrot.slane %v230_v6, %v183_v49  ;;  %v262_v14 = vrot.slane %v230_v6, %v187_v50  ;;  %v266_v15 = vrot.slane %v230_v6, %v191_v51 }
  0x47   :  { %v267_v16 = vcombine.low %v254_v7, %v258_v13  ;;  %v268_v17 = vcombine.low %v262_v14, %v266_v15 }
  0x49   :  { %v275_v19 = vrot.slane %v267_v16, %v344_v9  ;;  %v282_v20 = vrot.slane %v268_v17, %v344_v9 }
  0x4b   :  { %v283_v21 = vcombine.low %v275_v19, %v282_v20 }
  0x4d   :  { %v285_v23 = vadd.f32 %v283_v21, %v249_v18 }
  0x4f   :  { %v287_v24 = vadd.f32 %v286_v22, %v285_v23 }
  0x51   :  { %v288_v25 = vmax.f32 %v287_v24, 0.0 }
  0x53   :  { %289 = vst [vmem:[%s385_s4] sm:$0xff] %v288_v25 }

// kernel: _lambda_.75
= control target key start
LH: loop header
LB: loop body
LE: loop exit
PB: predicated region body
PF: predicated region fallthrough
CT: control target
= control target key end

     0   :  { %v20_v0 = vlaneseq  ;;  %v299_v2 = vmov 1983009808   ;;  %vm37_vm0 = vcmask 1041408   ;;  %s367_s0 = inlined_call_operand.vmem [shape: f32[2,512], index: 0, kind: input, shape index: {}]   ;;  %s368_s1 = inlined_call_operand.vmem [shape: f32[1,512], index: 1, kind: input, shape index: {}]   ;;  %s369_s2 = inlined_call_operand.vmem [shape: f32[1,512], index: 2, kind: input, shape index: {}]   ;;  %s370_s3 = inlined_call_operand.vmem [shape: f32[2,512], index: 3, kind: output, shape index: {}]  }
   0x1   :  { %v324_v1 = vld [vmem:[%s367_s0] sm:$0xff]  ;;  %v18_v3 = vunpack.c.l.s4 %v299_v2 }
   0x2   :  { %v326_v4 = vshrl.u32 %v20_v0, 7  ;;  %v66_v5 = vmul.f32 %v324_v1, %v324_v1  ;;  %v16_v6 = vcombine.high %v324_v1, %v324_v1 }
   0x3   :  { %v19_v7 = vunpack.c.0.s8 %v18_v3 }
   0x4   :  { %v68_v8 = vcombine.high %v66_v5, %v66_v5 }
   0x5   :  { %v333_v9 = vsub.s32 %v19_v7, %v326_v4 }
   0x7   :  { %v23_v10 = vrot.slane %v324_v1, %v333_v9  ;;  %v30_v11 = vrot.slane %v16_v6, %v333_v9  ;;  %v75_v12 = vrot.slane %v66_v5, %v333_v9  ;;  %v82_v13 = vrot.slane %v68_v8, %v333_v9 }
   0x9   :  { %v31_v14 = vcombine.high %v23_v10, %v23_v10  ;;  %v32_v15 = vcombine.high %v30_v11, %v30_v11  ;;  %v38_v16 = vsel %vm37_vm0, %v23_v10, 0.0  ;;  %v52_v17 = vsel %vm37_vm0, %v30_v11, 0.0 }
   0xa   :  { %v39_v18 = vrot.slane %v38_v16, 4  ;;  %v53_v19 = vrot.slane %v52_v17, 4  ;;  %v83_v20 = vcombine.high %v75_v12, %v75_v12  ;;  %v84_v21 = vcombine.high %v82_v13, %v82_v13 }
   0xb   :  { %v45_v22 = vsel %vm37_vm0, %v31_v14, 0.0  ;;  %v59_v23 = vsel %vm37_vm0, %v32_v15, 0.0  ;;  %v89_v24 = vsel %vm37_vm0, %v75_v12, 0.0  ;;  %v103_v25 = vsel %vm37_vm0, %v82_v13, 0.0 }
   0xc   :  { %v40_v26 = vadd.f32 %v39_v18, %v38_v16  ;;  %v46_v27 = vrot.slane %v45_v22, 4  ;;  %v54_v28 = vadd.f32 %v53_v19, %v52_v17  ;;  %v60_v29 = vrot.slane %v59_v23, 4 }
   0xd   :  { %v90_v30 = vrot.slane %v89_v24, 4  ;;  %v96_v31 = vsel %vm37_vm0, %v83_v20, 0.0  ;;  %v104_v32 = vrot.slane %v103_v25, 4  ;;  %v110_v33 = vsel %vm37_vm0, %v84_v21, 0.0 }
   0xe   :  { %v41_v34 = vrot.slane %v40_v26, 2  ;;  %v47_v35 = vadd.f32 %v46_v27, %v45_v22  ;;  %v55_v36 = vrot.slane %v54_v28, 2  ;;  %v61_v37 = vadd.f32 %v60_v29, %v59_v23 }
   0xf   :  { %v91_v38 = vadd.f32 %v90_v30, %v89_v24  ;;  %v97_v39 = vrot.slane %v96_v31, 4  ;;  %v105_v40 = vadd.f32 %v104_v32, %v103_v25  ;;  %v111_v41 = vrot.slane %v110_v33, 4 }
  0x10   :  { %v42_v42 = vadd.f32 %v41_v34, %v40_v26  ;;  %v48_v43 = vrot.slane %v47_v35, 2  ;;  %v56_v44 = vadd.f32 %v55_v36, %v54_v28  ;;  %v62_v45 = vrot.slane %v61_v37, 2 }
  0x11   :  { %v92_v46 = vrot.slane %v91_v38, 2  ;;  %v98_v47 = vadd.f32 %v97_v39, %v96_v31  ;;  %v106_v48 = vrot.slane %v105_v40, 2  ;;  %v112_v49 = vadd.f32 %v111_v41, %v110_v33 }
  0x12   :  { %v43_v50 = vrot.slane %v42_v42, 1  ;;  %v49_v51 = vadd.f32 %v48_v43, %v47_v35  ;;  %v57_v52 = vrot.slane %v56_v44, 1  ;;  %v63_v53 = vadd.f32 %v62_v45, %v61_v37 }
  0x13   :  { %v93_v54 = vadd.f32 %v92_v46, %v91_v38  ;;  %v99_v55 = vrot.slane %v98_v47, 2  ;;  %v107_v56 = vadd.f32 %v106_v48, %v105_v40  ;;  %v113_v57 = vrot.slane %v112_v49, 2  ;;  %v133_v46 = vld [vmem:[%s368_s1] sm:$0xf] }
  0x14   :  { %v44_v58 = vadd.f32 %v43_v50, %v42_v42  ;;  %v50_v59 = vrot.slane %v49_v51, 1  ;;  %v58_v60 = vadd.f32 %v57_v52, %v56_v44  ;;  %v64_v61 = vrot.slane %v63_v53, 1 }
  0x15   :  { %v94_v62 = vrot.slane %v93_v54, 1  ;;  %v100_v63 = vadd.f32 %v99_v55, %v98_v47  ;;  %v108_v0 = vrot.slane %v107_v56, 1  ;;  %v114_v2 = vadd.f32 %v113_v57, %v112_v49 }
  0x16   :  { %v51_v3 = vadd.f32 %v50_v59, %v49_v51  ;;  %v65_v5 = vadd.f32 %v64_v61, %v63_v53  ;;  %v117_v6 = vmul.f32 0.5, %v44_v58  ;;  %v119_v7 = vmul.f32 0.5, %v58_v60 }
  0x17   :  { %v95_v8 = vadd.f32 %v94_v62, %v93_v54  ;;  %v101_v10 = vrot.slane %v100_v63, 1  ;;  %v109_v11 = vadd.f32 %v108_v0, %v107_v56  ;;  %v115_v12 = vrot.slane %v114_v2, 1 }
  0x18   :  { %v118_v13 = vmul.f32 0.5, %v51_v3  ;;  %v120_v14 = vmul.f32 0.5, %v65_v5  ;;  %v125_v15 = vmul.f32 %v117_v6, %v117_v6  ;;  %v127_v16 = vmul.f32 %v119_v7, %v119_v7 }
  0x19   :  { %v102_v17 = vadd.f32 %v101_v10, %v100_v63  ;;  %v116_v18 = vadd.f32 %v115_v12, %v114_v2  ;;  %v121_v19 = vmul.f32 0.5, %v95_v8  ;;  %v123_v20 = vmul.f32 0.5, %v109_v11 }
  0x1a   :  { %v126_v21 = vmul.f32 %v118_v13, %v118_v13  ;;  %v128_v22 = vmul.f32 %v120_v14, %v120_v14  ;;  %v300_v33 = vmov 1966171168   ;;  %v176_v47 = vsub.s32 0, %v326_v4 }
  0x1b   :  { %v122_v23 = vmul.f32 0.5, %v102_v17  ;;  %v124_v24 = vmul.f32 0.5, %v116_v18  ;;  %v129_v25 = vsub.f32 %v121_v19, %v125_v15  ;;  %v131_v26 = vsub.f32 %v123_v20, %v127_v16 }
  0x1c   :  { %v149_v34 = vunpack.c.l.s4 %v300_v33  ;;  %v180_v49 = vsub.s32 1, %v326_v4  ;;  %v184_v50 = vsub.s32 2, %v326_v4  ;;  %v188_v51 = vsub.s32 3, %v326_v4 }
  0x1d   :  { %v130_v27 = vsub.f32 %v122_v23, %v126_v21  ;;  %v132_v28 = vsub.f32 %v124_v24, %v128_v22  ;;  %v134_v29 = vadd.f32 1e-05, %v129_v25  ;;  %v136_v30 = vadd.f32 1e-05, %v131_v26 }
  0x1e   :  { %v150_v35 = vunpack.c.0.s8 %v149_v34 }
  0x1f   :  { %v135_v31 = vadd.f32 1e-05, %v130_v27  ;;  %v137_v32 = vadd.f32 1e-05, %v132_v28  ;;  %291 = vrsqrt.f32 %v134_v29 }
  0x20   :  { %293 = vrsqrt.f32 %v136_v30  ;;  %v153_v38 = vsub.s32 %v150_v35, %v326_v4  ;;  %v172_v4 = vld [vmem:[%s369_s2] sm:$0xf] }
  0x21   :  { %295 = vrsqrt.f32 %v135_v31 }
  0x22   :  { %297 = vrsqrt.f32 %v137_v32 }
  0x29   :  { %v292_v36 = vpop.eup %291 }
  0x2a   :  { %v294_v37 = vpop.eup %293 }
  0x2b   :  { %v296_v39 = vpop.eup %295 }
  0x2c   :  { %v298_v40 = vpop.eup %297  ;;  %v146_v41 = vcombine.low %v292_v36, %v296_v39 }
  0x2d   :  { %v147_v42 = vcombine.low %v294_v37, %v298_v40 }
  0x2e   :  { %v154_v43 = vrot.slane %v146_v41, %v153_v38 }
  0x2f   :  { %v161_v44 = vrot.slane %v147_v42, %v153_v38 }
  0x31   :  { %v162_v45 = vcombine.low %v154_v43, %v161_v44 }
  0x33   :  { %v169_v48 = vrot.slane %v162_v45, %v153_v38 }
  0x35   :  { %v171_v52 = vmul.f32 %v169_v48, %v133_v46 }
  0x37   :  { %v177_v53 = vrot.slane %v171_v52, %v176_v47  ;;  %v181_v54 = vrot.slane %v171_v52, %v180_v49  ;;  %v185_v55 = vrot.slane %v171_v52, %v184_v50  ;;  %v189_v56 = vrot.slane %v171_v52, %v188_v51 }
  0x39   :  { %v194_v57 = vmul.f32 %v177_v53, %v117_v6  ;;  %v195_v58 = vmul.f32 %v181_v54, %v118_v13  ;;  %v196_v59 = vmul.f32 %v185_v55, %v119_v7  ;;  %v197_v60 = vmul.f32 %v189_v56, %v120_v14 }
  0x3a   :  { %v228_v63 = vcombine.low %v177_v53, %v181_v54  ;;  %v229_v0 = vcombine.low %v185_v55, %v189_v56 }
  0x3b   :  { %v202_v61 = vcombine.low %v194_v57, %v195_v58  ;;  %v203_v62 = vcombine.low %v196_v59, %v197_v60 }
  0x3c   :  { %v236_v8 = vrot.slane %v228_v63, %v333_v9  ;;  %v243_v10 = vrot.slane %v229_v0, %v333_v9 }
  0x3d   :  { %v210_v2 = vrot.slane %v202_v61, %v153_v38  ;;  %v217_v3 = vrot.slane %v203_v62, %v153_v38 }
  0x3e   :  { %v244_v12 = vcombine.low %v236_v8, %v243_v10 }
  0x3f   :  { %v218_v5 = vcombine.low %v210_v2, %v217_v3 }
  0x40   :  { %v246_v18 = vmul.f32 %v244_v12, %v324_v1 }
  0x41   :  { %v225_v11 = vrot.slane %v218_v5, %v153_v38 }
  0x43   :  { %v227_v6 = vsub.f32 %v172_v4, %v225_v11 }
  0x45   :  { %v251_v7 = vrot.slane %v227_v6, %v176_v47  ;;  %v255_v13 = vrot.slane %v227_v6, %v180_v49  ;;  %v259_v14 = vrot.slane %v227_v6, %v184_v50  ;;  %v263_v15 = vrot.slane %v227_v6, %v188_v51 }
  0x47   :  { %v264_v16 = vcombine.low %v251_v7, %v255_v13  ;;  %v265_v17 = vcombine.low %v259_v14, %v263_v15 }
  0x49   :  { %v272_v19 = vrot.slane %v264_v16, %v333_v9  ;;  %v279_v20 = vrot.slane %v265_v17, %v333_v9 }
  0x4b   :  { %v280_v21 = vcombine.low %v272_v19, %v279_v20 }
  0x4d   :  { %v282_v22 = vadd.f32 %v280_v21, %v246_v18 }
  0x4f   :  { %283 = vst [vmem:[%s370_s3] sm:$0xff] %v282_v22 }

// kernel: _lambda_.81
= control target key start
LH: loop header
LB: loop body
LE: loop exit
PB: predicated region body
PF: predicated region fallthrough
CT: control target
= control target key end

     0   :  { %vm17_vm0 = vcmask 74752   ;;  %v621_v3 = vmov 0.0   ;;  %v91_v31 = vlaneseq  ;;  %v622_v34 = vmov 1966171168   ;;  %s760_s0 = inlined_call_operand.vmem [shape: bf16[2,513], index: 0, kind: input, shape index: {}]   ;;  %s761_s1 = inlined_call_operand.vmem [shape: bf16[513,10], index: 1, kind: input, shape index: {}]   ;;  %s762_s2 = inlined_call_operand.hbm [shape: f32[2,10], index: 2, kind: output, shape index: {}]  }
   0x1   :  { %v563_v0 = vld [vmem:[%s761_s1 + $0x40] sm:$0xff]   ;;  %18 = vst.msk [vmem:[#allocation2] sm:$0x3] %vm17_vm0, %v621_v3  ;;  %v567_v5 = vld [vmem:[%s761_s1 + $0x48] sm:$0xff]   ;;  %v571_v9 = vld [vmem:[%s761_s1 + $0x50] sm:$0xff]   ;;  %v89_v35 = vunpack.c.l.s4 %v622_v34 }
   0x2   :  { %v564_v1 = vld [vmem:[%s761_s1 + $0xc0] sm:$0xff]   ;;  %506 = vmatprep.subr.bf16.mxu0 %v563_v0  ;;  %v568_v6 = vld [vmem:[%s761_s1 + $0xc8] sm:$0xff]   ;;  %v572_v10 = vld [vmem:[%s761_s1 + $0xd0] sm:$0xff]   ;;  %v92_v36 = vshrl.u32 %v91_v31, 7 }
   0x3   :  { %v565_v2 = vld [vmem:[%s761_s1] sm:$0xff]   ;;  %528 = vmatprep.subr.bf16.mxu1 %v564_v1  ;;  %v569_v7 = vld [vmem:[%s761_s1 + $0x8] sm:$0xff]   ;;  %v573_v11 = vld [vmem:[%s761_s1 + $0x10] sm:$0xff]  }
   0x4   :  { %v566_v4 = vld [vmem:[%s761_s1 + $0x80] sm:$0xff]   ;;  %507 = vmatpush3.bf16.msra.mxu0 %v565_v2  ;;  %v570_v8 = vld [vmem:[%s761_s1 + $0x88] sm:$0xff]   ;;  %v574_v12 = vld [vmem:[%s761_s1 + $0x90] sm:$0xff]  }
   0x5   :  { %529 = vmatpush3.bf16.msra.mxu1 %v566_v4  ;;  %508 = vmatprep.subr.bf16.mxu0 %v567_v5  ;;  %v575_v13 = vld [vmem:[%s761_s1 + $0x58] sm:$0xff]   ;;  %v579_v17 = vld [vmem:[%s761_s1 + $0x60] sm:$0xff]   ;;  %v583_v21 = vld [vmem:[%s761_s1 + $0x68] sm:$0xff]  }
   0x6   :  { %530 = vmatprep.subr.bf16.mxu1 %v568_v6  ;;  %v576_v14 = vld [vmem:[%s761_s1 + $0xd8] sm:$0xff]   ;;  %v580_v18 = vld [vmem:[%s761_s1 + $0xe0] sm:$0xff]   ;;  %v584_v22 = vld [vmem:[%s761_s1 + $0xe8] sm:$0xff]  }
   0x7   :  { %v577_v15 = vld [vmem:[%s761_s1 + $0x18] sm:$0xff]   ;;  %v581_v19 = vld [vmem:[%s761_s1 + $0x20] sm:$0xff]   ;;  %v585_v23 = vld [vmem:[%s761_s1 + $0x28] sm:$0xff]  }
   0x8   :  { %509 = vmatpush3.bf16.msra.mxu0 %v569_v7  ;;  %v578_v16 = vld [vmem:[%s761_s1 + $0x98] sm:$0xff]   ;;  %v582_v20 = vld [vmem:[%s761_s1 + $0xa0] sm:$0xff]   ;;  %v586_v24 = vld [vmem:[%s761_s1 + $0xa8] sm:$0xff]  }
   0x9   :  { %531 = vmatpush3.bf16.msra.mxu1 %v570_v8  ;;  %510 = vmatprep.subr.bf16.mxu0 %v571_v9  ;;  %v587_v25 = vld [vmem:[%s761_s1 + $0x70] sm:$0xff]   ;;  %v591_v29 = vld [vmem:[%s761_s1 + $0x78] sm:$0xff]  }
   0xa   :  { %532 = vmatprep.subr.bf16.mxu1 %v572_v10  ;;  %v588_v26 = vld [vmem:[%s761_s1 + $0xf0] sm:$0xff]   ;;  %v592_v30 = vld [vmem:[%s761_s1 + $0xf8] sm:$0xff]  }
   0xb   :  { %v589_v27 = vld [vmem:[%s761_s1 + $0x30] sm:$0xff]   ;;  %v593_v32 = vld [vmem:[%s761_s1 + $0x38] sm:$0xff]  }
   0xc   :  { %511 = vmatpush3.bf16.msra.mxu0 %v573_v11  ;;  %v590_v28 = vld [vmem:[%s761_s1 + $0xb0] sm:$0xff]   ;;  %v594_v33 = vld [vmem:[%s761_s1 + $0xb8] sm:$0xff]  }
   0xd   :  { %533 = vmatpush3.bf16.msra.mxu1 %v574_v12  ;;  %512 = vmatprep.subr.bf16.mxu0 %v575_v13 }
   0xe   :  { %534 = vmatprep.subr.bf16.mxu1 %v576_v14 }
  0x10   :  { %513 = vmatpush3.bf16.msra.mxu0 %v577_v15 }
  0x11   :  { %535 = vmatpush3.bf16.msra.mxu1 %v578_v16  ;;  %514 = vmatprep.subr.bf16.mxu0 %v579_v17 }
  0x12   :  { %536 = vmatprep.subr.bf16.mxu1 %v580_v18 }
  0x14   :  { %515 = vmatpush3.bf16.msra.mxu0 %v581_v19 }
  0x15   :  { %537 = vmatpush3.bf16.msra.mxu1 %v582_v20  ;;  %516 = vmatprep.subr.bf16.mxu0 %v583_v21 }
  0x16   :  { %538 = vmatprep.subr.bf16.mxu1 %v584_v22 }
  0x18   :  { %517 = vmatpush3.bf16.msra.mxu0 %v585_v23 }
  0x19   :  { %539 = vmatpush3.bf16.msra.mxu1 %v586_v24  ;;  %518 = vmatprep.subr.bf16.mxu0 %v587_v25 }
  0x1a   :  { %540 = vmatprep.subr.bf16.mxu1 %v588_v26 }
  0x1c   :  { %519 = vmatpush3.bf16.msra.mxu0 %v589_v27 }
  0x1d   :  { %541 = vmatpush3.bf16.msra.mxu1 %v590_v28  ;;  %520 = vmatprep.subr.bf16.mxu0 %v591_v29 }
  0x1e   :  { %542 = vmatprep.subr.bf16.mxu1 %v592_v30 }
  0x20   :  { %521 = vmatpush3.bf16.msra.mxu0 %v593_v32 }
  0x21   :  { %543 = vmatpush3.bf16.msra.mxu1 %v594_v33  ;;  %552 = vmatprep.subr.bf16.mxu0 %v621_v3 }
  0x22   :  { %7 = vsyncpa [#allocation3], 0  ;;  %v90_v37 = vunpack.c.0.s8 %v89_v35  ;;  %v20_v38 = vld [vmem:[%s760_s0] sm:$0x1f]  ;;  %vm329_vm1 = vcmask 1040384   ;;  %v623_v42 = vmov 0  }
  0x23   :  { %v596_v41 = vld [vmem:[%s761_s1 + $0x100] ss:$0 sps:$4 sm:$0x11]   ;;  %v331_v43 = vsel %vm329_vm1, 65535, %v623_v42  ;;  %v87_v46 = vcombine.high %v20_v38, %v20_v38  ;;  %vm624_vm2 = vmmov 0   ;;  %vm325_vm3 = vcmask 7168  }
  0x24   :  { %v93_v39 = vsub.s32 %v90_v37, %v92_v36  ;;  %v333_v48 = vand.u32 %v596_v41, %v331_v43  ;;  %v19_v0 = vld [vmem:[#allocation2] sm:$0x3]  ;;  %s625_s0 = smov [#allocation2]  }
  0x25   :  { %s464_s1 = sshll.u32 %s625_s0, 4  ;;  %s465_s1 = int_to_ptr.vmem [resolvable:$true] %s464_s1 }
  0x26   :  { %v94_v40 = vrot.slane %v20_v38, %v93_v39  ;;  %v101_v51 = vrot.slane %v87_v46, %v93_v39  ;;  %s597_s21 = scalar_lea.vmem %s465_s1, 32  ;;  %p602_p1 = scmp.lt.s32.totalorder %s465_s1, %s465_s1 }
  0x27   :  { %p598_p0 = scmp.ne.s32.totalorder %s465_s1, %s597_s21  ;;  %p603_p2 = scmp.lt.s32.totalorder %s597_s21, %s597_s21 }
  0x28   :  { %v102_v44 = vcombine.high %v94_v40, %v94_v40  ;;  %v109_v45 = vrot.slane %v94_v40, %v93_v39  ;;  %v116_v52 = vrot.slane %v101_v51, %v93_v39 }
  0x29   :  { %p604_p3 = por %p603_p2, %p602_p1 }
  0x2a   :  { %v123_v47 = vrot.slane %v102_v44, %v93_v39  ;;  %v124_v49 = vcombine.high %v109_v45, %v109_v45 }
  0x2b   :  { %p605_p4 = pnand %p604_p3, %p598_p0 }
  0x2c   :  { %367 = vmatprep.mubr.bf16.mxu0 %v123_v47  ;;  %v125_v50 = vcombine.high %v123_v47, %v123_v47 }
  0x2d   :  { %368 = vmatmul.mubr.bf16.vlgmr.msra.gmra.mrb[0].mxu0 %v109_v45 }
  0x2e   :  { %407 = vmatprep.mubr.bf16.mxu1 %v125_v50  ;;  %553 = vmatpush3.bf16.msra.mxu0 %v333_v48 }
  0x2f   :  { %408 = vmatmul.mubr.bf16.vlgmr.msra.gmra.mrb[0].mxu1 %v124_v49  ;;  %554 = vmatprep.mubr.msk.bf16.mxu0 %vm624_vm2, %v621_v3 }
  0x35   :  { %555 = vmatmul.mubr.msk.bf16.vlgmr.msra.gmra.mrb[4].mxu0 %vm325_vm3, %v116_v52 }
 0x100   :  { %v522_v53 = vpop.f32.mrb[0].mxu0 }
 0x101   :  { %v523_v54 = vpop.f32.mrb[1].mxu0 }
 0x102   :  { %v544_v55 = vpop.f32.mrb[0].mxu1  ;;  %v524_v56 = vadd.f32 %v523_v54, %v522_v53  ;;  %v525_v57 = vpop.f32.mrb[2].mxu0 }
 0x103   :  { %v545_v58 = vpop.f32.mrb[1].mxu1  ;;  %v526_v59 = vpop.f32.mrb[3].mxu0 }
 0x104   :  { %v546_v60 = vadd.f32 %v545_v58, %v544_v55  ;;  %v547_v61 = vpop.f32.mrb[2].mxu1 }
 0x105   :  { %v548_v62 = vpop.f32.mrb[3].mxu1 }
 0x106   :  { %v410_v63 = vadd.f32 %v546_v60, %v524_v56 }
 0x108   :  { %v449_v1 = vpop.f32.mrb[4].mxu0 }
 0x109   :  { %v450_v2 = vadd.f32 %v449_v1, %v410_v63  ;;  %v556_v3 = vpop.f32.mrb[5].mxu0 }
 0x10a   :  { %v452_v4 = vpop.f32.mrb[6].mxu0 }
 0x10b   :  { %v455_v5 = vadd.f32 %v450_v2, %v19_v0  ;;  %v557_v6 = vpop.f32.mrb[7].mxu0 }
 0x10d   :  { %457 = vst.msk [vmem:[#allocation2] sm:$0x3] %vm17_vm0, %v455_v5 }
 0x10e   :  { %608 = shalt.err (!%p605_p4)
}
 0x10f   :  { %s609_s24 = scalar_lea.hbm %s762_s2, 32 }
 0x110   :  { %p610_p5 = scmp.ne.s32.totalorder %s762_s2, %s609_s24  ;;  %p613_p6 = scmp.lt.u32.totalorder %s609_s24, %s762_s2 }
 0x112   :  { %p615_p7 = pnand %p613_p6, %p610_p5 }
 0x114   :  { %618 = shalt.err (!%p615_p7)
}
 0x115   :  { %467 = dma.vmem_to_hbm [thread:$0]  %s465_s1, 32, %s762_s2, [#allocation3]  }
 0x116   :  { %619 = dma.done.wait [#allocation3], 32  }
 0x117   :  { %620 = vsyncadd [#allocation3], 4294967264 }
 0x118   :  { %471 = vsyncpa [#allocation3], 1 }

</bundles_post_ra>
